<compile_context>
chip_gen: v6e
topology: v6e:2x2x1
jax: 0.10.0
libtpu: 0.0.40
codegen_flags: <defaults>
</compile_context>

<pallas_src>
import functools

import numpy as np

import jax
import jax.numpy as jnp
from jax.experimental import pallas as pl
from jax.experimental.pallas import tpu as pltpu

NEG_SLOPE = 0.2
BN_EPS = 1e-5

_VMEM = pltpu.MemorySpace.VMEM


# ------------------------------ kernel helpers ------------------------------

def _bn_act(h, gb_ref, act, extra=None):
    """Train-mode BatchNorm (batch stats, biased var) + optional residual add
    + LeakyReLU.  One-pass statistics: sum and sum-of-squares are issued
    back-to-back so the two cross-sublane reductions overlap."""
    gb = gb_ref[...]
    gamma, beta = gb[0:1, :], gb[1:2, :]
    inv_m = 1.0 / h.shape[0]
    s1 = jnp.sum(h, axis=0, keepdims=True)
    s2 = jnp.sum(h * h, axis=0, keepdims=True)
    mean = s1 * inv_m
    var = jnp.maximum(s2 * inv_m - mean * mean, 0.0)    # guard tiny negatives
    y = (h - mean) * (gamma * jax.lax.rsqrt(var + BN_EPS)) + beta
    if extra is not None:
        y = y + extra
    if act:
        y = jnp.where(y >= 0, y, NEG_SLOPE * y)
    return y


def _conv_stacked_gather(x, s_ref, w_ref):
    """Strided conv: ONE stacked spatial-gather matmul, then per-tap weight
    matmuls on free static sublane slices of the gathered rows."""
    f32 = jnp.float32
    ntaps = w_ref.shape[0]
    m_out = s_ref.shape[0] // ntaps
    g_all = jnp.dot(s_ref[...], x, preferred_element_type=f32)  # (taps*M_out, Cin)
    acc = None
    for k in range(ntaps):
        g = g_all[k * m_out:(k + 1) * m_out, :]
        t = jnp.dot(g, w_ref[k], preferred_element_type=f32)
        acc = t if acc is None else acc + t
    return acc


def _conv3x3_roll(h, mask_ref, w_ref, fm_width):
    """3x3 stride-1 pad-1 conv on the flattened (N*H*W, C) activation.
    Per-tap spatial gather = sublane roll (XLU) + 0/1 boundary mask (VPU);
    the only MXU work is the 9 per-tap weight matmuls."""
    f32 = jnp.float32
    m_rows = h.shape[0]
    acc = None
    for k in range(9):
        dh, dw = divmod(k, 3)
        s = (dh - 1) * fm_width + (dw - 1)      # flat-row offset of this tap
        if s == 0:
            g = h                               # centre tap: no shift, no mask
        else:
            # want g[r] = h[r + s]  -> roll by -s; wrap-around rows are masked.
            g = pltpu.roll(h, shift=(-s) % m_rows, axis=0) * mask_ref[k]
        t = jnp.dot(g, w_ref[k], preferred_element_type=f32)
        acc = t if acc is None else acc + t
    return acc


# ------------------------------- fused kernel -------------------------------

def _encoder_kernel(patches1_ref, w1_ref, gb1_ref,
                    s2_ref, w2_ref, gb2_ref,
                    mask3_ref,
                    r1w1_ref, r1gb1_ref, r1w2_ref, r1gb2_ref,
                    r2w1_ref, r2gb1_ref, r2w2_ref, r2gb2_ref,
                    wqkv_ref, bqkv_ref, gamma_ref, amask_ref,
                    w3_ref, gb3_ref,
                    o_ref, *, fm_width):
    f32 = jnp.float32

    # ---- conv1 (4x4 s2, wrapper-gathered patches) + BN1 + LeakyReLU ----
    h = jnp.dot(patches1_ref[...], w1_ref[...], preferred_element_type=f32)
    h = _bn_act(h, gb1_ref, act=True)                       # (N*H1*W1, C1)

    # ---- conv2 (4x4 s2, stacked in-kernel gather) + BN2 + LeakyReLU ----
    h = _conv_stacked_gather(h, s2_ref, w2_ref)             # (M, hidden)
    h = _bn_act(h, gb2_ref, act=True)

    # ---- residual blocks: conv->BN->LReLU->conv->BN, +res, LReLU ----
    for wa, gba, wb, gbb in ((r1w1_ref, r1gb1_ref, r1w2_ref, r1gb2_ref),
                             (r2w1_ref, r2gb1_ref, r2w2_ref, r2gb2_ref)):
        res = h
        t = _conv3x3_roll(h, mask3_ref, wa, fm_width)
        t = _bn_act(t, gba, act=True)
        t = _conv3x3_roll(t, mask3_ref, wb, fm_width)
        h = _bn_act(t, gbb, act=True, extra=res)

    # ---- self-attention (block-diagonal over the batch), fused QKV ----
    hid = h.shape[1]
    qkv = jnp.dot(h, wqkv_ref[...], preferred_element_type=f32) + bqkv_ref[...]
    dq = (qkv.shape[1] - hid) // 2
    q, kk, v = qkv[:, :dq], qkv[:, dq:2 * dq], qkv[:, 2 * dq:]
    energy = jax.lax.dot_general(q, kk, (((1,), (1,)), ((), ())),
                                 preferred_element_type=f32) + amask_ref[...]
    energy = energy - jnp.max(energy, axis=-1, keepdims=True)
    pexp = jnp.exp(energy)
    attn = pexp * pl.reciprocal(jnp.sum(pexp, axis=-1, keepdims=True),
                                approx=True)
    h = gamma_ref[...] * jnp.dot(attn, v, preferred_element_type=f32) + h

    # ---- conv3 (3x3 s1) + BN3 (no activation) ----
    t = _conv3x3_roll(h, mask3_ref, w3_ref, fm_width)
    o_ref[...] = _bn_act(t, gb3_ref, act=False)


# ----------------------------- wrapper utilities -----------------------------

def _patch_indices(N, H, W, kh, kw, stride, pad):
    """Row indices + validity mask for the wrapper-side conv1 patch gather."""
    OH = (H + 2 * pad - kh) // stride + 1
    OW = (W + 2 * pad - kw) // stride + 1
    idx = np.zeros((N * OH * OW, kh * kw), np.int32)
    val = np.zeros((N * OH * OW, kh * kw, 1), np.float32)
    for n in range(N):
        for yo in range(OH):
            for xo in range(OW):
                r = (n * OH + yo) * OW + xo
                for dh in range(kh):
                    for dw in range(kw):
                        yi = yo * stride - pad + dh
                        xi = xo * stride - pad + dw
                        if 0 <= yi < H and 0 <= xi < W:
                            idx[r, dh * kw + dw] = (n * H + yi) * W + xi
                            val[r, dh * kw + dw, 0] = 1.0
    return idx, val, OH, OW


def _stacked_gather(N, H, W, kh, kw, stride, pad):
    """0/1 stacked gather matrix (kh*kw*M_out, M_in) for a strided conv."""
    OH = (H + 2 * pad - kh) // stride + 1
    OW = (W + 2 * pad - kw) // stride + 1
    Mout, Min = N * OH * OW, N * H * W
    S = np.zeros((kh * kw * Mout, Min), np.float32)
    for n in range(N):
        for yo in range(OH):
            for xo in range(OW):
                r = (n * OH + yo) * OW + xo
                for dh in range(kh):
                    for dw in range(kw):
                        yi = yo * stride - pad + dh
                        xi = xo * stride - pad + dw
                        if 0 <= yi < H and 0 <= xi < W:
                            S[(dh * kw + dw) * Mout + r,
                              (n * H + yi) * W + xi] = 1.0
    return jnp.asarray(S), OH, OW


def _roll_masks(N, H, W):
    """0/1 boundary masks (9, N*H*W, 1) for the roll-based 3x3 convs."""
    m = np.zeros((9, N * H * W, 1), np.float32)
    for n in range(N):
        for y in range(H):
            for x in range(W):
                r = (n * H + y) * W + x
                for dh in range(3):
                    for dw in range(3):
                        if 0 <= y + dh - 1 < H and 0 <= x + dw - 1 < W:
                            m[dh * 3 + dw, r, 0] = 1.0
    return jnp.asarray(m)


def _attn_mask(N, L):
    m = np.full((N * L, N * L), -1e30, np.float32)
    for n in range(N):
        m[n * L:(n + 1) * L, n * L:(n + 1) * L] = 0.0
    return jnp.asarray(m)


def _w_taps(w):
    """torch conv weight (Cout, Cin, kh, kw) -> per-tap (kh*kw, Cin, Cout)."""
    Cout, Cin, kh, kw = w.shape
    return (jnp.transpose(w, (2, 3, 1, 0))
            .reshape(kh * kw, Cin, Cout).astype(jnp.float32))


def _gb(gamma, beta):
    """Pack BN gamma + beta into one (2, C) array."""
    return jnp.stack([gamma, beta], axis=0).astype(jnp.float32)


# ------------------------------ encoder forward ------------------------------

def encoder_forward(x_nchw, p):
    N, Cin, H, W = x_nchw.shape
    hid = p['conv2_w'].shape[0]
    h2 = hid // 2
    dq = p['attn_wq'].shape[0]
    emb = p['conv3_w'].shape[0]
    kh1, kw1 = p['conv1_w'].shape[2], p['conv1_w'].shape[3]

    # conv1 patches: one masked gather in the wrapper (the strided/padded
    # window extraction on the raw input is not expressible as rolls).
    idx1, val1, OH1, OW1 = _patch_indices(N, H, W, kh1, kw1, 2, 1)
    x_rows = (jnp.transpose(x_nchw, (0, 2, 3, 1)).astype(jnp.float32)
              .reshape(N * H * W, Cin))
    patches1 = (x_rows[jnp.asarray(idx1)] * jnp.asarray(val1)
                ).reshape(N * OH1 * OW1, kh1 * kw1 * Cin)
    w1 = (jnp.transpose(p['conv1_w'], (2, 3, 1, 0))
          .reshape(kh1 * kw1 * Cin, h2).astype(jnp.float32))

    S2, OH2, OW2 = _stacked_gather(N, OH1, OW1, 4, 4, 2, 1)
    masks3 = _roll_masks(N, OH2, OW2)
    L = OH2 * OW2
    M = N * L
    amask = _attn_mask(N, L)

    # fused QKV projection weights / biases
    wq = p['attn_wq'].reshape(dq, hid).T
    wk = p['attn_wk'].reshape(dq, hid).T
    wv = p['attn_wv'].reshape(hid, hid).T
    wqkv = jnp.concatenate([wq, wk, wv], axis=1).astype(jnp.float32)
    bqkv = jnp.concatenate([p['attn_bq'], p['attn_bk'], p['attn_bv']]
                           ).reshape(1, -1).astype(jnp.float32)

    # NOTE: conv biases feeding batch-statistics BN cancel exactly in the mean
    # subtraction, so they are not passed to the kernel (they would matter in
    # eval-mode / running-stats BN, which is not what this forward implements).
    args = (
        patches1, w1, _gb(p['bn1_g'], p['bn1_b']),
        S2, _w_taps(p['conv2_w']), _gb(p['bn2_g'], p['bn2_b']),
        masks3,
        _w_taps(p['res1_w1']), _gb(p['res1_g1'], p['res1_be1']),
        _w_taps(p['res1_w2']), _gb(p['res1_g2'], p['res1_be2']),
        _w_taps(p['res2_w1']), _gb(p['res2_g1'], p['res2_be1']),
        _w_taps(p['res2_w2']), _gb(p['res2_g2'], p['res2_be2']),
        wqkv, bqkv,
        p['attn_gamma'].reshape(1, 1).astype(jnp.float32), amask,
        _w_taps(p['conv3_w']), _gb(p['bn3_g'], p['bn3_b']),
    )

    out = pl.pallas_call(
        functools.partial(_encoder_kernel, fm_width=OW2),
        out_shape=jax.ShapeDtypeStruct((M, emb), jnp.float32),
        in_specs=[pl.BlockSpec(memory_space=_VMEM) for _ in args],
        out_specs=pl.BlockSpec(memory_space=_VMEM),
        compiler_params=pltpu.CompilerParams(
            vmem_limit_bytes=8 * 1024 * 1024),   # actual footprint ~2 MiB
    )(*args)

    out = out.reshape(N, OH2, OW2, emb)
    return jnp.transpose(out, (0, 3, 1, 2))      # back to NCHW


# --------------------------- parameter construction --------------------------

def init_params(key, in_ch=1, hidden=32, emb=16):
    keys = iter(jax.random.split(key, 64))

    def conv_w(cout, cin, k):
        return 0.1 * jax.random.normal(next(keys), (cout, cin, k, k), jnp.float32)

    def conv_b(cout):
        return 0.01 * jax.random.normal(next(keys), (cout,), jnp.float32)

    def bn(c):
        g = 1.0 + 0.1 * jax.random.normal(next(keys), (c,), jnp.float32)
        b = 0.1 * jax.random.normal(next(keys), (c,), jnp.float32)
        return g, b

    p = {}
    h2 = hidden // 2
    p['conv1_w'], p['conv1_b'] = conv_w(h2, in_ch, 4), conv_b(h2)
    p['bn1_g'], p['bn1_b'] = bn(h2)
    p['conv2_w'], p['conv2_b'] = conv_w(hidden, h2, 4), conv_b(hidden)
    p['bn2_g'], p['bn2_b'] = bn(hidden)
    for i in (1, 2):
        p[f'res{i}_w1'], p[f'res{i}_b1'] = conv_w(hidden, hidden, 3), conv_b(hidden)
        p[f'res{i}_g1'], p[f'res{i}_be1'] = bn(hidden)
        p[f'res{i}_w2'], p[f'res{i}_b2'] = conv_w(hidden, hidden, 3), conv_b(hidden)
        p[f'res{i}_g2'], p[f'res{i}_be2'] = bn(hidden)
    dq = hidden // 8
    p['attn_wq'], p['attn_bq'] = conv_w(dq, hidden, 1), conv_b(dq)
    p['attn_wk'], p['attn_bk'] = conv_w(dq, hidden, 1), conv_b(dq)
    p['attn_wv'], p['attn_bv'] = conv_w(hidden, hidden, 1), conv_b(hidden)
    # torch initializes gamma to 0; use a nonzero value so the attention path
    # is actually exercised by the smoke test.
    p['attn_gamma'] = jnp.full((1,), 0.1, jnp.float32)
    p['conv3_w'], p['conv3_b'] = conv_w(emb, hidden, 3), conv_b(emb)
    p['bn3_g'], p['bn3_b'] = bn(emb)
    return p


# ----------------------------------- main -------------------------------------

if __name__ == "__main__":
    key = jax.random.PRNGKey(0)
    pkey, xkey = jax.random.split(key)

    # batch=2, in_channels=1, hidden_channels=32, embedding_dim=16, 16x16 input
    # -> output (2, 16, 4, 4) after the two stride-2 convs.
    params = init_params(pkey, in_ch=1, hidden=32, emb=16)
    x = jax.random.normal(xkey, (2, 1, 16, 16), jnp.float32)

    out = jax.jit(lambda inp: encoder_forward(inp, params))(x)
    out = jax.block_until_ready(out)

    assert out.shape == (2, 16, 4, 4), out.shape
    assert bool(jnp.all(jnp.isfinite(out)))
    print("KERNEL_OK")
</pallas_src>

<mosaic_0001>
module attributes {stable_mosaic.version = 11 : i64} {
  func.func @_encoder_kernel(%arg0: memref<128x16xf32, #tpu.memory_space<vmem>>, %arg1: memref<16x16xf32, #tpu.memory_space<vmem>>, %arg2: memref<2x16xf32, #tpu.memory_space<vmem>>, %arg3: memref<512x128xf32, #tpu.memory_space<vmem>>, %arg4: memref<16x16x32xf32, #tpu.memory_space<vmem>>, %arg5: memref<2x32xf32, #tpu.memory_space<vmem>>, %arg6: memref<9x32x1xf32, #tpu.memory_space<vmem>>, %arg7: memref<9x32x32xf32, #tpu.memory_space<vmem>>, %arg8: memref<2x32xf32, #tpu.memory_space<vmem>>, %arg9: memref<9x32x32xf32, #tpu.memory_space<vmem>>, %arg10: memref<2x32xf32, #tpu.memory_space<vmem>>, %arg11: memref<9x32x32xf32, #tpu.memory_space<vmem>>, %arg12: memref<2x32xf32, #tpu.memory_space<vmem>>, %arg13: memref<9x32x32xf32, #tpu.memory_space<vmem>>, %arg14: memref<2x32xf32, #tpu.memory_space<vmem>>, %arg15: memref<32x40xf32, #tpu.memory_space<vmem>>, %arg16: memref<1x40xf32, #tpu.memory_space<vmem>>, %arg17: memref<1x1xf32, #tpu.memory_space<vmem>>, %arg18: memref<32x32xf32, #tpu.memory_space<vmem>>, %arg19: memref<9x32x16xf32, #tpu.memory_space<vmem>>, %arg20: memref<2x16xf32, #tpu.memory_space<vmem>>, %arg21: memref<32x16xf32, #tpu.memory_space<vmem>>) attributes {dimension_semantics = [], scalar_prefetch = 0 : i64, scratch_operands = 0 : i64, tpu.core_type = #tpu.core_type<tc>} {
    %c0 = arith.constant 0 : index
    %c0_0 = arith.constant 0 : index
    %0 = vector.load %arg0[%c0, %c0_0] : memref<128x16xf32, #tpu.memory_space<vmem>>, vector<128x16xf32>
    %c0_1 = arith.constant 0 : index
    %c0_2 = arith.constant 0 : index
    %1 = vector.load %arg1[%c0_1, %c0_2] : memref<16x16xf32, #tpu.memory_space<vmem>>, vector<16x16xf32>
    %cst = arith.constant dense<0.000000e+00> : vector<128x16xf32>
    %2 = tpu.matmul %0, %1, %cst {dimension_numbers = #tpu.dot_dimension_numbers<[1], [0], [0], [1], [0, 0, 1, 1], [], []>} : vector<128x16xf32>, vector<16x16xf32>, vector<128x16xf32> -> vector<128x16xf32>
    %c0_3 = arith.constant 0 : index
    %c0_4 = arith.constant 0 : index
    %3 = vector.load %arg2[%c0_3, %c0_4] : memref<2x16xf32, #tpu.memory_space<vmem>>, vector<2x16xf32>
    %4 = vector.extract_strided_slice %3 {offsets = [0, 0], sizes = [1, 16], strides = [1, 1]} : vector<2x16xf32> to vector<1x16xf32>
    %5 = vector.extract_strided_slice %3 {offsets = [1, 0], sizes = [1, 16], strides = [1, 1]} : vector<2x16xf32> to vector<1x16xf32>
    %cst_5 = arith.constant dense<0.000000e+00> : vector<16xf32>
    %6 = vector.multi_reduction <add>, %2, %cst_5 [0] : vector<128x16xf32> to vector<16xf32>
    %7 = vector.shape_cast %6 : vector<16xf32> to vector<1x16xf32>
    %8 = arith.mulf %2, %2 : vector<128x16xf32>
    %cst_6 = arith.constant dense<0.000000e+00> : vector<16xf32>
    %9 = vector.multi_reduction <add>, %8, %cst_6 [0] : vector<128x16xf32> to vector<16xf32>
    %10 = vector.shape_cast %9 : vector<16xf32> to vector<1x16xf32>
    %cst_7 = arith.constant 7.812500e-03 : f32
    %11 = vector.broadcast %cst_7 : f32 to vector<1x16xf32>
    %12 = arith.mulf %7, %11 : vector<1x16xf32>
    %cst_8 = arith.constant 7.812500e-03 : f32
    %13 = vector.broadcast %cst_8 : f32 to vector<1x16xf32>
    %14 = arith.mulf %10, %13 : vector<1x16xf32>
    %15 = arith.mulf %12, %12 : vector<1x16xf32>
    %16 = arith.subf %14, %15 : vector<1x16xf32>
    %cst_9 = arith.constant 0.000000e+00 : f32
    %17 = vector.broadcast %cst_9 : f32 to vector<1x16xf32>
    %18 = arith.maximumf %16, %17 : vector<1x16xf32>
    %19 = vector.broadcast %12 : vector<1x16xf32> to vector<128x16xf32>
    %20 = arith.subf %2, %19 : vector<128x16xf32>
    %cst_10 = arith.constant 9.99999974E-6 : f32
    %21 = vector.broadcast %cst_10 : f32 to vector<1x16xf32>
    %22 = arith.addf %18, %21 : vector<1x16xf32>
    %23 = math.rsqrt %22 : vector<1x16xf32>
    %24 = arith.mulf %4, %23 : vector<1x16xf32>
    %25 = vector.broadcast %24 : vector<1x16xf32> to vector<128x16xf32>
    %26 = arith.mulf %20, %25 : vector<128x16xf32>
    %27 = vector.broadcast %5 : vector<1x16xf32> to vector<128x16xf32>
    %28 = arith.addf %26, %27 : vector<128x16xf32>
    %cst_11 = arith.constant 0.000000e+00 : f32
    %29 = vector.broadcast %cst_11 : f32 to vector<128x16xf32>
    %30 = arith.cmpf oge, %28, %29 : vector<128x16xf32>
    %cst_12 = arith.constant 2.000000e-01 : f32
    %31 = vector.broadcast %cst_12 : f32 to vector<128x16xf32>
    %32 = arith.mulf %31, %28 : vector<128x16xf32>
    %33 = arith.select %30, %28, %32 : vector<128x16xi1>, vector<128x16xf32>
    %c0_13 = arith.constant 0 : index
    %c0_14 = arith.constant 0 : index
    %34 = vector.load %arg3[%c0_13, %c0_14] : memref<512x128xf32, #tpu.memory_space<vmem>>, vector<512x128xf32>
    %cst_15 = arith.constant dense<0.000000e+00> : vector<512x16xf32>
    %35 = tpu.matmul %34, %33, %cst_15 {dimension_numbers = #tpu.dot_dimension_numbers<[1], [0], [0], [1], [0, 0, 1, 1], [], []>} : vector<512x128xf32>, vector<128x16xf32>, vector<512x16xf32> -> vector<512x16xf32>
    %36 = vector.extract_strided_slice %35 {offsets = [0, 0], sizes = [32, 16], strides = [1, 1]} : vector<512x16xf32> to vector<32x16xf32>
    %c0_16 = arith.constant 0 : index
    %c0_17 = arith.constant 0 : index
    %c0_18 = arith.constant 0 : index
    %37 = vector.load %arg4[%c0_16, %c0_17, %c0_18] : memref<16x16x32xf32, #tpu.memory_space<vmem>>, vector<1x16x32xf32>
    %38 = vector.shape_cast %37 : vector<1x16x32xf32> to vector<16x32xf32>
    %cst_19 = arith.constant dense<0.000000e+00> : vector<32x32xf32>
    %39 = tpu.matmul %36, %38, %cst_19 {dimension_numbers = #tpu.dot_dimension_numbers<[1], [0], [0], [1], [0, 0, 1, 1], [], []>} : vector<32x16xf32>, vector<16x32xf32>, vector<32x32xf32> -> vector<32x32xf32>
    %40 = vector.extract_strided_slice %35 {offsets = [32, 0], sizes = [32, 16], strides = [1, 1]} : vector<512x16xf32> to vector<32x16xf32>
    %c1 = arith.constant 1 : index
    %c0_20 = arith.constant 0 : index
    %c0_21 = arith.constant 0 : index
    %41 = vector.load %arg4[%c1, %c0_20, %c0_21] : memref<16x16x32xf32, #tpu.memory_space<vmem>>, vector<1x16x32xf32>
    %42 = vector.shape_cast %41 : vector<1x16x32xf32> to vector<16x32xf32>
    %cst_22 = arith.constant dense<0.000000e+00> : vector<32x32xf32>
    %43 = tpu.matmul %40, %42, %cst_22 {dimension_numbers = #tpu.dot_dimension_numbers<[1], [0], [0], [1], [0, 0, 1, 1], [], []>} : vector<32x16xf32>, vector<16x32xf32>, vector<32x32xf32> -> vector<32x32xf32>
    %44 = arith.addf %39, %43 : vector<32x32xf32>
    %45 = vector.extract_strided_slice %35 {offsets = [64, 0], sizes = [32, 16], strides = [1, 1]} : vector<512x16xf32> to vector<32x16xf32>
    %c2 = arith.constant 2 : index
    %c0_23 = arith.constant 0 : index
    %c0_24 = arith.constant 0 : index
    %46 = vector.load %arg4[%c2, %c0_23, %c0_24] : memref<16x16x32xf32, #tpu.memory_space<vmem>>, vector<1x16x32xf32>
    %47 = vector.shape_cast %46 : vector<1x16x32xf32> to vector<16x32xf32>
    %cst_25 = arith.constant dense<0.000000e+00> : vector<32x32xf32>
    %48 = tpu.matmul %45, %47, %cst_25 {dimension_numbers = #tpu.dot_dimension_numbers<[1], [0], [0], [1], [0, 0, 1, 1], [], []>} : vector<32x16xf32>, vector<16x32xf32>, vector<32x32xf32> -> vector<32x32xf32>
    %49 = arith.addf %44, %48 : vector<32x32xf32>
    %50 = vector.extract_strided_slice %35 {offsets = [96, 0], sizes = [32, 16], strides = [1, 1]} : vector<512x16xf32> to vector<32x16xf32>
    %c3 = arith.constant 3 : index
    %c0_26 = arith.constant 0 : index
    %c0_27 = arith.constant 0 : index
    %51 = vector.load %arg4[%c3, %c0_26, %c0_27] : memref<16x16x32xf32, #tpu.memory_space<vmem>>, vector<1x16x32xf32>
    %52 = vector.shape_cast %51 : vector<1x16x32xf32> to vector<16x32xf32>
    %cst_28 = arith.constant dense<0.000000e+00> : vector<32x32xf32>
    %53 = tpu.matmul %50, %52, %cst_28 {dimension_numbers = #tpu.dot_dimension_numbers<[1], [0], [0], [1], [0, 0, 1, 1], [], []>} : vector<32x16xf32>, vector<16x32xf32>, vector<32x32xf32> -> vector<32x32xf32>
    %54 = arith.addf %49, %53 : vector<32x32xf32>
    %55 = vector.extract_strided_slice %35 {offsets = [128, 0], sizes = [32, 16], strides = [1, 1]} : vector<512x16xf32> to vector<32x16xf32>
    %c4 = arith.constant 4 : index
    %c0_29 = arith.constant 0 : index
    %c0_30 = arith.constant 0 : index
    %56 = vector.load %arg4[%c4, %c0_29, %c0_30] : memref<16x16x32xf32, #tpu.memory_space<vmem>>, vector<1x16x32xf32>
    %57 = vector.shape_cast %56 : vector<1x16x32xf32> to vector<16x32xf32>
    %cst_31 = arith.constant dense<0.000000e+00> : vector<32x32xf32>
    %58 = tpu.matmul %55, %57, %cst_31 {dimension_numbers = #tpu.dot_dimension_numbers<[1], [0], [0], [1], [0, 0, 1, 1], [], []>} : vector<32x16xf32>, vector<16x32xf32>, vector<32x32xf32> -> vector<32x32xf32>
    %59 = arith.addf %54, %58 : vector<32x32xf32>
    %60 = vector.extract_strided_slice %35 {offsets = [160, 0], sizes = [32, 16], strides = [1, 1]} : vector<512x16xf32> to vector<32x16xf32>
    %c5 = arith.constant 5 : index
    %c0_32 = arith.constant 0 : index
    %c0_33 = arith.constant 0 : index
    %61 = vector.load %arg4[%c5, %c0_32, %c0_33] : memref<16x16x32xf32, #tpu.memory_space<vmem>>, vector<1x16x32xf32>
    %62 = vector.shape_cast %61 : vector<1x16x32xf32> to vector<16x32xf32>
    %cst_34 = arith.constant dense<0.000000e+00> : vector<32x32xf32>
    %63 = tpu.matmul %60, %62, %cst_34 {dimension_numbers = #tpu.dot_dimension_numbers<[1], [0], [0], [1], [0, 0, 1, 1], [], []>} : vector<32x16xf32>, vector<16x32xf32>, vector<32x32xf32> -> vector<32x32xf32>
    %64 = arith.addf %59, %63 : vector<32x32xf32>
    %65 = vector.extract_strided_slice %35 {offsets = [192, 0], sizes = [32, 16], strides = [1, 1]} : vector<512x16xf32> to vector<32x16xf32>
    %c6 = arith.constant 6 : index
    %c0_35 = arith.constant 0 : index
    %c0_36 = arith.constant 0 : index
    %66 = vector.load %arg4[%c6, %c0_35, %c0_36] : memref<16x16x32xf32, #tpu.memory_space<vmem>>, vector<1x16x32xf32>
    %67 = vector.shape_cast %66 : vector<1x16x32xf32> to vector<16x32xf32>
    %cst_37 = arith.constant dense<0.000000e+00> : vector<32x32xf32>
    %68 = tpu.matmul %65, %67, %cst_37 {dimension_numbers = #tpu.dot_dimension_numbers<[1], [0], [0], [1], [0, 0, 1, 1], [], []>} : vector<32x16xf32>, vector<16x32xf32>, vector<32x32xf32> -> vector<32x32xf32>
    %69 = arith.addf %64, %68 : vector<32x32xf32>
    %70 = vector.extract_strided_slice %35 {offsets = [224, 0], sizes = [32, 16], strides = [1, 1]} : vector<512x16xf32> to vector<32x16xf32>
    %c7 = arith.constant 7 : index
    %c0_38 = arith.constant 0 : index
    %c0_39 = arith.constant 0 : index
    %71 = vector.load %arg4[%c7, %c0_38, %c0_39] : memref<16x16x32xf32, #tpu.memory_space<vmem>>, vector<1x16x32xf32>
    %72 = vector.shape_cast %71 : vector<1x16x32xf32> to vector<16x32xf32>
    %cst_40 = arith.constant dense<0.000000e+00> : vector<32x32xf32>
    %73 = tpu.matmul %70, %72, %cst_40 {dimension_numbers = #tpu.dot_dimension_numbers<[1], [0], [0], [1], [0, 0, 1, 1], [], []>} : vector<32x16xf32>, vector<16x32xf32>, vector<32x32xf32> -> vector<32x32xf32>
    %74 = arith.addf %69, %73 : vector<32x32xf32>
    %75 = vector.extract_strided_slice %35 {offsets = [256, 0], sizes = [32, 16], strides = [1, 1]} : vector<512x16xf32> to vector<32x16xf32>
    %c8 = arith.constant 8 : index
    %c0_41 = arith.constant 0 : index
    %c0_42 = arith.constant 0 : index
    %76 = vector.load %arg4[%c8, %c0_41, %c0_42] : memref<16x16x32xf32, #tpu.memory_space<vmem>>, vector<1x16x32xf32>
    %77 = vector.shape_cast %76 : vector<1x16x32xf32> to vector<16x32xf32>
    %cst_43 = arith.constant dense<0.000000e+00> : vector<32x32xf32>
    %78 = tpu.matmul %75, %77, %cst_43 {dimension_numbers = #tpu.dot_dimension_numbers<[1], [0], [0], [1], [0, 0, 1, 1], [], []>} : vector<32x16xf32>, vector<16x32xf32>, vector<32x32xf32> -> vector<32x32xf32>
    %79 = arith.addf %74, %78 : vector<32x32xf32>
    %80 = vector.extract_strided_slice %35 {offsets = [288, 0], sizes = [32, 16], strides = [1, 1]} : vector<512x16xf32> to vector<32x16xf32>
    %c9 = arith.constant 9 : index
    %c0_44 = arith.constant 0 : index
    %c0_45 = arith.constant 0 : index
    %81 = vector.load %arg4[%c9, %c0_44, %c0_45] : memref<16x16x32xf32, #tpu.memory_space<vmem>>, vector<1x16x32xf32>
    %82 = vector.shape_cast %81 : vector<1x16x32xf32> to vector<16x32xf32>
    %cst_46 = arith.constant dense<0.000000e+00> : vector<32x32xf32>
    %83 = tpu.matmul %80, %82, %cst_46 {dimension_numbers = #tpu.dot_dimension_numbers<[1], [0], [0], [1], [0, 0, 1, 1], [], []>} : vector<32x16xf32>, vector<16x32xf32>, vector<32x32xf32> -> vector<32x32xf32>
    %84 = arith.addf %79, %83 : vector<32x32xf32>
    %85 = vector.extract_strided_slice %35 {offsets = [320, 0], sizes = [32, 16], strides = [1, 1]} : vector<512x16xf32> to vector<32x16xf32>
    %c10 = arith.constant 10 : index
    %c0_47 = arith.constant 0 : index
    %c0_48 = arith.constant 0 : index
    %86 = vector.load %arg4[%c10, %c0_47, %c0_48] : memref<16x16x32xf32, #tpu.memory_space<vmem>>, vector<1x16x32xf32>
    %87 = vector.shape_cast %86 : vector<1x16x32xf32> to vector<16x32xf32>
    %cst_49 = arith.constant dense<0.000000e+00> : vector<32x32xf32>
    %88 = tpu.matmul %85, %87, %cst_49 {dimension_numbers = #tpu.dot_dimension_numbers<[1], [0], [0], [1], [0, 0, 1, 1], [], []>} : vector<32x16xf32>, vector<16x32xf32>, vector<32x32xf32> -> vector<32x32xf32>
    %89 = arith.addf %84, %88 : vector<32x32xf32>
    %90 = vector.extract_strided_slice %35 {offsets = [352, 0], sizes = [32, 16], strides = [1, 1]} : vector<512x16xf32> to vector<32x16xf32>
    %c11 = arith.constant 11 : index
    %c0_50 = arith.constant 0 : index
    %c0_51 = arith.constant 0 : index
    %91 = vector.load %arg4[%c11, %c0_50, %c0_51] : memref<16x16x32xf32, #tpu.memory_space<vmem>>, vector<1x16x32xf32>
    %92 = vector.shape_cast %91 : vector<1x16x32xf32> to vector<16x32xf32>
    %cst_52 = arith.constant dense<0.000000e+00> : vector<32x32xf32>
    %93 = tpu.matmul %90, %92, %cst_52 {dimension_numbers = #tpu.dot_dimension_numbers<[1], [0], [0], [1], [0, 0, 1, 1], [], []>} : vector<32x16xf32>, vector<16x32xf32>, vector<32x32xf32> -> vector<32x32xf32>
    %94 = arith.addf %89, %93 : vector<32x32xf32>
    %95 = vector.extract_strided_slice %35 {offsets = [384, 0], sizes = [32, 16], strides = [1, 1]} : vector<512x16xf32> to vector<32x16xf32>
    %c12 = arith.constant 12 : index
    %c0_53 = arith.constant 0 : index
    %c0_54 = arith.constant 0 : index
    %96 = vector.load %arg4[%c12, %c0_53, %c0_54] : memref<16x16x32xf32, #tpu.memory_space<vmem>>, vector<1x16x32xf32>
    %97 = vector.shape_cast %96 : vector<1x16x32xf32> to vector<16x32xf32>
    %cst_55 = arith.constant dense<0.000000e+00> : vector<32x32xf32>
    %98 = tpu.matmul %95, %97, %cst_55 {dimension_numbers = #tpu.dot_dimension_numbers<[1], [0], [0], [1], [0, 0, 1, 1], [], []>} : vector<32x16xf32>, vector<16x32xf32>, vector<32x32xf32> -> vector<32x32xf32>
    %99 = arith.addf %94, %98 : vector<32x32xf32>
    %100 = vector.extract_strided_slice %35 {offsets = [416, 0], sizes = [32, 16], strides = [1, 1]} : vector<512x16xf32> to vector<32x16xf32>
    %c13 = arith.constant 13 : index
    %c0_56 = arith.constant 0 : index
    %c0_57 = arith.constant 0 : index
    %101 = vector.load %arg4[%c13, %c0_56, %c0_57] : memref<16x16x32xf32, #tpu.memory_space<vmem>>, vector<1x16x32xf32>
    %102 = vector.shape_cast %101 : vector<1x16x32xf32> to vector<16x32xf32>
    %cst_58 = arith.constant dense<0.000000e+00> : vector<32x32xf32>
    %103 = tpu.matmul %100, %102, %cst_58 {dimension_numbers = #tpu.dot_dimension_numbers<[1], [0], [0], [1], [0, 0, 1, 1], [], []>} : vector<32x16xf32>, vector<16x32xf32>, vector<32x32xf32> -> vector<32x32xf32>
    %104 = arith.addf %99, %103 : vector<32x32xf32>
    %105 = vector.extract_strided_slice %35 {offsets = [448, 0], sizes = [32, 16], strides = [1, 1]} : vector<512x16xf32> to vector<32x16xf32>
    %c14 = arith.constant 14 : index
    %c0_59 = arith.constant 0 : index
    %c0_60 = arith.constant 0 : index
    %106 = vector.load %arg4[%c14, %c0_59, %c0_60] : memref<16x16x32xf32, #tpu.memory_space<vmem>>, vector<1x16x32xf32>
    %107 = vector.shape_cast %106 : vector<1x16x32xf32> to vector<16x32xf32>
    %cst_61 = arith.constant dense<0.000000e+00> : vector<32x32xf32>
    %108 = tpu.matmul %105, %107, %cst_61 {dimension_numbers = #tpu.dot_dimension_numbers<[1], [0], [0], [1], [0, 0, 1, 1], [], []>} : vector<32x16xf32>, vector<16x32xf32>, vector<32x32xf32> -> vector<32x32xf32>
    %109 = arith.addf %104, %108 : vector<32x32xf32>
    %110 = vector.extract_strided_slice %35 {offsets = [480, 0], sizes = [32, 16], strides = [1, 1]} : vector<512x16xf32> to vector<32x16xf32>
    %c15 = arith.constant 15 : index
    %c0_62 = arith.constant 0 : index
    %c0_63 = arith.constant 0 : index
    %111 = vector.load %arg4[%c15, %c0_62, %c0_63] : memref<16x16x32xf32, #tpu.memory_space<vmem>>, vector<1x16x32xf32>
    %112 = vector.shape_cast %111 : vector<1x16x32xf32> to vector<16x32xf32>
    %cst_64 = arith.constant dense<0.000000e+00> : vector<32x32xf32>
    %113 = tpu.matmul %110, %112, %cst_64 {dimension_numbers = #tpu.dot_dimension_numbers<[1], [0], [0], [1], [0, 0, 1, 1], [], []>} : vector<32x16xf32>, vector<16x32xf32>, vector<32x32xf32> -> vector<32x32xf32>
    %114 = arith.addf %109, %113 : vector<32x32xf32>
    %c0_65 = arith.constant 0 : index
    %c0_66 = arith.constant 0 : index
    %115 = vector.load %arg5[%c0_65, %c0_66] : memref<2x32xf32, #tpu.memory_space<vmem>>, vector<2x32xf32>
    %116 = vector.extract_strided_slice %115 {offsets = [0, 0], sizes = [1, 32], strides = [1, 1]} : vector<2x32xf32> to vector<1x32xf32>
    %117 = vector.extract_strided_slice %115 {offsets = [1, 0], sizes = [1, 32], strides = [1, 1]} : vector<2x32xf32> to vector<1x32xf32>
    %cst_67 = arith.constant dense<0.000000e+00> : vector<32xf32>
    %118 = vector.multi_reduction <add>, %114, %cst_67 [0] : vector<32x32xf32> to vector<32xf32>
    %119 = vector.shape_cast %118 : vector<32xf32> to vector<1x32xf32>
    %120 = arith.mulf %114, %114 : vector<32x32xf32>
    %cst_68 = arith.constant dense<0.000000e+00> : vector<32xf32>
    %121 = vector.multi_reduction <add>, %120, %cst_68 [0] : vector<32x32xf32> to vector<32xf32>
    %122 = vector.shape_cast %121 : vector<32xf32> to vector<1x32xf32>
    %cst_69 = arith.constant 3.125000e-02 : f32
    %123 = vector.broadcast %cst_69 : f32 to vector<1x32xf32>
    %124 = arith.mulf %119, %123 : vector<1x32xf32>
    %cst_70 = arith.constant 3.125000e-02 : f32
    %125 = vector.broadcast %cst_70 : f32 to vector<1x32xf32>
    %126 = arith.mulf %122, %125 : vector<1x32xf32>
    %127 = arith.mulf %124, %124 : vector<1x32xf32>
    %128 = arith.subf %126, %127 : vector<1x32xf32>
    %cst_71 = arith.constant 0.000000e+00 : f32
    %129 = vector.broadcast %cst_71 : f32 to vector<1x32xf32>
    %130 = arith.maximumf %128, %129 : vector<1x32xf32>
    %131 = vector.broadcast %124 : vector<1x32xf32> to vector<32x32xf32>
    %132 = arith.subf %114, %131 : vector<32x32xf32>
    %cst_72 = arith.constant 9.99999974E-6 : f32
    %133 = vector.broadcast %cst_72 : f32 to vector<1x32xf32>
    %134 = arith.addf %130, %133 : vector<1x32xf32>
    %135 = math.rsqrt %134 : vector<1x32xf32>
    %136 = arith.mulf %116, %135 : vector<1x32xf32>
    %137 = vector.broadcast %136 : vector<1x32xf32> to vector<32x32xf32>
    %138 = arith.mulf %132, %137 : vector<32x32xf32>
    %139 = vector.broadcast %117 : vector<1x32xf32> to vector<32x32xf32>
    %140 = arith.addf %138, %139 : vector<32x32xf32>
    %cst_73 = arith.constant 0.000000e+00 : f32
    %141 = vector.broadcast %cst_73 : f32 to vector<32x32xf32>
    %142 = arith.cmpf oge, %140, %141 : vector<32x32xf32>
    %cst_74 = arith.constant 2.000000e-01 : f32
    %143 = vector.broadcast %cst_74 : f32 to vector<32x32xf32>
    %144 = arith.mulf %143, %140 : vector<32x32xf32>
    %145 = arith.select %142, %140, %144 : vector<32x32xi1>, vector<32x32xf32>
    %c5_i32 = arith.constant 5 : i32
    %146 = tpu.dynamic_rotate %145 by %c5_i32 dim 0 : vector<32x32xf32>, i32 -> vector<32x32xf32>
    %c0_75 = arith.constant 0 : index
    %c0_76 = arith.constant 0 : index
    %c0_77 = arith.constant 0 : index
    %147 = vector.load %arg6[%c0_75, %c0_76, %c0_77] : memref<9x32x1xf32, #tpu.memory_space<vmem>>, vector<1x32x1xf32>
    %148 = vector.shape_cast %147 : vector<1x32x1xf32> to vector<32x1xf32>
    %149 = vector.broadcast %148 : vector<32x1xf32> to vector<32x32xf32>
    %150 = arith.mulf %146, %149 : vector<32x32xf32>
    %c0_78 = arith.constant 0 : index
    %c0_79 = arith.constant 0 : index
    %c0_80 = arith.constant 0 : index
    %151 = vector.load %arg7[%c0_78, %c0_79, %c0_80] : memref<9x32x32xf32, #tpu.memory_space<vmem>>, vector<1x32x32xf32>
    %152 = vector.shape_cast %151 : vector<1x32x32xf32> to vector<32x32xf32>
    %cst_81 = arith.constant dense<0.000000e+00> : vector<32x32xf32>
    %153 = tpu.matmul %150, %152, %cst_81 {dimension_numbers = #tpu.dot_dimension_numbers<[1], [0], [0], [1], [0, 0, 1, 1], [], []>} : vector<32x32xf32>, vector<32x32xf32>, vector<32x32xf32> -> vector<32x32xf32>
    %c4_i32 = arith.constant 4 : i32
    %154 = tpu.dynamic_rotate %145 by %c4_i32 dim 0 : vector<32x32xf32>, i32 -> vector<32x32xf32>
    %c1_82 = arith.constant 1 : index
    %c0_83 = arith.constant 0 : index
    %c0_84 = arith.constant 0 : index
    %155 = vector.load %arg6[%c1_82, %c0_83, %c0_84] : memref<9x32x1xf32, #tpu.memory_space<vmem>>, vector<1x32x1xf32>
    %156 = vector.shape_cast %155 : vector<1x32x1xf32> to vector<32x1xf32>
    %157 = vector.broadcast %156 : vector<32x1xf32> to vector<32x32xf32>
    %158 = arith.mulf %154, %157 : vector<32x32xf32>
    %c1_85 = arith.constant 1 : index
    %c0_86 = arith.constant 0 : index
    %c0_87 = arith.constant 0 : index
    %159 = vector.load %arg7[%c1_85, %c0_86, %c0_87] : memref<9x32x32xf32, #tpu.memory_space<vmem>>, vector<1x32x32xf32>
    %160 = vector.shape_cast %159 : vector<1x32x32xf32> to vector<32x32xf32>
    %cst_88 = arith.constant dense<0.000000e+00> : vector<32x32xf32>
    %161 = tpu.matmul %158, %160, %cst_88 {dimension_numbers = #tpu.dot_dimension_numbers<[1], [0], [0], [1], [0, 0, 1, 1], [], []>} : vector<32x32xf32>, vector<32x32xf32>, vector<32x32xf32> -> vector<32x32xf32>
    %162 = arith.addf %153, %161 : vector<32x32xf32>
    %c3_i32 = arith.constant 3 : i32
    %163 = tpu.dynamic_rotate %145 by %c3_i32 dim 0 : vector<32x32xf32>, i32 -> vector<32x32xf32>
    %c2_89 = arith.constant 2 : index
    %c0_90 = arith.constant 0 : index
    %c0_91 = arith.constant 0 : index
    %164 = vector.load %arg6[%c2_89, %c0_90, %c0_91] : memref<9x32x1xf32, #tpu.memory_space<vmem>>, vector<1x32x1xf32>
    %165 = vector.shape_cast %164 : vector<1x32x1xf32> to vector<32x1xf32>
    %166 = vector.broadcast %165 : vector<32x1xf32> to vector<32x32xf32>
    %167 = arith.mulf %163, %166 : vector<32x32xf32>
    %c2_92 = arith.constant 2 : index
    %c0_93 = arith.constant 0 : index
    %c0_94 = arith.constant 0 : index
    %168 = vector.load %arg7[%c2_92, %c0_93, %c0_94] : memref<9x32x32xf32, #tpu.memory_space<vmem>>, vector<1x32x32xf32>
    %169 = vector.shape_cast %168 : vector<1x32x32xf32> to vector<32x32xf32>
    %cst_95 = arith.constant dense<0.000000e+00> : vector<32x32xf32>
    %170 = tpu.matmul %167, %169, %cst_95 {dimension_numbers = #tpu.dot_dimension_numbers<[1], [0], [0], [1], [0, 0, 1, 1], [], []>} : vector<32x32xf32>, vector<32x32xf32>, vector<32x32xf32> -> vector<32x32xf32>
    %171 = arith.addf %162, %170 : vector<32x32xf32>
    %c1_i32 = arith.constant 1 : i32
    %172 = tpu.dynamic_rotate %145 by %c1_i32 dim 0 : vector<32x32xf32>, i32 -> vector<32x32xf32>
    %c3_96 = arith.constant 3 : index
    %c0_97 = arith.constant 0 : index
    %c0_98 = arith.constant 0 : index
    %173 = vector.load %arg6[%c3_96, %c0_97, %c0_98] : memref<9x32x1xf32, #tpu.memory_space<vmem>>, vector<1x32x1xf32>
    %174 = vector.shape_cast %173 : vector<1x32x1xf32> to vector<32x1xf32>
    %175 = vector.broadcast %174 : vector<32x1xf32> to vector<32x32xf32>
    %176 = arith.mulf %172, %175 : vector<32x32xf32>
    %c3_99 = arith.constant 3 : index
    %c0_100 = arith.constant 0 : index
    %c0_101 = arith.constant 0 : index
    %177 = vector.load %arg7[%c3_99, %c0_100, %c0_101] : memref<9x32x32xf32, #tpu.memory_space<vmem>>, vector<1x32x32xf32>
    %178 = vector.shape_cast %177 : vector<1x32x32xf32> to vector<32x32xf32>
    %cst_102 = arith.constant dense<0.000000e+00> : vector<32x32xf32>
    %179 = tpu.matmul %176, %178, %cst_102 {dimension_numbers = #tpu.dot_dimension_numbers<[1], [0], [0], [1], [0, 0, 1, 1], [], []>} : vector<32x32xf32>, vector<32x32xf32>, vector<32x32xf32> -> vector<32x32xf32>
    %180 = arith.addf %171, %179 : vector<32x32xf32>
    %c4_103 = arith.constant 4 : index
    %c0_104 = arith.constant 0 : index
    %c0_105 = arith.constant 0 : index
    %181 = vector.load %arg7[%c4_103, %c0_104, %c0_105] : memref<9x32x32xf32, #tpu.memory_space<vmem>>, vector<1x32x32xf32>
    %182 = vector.shape_cast %181 : vector<1x32x32xf32> to vector<32x32xf32>
    %cst_106 = arith.constant dense<0.000000e+00> : vector<32x32xf32>
    %183 = tpu.matmul %145, %182, %cst_106 {dimension_numbers = #tpu.dot_dimension_numbers<[1], [0], [0], [1], [0, 0, 1, 1], [], []>} : vector<32x32xf32>, vector<32x32xf32>, vector<32x32xf32> -> vector<32x32xf32>
    %184 = arith.addf %180, %183 : vector<32x32xf32>
    %c31_i32 = arith.constant 31 : i32
    %185 = tpu.dynamic_rotate %145 by %c31_i32 dim 0 : vector<32x32xf32>, i32 -> vector<32x32xf32>
    %c5_107 = arith.constant 5 : index
    %c0_108 = arith.constant 0 : index
    %c0_109 = arith.constant 0 : index
    %186 = vector.load %arg6[%c5_107, %c0_108, %c0_109] : memref<9x32x1xf32, #tpu.memory_space<vmem>>, vector<1x32x1xf32>
    %187 = vector.shape_cast %186 : vector<1x32x1xf32> to vector<32x1xf32>
    %188 = vector.broadcast %187 : vector<32x1xf32> to vector<32x32xf32>
    %189 = arith.mulf %185, %188 : vector<32x32xf32>
    %c5_110 = arith.constant 5 : index
    %c0_111 = arith.constant 0 : index
    %c0_112 = arith.constant 0 : index
    %190 = vector.load %arg7[%c5_110, %c0_111, %c0_112] : memref<9x32x32xf32, #tpu.memory_space<vmem>>, vector<1x32x32xf32>
    %191 = vector.shape_cast %190 : vector<1x32x32xf32> to vector<32x32xf32>
    %cst_113 = arith.constant dense<0.000000e+00> : vector<32x32xf32>
    %192 = tpu.matmul %189, %191, %cst_113 {dimension_numbers = #tpu.dot_dimension_numbers<[1], [0], [0], [1], [0, 0, 1, 1], [], []>} : vector<32x32xf32>, vector<32x32xf32>, vector<32x32xf32> -> vector<32x32xf32>
    %193 = arith.addf %184, %192 : vector<32x32xf32>
    %c29_i32 = arith.constant 29 : i32
    %194 = tpu.dynamic_rotate %145 by %c29_i32 dim 0 : vector<32x32xf32>, i32 -> vector<32x32xf32>
    %c6_114 = arith.constant 6 : index
    %c0_115 = arith.constant 0 : index
    %c0_116 = arith.constant 0 : index
    %195 = vector.load %arg6[%c6_114, %c0_115, %c0_116] : memref<9x32x1xf32, #tpu.memory_space<vmem>>, vector<1x32x1xf32>
    %196 = vector.shape_cast %195 : vector<1x32x1xf32> to vector<32x1xf32>
    %197 = vector.broadcast %196 : vector<32x1xf32> to vector<32x32xf32>
    %198 = arith.mulf %194, %197 : vector<32x32xf32>
    %c6_117 = arith.constant 6 : index
    %c0_118 = arith.constant 0 : index
    %c0_119 = arith.constant 0 : index
    %199 = vector.load %arg7[%c6_117, %c0_118, %c0_119] : memref<9x32x32xf32, #tpu.memory_space<vmem>>, vector<1x32x32xf32>
    %200 = vector.shape_cast %199 : vector<1x32x32xf32> to vector<32x32xf32>
    %cst_120 = arith.constant dense<0.000000e+00> : vector<32x32xf32>
    %201 = tpu.matmul %198, %200, %cst_120 {dimension_numbers = #tpu.dot_dimension_numbers<[1], [0], [0], [1], [0, 0, 1, 1], [], []>} : vector<32x32xf32>, vector<32x32xf32>, vector<32x32xf32> -> vector<32x32xf32>
    %202 = arith.addf %193, %201 : vector<32x32xf32>
    %c28_i32 = arith.constant 28 : i32
    %203 = tpu.dynamic_rotate %145 by %c28_i32 dim 0 : vector<32x32xf32>, i32 -> vector<32x32xf32>
    %c7_121 = arith.constant 7 : index
    %c0_122 = arith.constant 0 : index
    %c0_123 = arith.constant 0 : index
    %204 = vector.load %arg6[%c7_121, %c0_122, %c0_123] : memref<9x32x1xf32, #tpu.memory_space<vmem>>, vector<1x32x1xf32>
    %205 = vector.shape_cast %204 : vector<1x32x1xf32> to vector<32x1xf32>
    %206 = vector.broadcast %205 : vector<32x1xf32> to vector<32x32xf32>
    %207 = arith.mulf %203, %206 : vector<32x32xf32>
    %c7_124 = arith.constant 7 : index
    %c0_125 = arith.constant 0 : index
    %c0_126 = arith.constant 0 : index
    %208 = vector.load %arg7[%c7_124, %c0_125, %c0_126] : memref<9x32x32xf32, #tpu.memory_space<vmem>>, vector<1x32x32xf32>
    %209 = vector.shape_cast %208 : vector<1x32x32xf32> to vector<32x32xf32>
    %cst_127 = arith.constant dense<0.000000e+00> : vector<32x32xf32>
    %210 = tpu.matmul %207, %209, %cst_127 {dimension_numbers = #tpu.dot_dimension_numbers<[1], [0], [0], [1], [0, 0, 1, 1], [], []>} : vector<32x32xf32>, vector<32x32xf32>, vector<32x32xf32> -> vector<32x32xf32>
    %211 = arith.addf %202, %210 : vector<32x32xf32>
    %c27_i32 = arith.constant 27 : i32
    %212 = tpu.dynamic_rotate %145 by %c27_i32 dim 0 : vector<32x32xf32>, i32 -> vector<32x32xf32>
    %c8_128 = arith.constant 8 : index
    %c0_129 = arith.constant 0 : index
    %c0_130 = arith.constant 0 : index
    %213 = vector.load %arg6[%c8_128, %c0_129, %c0_130] : memref<9x32x1xf32, #tpu.memory_space<vmem>>, vector<1x32x1xf32>
    %214 = vector.shape_cast %213 : vector<1x32x1xf32> to vector<32x1xf32>
    %215 = vector.broadcast %214 : vector<32x1xf32> to vector<32x32xf32>
    %216 = arith.mulf %212, %215 : vector<32x32xf32>
    %c8_131 = arith.constant 8 : index
    %c0_132 = arith.constant 0 : index
    %c0_133 = arith.constant 0 : index
    %217 = vector.load %arg7[%c8_131, %c0_132, %c0_133] : memref<9x32x32xf32, #tpu.memory_space<vmem>>, vector<1x32x32xf32>
    %218 = vector.shape_cast %217 : vector<1x32x32xf32> to vector<32x32xf32>
    %cst_134 = arith.constant dense<0.000000e+00> : vector<32x32xf32>
    %219 = tpu.matmul %216, %218, %cst_134 {dimension_numbers = #tpu.dot_dimension_numbers<[1], [0], [0], [1], [0, 0, 1, 1], [], []>} : vector<32x32xf32>, vector<32x32xf32>, vector<32x32xf32> -> vector<32x32xf32>
    %220 = arith.addf %211, %219 : vector<32x32xf32>
    %c0_135 = arith.constant 0 : index
    %c0_136 = arith.constant 0 : index
    %221 = vector.load %arg8[%c0_135, %c0_136] : memref<2x32xf32, #tpu.memory_space<vmem>>, vector<2x32xf32>
    %222 = vector.extract_strided_slice %221 {offsets = [0, 0], sizes = [1, 32], strides = [1, 1]} : vector<2x32xf32> to vector<1x32xf32>
    %223 = vector.extract_strided_slice %221 {offsets = [1, 0], sizes = [1, 32], strides = [1, 1]} : vector<2x32xf32> to vector<1x32xf32>
    %cst_137 = arith.constant dense<0.000000e+00> : vector<32xf32>
    %224 = vector.multi_reduction <add>, %220, %cst_137 [0] : vector<32x32xf32> to vector<32xf32>
    %225 = vector.shape_cast %224 : vector<32xf32> to vector<1x32xf32>
    %226 = arith.mulf %220, %220 : vector<32x32xf32>
    %cst_138 = arith.constant dense<0.000000e+00> : vector<32xf32>
    %227 = vector.multi_reduction <add>, %226, %cst_138 [0] : vector<32x32xf32> to vector<32xf32>
    %228 = vector.shape_cast %227 : vector<32xf32> to vector<1x32xf32>
    %cst_139 = arith.constant 3.125000e-02 : f32
    %229 = vector.broadcast %cst_139 : f32 to vector<1x32xf32>
    %230 = arith.mulf %225, %229 : vector<1x32xf32>
    %cst_140 = arith.constant 3.125000e-02 : f32
    %231 = vector.broadcast %cst_140 : f32 to vector<1x32xf32>
    %232 = arith.mulf %228, %231 : vector<1x32xf32>
    %233 = arith.mulf %230, %230 : vector<1x32xf32>
    %234 = arith.subf %232, %233 : vector<1x32xf32>
    %cst_141 = arith.constant 0.000000e+00 : f32
    %235 = vector.broadcast %cst_141 : f32 to vector<1x32xf32>
    %236 = arith.maximumf %234, %235 : vector<1x32xf32>
    %237 = vector.broadcast %230 : vector<1x32xf32> to vector<32x32xf32>
    %238 = arith.subf %220, %237 : vector<32x32xf32>
    %cst_142 = arith.constant 9.99999974E-6 : f32
    %239 = vector.broadcast %cst_142 : f32 to vector<1x32xf32>
    %240 = arith.addf %236, %239 : vector<1x32xf32>
    %241 = math.rsqrt %240 : vector<1x32xf32>
    %242 = arith.mulf %222, %241 : vector<1x32xf32>
    %243 = vector.broadcast %242 : vector<1x32xf32> to vector<32x32xf32>
    %244 = arith.mulf %238, %243 : vector<32x32xf32>
    %245 = vector.broadcast %223 : vector<1x32xf32> to vector<32x32xf32>
    %246 = arith.addf %244, %245 : vector<32x32xf32>
    %cst_143 = arith.constant 0.000000e+00 : f32
    %247 = vector.broadcast %cst_143 : f32 to vector<32x32xf32>
    %248 = arith.cmpf oge, %246, %247 : vector<32x32xf32>
    %cst_144 = arith.constant 2.000000e-01 : f32
    %249 = vector.broadcast %cst_144 : f32 to vector<32x32xf32>
    %250 = arith.mulf %249, %246 : vector<32x32xf32>
    %251 = arith.select %248, %246, %250 : vector<32x32xi1>, vector<32x32xf32>
    %c5_i32_145 = arith.constant 5 : i32
    %252 = tpu.dynamic_rotate %251 by %c5_i32_145 dim 0 : vector<32x32xf32>, i32 -> vector<32x32xf32>
    %c0_146 = arith.constant 0 : index
    %c0_147 = arith.constant 0 : index
    %c0_148 = arith.constant 0 : index
    %253 = vector.load %arg6[%c0_146, %c0_147, %c0_148] : memref<9x32x1xf32, #tpu.memory_space<vmem>>, vector<1x32x1xf32>
    %254 = vector.shape_cast %253 : vector<1x32x1xf32> to vector<32x1xf32>
    %255 = vector.broadcast %254 : vector<32x1xf32> to vector<32x32xf32>
    %256 = arith.mulf %252, %255 : vector<32x32xf32>
    %c0_149 = arith.constant 0 : index
    %c0_150 = arith.constant 0 : index
    %c0_151 = arith.constant 0 : index
    %257 = vector.load %arg9[%c0_149, %c0_150, %c0_151] : memref<9x32x32xf32, #tpu.memory_space<vmem>>, vector<1x32x32xf32>
    %258 = vector.shape_cast %257 : vector<1x32x32xf32> to vector<32x32xf32>
    %cst_152 = arith.constant dense<0.000000e+00> : vector<32x32xf32>
    %259 = tpu.matmul %256, %258, %cst_152 {dimension_numbers = #tpu.dot_dimension_numbers<[1], [0], [0], [1], [0, 0, 1, 1], [], []>} : vector<32x32xf32>, vector<32x32xf32>, vector<32x32xf32> -> vector<32x32xf32>
    %c4_i32_153 = arith.constant 4 : i32
    %260 = tpu.dynamic_rotate %251 by %c4_i32_153 dim 0 : vector<32x32xf32>, i32 -> vector<32x32xf32>
    %c1_154 = arith.constant 1 : index
    %c0_155 = arith.constant 0 : index
    %c0_156 = arith.constant 0 : index
    %261 = vector.load %arg6[%c1_154, %c0_155, %c0_156] : memref<9x32x1xf32, #tpu.memory_space<vmem>>, vector<1x32x1xf32>
    %262 = vector.shape_cast %261 : vector<1x32x1xf32> to vector<32x1xf32>
    %263 = vector.broadcast %262 : vector<32x1xf32> to vector<32x32xf32>
    %264 = arith.mulf %260, %263 : vector<32x32xf32>
    %c1_157 = arith.constant 1 : index
    %c0_158 = arith.constant 0 : index
    %c0_159 = arith.constant 0 : index
    %265 = vector.load %arg9[%c1_157, %c0_158, %c0_159] : memref<9x32x32xf32, #tpu.memory_space<vmem>>, vector<1x32x32xf32>
    %266 = vector.shape_cast %265 : vector<1x32x32xf32> to vector<32x32xf32>
    %cst_160 = arith.constant dense<0.000000e+00> : vector<32x32xf32>
    %267 = tpu.matmul %264, %266, %cst_160 {dimension_numbers = #tpu.dot_dimension_numbers<[1], [0], [0], [1], [0, 0, 1, 1], [], []>} : vector<32x32xf32>, vector<32x32xf32>, vector<32x32xf32> -> vector<32x32xf32>
    %268 = arith.addf %259, %267 : vector<32x32xf32>
    %c3_i32_161 = arith.constant 3 : i32
    %269 = tpu.dynamic_rotate %251 by %c3_i32_161 dim 0 : vector<32x32xf32>, i32 -> vector<32x32xf32>
    %c2_162 = arith.constant 2 : index
    %c0_163 = arith.constant 0 : index
    %c0_164 = arith.constant 0 : index
    %270 = vector.load %arg6[%c2_162, %c0_163, %c0_164] : memref<9x32x1xf32, #tpu.memory_space<vmem>>, vector<1x32x1xf32>
    %271 = vector.shape_cast %270 : vector<1x32x1xf32> to vector<32x1xf32>
    %272 = vector.broadcast %271 : vector<32x1xf32> to vector<32x32xf32>
    %273 = arith.mulf %269, %272 : vector<32x32xf32>
    %c2_165 = arith.constant 2 : index
    %c0_166 = arith.constant 0 : index
    %c0_167 = arith.constant 0 : index
    %274 = vector.load %arg9[%c2_165, %c0_166, %c0_167] : memref<9x32x32xf32, #tpu.memory_space<vmem>>, vector<1x32x32xf32>
    %275 = vector.shape_cast %274 : vector<1x32x32xf32> to vector<32x32xf32>
    %cst_168 = arith.constant dense<0.000000e+00> : vector<32x32xf32>
    %276 = tpu.matmul %273, %275, %cst_168 {dimension_numbers = #tpu.dot_dimension_numbers<[1], [0], [0], [1], [0, 0, 1, 1], [], []>} : vector<32x32xf32>, vector<32x32xf32>, vector<32x32xf32> -> vector<32x32xf32>
    %277 = arith.addf %268, %276 : vector<32x32xf32>
    %c1_i32_169 = arith.constant 1 : i32
    %278 = tpu.dynamic_rotate %251 by %c1_i32_169 dim 0 : vector<32x32xf32>, i32 -> vector<32x32xf32>
    %c3_170 = arith.constant 3 : index
    %c0_171 = arith.constant 0 : index
    %c0_172 = arith.constant 0 : index
    %279 = vector.load %arg6[%c3_170, %c0_171, %c0_172] : memref<9x32x1xf32, #tpu.memory_space<vmem>>, vector<1x32x1xf32>
    %280 = vector.shape_cast %279 : vector<1x32x1xf32> to vector<32x1xf32>
    %281 = vector.broadcast %280 : vector<32x1xf32> to vector<32x32xf32>
    %282 = arith.mulf %278, %281 : vector<32x32xf32>
    %c3_173 = arith.constant 3 : index
    %c0_174 = arith.constant 0 : index
    %c0_175 = arith.constant 0 : index
    %283 = vector.load %arg9[%c3_173, %c0_174, %c0_175] : memref<9x32x32xf32, #tpu.memory_space<vmem>>, vector<1x32x32xf32>
    %284 = vector.shape_cast %283 : vector<1x32x32xf32> to vector<32x32xf32>
    %cst_176 = arith.constant dense<0.000000e+00> : vector<32x32xf32>
    %285 = tpu.matmul %282, %284, %cst_176 {dimension_numbers = #tpu.dot_dimension_numbers<[1], [0], [0], [1], [0, 0, 1, 1], [], []>} : vector<32x32xf32>, vector<32x32xf32>, vector<32x32xf32> -> vector<32x32xf32>
    %286 = arith.addf %277, %285 : vector<32x32xf32>
    %c4_177 = arith.constant 4 : index
    %c0_178 = arith.constant 0 : index
    %c0_179 = arith.constant 0 : index
    %287 = vector.load %arg9[%c4_177, %c0_178, %c0_179] : memref<9x32x32xf32, #tpu.memory_space<vmem>>, vector<1x32x32xf32>
    %288 = vector.shape_cast %287 : vector<1x32x32xf32> to vector<32x32xf32>
    %cst_180 = arith.constant dense<0.000000e+00> : vector<32x32xf32>
    %289 = tpu.matmul %251, %288, %cst_180 {dimension_numbers = #tpu.dot_dimension_numbers<[1], [0], [0], [1], [0, 0, 1, 1], [], []>} : vector<32x32xf32>, vector<32x32xf32>, vector<32x32xf32> -> vector<32x32xf32>
    %290 = arith.addf %286, %289 : vector<32x32xf32>
    %c31_i32_181 = arith.constant 31 : i32
    %291 = tpu.dynamic_rotate %251 by %c31_i32_181 dim 0 : vector<32x32xf32>, i32 -> vector<32x32xf32>
    %c5_182 = arith.constant 5 : index
    %c0_183 = arith.constant 0 : index
    %c0_184 = arith.constant 0 : index
    %292 = vector.load %arg6[%c5_182, %c0_183, %c0_184] : memref<9x32x1xf32, #tpu.memory_space<vmem>>, vector<1x32x1xf32>
    %293 = vector.shape_cast %292 : vector<1x32x1xf32> to vector<32x1xf32>
    %294 = vector.broadcast %293 : vector<32x1xf32> to vector<32x32xf32>
    %295 = arith.mulf %291, %294 : vector<32x32xf32>
    %c5_185 = arith.constant 5 : index
    %c0_186 = arith.constant 0 : index
    %c0_187 = arith.constant 0 : index
    %296 = vector.load %arg9[%c5_185, %c0_186, %c0_187] : memref<9x32x32xf32, #tpu.memory_space<vmem>>, vector<1x32x32xf32>
    %297 = vector.shape_cast %296 : vector<1x32x32xf32> to vector<32x32xf32>
    %cst_188 = arith.constant dense<0.000000e+00> : vector<32x32xf32>
    %298 = tpu.matmul %295, %297, %cst_188 {dimension_numbers = #tpu.dot_dimension_numbers<[1], [0], [0], [1], [0, 0, 1, 1], [], []>} : vector<32x32xf32>, vector<32x32xf32>, vector<32x32xf32> -> vector<32x32xf32>
    %299 = arith.addf %290, %298 : vector<32x32xf32>
    %c29_i32_189 = arith.constant 29 : i32
    %300 = tpu.dynamic_rotate %251 by %c29_i32_189 dim 0 : vector<32x32xf32>, i32 -> vector<32x32xf32>
    %c6_190 = arith.constant 6 : index
    %c0_191 = arith.constant 0 : index
    %c0_192 = arith.constant 0 : index
    %301 = vector.load %arg6[%c6_190, %c0_191, %c0_192] : memref<9x32x1xf32, #tpu.memory_space<vmem>>, vector<1x32x1xf32>
    %302 = vector.shape_cast %301 : vector<1x32x1xf32> to vector<32x1xf32>
    %303 = vector.broadcast %302 : vector<32x1xf32> to vector<32x32xf32>
    %304 = arith.mulf %300, %303 : vector<32x32xf32>
    %c6_193 = arith.constant 6 : index
    %c0_194 = arith.constant 0 : index
    %c0_195 = arith.constant 0 : index
    %305 = vector.load %arg9[%c6_193, %c0_194, %c0_195] : memref<9x32x32xf32, #tpu.memory_space<vmem>>, vector<1x32x32xf32>
    %306 = vector.shape_cast %305 : vector<1x32x32xf32> to vector<32x32xf32>
    %cst_196 = arith.constant dense<0.000000e+00> : vector<32x32xf32>
    %307 = tpu.matmul %304, %306, %cst_196 {dimension_numbers = #tpu.dot_dimension_numbers<[1], [0], [0], [1], [0, 0, 1, 1], [], []>} : vector<32x32xf32>, vector<32x32xf32>, vector<32x32xf32> -> vector<32x32xf32>
    %308 = arith.addf %299, %307 : vector<32x32xf32>
    %c28_i32_197 = arith.constant 28 : i32
    %309 = tpu.dynamic_rotate %251 by %c28_i32_197 dim 0 : vector<32x32xf32>, i32 -> vector<32x32xf32>
    %c7_198 = arith.constant 7 : index
    %c0_199 = arith.constant 0 : index
    %c0_200 = arith.constant 0 : index
    %310 = vector.load %arg6[%c7_198, %c0_199, %c0_200] : memref<9x32x1xf32, #tpu.memory_space<vmem>>, vector<1x32x1xf32>
    %311 = vector.shape_cast %310 : vector<1x32x1xf32> to vector<32x1xf32>
    %312 = vector.broadcast %311 : vector<32x1xf32> to vector<32x32xf32>
    %313 = arith.mulf %309, %312 : vector<32x32xf32>
    %c7_201 = arith.constant 7 : index
    %c0_202 = arith.constant 0 : index
    %c0_203 = arith.constant 0 : index
    %314 = vector.load %arg9[%c7_201, %c0_202, %c0_203] : memref<9x32x32xf32, #tpu.memory_space<vmem>>, vector<1x32x32xf32>
    %315 = vector.shape_cast %314 : vector<1x32x32xf32> to vector<32x32xf32>
    %cst_204 = arith.constant dense<0.000000e+00> : vector<32x32xf32>
    %316 = tpu.matmul %313, %315, %cst_204 {dimension_numbers = #tpu.dot_dimension_numbers<[1], [0], [0], [1], [0, 0, 1, 1], [], []>} : vector<32x32xf32>, vector<32x32xf32>, vector<32x32xf32> -> vector<32x32xf32>
    %317 = arith.addf %308, %316 : vector<32x32xf32>
    %c27_i32_205 = arith.constant 27 : i32
    %318 = tpu.dynamic_rotate %251 by %c27_i32_205 dim 0 : vector<32x32xf32>, i32 -> vector<32x32xf32>
    %c8_206 = arith.constant 8 : index
    %c0_207 = arith.constant 0 : index
    %c0_208 = arith.constant 0 : index
    %319 = vector.load %arg6[%c8_206, %c0_207, %c0_208] : memref<9x32x1xf32, #tpu.memory_space<vmem>>, vector<1x32x1xf32>
    %320 = vector.shape_cast %319 : vector<1x32x1xf32> to vector<32x1xf32>
    %321 = vector.broadcast %320 : vector<32x1xf32> to vector<32x32xf32>
    %322 = arith.mulf %318, %321 : vector<32x32xf32>
    %c8_209 = arith.constant 8 : index
    %c0_210 = arith.constant 0 : index
    %c0_211 = arith.constant 0 : index
    %323 = vector.load %arg9[%c8_209, %c0_210, %c0_211] : memref<9x32x32xf32, #tpu.memory_space<vmem>>, vector<1x32x32xf32>
    %324 = vector.shape_cast %323 : vector<1x32x32xf32> to vector<32x32xf32>
    %cst_212 = arith.constant dense<0.000000e+00> : vector<32x32xf32>
    %325 = tpu.matmul %322, %324, %cst_212 {dimension_numbers = #tpu.dot_dimension_numbers<[1], [0], [0], [1], [0, 0, 1, 1], [], []>} : vector<32x32xf32>, vector<32x32xf32>, vector<32x32xf32> -> vector<32x32xf32>
    %326 = arith.addf %317, %325 : vector<32x32xf32>
    %c0_213 = arith.constant 0 : index
    %c0_214 = arith.constant 0 : index
    %327 = vector.load %arg10[%c0_213, %c0_214] : memref<2x32xf32, #tpu.memory_space<vmem>>, vector<2x32xf32>
    %328 = vector.extract_strided_slice %327 {offsets = [0, 0], sizes = [1, 32], strides = [1, 1]} : vector<2x32xf32> to vector<1x32xf32>
    %329 = vector.extract_strided_slice %327 {offsets = [1, 0], sizes = [1, 32], strides = [1, 1]} : vector<2x32xf32> to vector<1x32xf32>
    %cst_215 = arith.constant dense<0.000000e+00> : vector<32xf32>
    %330 = vector.multi_reduction <add>, %326, %cst_215 [0] : vector<32x32xf32> to vector<32xf32>
    %331 = vector.shape_cast %330 : vector<32xf32> to vector<1x32xf32>
    %332 = arith.mulf %326, %326 : vector<32x32xf32>
    %cst_216 = arith.constant dense<0.000000e+00> : vector<32xf32>
    %333 = vector.multi_reduction <add>, %332, %cst_216 [0] : vector<32x32xf32> to vector<32xf32>
    %334 = vector.shape_cast %333 : vector<32xf32> to vector<1x32xf32>
    %cst_217 = arith.constant 3.125000e-02 : f32
    %335 = vector.broadcast %cst_217 : f32 to vector<1x32xf32>
    %336 = arith.mulf %331, %335 : vector<1x32xf32>
    %cst_218 = arith.constant 3.125000e-02 : f32
    %337 = vector.broadcast %cst_218 : f32 to vector<1x32xf32>
    %338 = arith.mulf %334, %337 : vector<1x32xf32>
    %339 = arith.mulf %336, %336 : vector<1x32xf32>
    %340 = arith.subf %338, %339 : vector<1x32xf32>
    %cst_219 = arith.constant 0.000000e+00 : f32
    %341 = vector.broadcast %cst_219 : f32 to vector<1x32xf32>
    %342 = arith.maximumf %340, %341 : vector<1x32xf32>
    %343 = vector.broadcast %336 : vector<1x32xf32> to vector<32x32xf32>
    %344 = arith.subf %326, %343 : vector<32x32xf32>
    %cst_220 = arith.constant 9.99999974E-6 : f32
    %345 = vector.broadcast %cst_220 : f32 to vector<1x32xf32>
    %346 = arith.addf %342, %345 : vector<1x32xf32>
    %347 = math.rsqrt %346 : vector<1x32xf32>
    %348 = arith.mulf %328, %347 : vector<1x32xf32>
    %349 = vector.broadcast %348 : vector<1x32xf32> to vector<32x32xf32>
    %350 = arith.mulf %344, %349 : vector<32x32xf32>
    %351 = vector.broadcast %329 : vector<1x32xf32> to vector<32x32xf32>
    %352 = arith.addf %350, %351 : vector<32x32xf32>
    %353 = arith.addf %352, %145 : vector<32x32xf32>
    %cst_221 = arith.constant 0.000000e+00 : f32
    %354 = vector.broadcast %cst_221 : f32 to vector<32x32xf32>
    %355 = arith.cmpf oge, %353, %354 : vector<32x32xf32>
    %cst_222 = arith.constant 2.000000e-01 : f32
    %356 = vector.broadcast %cst_222 : f32 to vector<32x32xf32>
    %357 = arith.mulf %356, %353 : vector<32x32xf32>
    %358 = arith.select %355, %353, %357 : vector<32x32xi1>, vector<32x32xf32>
    %c5_i32_223 = arith.constant 5 : i32
    %359 = tpu.dynamic_rotate %358 by %c5_i32_223 dim 0 : vector<32x32xf32>, i32 -> vector<32x32xf32>
    %c0_224 = arith.constant 0 : index
    %c0_225 = arith.constant 0 : index
    %c0_226 = arith.constant 0 : index
    %360 = vector.load %arg6[%c0_224, %c0_225, %c0_226] : memref<9x32x1xf32, #tpu.memory_space<vmem>>, vector<1x32x1xf32>
    %361 = vector.shape_cast %360 : vector<1x32x1xf32> to vector<32x1xf32>
    %362 = vector.broadcast %361 : vector<32x1xf32> to vector<32x32xf32>
    %363 = arith.mulf %359, %362 : vector<32x32xf32>
    %c0_227 = arith.constant 0 : index
    %c0_228 = arith.constant 0 : index
    %c0_229 = arith.constant 0 : index
    %364 = vector.load %arg11[%c0_227, %c0_228, %c0_229] : memref<9x32x32xf32, #tpu.memory_space<vmem>>, vector<1x32x32xf32>
    %365 = vector.shape_cast %364 : vector<1x32x32xf32> to vector<32x32xf32>
    %cst_230 = arith.constant dense<0.000000e+00> : vector<32x32xf32>
    %366 = tpu.matmul %363, %365, %cst_230 {dimension_numbers = #tpu.dot_dimension_numbers<[1], [0], [0], [1], [0, 0, 1, 1], [], []>} : vector<32x32xf32>, vector<32x32xf32>, vector<32x32xf32> -> vector<32x32xf32>
    %c4_i32_231 = arith.constant 4 : i32
    %367 = tpu.dynamic_rotate %358 by %c4_i32_231 dim 0 : vector<32x32xf32>, i32 -> vector<32x32xf32>
    %c1_232 = arith.constant 1 : index
    %c0_233 = arith.constant 0 : index
    %c0_234 = arith.constant 0 : index
    %368 = vector.load %arg6[%c1_232, %c0_233, %c0_234] : memref<9x32x1xf32, #tpu.memory_space<vmem>>, vector<1x32x1xf32>
    %369 = vector.shape_cast %368 : vector<1x32x1xf32> to vector<32x1xf32>
    %370 = vector.broadcast %369 : vector<32x1xf32> to vector<32x32xf32>
    %371 = arith.mulf %367, %370 : vector<32x32xf32>
    %c1_235 = arith.constant 1 : index
    %c0_236 = arith.constant 0 : index
    %c0_237 = arith.constant 0 : index
    %372 = vector.load %arg11[%c1_235, %c0_236, %c0_237] : memref<9x32x32xf32, #tpu.memory_space<vmem>>, vector<1x32x32xf32>
    %373 = vector.shape_cast %372 : vector<1x32x32xf32> to vector<32x32xf32>
    %cst_238 = arith.constant dense<0.000000e+00> : vector<32x32xf32>
    %374 = tpu.matmul %371, %373, %cst_238 {dimension_numbers = #tpu.dot_dimension_numbers<[1], [0], [0], [1], [0, 0, 1, 1], [], []>} : vector<32x32xf32>, vector<32x32xf32>, vector<32x32xf32> -> vector<32x32xf32>
    %375 = arith.addf %366, %374 : vector<32x32xf32>
    %c3_i32_239 = arith.constant 3 : i32
    %376 = tpu.dynamic_rotate %358 by %c3_i32_239 dim 0 : vector<32x32xf32>, i32 -> vector<32x32xf32>
    %c2_240 = arith.constant 2 : index
    %c0_241 = arith.constant 0 : index
    %c0_242 = arith.constant 0 : index
    %377 = vector.load %arg6[%c2_240, %c0_241, %c0_242] : memref<9x32x1xf32, #tpu.memory_space<vmem>>, vector<1x32x1xf32>
    %378 = vector.shape_cast %377 : vector<1x32x1xf32> to vector<32x1xf32>
    %379 = vector.broadcast %378 : vector<32x1xf32> to vector<32x32xf32>
    %380 = arith.mulf %376, %379 : vector<32x32xf32>
    %c2_243 = arith.constant 2 : index
    %c0_244 = arith.constant 0 : index
    %c0_245 = arith.constant 0 : index
    %381 = vector.load %arg11[%c2_243, %c0_244, %c0_245] : memref<9x32x32xf32, #tpu.memory_space<vmem>>, vector<1x32x32xf32>
    %382 = vector.shape_cast %381 : vector<1x32x32xf32> to vector<32x32xf32>
    %cst_246 = arith.constant dense<0.000000e+00> : vector<32x32xf32>
    %383 = tpu.matmul %380, %382, %cst_246 {dimension_numbers = #tpu.dot_dimension_numbers<[1], [0], [0], [1], [0, 0, 1, 1], [], []>} : vector<32x32xf32>, vector<32x32xf32>, vector<32x32xf32> -> vector<32x32xf32>
    %384 = arith.addf %375, %383 : vector<32x32xf32>
    %c1_i32_247 = arith.constant 1 : i32
    %385 = tpu.dynamic_rotate %358 by %c1_i32_247 dim 0 : vector<32x32xf32>, i32 -> vector<32x32xf32>
    %c3_248 = arith.constant 3 : index
    %c0_249 = arith.constant 0 : index
    %c0_250 = arith.constant 0 : index
    %386 = vector.load %arg6[%c3_248, %c0_249, %c0_250] : memref<9x32x1xf32, #tpu.memory_space<vmem>>, vector<1x32x1xf32>
    %387 = vector.shape_cast %386 : vector<1x32x1xf32> to vector<32x1xf32>
    %388 = vector.broadcast %387 : vector<32x1xf32> to vector<32x32xf32>
    %389 = arith.mulf %385, %388 : vector<32x32xf32>
    %c3_251 = arith.constant 3 : index
    %c0_252 = arith.constant 0 : index
    %c0_253 = arith.constant 0 : index
    %390 = vector.load %arg11[%c3_251, %c0_252, %c0_253] : memref<9x32x32xf32, #tpu.memory_space<vmem>>, vector<1x32x32xf32>
    %391 = vector.shape_cast %390 : vector<1x32x32xf32> to vector<32x32xf32>
    %cst_254 = arith.constant dense<0.000000e+00> : vector<32x32xf32>
    %392 = tpu.matmul %389, %391, %cst_254 {dimension_numbers = #tpu.dot_dimension_numbers<[1], [0], [0], [1], [0, 0, 1, 1], [], []>} : vector<32x32xf32>, vector<32x32xf32>, vector<32x32xf32> -> vector<32x32xf32>
    %393 = arith.addf %384, %392 : vector<32x32xf32>
    %c4_255 = arith.constant 4 : index
    %c0_256 = arith.constant 0 : index
    %c0_257 = arith.constant 0 : index
    %394 = vector.load %arg11[%c4_255, %c0_256, %c0_257] : memref<9x32x32xf32, #tpu.memory_space<vmem>>, vector<1x32x32xf32>
    %395 = vector.shape_cast %394 : vector<1x32x32xf32> to vector<32x32xf32>
    %cst_258 = arith.constant dense<0.000000e+00> : vector<32x32xf32>
    %396 = tpu.matmul %358, %395, %cst_258 {dimension_numbers = #tpu.dot_dimension_numbers<[1], [0], [0], [1], [0, 0, 1, 1], [], []>} : vector<32x32xf32>, vector<32x32xf32>, vector<32x32xf32> -> vector<32x32xf32>
    %397 = arith.addf %393, %396 : vector<32x32xf32>
    %c31_i32_259 = arith.constant 31 : i32
    %398 = tpu.dynamic_rotate %358 by %c31_i32_259 dim 0 : vector<32x32xf32>, i32 -> vector<32x32xf32>
    %c5_260 = arith.constant 5 : index
    %c0_261 = arith.constant 0 : index
    %c0_262 = arith.constant 0 : index
    %399 = vector.load %arg6[%c5_260, %c0_261, %c0_262] : memref<9x32x1xf32, #tpu.memory_space<vmem>>, vector<1x32x1xf32>
    %400 = vector.shape_cast %399 : vector<1x32x1xf32> to vector<32x1xf32>
    %401 = vector.broadcast %400 : vector<32x1xf32> to vector<32x32xf32>
    %402 = arith.mulf %398, %401 : vector<32x32xf32>
    %c5_263 = arith.constant 5 : index
    %c0_264 = arith.constant 0 : index
    %c0_265 = arith.constant 0 : index
    %403 = vector.load %arg11[%c5_263, %c0_264, %c0_265] : memref<9x32x32xf32, #tpu.memory_space<vmem>>, vector<1x32x32xf32>
    %404 = vector.shape_cast %403 : vector<1x32x32xf32> to vector<32x32xf32>
    %cst_266 = arith.constant dense<0.000000e+00> : vector<32x32xf32>
    %405 = tpu.matmul %402, %404, %cst_266 {dimension_numbers = #tpu.dot_dimension_numbers<[1], [0], [0], [1], [0, 0, 1, 1], [], []>} : vector<32x32xf32>, vector<32x32xf32>, vector<32x32xf32> -> vector<32x32xf32>
    %406 = arith.addf %397, %405 : vector<32x32xf32>
    %c29_i32_267 = arith.constant 29 : i32
    %407 = tpu.dynamic_rotate %358 by %c29_i32_267 dim 0 : vector<32x32xf32>, i32 -> vector<32x32xf32>
    %c6_268 = arith.constant 6 : index
    %c0_269 = arith.constant 0 : index
    %c0_270 = arith.constant 0 : index
    %408 = vector.load %arg6[%c6_268, %c0_269, %c0_270] : memref<9x32x1xf32, #tpu.memory_space<vmem>>, vector<1x32x1xf32>
    %409 = vector.shape_cast %408 : vector<1x32x1xf32> to vector<32x1xf32>
    %410 = vector.broadcast %409 : vector<32x1xf32> to vector<32x32xf32>
    %411 = arith.mulf %407, %410 : vector<32x32xf32>
    %c6_271 = arith.constant 6 : index
    %c0_272 = arith.constant 0 : index
    %c0_273 = arith.constant 0 : index
    %412 = vector.load %arg11[%c6_271, %c0_272, %c0_273] : memref<9x32x32xf32, #tpu.memory_space<vmem>>, vector<1x32x32xf32>
    %413 = vector.shape_cast %412 : vector<1x32x32xf32> to vector<32x32xf32>
    %cst_274 = arith.constant dense<0.000000e+00> : vector<32x32xf32>
    %414 = tpu.matmul %411, %413, %cst_274 {dimension_numbers = #tpu.dot_dimension_numbers<[1], [0], [0], [1], [0, 0, 1, 1], [], []>} : vector<32x32xf32>, vector<32x32xf32>, vector<32x32xf32> -> vector<32x32xf32>
    %415 = arith.addf %406, %414 : vector<32x32xf32>
    %c28_i32_275 = arith.constant 28 : i32
    %416 = tpu.dynamic_rotate %358 by %c28_i32_275 dim 0 : vector<32x32xf32>, i32 -> vector<32x32xf32>
    %c7_276 = arith.constant 7 : index
    %c0_277 = arith.constant 0 : index
    %c0_278 = arith.constant 0 : index
    %417 = vector.load %arg6[%c7_276, %c0_277, %c0_278] : memref<9x32x1xf32, #tpu.memory_space<vmem>>, vector<1x32x1xf32>
    %418 = vector.shape_cast %417 : vector<1x32x1xf32> to vector<32x1xf32>
    %419 = vector.broadcast %418 : vector<32x1xf32> to vector<32x32xf32>
    %420 = arith.mulf %416, %419 : vector<32x32xf32>
    %c7_279 = arith.constant 7 : index
    %c0_280 = arith.constant 0 : index
    %c0_281 = arith.constant 0 : index
    %421 = vector.load %arg11[%c7_279, %c0_280, %c0_281] : memref<9x32x32xf32, #tpu.memory_space<vmem>>, vector<1x32x32xf32>
    %422 = vector.shape_cast %421 : vector<1x32x32xf32> to vector<32x32xf32>
    %cst_282 = arith.constant dense<0.000000e+00> : vector<32x32xf32>
    %423 = tpu.matmul %420, %422, %cst_282 {dimension_numbers = #tpu.dot_dimension_numbers<[1], [0], [0], [1], [0, 0, 1, 1], [], []>} : vector<32x32xf32>, vector<32x32xf32>, vector<32x32xf32> -> vector<32x32xf32>
    %424 = arith.addf %415, %423 : vector<32x32xf32>
    %c27_i32_283 = arith.constant 27 : i32
    %425 = tpu.dynamic_rotate %358 by %c27_i32_283 dim 0 : vector<32x32xf32>, i32 -> vector<32x32xf32>
    %c8_284 = arith.constant 8 : index
    %c0_285 = arith.constant 0 : index
    %c0_286 = arith.constant 0 : index
    %426 = vector.load %arg6[%c8_284, %c0_285, %c0_286] : memref<9x32x1xf32, #tpu.memory_space<vmem>>, vector<1x32x1xf32>
    %427 = vector.shape_cast %426 : vector<1x32x1xf32> to vector<32x1xf32>
    %428 = vector.broadcast %427 : vector<32x1xf32> to vector<32x32xf32>
    %429 = arith.mulf %425, %428 : vector<32x32xf32>
    %c8_287 = arith.constant 8 : index
    %c0_288 = arith.constant 0 : index
    %c0_289 = arith.constant 0 : index
    %430 = vector.load %arg11[%c8_287, %c0_288, %c0_289] : memref<9x32x32xf32, #tpu.memory_space<vmem>>, vector<1x32x32xf32>
    %431 = vector.shape_cast %430 : vector<1x32x32xf32> to vector<32x32xf32>
    %cst_290 = arith.constant dense<0.000000e+00> : vector<32x32xf32>
    %432 = tpu.matmul %429, %431, %cst_290 {dimension_numbers = #tpu.dot_dimension_numbers<[1], [0], [0], [1], [0, 0, 1, 1], [], []>} : vector<32x32xf32>, vector<32x32xf32>, vector<32x32xf32> -> vector<32x32xf32>
    %433 = arith.addf %424, %432 : vector<32x32xf32>
    %c0_291 = arith.constant 0 : index
    %c0_292 = arith.constant 0 : index
    %434 = vector.load %arg12[%c0_291, %c0_292] : memref<2x32xf32, #tpu.memory_space<vmem>>, vector<2x32xf32>
    %435 = vector.extract_strided_slice %434 {offsets = [0, 0], sizes = [1, 32], strides = [1, 1]} : vector<2x32xf32> to vector<1x32xf32>
    %436 = vector.extract_strided_slice %434 {offsets = [1, 0], sizes = [1, 32], strides = [1, 1]} : vector<2x32xf32> to vector<1x32xf32>
    %cst_293 = arith.constant dense<0.000000e+00> : vector<32xf32>
    %437 = vector.multi_reduction <add>, %433, %cst_293 [0] : vector<32x32xf32> to vector<32xf32>
    %438 = vector.shape_cast %437 : vector<32xf32> to vector<1x32xf32>
    %439 = arith.mulf %433, %433 : vector<32x32xf32>
    %cst_294 = arith.constant dense<0.000000e+00> : vector<32xf32>
    %440 = vector.multi_reduction <add>, %439, %cst_294 [0] : vector<32x32xf32> to vector<32xf32>
    %441 = vector.shape_cast %440 : vector<32xf32> to vector<1x32xf32>
    %cst_295 = arith.constant 3.125000e-02 : f32
    %442 = vector.broadcast %cst_295 : f32 to vector<1x32xf32>
    %443 = arith.mulf %438, %442 : vector<1x32xf32>
    %cst_296 = arith.constant 3.125000e-02 : f32
    %444 = vector.broadcast %cst_296 : f32 to vector<1x32xf32>
    %445 = arith.mulf %441, %444 : vector<1x32xf32>
    %446 = arith.mulf %443, %443 : vector<1x32xf32>
    %447 = arith.subf %445, %446 : vector<1x32xf32>
    %cst_297 = arith.constant 0.000000e+00 : f32
    %448 = vector.broadcast %cst_297 : f32 to vector<1x32xf32>
    %449 = arith.maximumf %447, %448 : vector<1x32xf32>
    %450 = vector.broadcast %443 : vector<1x32xf32> to vector<32x32xf32>
    %451 = arith.subf %433, %450 : vector<32x32xf32>
    %cst_298 = arith.constant 9.99999974E-6 : f32
    %452 = vector.broadcast %cst_298 : f32 to vector<1x32xf32>
    %453 = arith.addf %449, %452 : vector<1x32xf32>
    %454 = math.rsqrt %453 : vector<1x32xf32>
    %455 = arith.mulf %435, %454 : vector<1x32xf32>
    %456 = vector.broadcast %455 : vector<1x32xf32> to vector<32x32xf32>
    %457 = arith.mulf %451, %456 : vector<32x32xf32>
    %458 = vector.broadcast %436 : vector<1x32xf32> to vector<32x32xf32>
    %459 = arith.addf %457, %458 : vector<32x32xf32>
    %cst_299 = arith.constant 0.000000e+00 : f32
    %460 = vector.broadcast %cst_299 : f32 to vector<32x32xf32>
    %461 = arith.cmpf oge, %459, %460 : vector<32x32xf32>
    %cst_300 = arith.constant 2.000000e-01 : f32
    %462 = vector.broadcast %cst_300 : f32 to vector<32x32xf32>
    %463 = arith.mulf %462, %459 : vector<32x32xf32>
    %464 = arith.select %461, %459, %463 : vector<32x32xi1>, vector<32x32xf32>
    %c5_i32_301 = arith.constant 5 : i32
    %465 = tpu.dynamic_rotate %464 by %c5_i32_301 dim 0 : vector<32x32xf32>, i32 -> vector<32x32xf32>
    %c0_302 = arith.constant 0 : index
    %c0_303 = arith.constant 0 : index
    %c0_304 = arith.constant 0 : index
    %466 = vector.load %arg6[%c0_302, %c0_303, %c0_304] : memref<9x32x1xf32, #tpu.memory_space<vmem>>, vector<1x32x1xf32>
    %467 = vector.shape_cast %466 : vector<1x32x1xf32> to vector<32x1xf32>
    %468 = vector.broadcast %467 : vector<32x1xf32> to vector<32x32xf32>
    %469 = arith.mulf %465, %468 : vector<32x32xf32>
    %c0_305 = arith.constant 0 : index
    %c0_306 = arith.constant 0 : index
    %c0_307 = arith.constant 0 : index
    %470 = vector.load %arg13[%c0_305, %c0_306, %c0_307] : memref<9x32x32xf32, #tpu.memory_space<vmem>>, vector<1x32x32xf32>
    %471 = vector.shape_cast %470 : vector<1x32x32xf32> to vector<32x32xf32>
    %cst_308 = arith.constant dense<0.000000e+00> : vector<32x32xf32>
    %472 = tpu.matmul %469, %471, %cst_308 {dimension_numbers = #tpu.dot_dimension_numbers<[1], [0], [0], [1], [0, 0, 1, 1], [], []>} : vector<32x32xf32>, vector<32x32xf32>, vector<32x32xf32> -> vector<32x32xf32>
    %c4_i32_309 = arith.constant 4 : i32
    %473 = tpu.dynamic_rotate %464 by %c4_i32_309 dim 0 : vector<32x32xf32>, i32 -> vector<32x32xf32>
    %c1_310 = arith.constant 1 : index
    %c0_311 = arith.constant 0 : index
    %c0_312 = arith.constant 0 : index
    %474 = vector.load %arg6[%c1_310, %c0_311, %c0_312] : memref<9x32x1xf32, #tpu.memory_space<vmem>>, vector<1x32x1xf32>
    %475 = vector.shape_cast %474 : vector<1x32x1xf32> to vector<32x1xf32>
    %476 = vector.broadcast %475 : vector<32x1xf32> to vector<32x32xf32>
    %477 = arith.mulf %473, %476 : vector<32x32xf32>
    %c1_313 = arith.constant 1 : index
    %c0_314 = arith.constant 0 : index
    %c0_315 = arith.constant 0 : index
    %478 = vector.load %arg13[%c1_313, %c0_314, %c0_315] : memref<9x32x32xf32, #tpu.memory_space<vmem>>, vector<1x32x32xf32>
    %479 = vector.shape_cast %478 : vector<1x32x32xf32> to vector<32x32xf32>
    %cst_316 = arith.constant dense<0.000000e+00> : vector<32x32xf32>
    %480 = tpu.matmul %477, %479, %cst_316 {dimension_numbers = #tpu.dot_dimension_numbers<[1], [0], [0], [1], [0, 0, 1, 1], [], []>} : vector<32x32xf32>, vector<32x32xf32>, vector<32x32xf32> -> vector<32x32xf32>
    %481 = arith.addf %472, %480 : vector<32x32xf32>
    %c3_i32_317 = arith.constant 3 : i32
    %482 = tpu.dynamic_rotate %464 by %c3_i32_317 dim 0 : vector<32x32xf32>, i32 -> vector<32x32xf32>
    %c2_318 = arith.constant 2 : index
    %c0_319 = arith.constant 0 : index
    %c0_320 = arith.constant 0 : index
    %483 = vector.load %arg6[%c2_318, %c0_319, %c0_320] : memref<9x32x1xf32, #tpu.memory_space<vmem>>, vector<1x32x1xf32>
    %484 = vector.shape_cast %483 : vector<1x32x1xf32> to vector<32x1xf32>
    %485 = vector.broadcast %484 : vector<32x1xf32> to vector<32x32xf32>
    %486 = arith.mulf %482, %485 : vector<32x32xf32>
    %c2_321 = arith.constant 2 : index
    %c0_322 = arith.constant 0 : index
    %c0_323 = arith.constant 0 : index
    %487 = vector.load %arg13[%c2_321, %c0_322, %c0_323] : memref<9x32x32xf32, #tpu.memory_space<vmem>>, vector<1x32x32xf32>
    %488 = vector.shape_cast %487 : vector<1x32x32xf32> to vector<32x32xf32>
    %cst_324 = arith.constant dense<0.000000e+00> : vector<32x32xf32>
    %489 = tpu.matmul %486, %488, %cst_324 {dimension_numbers = #tpu.dot_dimension_numbers<[1], [0], [0], [1], [0, 0, 1, 1], [], []>} : vector<32x32xf32>, vector<32x32xf32>, vector<32x32xf32> -> vector<32x32xf32>
    %490 = arith.addf %481, %489 : vector<32x32xf32>
    %c1_i32_325 = arith.constant 1 : i32
    %491 = tpu.dynamic_rotate %464 by %c1_i32_325 dim 0 : vector<32x32xf32>, i32 -> vector<32x32xf32>
    %c3_326 = arith.constant 3 : index
    %c0_327 = arith.constant 0 : index
    %c0_328 = arith.constant 0 : index
    %492 = vector.load %arg6[%c3_326, %c0_327, %c0_328] : memref<9x32x1xf32, #tpu.memory_space<vmem>>, vector<1x32x1xf32>
    %493 = vector.shape_cast %492 : vector<1x32x1xf32> to vector<32x1xf32>
    %494 = vector.broadcast %493 : vector<32x1xf32> to vector<32x32xf32>
    %495 = arith.mulf %491, %494 : vector<32x32xf32>
    %c3_329 = arith.constant 3 : index
    %c0_330 = arith.constant 0 : index
    %c0_331 = arith.constant 0 : index
    %496 = vector.load %arg13[%c3_329, %c0_330, %c0_331] : memref<9x32x32xf32, #tpu.memory_space<vmem>>, vector<1x32x32xf32>
    %497 = vector.shape_cast %496 : vector<1x32x32xf32> to vector<32x32xf32>
    %cst_332 = arith.constant dense<0.000000e+00> : vector<32x32xf32>
    %498 = tpu.matmul %495, %497, %cst_332 {dimension_numbers = #tpu.dot_dimension_numbers<[1], [0], [0], [1], [0, 0, 1, 1], [], []>} : vector<32x32xf32>, vector<32x32xf32>, vector<32x32xf32> -> vector<32x32xf32>
    %499 = arith.addf %490, %498 : vector<32x32xf32>
    %c4_333 = arith.constant 4 : index
    %c0_334 = arith.constant 0 : index
    %c0_335 = arith.constant 0 : index
    %500 = vector.load %arg13[%c4_333, %c0_334, %c0_335] : memref<9x32x32xf32, #tpu.memory_space<vmem>>, vector<1x32x32xf32>
    %501 = vector.shape_cast %500 : vector<1x32x32xf32> to vector<32x32xf32>
    %cst_336 = arith.constant dense<0.000000e+00> : vector<32x32xf32>
    %502 = tpu.matmul %464, %501, %cst_336 {dimension_numbers = #tpu.dot_dimension_numbers<[1], [0], [0], [1], [0, 0, 1, 1], [], []>} : vector<32x32xf32>, vector<32x32xf32>, vector<32x32xf32> -> vector<32x32xf32>
    %503 = arith.addf %499, %502 : vector<32x32xf32>
    %c31_i32_337 = arith.constant 31 : i32
    %504 = tpu.dynamic_rotate %464 by %c31_i32_337 dim 0 : vector<32x32xf32>, i32 -> vector<32x32xf32>
    %c5_338 = arith.constant 5 : index
    %c0_339 = arith.constant 0 : index
    %c0_340 = arith.constant 0 : index
    %505 = vector.load %arg6[%c5_338, %c0_339, %c0_340] : memref<9x32x1xf32, #tpu.memory_space<vmem>>, vector<1x32x1xf32>
    %506 = vector.shape_cast %505 : vector<1x32x1xf32> to vector<32x1xf32>
    %507 = vector.broadcast %506 : vector<32x1xf32> to vector<32x32xf32>
    %508 = arith.mulf %504, %507 : vector<32x32xf32>
    %c5_341 = arith.constant 5 : index
    %c0_342 = arith.constant 0 : index
    %c0_343 = arith.constant 0 : index
    %509 = vector.load %arg13[%c5_341, %c0_342, %c0_343] : memref<9x32x32xf32, #tpu.memory_space<vmem>>, vector<1x32x32xf32>
    %510 = vector.shape_cast %509 : vector<1x32x32xf32> to vector<32x32xf32>
    %cst_344 = arith.constant dense<0.000000e+00> : vector<32x32xf32>
    %511 = tpu.matmul %508, %510, %cst_344 {dimension_numbers = #tpu.dot_dimension_numbers<[1], [0], [0], [1], [0, 0, 1, 1], [], []>} : vector<32x32xf32>, vector<32x32xf32>, vector<32x32xf32> -> vector<32x32xf32>
    %512 = arith.addf %503, %511 : vector<32x32xf32>
    %c29_i32_345 = arith.constant 29 : i32
    %513 = tpu.dynamic_rotate %464 by %c29_i32_345 dim 0 : vector<32x32xf32>, i32 -> vector<32x32xf32>
    %c6_346 = arith.constant 6 : index
    %c0_347 = arith.constant 0 : index
    %c0_348 = arith.constant 0 : index
    %514 = vector.load %arg6[%c6_346, %c0_347, %c0_348] : memref<9x32x1xf32, #tpu.memory_space<vmem>>, vector<1x32x1xf32>
    %515 = vector.shape_cast %514 : vector<1x32x1xf32> to vector<32x1xf32>
    %516 = vector.broadcast %515 : vector<32x1xf32> to vector<32x32xf32>
    %517 = arith.mulf %513, %516 : vector<32x32xf32>
    %c6_349 = arith.constant 6 : index
    %c0_350 = arith.constant 0 : index
    %c0_351 = arith.constant 0 : index
    %518 = vector.load %arg13[%c6_349, %c0_350, %c0_351] : memref<9x32x32xf32, #tpu.memory_space<vmem>>, vector<1x32x32xf32>
    %519 = vector.shape_cast %518 : vector<1x32x32xf32> to vector<32x32xf32>
    %cst_352 = arith.constant dense<0.000000e+00> : vector<32x32xf32>
    %520 = tpu.matmul %517, %519, %cst_352 {dimension_numbers = #tpu.dot_dimension_numbers<[1], [0], [0], [1], [0, 0, 1, 1], [], []>} : vector<32x32xf32>, vector<32x32xf32>, vector<32x32xf32> -> vector<32x32xf32>
    %521 = arith.addf %512, %520 : vector<32x32xf32>
    %c28_i32_353 = arith.constant 28 : i32
    %522 = tpu.dynamic_rotate %464 by %c28_i32_353 dim 0 : vector<32x32xf32>, i32 -> vector<32x32xf32>
    %c7_354 = arith.constant 7 : index
    %c0_355 = arith.constant 0 : index
    %c0_356 = arith.constant 0 : index
    %523 = vector.load %arg6[%c7_354, %c0_355, %c0_356] : memref<9x32x1xf32, #tpu.memory_space<vmem>>, vector<1x32x1xf32>
    %524 = vector.shape_cast %523 : vector<1x32x1xf32> to vector<32x1xf32>
    %525 = vector.broadcast %524 : vector<32x1xf32> to vector<32x32xf32>
    %526 = arith.mulf %522, %525 : vector<32x32xf32>
    %c7_357 = arith.constant 7 : index
    %c0_358 = arith.constant 0 : index
    %c0_359 = arith.constant 0 : index
    %527 = vector.load %arg13[%c7_357, %c0_358, %c0_359] : memref<9x32x32xf32, #tpu.memory_space<vmem>>, vector<1x32x32xf32>
    %528 = vector.shape_cast %527 : vector<1x32x32xf32> to vector<32x32xf32>
    %cst_360 = arith.constant dense<0.000000e+00> : vector<32x32xf32>
    %529 = tpu.matmul %526, %528, %cst_360 {dimension_numbers = #tpu.dot_dimension_numbers<[1], [0], [0], [1], [0, 0, 1, 1], [], []>} : vector<32x32xf32>, vector<32x32xf32>, vector<32x32xf32> -> vector<32x32xf32>
    %530 = arith.addf %521, %529 : vector<32x32xf32>
    %c27_i32_361 = arith.constant 27 : i32
    %531 = tpu.dynamic_rotate %464 by %c27_i32_361 dim 0 : vector<32x32xf32>, i32 -> vector<32x32xf32>
    %c8_362 = arith.constant 8 : index
    %c0_363 = arith.constant 0 : index
    %c0_364 = arith.constant 0 : index
    %532 = vector.load %arg6[%c8_362, %c0_363, %c0_364] : memref<9x32x1xf32, #tpu.memory_space<vmem>>, vector<1x32x1xf32>
    %533 = vector.shape_cast %532 : vector<1x32x1xf32> to vector<32x1xf32>
    %534 = vector.broadcast %533 : vector<32x1xf32> to vector<32x32xf32>
    %535 = arith.mulf %531, %534 : vector<32x32xf32>
    %c8_365 = arith.constant 8 : index
    %c0_366 = arith.constant 0 : index
    %c0_367 = arith.constant 0 : index
    %536 = vector.load %arg13[%c8_365, %c0_366, %c0_367] : memref<9x32x32xf32, #tpu.memory_space<vmem>>, vector<1x32x32xf32>
    %537 = vector.shape_cast %536 : vector<1x32x32xf32> to vector<32x32xf32>
    %cst_368 = arith.constant dense<0.000000e+00> : vector<32x32xf32>
    %538 = tpu.matmul %535, %537, %cst_368 {dimension_numbers = #tpu.dot_dimension_numbers<[1], [0], [0], [1], [0, 0, 1, 1], [], []>} : vector<32x32xf32>, vector<32x32xf32>, vector<32x32xf32> -> vector<32x32xf32>
    %539 = arith.addf %530, %538 : vector<32x32xf32>
    %c0_369 = arith.constant 0 : index
    %c0_370 = arith.constant 0 : index
    %540 = vector.load %arg14[%c0_369, %c0_370] : memref<2x32xf32, #tpu.memory_space<vmem>>, vector<2x32xf32>
    %541 = vector.extract_strided_slice %540 {offsets = [0, 0], sizes = [1, 32], strides = [1, 1]} : vector<2x32xf32> to vector<1x32xf32>
    %542 = vector.extract_strided_slice %540 {offsets = [1, 0], sizes = [1, 32], strides = [1, 1]} : vector<2x32xf32> to vector<1x32xf32>
    %cst_371 = arith.constant dense<0.000000e+00> : vector<32xf32>
    %543 = vector.multi_reduction <add>, %539, %cst_371 [0] : vector<32x32xf32> to vector<32xf32>
    %544 = vector.shape_cast %543 : vector<32xf32> to vector<1x32xf32>
    %545 = arith.mulf %539, %539 : vector<32x32xf32>
    %cst_372 = arith.constant dense<0.000000e+00> : vector<32xf32>
    %546 = vector.multi_reduction <add>, %545, %cst_372 [0] : vector<32x32xf32> to vector<32xf32>
    %547 = vector.shape_cast %546 : vector<32xf32> to vector<1x32xf32>
    %cst_373 = arith.constant 3.125000e-02 : f32
    %548 = vector.broadcast %cst_373 : f32 to vector<1x32xf32>
    %549 = arith.mulf %544, %548 : vector<1x32xf32>
    %cst_374 = arith.constant 3.125000e-02 : f32
    %550 = vector.broadcast %cst_374 : f32 to vector<1x32xf32>
    %551 = arith.mulf %547, %550 : vector<1x32xf32>
    %552 = arith.mulf %549, %549 : vector<1x32xf32>
    %553 = arith.subf %551, %552 : vector<1x32xf32>
    %cst_375 = arith.constant 0.000000e+00 : f32
    %554 = vector.broadcast %cst_375 : f32 to vector<1x32xf32>
    %555 = arith.maximumf %553, %554 : vector<1x32xf32>
    %556 = vector.broadcast %549 : vector<1x32xf32> to vector<32x32xf32>
    %557 = arith.subf %539, %556 : vector<32x32xf32>
    %cst_376 = arith.constant 9.99999974E-6 : f32
    %558 = vector.broadcast %cst_376 : f32 to vector<1x32xf32>
    %559 = arith.addf %555, %558 : vector<1x32xf32>
    %560 = math.rsqrt %559 : vector<1x32xf32>
    %561 = arith.mulf %541, %560 : vector<1x32xf32>
    %562 = vector.broadcast %561 : vector<1x32xf32> to vector<32x32xf32>
    %563 = arith.mulf %557, %562 : vector<32x32xf32>
    %564 = vector.broadcast %542 : vector<1x32xf32> to vector<32x32xf32>
    %565 = arith.addf %563, %564 : vector<32x32xf32>
    %566 = arith.addf %565, %358 : vector<32x32xf32>
    %cst_377 = arith.constant 0.000000e+00 : f32
    %567 = vector.broadcast %cst_377 : f32 to vector<32x32xf32>
    %568 = arith.cmpf oge, %566, %567 : vector<32x32xf32>
    %cst_378 = arith.constant 2.000000e-01 : f32
    %569 = vector.broadcast %cst_378 : f32 to vector<32x32xf32>
    %570 = arith.mulf %569, %566 : vector<32x32xf32>
    %571 = arith.select %568, %566, %570 : vector<32x32xi1>, vector<32x32xf32>
    %c0_379 = arith.constant 0 : index
    %c0_380 = arith.constant 0 : index
    %572 = vector.load %arg15[%c0_379, %c0_380] : memref<32x40xf32, #tpu.memory_space<vmem>>, vector<32x40xf32>
    %cst_381 = arith.constant dense<0.000000e+00> : vector<32x40xf32>
    %573 = tpu.matmul %571, %572, %cst_381 {dimension_numbers = #tpu.dot_dimension_numbers<[1], [0], [0], [1], [0, 0, 1, 1], [], []>} : vector<32x32xf32>, vector<32x40xf32>, vector<32x40xf32> -> vector<32x40xf32>
    %c0_382 = arith.constant 0 : index
    %c0_383 = arith.constant 0 : index
    %574 = vector.load %arg16[%c0_382, %c0_383] : memref<1x40xf32, #tpu.memory_space<vmem>>, vector<1x40xf32>
    %575 = vector.broadcast %574 : vector<1x40xf32> to vector<32x40xf32>
    %576 = arith.addf %573, %575 : vector<32x40xf32>
    %577 = vector.extract_strided_slice %576 {offsets = [0, 0], sizes = [32, 4], strides = [1, 1]} : vector<32x40xf32> to vector<32x4xf32>
    %578 = vector.extract_strided_slice %576 {offsets = [0, 4], sizes = [32, 4], strides = [1, 1]} : vector<32x40xf32> to vector<32x4xf32>
    %579 = vector.extract_strided_slice %576 {offsets = [0, 8], sizes = [32, 32], strides = [1, 1]} : vector<32x40xf32> to vector<32x32xf32>
    %cst_384 = arith.constant dense<0.000000e+00> : vector<32x32xf32>
    %580 = tpu.matmul %577, %578, %cst_384 {dimension_numbers = #tpu.dot_dimension_numbers<[1], [1], [0], [0], [0, 0, 1, 0], [], []>} : vector<32x4xf32>, vector<32x4xf32>, vector<32x32xf32> -> vector<32x32xf32>
    %c0_385 = arith.constant 0 : index
    %c0_386 = arith.constant 0 : index
    %581 = vector.load %arg18[%c0_385, %c0_386] : memref<32x32xf32, #tpu.memory_space<vmem>>, vector<32x32xf32>
    %582 = arith.addf %580, %581 : vector<32x32xf32>
    %cst_387 = arith.constant dense<0xFF800000> : vector<32xf32>
    %583 = vector.multi_reduction <maximumf>, %582, %cst_387 [1] : vector<32x32xf32> to vector<32xf32>
    %584 = vector.shape_cast %583 : vector<32xf32> to vector<32x1xf32>
    %585 = vector.broadcast %584 : vector<32x1xf32> to vector<32x32xf32>
    %586 = arith.subf %582, %585 : vector<32x32xf32>
    %587 = math.exp %586 : vector<32x32xf32>
    %cst_388 = arith.constant dense<0.000000e+00> : vector<32xf32>
    %588 = vector.multi_reduction <add>, %587, %cst_388 [1] : vector<32x32xf32> to vector<32xf32>
    %589 = vector.shape_cast %588 : vector<32xf32> to vector<32x1xf32>
    %590 = tpu.reciprocal %589 {approx = true} : vector<32x1xf32> -> vector<32x1xf32>
    %591 = vector.broadcast %590 : vector<32x1xf32> to vector<32x32xf32>
    %592 = arith.mulf %587, %591 : vector<32x32xf32>
    %c0_389 = arith.constant 0 : index
    %c0_390 = arith.constant 0 : index
    %593 = vector.load %arg17[%c0_389, %c0_390] : memref<1x1xf32, #tpu.memory_space<vmem>>, vector<1x1xf32>
    %cst_391 = arith.constant dense<0.000000e+00> : vector<32x32xf32>
    %594 = tpu.matmul %592, %579, %cst_391 {dimension_numbers = #tpu.dot_dimension_numbers<[1], [0], [0], [1], [0, 0, 1, 1], [], []>} : vector<32x32xf32>, vector<32x32xf32>, vector<32x32xf32> -> vector<32x32xf32>
    %595 = vector.broadcast %593 : vector<1x1xf32> to vector<32x32xf32>
    %596 = arith.mulf %595, %594 : vector<32x32xf32>
    %597 = arith.addf %596, %571 : vector<32x32xf32>
    %c5_i32_392 = arith.constant 5 : i32
    %598 = tpu.dynamic_rotate %597 by %c5_i32_392 dim 0 : vector<32x32xf32>, i32 -> vector<32x32xf32>
    %c0_393 = arith.constant 0 : index
    %c0_394 = arith.constant 0 : index
    %c0_395 = arith.constant 0 : index
    %599 = vector.load %arg6[%c0_393, %c0_394, %c0_395] : memref<9x32x1xf32, #tpu.memory_space<vmem>>, vector<1x32x1xf32>
    %600 = vector.shape_cast %599 : vector<1x32x1xf32> to vector<32x1xf32>
    %601 = vector.broadcast %600 : vector<32x1xf32> to vector<32x32xf32>
    %602 = arith.mulf %598, %601 : vector<32x32xf32>
    %c0_396 = arith.constant 0 : index
    %c0_397 = arith.constant 0 : index
    %c0_398 = arith.constant 0 : index
    %603 = vector.load %arg19[%c0_396, %c0_397, %c0_398] : memref<9x32x16xf32, #tpu.memory_space<vmem>>, vector<1x32x16xf32>
    %604 = vector.shape_cast %603 : vector<1x32x16xf32> to vector<32x16xf32>
    %cst_399 = arith.constant dense<0.000000e+00> : vector<32x16xf32>
    %605 = tpu.matmul %602, %604, %cst_399 {dimension_numbers = #tpu.dot_dimension_numbers<[1], [0], [0], [1], [0, 0, 1, 1], [], []>} : vector<32x32xf32>, vector<32x16xf32>, vector<32x16xf32> -> vector<32x16xf32>
    %c4_i32_400 = arith.constant 4 : i32
    %606 = tpu.dynamic_rotate %597 by %c4_i32_400 dim 0 : vector<32x32xf32>, i32 -> vector<32x32xf32>
    %c1_401 = arith.constant 1 : index
    %c0_402 = arith.constant 0 : index
    %c0_403 = arith.constant 0 : index
    %607 = vector.load %arg6[%c1_401, %c0_402, %c0_403] : memref<9x32x1xf32, #tpu.memory_space<vmem>>, vector<1x32x1xf32>
    %608 = vector.shape_cast %607 : vector<1x32x1xf32> to vector<32x1xf32>
    %609 = vector.broadcast %608 : vector<32x1xf32> to vector<32x32xf32>
    %610 = arith.mulf %606, %609 : vector<32x32xf32>
    %c1_404 = arith.constant 1 : index
    %c0_405 = arith.constant 0 : index
    %c0_406 = arith.constant 0 : index
    %611 = vector.load %arg19[%c1_404, %c0_405, %c0_406] : memref<9x32x16xf32, #tpu.memory_space<vmem>>, vector<1x32x16xf32>
    %612 = vector.shape_cast %611 : vector<1x32x16xf32> to vector<32x16xf32>
    %cst_407 = arith.constant dense<0.000000e+00> : vector<32x16xf32>
    %613 = tpu.matmul %610, %612, %cst_407 {dimension_numbers = #tpu.dot_dimension_numbers<[1], [0], [0], [1], [0, 0, 1, 1], [], []>} : vector<32x32xf32>, vector<32x16xf32>, vector<32x16xf32> -> vector<32x16xf32>
    %614 = arith.addf %605, %613 : vector<32x16xf32>
    %c3_i32_408 = arith.constant 3 : i32
    %615 = tpu.dynamic_rotate %597 by %c3_i32_408 dim 0 : vector<32x32xf32>, i32 -> vector<32x32xf32>
    %c2_409 = arith.constant 2 : index
    %c0_410 = arith.constant 0 : index
    %c0_411 = arith.constant 0 : index
    %616 = vector.load %arg6[%c2_409, %c0_410, %c0_411] : memref<9x32x1xf32, #tpu.memory_space<vmem>>, vector<1x32x1xf32>
    %617 = vector.shape_cast %616 : vector<1x32x1xf32> to vector<32x1xf32>
    %618 = vector.broadcast %617 : vector<32x1xf32> to vector<32x32xf32>
    %619 = arith.mulf %615, %618 : vector<32x32xf32>
    %c2_412 = arith.constant 2 : index
    %c0_413 = arith.constant 0 : index
    %c0_414 = arith.constant 0 : index
    %620 = vector.load %arg19[%c2_412, %c0_413, %c0_414] : memref<9x32x16xf32, #tpu.memory_space<vmem>>, vector<1x32x16xf32>
    %621 = vector.shape_cast %620 : vector<1x32x16xf32> to vector<32x16xf32>
    %cst_415 = arith.constant dense<0.000000e+00> : vector<32x16xf32>
    %622 = tpu.matmul %619, %621, %cst_415 {dimension_numbers = #tpu.dot_dimension_numbers<[1], [0], [0], [1], [0, 0, 1, 1], [], []>} : vector<32x32xf32>, vector<32x16xf32>, vector<32x16xf32> -> vector<32x16xf32>
    %623 = arith.addf %614, %622 : vector<32x16xf32>
    %c1_i32_416 = arith.constant 1 : i32
    %624 = tpu.dynamic_rotate %597 by %c1_i32_416 dim 0 : vector<32x32xf32>, i32 -> vector<32x32xf32>
    %c3_417 = arith.constant 3 : index
    %c0_418 = arith.constant 0 : index
    %c0_419 = arith.constant 0 : index
    %625 = vector.load %arg6[%c3_417, %c0_418, %c0_419] : memref<9x32x1xf32, #tpu.memory_space<vmem>>, vector<1x32x1xf32>
    %626 = vector.shape_cast %625 : vector<1x32x1xf32> to vector<32x1xf32>
    %627 = vector.broadcast %626 : vector<32x1xf32> to vector<32x32xf32>
    %628 = arith.mulf %624, %627 : vector<32x32xf32>
    %c3_420 = arith.constant 3 : index
    %c0_421 = arith.constant 0 : index
    %c0_422 = arith.constant 0 : index
    %629 = vector.load %arg19[%c3_420, %c0_421, %c0_422] : memref<9x32x16xf32, #tpu.memory_space<vmem>>, vector<1x32x16xf32>
    %630 = vector.shape_cast %629 : vector<1x32x16xf32> to vector<32x16xf32>
    %cst_423 = arith.constant dense<0.000000e+00> : vector<32x16xf32>
    %631 = tpu.matmul %628, %630, %cst_423 {dimension_numbers = #tpu.dot_dimension_numbers<[1], [0], [0], [1], [0, 0, 1, 1], [], []>} : vector<32x32xf32>, vector<32x16xf32>, vector<32x16xf32> -> vector<32x16xf32>
    %632 = arith.addf %623, %631 : vector<32x16xf32>
    %c4_424 = arith.constant 4 : index
    %c0_425 = arith.constant 0 : index
    %c0_426 = arith.constant 0 : index
    %633 = vector.load %arg19[%c4_424, %c0_425, %c0_426] : memref<9x32x16xf32, #tpu.memory_space<vmem>>, vector<1x32x16xf32>
    %634 = vector.shape_cast %633 : vector<1x32x16xf32> to vector<32x16xf32>
    %cst_427 = arith.constant dense<0.000000e+00> : vector<32x16xf32>
    %635 = tpu.matmul %597, %634, %cst_427 {dimension_numbers = #tpu.dot_dimension_numbers<[1], [0], [0], [1], [0, 0, 1, 1], [], []>} : vector<32x32xf32>, vector<32x16xf32>, vector<32x16xf32> -> vector<32x16xf32>
    %636 = arith.addf %632, %635 : vector<32x16xf32>
    %c31_i32_428 = arith.constant 31 : i32
    %637 = tpu.dynamic_rotate %597 by %c31_i32_428 dim 0 : vector<32x32xf32>, i32 -> vector<32x32xf32>
    %c5_429 = arith.constant 5 : index
    %c0_430 = arith.constant 0 : index
    %c0_431 = arith.constant 0 : index
    %638 = vector.load %arg6[%c5_429, %c0_430, %c0_431] : memref<9x32x1xf32, #tpu.memory_space<vmem>>, vector<1x32x1xf32>
    %639 = vector.shape_cast %638 : vector<1x32x1xf32> to vector<32x1xf32>
    %640 = vector.broadcast %639 : vector<32x1xf32> to vector<32x32xf32>
    %641 = arith.mulf %637, %640 : vector<32x32xf32>
    %c5_432 = arith.constant 5 : index
    %c0_433 = arith.constant 0 : index
    %c0_434 = arith.constant 0 : index
    %642 = vector.load %arg19[%c5_432, %c0_433, %c0_434] : memref<9x32x16xf32, #tpu.memory_space<vmem>>, vector<1x32x16xf32>
    %643 = vector.shape_cast %642 : vector<1x32x16xf32> to vector<32x16xf32>
    %cst_435 = arith.constant dense<0.000000e+00> : vector<32x16xf32>
    %644 = tpu.matmul %641, %643, %cst_435 {dimension_numbers = #tpu.dot_dimension_numbers<[1], [0], [0], [1], [0, 0, 1, 1], [], []>} : vector<32x32xf32>, vector<32x16xf32>, vector<32x16xf32> -> vector<32x16xf32>
    %645 = arith.addf %636, %644 : vector<32x16xf32>
    %c29_i32_436 = arith.constant 29 : i32
    %646 = tpu.dynamic_rotate %597 by %c29_i32_436 dim 0 : vector<32x32xf32>, i32 -> vector<32x32xf32>
    %c6_437 = arith.constant 6 : index
    %c0_438 = arith.constant 0 : index
    %c0_439 = arith.constant 0 : index
    %647 = vector.load %arg6[%c6_437, %c0_438, %c0_439] : memref<9x32x1xf32, #tpu.memory_space<vmem>>, vector<1x32x1xf32>
    %648 = vector.shape_cast %647 : vector<1x32x1xf32> to vector<32x1xf32>
    %649 = vector.broadcast %648 : vector<32x1xf32> to vector<32x32xf32>
    %650 = arith.mulf %646, %649 : vector<32x32xf32>
    %c6_440 = arith.constant 6 : index
    %c0_441 = arith.constant 0 : index
    %c0_442 = arith.constant 0 : index
    %651 = vector.load %arg19[%c6_440, %c0_441, %c0_442] : memref<9x32x16xf32, #tpu.memory_space<vmem>>, vector<1x32x16xf32>
    %652 = vector.shape_cast %651 : vector<1x32x16xf32> to vector<32x16xf32>
    %cst_443 = arith.constant dense<0.000000e+00> : vector<32x16xf32>
    %653 = tpu.matmul %650, %652, %cst_443 {dimension_numbers = #tpu.dot_dimension_numbers<[1], [0], [0], [1], [0, 0, 1, 1], [], []>} : vector<32x32xf32>, vector<32x16xf32>, vector<32x16xf32> -> vector<32x16xf32>
    %654 = arith.addf %645, %653 : vector<32x16xf32>
    %c28_i32_444 = arith.constant 28 : i32
    %655 = tpu.dynamic_rotate %597 by %c28_i32_444 dim 0 : vector<32x32xf32>, i32 -> vector<32x32xf32>
    %c7_445 = arith.constant 7 : index
    %c0_446 = arith.constant 0 : index
    %c0_447 = arith.constant 0 : index
    %656 = vector.load %arg6[%c7_445, %c0_446, %c0_447] : memref<9x32x1xf32, #tpu.memory_space<vmem>>, vector<1x32x1xf32>
    %657 = vector.shape_cast %656 : vector<1x32x1xf32> to vector<32x1xf32>
    %658 = vector.broadcast %657 : vector<32x1xf32> to vector<32x32xf32>
    %659 = arith.mulf %655, %658 : vector<32x32xf32>
    %c7_448 = arith.constant 7 : index
    %c0_449 = arith.constant 0 : index
    %c0_450 = arith.constant 0 : index
    %660 = vector.load %arg19[%c7_448, %c0_449, %c0_450] : memref<9x32x16xf32, #tpu.memory_space<vmem>>, vector<1x32x16xf32>
    %661 = vector.shape_cast %660 : vector<1x32x16xf32> to vector<32x16xf32>
    %cst_451 = arith.constant dense<0.000000e+00> : vector<32x16xf32>
    %662 = tpu.matmul %659, %661, %cst_451 {dimension_numbers = #tpu.dot_dimension_numbers<[1], [0], [0], [1], [0, 0, 1, 1], [], []>} : vector<32x32xf32>, vector<32x16xf32>, vector<32x16xf32> -> vector<32x16xf32>
    %663 = arith.addf %654, %662 : vector<32x16xf32>
    %c27_i32_452 = arith.constant 27 : i32
    %664 = tpu.dynamic_rotate %597 by %c27_i32_452 dim 0 : vector<32x32xf32>, i32 -> vector<32x32xf32>
    %c8_453 = arith.constant 8 : index
    %c0_454 = arith.constant 0 : index
    %c0_455 = arith.constant 0 : index
    %665 = vector.load %arg6[%c8_453, %c0_454, %c0_455] : memref<9x32x1xf32, #tpu.memory_space<vmem>>, vector<1x32x1xf32>
    %666 = vector.shape_cast %665 : vector<1x32x1xf32> to vector<32x1xf32>
    %667 = vector.broadcast %666 : vector<32x1xf32> to vector<32x32xf32>
    %668 = arith.mulf %664, %667 : vector<32x32xf32>
    %c8_456 = arith.constant 8 : index
    %c0_457 = arith.constant 0 : index
    %c0_458 = arith.constant 0 : index
    %669 = vector.load %arg19[%c8_456, %c0_457, %c0_458] : memref<9x32x16xf32, #tpu.memory_space<vmem>>, vector<1x32x16xf32>
    %670 = vector.shape_cast %669 : vector<1x32x16xf32> to vector<32x16xf32>
    %cst_459 = arith.constant dense<0.000000e+00> : vector<32x16xf32>
    %671 = tpu.matmul %668, %670, %cst_459 {dimension_numbers = #tpu.dot_dimension_numbers<[1], [0], [0], [1], [0, 0, 1, 1], [], []>} : vector<32x32xf32>, vector<32x16xf32>, vector<32x16xf32> -> vector<32x16xf32>
    %672 = arith.addf %663, %671 : vector<32x16xf32>
    %c0_460 = arith.constant 0 : index
    %c0_461 = arith.constant 0 : index
    %673 = vector.load %arg20[%c0_460, %c0_461] : memref<2x16xf32, #tpu.memory_space<vmem>>, vector<2x16xf32>
    %674 = vector.extract_strided_slice %673 {offsets = [0, 0], sizes = [1, 16], strides = [1, 1]} : vector<2x16xf32> to vector<1x16xf32>
    %675 = vector.extract_strided_slice %673 {offsets = [1, 0], sizes = [1, 16], strides = [1, 1]} : vector<2x16xf32> to vector<1x16xf32>
    %cst_462 = arith.constant dense<0.000000e+00> : vector<16xf32>
    %676 = vector.multi_reduction <add>, %672, %cst_462 [0] : vector<32x16xf32> to vector<16xf32>
    %677 = vector.shape_cast %676 : vector<16xf32> to vector<1x16xf32>
    %678 = arith.mulf %672, %672 : vector<32x16xf32>
    %cst_463 = arith.constant dense<0.000000e+00> : vector<16xf32>
    %679 = vector.multi_reduction <add>, %678, %cst_463 [0] : vector<32x16xf32> to vector<16xf32>
    %680 = vector.shape_cast %679 : vector<16xf32> to vector<1x16xf32>
    %cst_464 = arith.constant 3.125000e-02 : f32
    %681 = vector.broadcast %cst_464 : f32 to vector<1x16xf32>
    %682 = arith.mulf %677, %681 : vector<1x16xf32>
    %cst_465 = arith.constant 3.125000e-02 : f32
    %683 = vector.broadcast %cst_465 : f32 to vector<1x16xf32>
    %684 = arith.mulf %680, %683 : vector<1x16xf32>
    %685 = arith.mulf %682, %682 : vector<1x16xf32>
    %686 = arith.subf %684, %685 : vector<1x16xf32>
    %cst_466 = arith.constant 0.000000e+00 : f32
    %687 = vector.broadcast %cst_466 : f32 to vector<1x16xf32>
    %688 = arith.maximumf %686, %687 : vector<1x16xf32>
    %689 = vector.broadcast %682 : vector<1x16xf32> to vector<32x16xf32>
    %690 = arith.subf %672, %689 : vector<32x16xf32>
    %cst_467 = arith.constant 9.99999974E-6 : f32
    %691 = vector.broadcast %cst_467 : f32 to vector<1x16xf32>
    %692 = arith.addf %688, %691 : vector<1x16xf32>
    %693 = math.rsqrt %692 : vector<1x16xf32>
    %694 = arith.mulf %674, %693 : vector<1x16xf32>
    %695 = vector.broadcast %694 : vector<1x16xf32> to vector<32x16xf32>
    %696 = arith.mulf %690, %695 : vector<32x16xf32>
    %697 = vector.broadcast %675 : vector<1x16xf32> to vector<32x16xf32>
    %698 = arith.addf %696, %697 : vector<32x16xf32>
    %c0_468 = arith.constant 0 : index
    %c0_469 = arith.constant 0 : index
    %699 = vector.load %arg21[%c0_468, %c0_469] : memref<32x16xf32, #tpu.memory_space<vmem>>, vector<32x16xf32>
    tpu.vector_store %arg21[%c0_468, %c0_469], %698 {strides = array<i32>} : memref<32x16xf32, #tpu.memory_space<vmem>>, vector<32x16xf32>,
    return
  }
}

</mosaic_0001>

<bundles_post_ra>
// kernel: mul.6
= control target key start
LH: loop header
LB: loop body
LE: loop exit
PB: predicated region body
PF: predicated region fallthrough
CT: control target
= control target key end

     0   :  { %s56_s0 = inlined_call_operand.vmem [shape: f32[2048], index: 0, kind: input, shape index: {}]   ;;  %s57_s1 = inlined_call_operand.vmem [shape: f32[2048], index: 1, kind: input, shape index: {}]   ;;  %s58_s2 = inlined_call_operand.vmem [shape: f32[2048], index: 2, kind: output, shape index: {}]  }
   0x1   :  { %v3_v0 = vld [vmem:[%s56_s0] sm:$0xff]  ;;  %v20_v2 = vld [vmem:[%s56_s0 + $0x8] sm:$0xff] }
   0x2   :  { %v4_v1 = vld [vmem:[%s57_s1] sm:$0xff]  ;;  %v21_v4 = vld [vmem:[%s57_s1 + $0x8] sm:$0xff] }
   0x3   :  { %v7_v3 = vmul.f32 %v4_v1, %v3_v0  ;;  %v16_v5 = vmul.f32 %v21_v4, %v20_v2 }
   0x5   :  { %9 = vst [vmem:[%s58_s2] sm:$0xff] %v7_v3  ;;  %22 = vst [vmem:[%s58_s2 + $0x8] sm:$0xff] %v16_v5 }

// kernel: _lambda_.1
= control target key start
LH: loop header
LB: loop body
LE: loop exit
PB: predicated region body
PF: predicated region fallthrough
CT: control target
= control target key end

     0   :  { %s13483_s0 = inlined_call_operand.vmem [shape: f32[128,16], index: 0, kind: input, shape index: {}]   ;;  %s13484_s1 = inlined_call_operand.vmem [shape: f32[16,16], index: 1, kind: input, shape index: {}]   ;;  %s13485_s2 = inlined_call_operand.vmem [shape: f32[2,16], index: 2, kind: input, shape index: {}]   ;;  %s13486_s3 = inlined_call_operand.vmem [shape: f32[512,128], index: 3, kind: input, shape index: {}]   ;;  %s13487_s4 = inlined_call_operand.vmem [shape: f32[16,16,32], index: 4, kind: input, shape index: {}]   ;;  %s13488_s5 = inlined_call_operand.vmem [shape: f32[2,32], index: 5, kind: input, shape index: {}]   ;;  %s13489_s6 = inlined_call_operand.vmem [shape: f32[9,32,1], index: 6, kind: input, shape index: {}]   ;;  %s13490_s7 = inlined_call_operand.vmem [shape: f32[9,32,32], index: 7, kind: input, shape index: {}]   ;;  %s13491_s8 = inlined_call_operand.vmem [shape: f32[2,32], index: 8, kind: input, shape index: {}]   ;;  %s13492_s9 = inlined_call_operand.vmem [shape: f32[9,32,32], index: 9, kind: input, shape index: {}]   ;;  %s13493_s10 = inlined_call_operand.vmem [shape: f32[2,32], index: 10, kind: input, shape index: {}]   ;;  %s13494_s11 = inlined_call_operand.vmem [shape: f32[9,32,32], index: 11, kind: input, shape index: {}]   ;;  %s13495_s12 = inlined_call_operand.vmem [shape: f32[2,32], index: 12, kind: input, shape index: {}]   ;;  %s13496_s13 = inlined_call_operand.vmem [shape: f32[9,32,32], index: 13, kind: input, shape index: {}]   ;;  %s13497_s14 = inlined_call_operand.vmem [shape: f32[2,32], index: 14, kind: input, shape index: {}]   ;;  %s13498_s15 = inlined_call_operand.vmem [shape: f32[32,40], index: 15, kind: input, shape index: {}]   ;;  %s13499_s16 = inlined_call_operand.vmem [shape: f32[1,40], index: 16, kind: input, shape index: {}]   ;;  %s13500_s17 = inlined_call_operand.<no memory space> [shape: f32[1,1], index: 17, kind: input, shape index: {}]   ;;  %s13501_s18 = inlined_call_operand.vmem [shape: f32[32,32], index: 18, kind: input, shape index: {}]   ;;  %s13502_s19 = inlined_call_operand.vmem [shape: f32[9,32,16], index: 19, kind: input, shape index: {}]   ;;  %s13503_s20 = inlined_call_operand.vmem [shape: f32[2,16], index: 20, kind: input, shape index: {}]   ;;  %s13504_s21 = inlined_call_operand.hbm [shape: f32[32,16], index: 21, kind: output, shape index: {}]  }
   0x1   :  { %13541 = sst [smem:[#allocation22_spill]] %s13483_s0  ;;  %v26_v0 = vstv %s13500_s17 }
   0x2   :  { %13542 = sst [smem:[#allocation23_spill]] %s13484_s1  ;;  %27 = vst [vmem:[#allocation2] sm:$0x1] %v26_v0 }
   0x3   :  { %13543 = sst [smem:[#allocation24_spill]] %s13485_s2 }
   0x4   :  { %13544 = sst [smem:[#allocation25_spill]] %s13486_s3 }
   0x5   :  { %13545 = sst [smem:[#allocation26_spill]] %s13487_s4 }
   0x6   :  { %13546 = sst [smem:[#allocation27_spill]] %s13488_s5 }
   0x7   :  { %s13547_s3 = sld [smem:[#allocation23_spill]]  ;;  %vm89_vm0 = vcmask 130048  }
   0x8   :  { %s13548_s30 = sld [smem:[#allocation22_spill]] }
   0xd   :  { %v88_v1 = vld [vmem:[%s13547_s3 + $0x8] sm:$0xff]  ;;  %v87_v2 = vld [vmem:[%s13547_s3] sm:$0xff] }
   0xe   :  { %v71_v3 = vld [vmem:[%s13548_s30] sm:$0xff]  ;;  %9795 = vmatprep.subr.mxu0 %v88_v1  ;;  %v72_v4 = vld [vmem:[%s13548_s30 + $0x8] sm:$0xff]  ;;  %v73_v5 = vld [vmem:[%s13548_s30 + $0x10] sm:$0xff] }
   0xf   :  { %9799 = vmatprep.mubr.msk.f32.mxu0 %vm89_vm0, %v71_v3  ;;  %9796 = vmatpush3.msra.mxu0 %v88_v1  ;;  %v74_v6 = vld [vmem:[%s13548_s30 + $0x18] sm:$0xff] }
  0x10   :  { %9797 = vmatprep.subr.mxu0 %v87_v2 }
  0x11   :  { %9798 = vmatpush3.msra.mxu0 %v87_v2 }
  0x12   :  { %9800 = vmatmul.mubr.msk.f32.vlgmr.msra.gmra.mxu0 %vm89_vm0, %v72_v4 }
  0x13   :  { %9802 = vmatprep.mubr.msk.f32.mxu0 %vm89_vm0, %v73_v5 }
  0x14   :  { %28 = vsyncpa [#allocation4], 0  ;;  %v75_v7 = vld [vmem:[%s13548_s30 + $0x20] sm:$0xff]  ;;  %v76_v8 = vld [vmem:[%s13548_s30 + $0x28] sm:$0xff]  ;;  %s13549_s22 = sld [smem:[#allocation25_spill]]  ;;  %s10844_s23 = smov 124  }
  0x15   :  { %v77_v9 = vld [vmem:[%s13548_s30 + $0x30] sm:$0xff]  ;;  %v78_v10 = vld [vmem:[%s13548_s30 + $0x38] sm:$0xff]  ;;  %v79_v11 = vld [vmem:[%s13548_s30 + $0x40] sm:$0xff]  ;;  %s13550_s1 = sld [smem:[#allocation24_spill]] }
  0x16   :  { %9803 = vmatmul.mubr.msk.f32.gmra.mxu0 %vm89_vm0, %v74_v6  ;;  %v80_v12 = vld [vmem:[%s13548_s30 + $0x48] sm:$0xff]  ;;  %v81_v13 = vld [vmem:[%s13548_s30 + $0x50] sm:$0xff]  ;;  %v82_v14 = vld [vmem:[%s13548_s30 + $0x58] sm:$0xff]  ;;  %s13551_s25 = sld [smem:[#allocation26_spill]] }
  0x17   :  { %9805 = vmatprep.mubr.msk.f32.mxu0 %vm89_vm0, %v75_v7  ;;  %v83_v15 = vld [vmem:[%s13548_s30 + $0x60] sm:$0xff]  ;;  %v84_v16 = vld [vmem:[%s13548_s30 + $0x68] sm:$0xff]  ;;  %v85_v17 = vld [vmem:[%s13548_s30 + $0x70] sm:$0xff]  ;;  %s13552_s17 = sld [smem:[#allocation27_spill]] }
  0x18   :  { %v86_v18 = vld [vmem:[%s13548_s30 + $0x78] sm:$0xff] }
  0x1a   :  { %9806 = vmatmul.mubr.msk.f32.gmra.mxu0 %vm89_vm0, %v76_v8  ;;  %v486_v19 = vld [vmem:[%s13549_s22] sm:$0xff] }
  0x1b   :  { %9808 = vmatprep.mubr.msk.f32.mxu0 %vm89_vm0, %v77_v9  ;;  %9855 = vmatprep.mubr.f32.mxu1 %v486_v19 }
  0x1e   :  { %9809 = vmatmul.mubr.msk.f32.gmra.mxu0 %vm89_vm0, %v78_v10 }
  0x1f   :  { %9811 = vmatprep.mubr.msk.f32.mxu0 %vm89_vm0, %v79_v11 }
  0x22   :  { %9812 = vmatmul.mubr.msk.f32.gmra.mxu0 %vm89_vm0, %v80_v12 }
  0x23   :  { %9814 = vmatprep.mubr.msk.f32.mxu0 %vm89_vm0, %v81_v13 }
  0x26   :  { %9815 = vmatmul.mubr.msk.f32.gmra.mxu0 %vm89_vm0, %v82_v14 }
  0x27   :  { %9817 = vmatprep.mubr.msk.f32.mxu0 %vm89_vm0, %v83_v15 }
  0x2a   :  { %9818 = vmatmul.mubr.msk.f32.gmra.mxu0 %vm89_vm0, %v84_v16 }
  0x2b   :  { %9820 = vmatprep.mubr.msk.f32.mxu0 %vm89_vm0, %v85_v17 }
  0x2e   :  { %9821 = vmatmul.mubr.msk.f32.gmra.mxu0 %vm89_vm0, %v86_v18 }
  0xd2   :  { %v11035_v20 = vpop.f32.mrf.mxu0 }
  0xd3   :  { %v322_v22 = vmul.f32 %v11035_v20, %v11035_v20  ;;  %v285_v26 = vsel %vm89_vm0, %v11035_v20, 0.0 }
  0xd4   :  { %v11037_v21 = vpop.f32.mrf.mxu0 }
  0xd5   :  { %v284_v23 = vsel %vm89_vm0, %v11037_v21, 0.0  ;;  %v321_v24 = vmul.f32 %v11037_v21, %v11037_v21  ;;  %v338_v30 = vsel %vm89_vm0, %v322_v22, 0.0 }
  0xd6   :  { %v11045_v25 = vpop.f32.mrf.mxu0  ;;  %v286_v28 = vadd.f32 %v285_v26, %v284_v23 }
  0xd7   :  { %v337_v27 = vsel %vm89_vm0, %v321_v24, 0.0  ;;  %v324_v31 = vmul.f32 %v11045_v25, %v11045_v25  ;;  %v289_v37 = vsel %vm89_vm0, %v11045_v25, 0.0 }
  0xd8   :  { %v11050_v29 = vpop.f32.mrf.mxu0  ;;  %v339_v34 = vadd.f32 %v338_v30, %v337_v27 }
  0xd9   :  { %v287_v32 = vsel %vm89_vm0, %v11050_v29, 0.0  ;;  %v323_v33 = vmul.f32 %v11050_v29, %v11050_v29  ;;  %v342_v42 = vsel %vm89_vm0, %v324_v31, 0.0 }
  0xda   :  { %v288_v35 = vadd.f32 %v287_v32, %v286_v28  ;;  %v11059_v36 = vpop.f32.mrf.mxu0 }
  0xdb   :  { %v340_v38 = vsel %vm89_vm0, %v323_v33, 0.0  ;;  %v326_v43 = vmul.f32 %v11059_v36, %v11059_v36  ;;  %v293_v49 = vsel %vm89_vm0, %v11059_v36, 0.0 }
  0xdc   :  { %v341_v39 = vadd.f32 %v340_v38, %v339_v34  ;;  %v11064_v40 = vpop.f32.mrf.mxu0  ;;  %v290_v41 = vadd.f32 %v289_v37, %v288_v35 }
  0xdd   :  { %v291_v44 = vsel %vm89_vm0, %v11064_v40, 0.0  ;;  %v325_v45 = vmul.f32 %v11064_v40, %v11064_v40  ;;  %v346_v54 = vsel %vm89_vm0, %v326_v43, 0.0 }
  0xde   :  { %v292_v46 = vadd.f32 %v291_v44, %v290_v41  ;;  %v343_v47 = vadd.f32 %v342_v42, %v341_v39  ;;  %v11073_v48 = vpop.f32.mrf.mxu0 }
  0xdf   :  { %v344_v50 = vsel %vm89_vm0, %v325_v45, 0.0  ;;  %v328_v55 = vmul.f32 %v11073_v48, %v11073_v48  ;;  %v297_v61 = vsel %vm89_vm0, %v11073_v48, 0.0 }
  0xe0   :  { %v345_v51 = vadd.f32 %v344_v50, %v343_v47  ;;  %v11078_v52 = vpop.f32.mrf.mxu0  ;;  %v294_v53 = vadd.f32 %v293_v49, %v292_v46 }
  0xe1   :  { %v295_v56 = vsel %vm89_vm0, %v11078_v52, 0.0  ;;  %v327_v57 = vmul.f32 %v11078_v52, %v11078_v52  ;;  %v350_v2 = vsel %vm89_vm0, %v328_v55, 0.0 }
  0xe2   :  { %v296_v58 = vadd.f32 %v295_v56, %v294_v53  ;;  %v347_v59 = vadd.f32 %v346_v54, %v345_v51  ;;  %v11087_v60 = vpop.f32.mrf.mxu0 }
  0xe3   :  { %v348_v62 = vsel %vm89_vm0, %v327_v57, 0.0  ;;  %v330_v3 = vmul.f32 %v11087_v60, %v11087_v60  ;;  %v301_v9 = vsel %vm89_vm0, %v11087_v60, 0.0 }
  0xe4   :  { %v349_v63 = vadd.f32 %v348_v62, %v347_v59  ;;  %v11092_v0 = vpop.f32.mrf.mxu0  ;;  %v298_v1 = vadd.f32 %v297_v61, %v296_v58 }
  0xe5   :  { %v299_v4 = vsel %vm89_vm0, %v11092_v0, 0.0  ;;  %v329_v5 = vmul.f32 %v11092_v0, %v11092_v0  ;;  %v354_v14 = vsel %vm89_vm0, %v330_v3, 0.0 }
  0xe6   :  { %v300_v6 = vadd.f32 %v299_v4, %v298_v1  ;;  %v351_v7 = vadd.f32 %v350_v2, %v349_v63  ;;  %v11101_v8 = vpop.f32.mrf.mxu0 }
  0xe7   :  { %v352_v10 = vsel %vm89_vm0, %v329_v5, 0.0  ;;  %v332_v15 = vmul.f32 %v11101_v8, %v11101_v8  ;;  %v305_v23 = vsel %vm89_vm0, %v11101_v8, 0.0 }
  0xe8   :  { %v353_v11 = vadd.f32 %v352_v10, %v351_v7  ;;  %v11106_v12 = vpop.f32.mrf.mxu0  ;;  %v302_v13 = vadd.f32 %v301_v9, %v300_v6 }
  0xe9   :  { %v303_v16 = vsel %vm89_vm0, %v11106_v12, 0.0  ;;  %v331_v17 = vmul.f32 %v11106_v12, %v11106_v12  ;;  %v358_v30 = vsel %vm89_vm0, %v332_v15, 0.0 }
  0xea   :  { %v304_v18 = vadd.f32 %v303_v16, %v302_v13  ;;  %v355_v19 = vadd.f32 %v354_v14, %v353_v11  ;;  %v11115_v22 = vpop.f32.mrf.mxu0  ;;  %v398_v16 = vlaneseq }
  0xeb   :  { %v356_v24 = vsel %vm89_vm0, %v331_v17, 0.0  ;;  %v334_v31 = vmul.f32 %v11115_v22, %v11115_v22  ;;  %v309_v38 = vsel %vm89_vm0, %v11115_v22, 0.0 }
  0xec   :  { %v357_v26 = vadd.f32 %v356_v24, %v355_v19  ;;  %v11120_v27 = vpop.f32.mrf.mxu0  ;;  %v306_v28 = vadd.f32 %v305_v23, %v304_v18  ;;  %v11141_v17 = vshrl.u32 %v398_v16, 7  ;;  %v283_v18 = vld [vmem:[%s13550_s1] sm:$0x3] }
  0xed   :  { %v307_v32 = vsel %vm89_vm0, %v11120_v27, 0.0  ;;  %v333_v33 = vmul.f32 %v11120_v27, %v11120_v27  ;;  %v362_v44 = vsel %vm89_vm0, %v334_v31, 0.0 }
  0xee   :  { %v308_v34 = vadd.f32 %v307_v32, %v306_v28  ;;  %v359_v35 = vadd.f32 %v358_v30, %v357_v26  ;;  %v9822_v37 = vpop.f32.mrf.mxu0  ;;  %v11147_v19 = vsub.s32 1, %v11141_v17  ;;  %v11150_v23 = vsub.s32 0, %v11141_v17 }
  0xef   :  { %v360_v39 = vsel %vm89_vm0, %v333_v33, 0.0  ;;  %v336_v45 = vmul.f32 %v9822_v37, %v9822_v37  ;;  %v313_v51 = vsel %vm89_vm0, %v9822_v37, 0.0 }
  0xf0   :  { %v361_v41 = vadd.f32 %v360_v39, %v359_v35  ;;  %v274_v42 = vpop.f32.mrf.mxu0  ;;  %v310_v43 = vadd.f32 %v309_v38, %v308_v34  ;;  %v11154_v30 = vrot.slane %v283_v18, %v11147_v19 }
  0xf1   :  { %v311_v46 = vsel %vm89_vm0, %v274_v42, 0.0  ;;  %v335_v47 = vmul.f32 %v274_v42, %v274_v42  ;;  %v366_v56 = vsel %vm89_vm0, %v336_v45, 0.0 }
  0xf2   :  { %v312_v49 = vadd.f32 %v311_v46, %v310_v43  ;;  %v363_v50 = vadd.f32 %v362_v44, %v361_v41 }
  0xf3   :  { %v364_v53 = vsel %vm89_vm0, %v335_v47, 0.0 }
  0xf4   :  { %v314_v54 = vadd.f32 %v313_v51, %v312_v49  ;;  %v365_v55 = vadd.f32 %v364_v53, %v363_v50 }
  0xf6   :  { %v315_v57 = vrot.slane %v314_v54, 4  ;;  %v367_v58 = vadd.f32 %v366_v56, %v365_v55 }
  0xf8   :  { %v316_v59 = vadd.f32 %v315_v57, %v314_v54  ;;  %v368_v61 = vrot.slane %v367_v58, 4 }
  0xfa   :  { %v317_v62 = vrot.slane %v316_v59, 2  ;;  %v369_v63 = vadd.f32 %v368_v61, %v367_v58 }
  0xfc   :  { %v318_v1 = vadd.f32 %v317_v62, %v316_v59  ;;  %v370_v2 = vrot.slane %v369_v63, 2 }
  0xfe   :  { %v319_v3 = vrot.slane %v318_v1, 1  ;;  %v371_v4 = vadd.f32 %v370_v2, %v369_v63 }
 0x100   :  { %v320_v5 = vadd.f32 %v319_v3, %v318_v1  ;;  %v372_v6 = vrot.slane %v371_v4, 1 }
 0x102   :  { %v373_v7 = vadd.f32 %v372_v6, %v371_v4  ;;  %v11137_v9 = vmul.f32 0.0078125, %v320_v5 }
 0x104   :  { %v375_v10 = vmul.f32 0.0078125, %v373_v7  ;;  %v376_v11 = vmul.f32 %v11137_v9, %v11137_v9  ;;  %v393_v28 = vsub.f32 %v274_v42, %v11137_v9  ;;  %v394_v32 = vsub.f32 %v9822_v37, %v11137_v9 }
 0x105   :  { %v392_v33 = vsub.f32 %v11115_v22, %v11137_v9  ;;  %v391_v34 = vsub.f32 %v11120_v27, %v11137_v9  ;;  %v390_v35 = vsub.f32 %v11101_v8, %v11137_v9  ;;  %v389_v37 = vsub.f32 %v11106_v12, %v11137_v9 }
 0x106   :  { %v377_v13 = vsub.f32 %v375_v10, %v376_v11  ;;  %v388_v45 = vsub.f32 %v11087_v60, %v11137_v9  ;;  %v387_v12 = vsub.f32 %v11092_v0, %v11137_v9  ;;  %v386_v60 = vsub.f32 %v11073_v48, %v11137_v9 }
 0x107   :  { %v385_v0 = vsub.f32 %v11078_v52, %v11137_v9  ;;  %v384_v48 = vsub.f32 %v11059_v36, %v11137_v9  ;;  %v383_v52 = vsub.f32 %v11064_v40, %v11137_v9  ;;  %v382_v36 = vsub.f32 %v11045_v25, %v11137_v9 }
 0x108   :  { %v378_v14 = vmax.f32 %v377_v13, 0.0  ;;  %v381_v40 = vsub.f32 %v11050_v29, %v11137_v9  ;;  %v380_v25 = vsub.f32 %v11035_v20, %v11137_v9  ;;  %v379_v29 = vsub.f32 %v11037_v21, %v11137_v9 }
 0x10a   :  { %v395_v15 = vadd.f32 1e-05, %v378_v14 }
 0x10c   :  { %10791 = vrsqrt.f32 %v395_v15 }
 0x119   :  { %v10792_v24 = vpop.eup %10791 }
 0x11a   :  { %v397_v26 = vmul.f32 %v10792_v24, %v283_v18 }
 0x11c   :  { %v11157_v31 = vrot.slane %v397_v26, %v11150_v23 }
 0x11e   :  { %v416_v38 = vmul.f32 %v11157_v31, %v393_v28  ;;  %v417_v39 = vmul.f32 %v11157_v31, %v394_v32  ;;  %v415_v41 = vmul.f32 %v11157_v31, %v392_v33  ;;  %v414_v42 = vmul.f32 %v11157_v31, %v391_v34 }
 0x11f   :  { %v413_v44 = vmul.f32 %v11157_v31, %v390_v35  ;;  %v412_v8 = vmul.f32 %v11157_v31, %v389_v37  ;;  %v411_v54 = vmul.f32 %v11157_v31, %v388_v45  ;;  %v410_v58 = vmul.f32 %v11157_v31, %v387_v12  ;;  %v8738_v12 = vld [vmem:[%s13551_s25 + $0x18] sm:$0xff] }
 0x120   :  { %v437_v43 = vadd.f32 %v11154_v30, %v417_v39  ;;  %v436_v22 = vadd.f32 %v11154_v30, %v416_v38  ;;  %v435_v27 = vadd.f32 %v11154_v30, %v415_v41  ;;  %v434_v49 = vadd.f32 %v11154_v30, %v414_v42  ;;  %9951 = vmatprep.subr.mxu0 %v8738_v12 }
 0x121   :  { %v433_v53 = vadd.f32 %v11154_v30, %v413_v44  ;;  %v432_v57 = vadd.f32 %v11154_v30, %v412_v8  ;;  %v431_v62 = vadd.f32 %v11154_v30, %v411_v54  ;;  %v409_v63 = vmul.f32 %v11157_v31, %v386_v60  ;;  %9952 = vmatpush3.msra.mxu0 %v8738_v12  ;;  %v489_v54 = vld [vmem:[%s13549_s22 + $0x18] sm:$0xff]  ;;  %v490_v60 = vld [vmem:[%s13549_s22 + $0x20] sm:$0xff]  ;;  %v544_v12 = vld [vmem:[%s13549_s22 + $0x1d0] sm:$0xff] }
 0x122   :  { %vm453_vm1 = vcmp.ge.f32.partialorder %v437_v43, 0.0  ;;  %v469_v46 = vmul.f32 0.2, %v437_v43  ;;  %v468_v47 = vmul.f32 0.2, %v436_v22  ;;  %vm452_vm2 = vcmp.ge.f32.partialorder %v436_v22, 0.0 }
 0x123   :  { %v467_v51 = vmul.f32 0.2, %v435_v27  ;;  %vm451_vm3 = vcmp.ge.f32.partialorder %v435_v27, 0.0  ;;  %v466_v56 = vmul.f32 0.2, %v434_v49  ;;  %vm450_vm4 = vcmp.ge.f32.partialorder %v434_v49, 0.0 }
 0x124   :  { %v485_v50 = vsel %vm453_vm1, %v437_v43, %v469_v46  ;;  %v484_v55 = vsel %vm452_vm2, %v436_v22, %v468_v47  ;;  %v465_v61 = vmul.f32 0.2, %v433_v53  ;;  %vm449_vm5 = vcmp.ge.f32.partialorder %v433_v53, 0.0 }
 0x125   :  { %9823 = vmatprep.subr.mxu1 %v485_v50  ;;  %v483_v59 = vsel %vm451_vm3, %v435_v27, %v467_v51  ;;  %v482_v1 = vsel %vm450_vm4, %v434_v49, %v466_v56  ;;  %v464_v2 = vmul.f32 0.2, %v432_v57  ;;  %v430_v3 = vadd.f32 %v11154_v30, %v410_v58  ;;  %v487_v51 = vld [vmem:[%s13549_s22 + $0x8] sm:$0xff]  ;;  %v492_v56 = vld [vmem:[%s13549_s22 + $0x30] sm:$0xff]  ;;  %v494_v58 = vld [vmem:[%s13549_s22 + $0x40] sm:$0xff] }
 0x126   :  { %9824 = vmatpush3.msra.mxu1 %v485_v50  ;;  %v408_v4 = vmul.f32 %v11157_v31, %v385_v0  ;;  %vm448_vm6 = vcmp.ge.f32.partialorder %v432_v57, 0.0  ;;  %v481_v5 = vsel %vm449_vm5, %v433_v53, %v465_v61  ;;  %v463_v6 = vmul.f32 0.2, %v431_v62  ;;  %v488_v53 = vld [vmem:[%s13549_s22 + $0x10] sm:$0xff]  ;;  %v495_v0 = vld [vmem:[%s13549_s22 + $0x48] sm:$0xff]  ;;  %v497_v61 = vld [vmem:[%s13549_s22 + $0x58] sm:$0xff] }
 0x127   :  { %9825 = vmatprep.subr.mxu1 %v484_v55  ;;  %v429_v7 = vadd.f32 %v11154_v30, %v409_v63  ;;  %v407_v10 = vmul.f32 %v11157_v31, %v384_v48  ;;  %vm447_vm7 = vcmp.ge.f32.partialorder %v431_v62, 0.0  ;;  %v480_v11 = vsel %vm448_vm6, %v432_v57, %v464_v2  ;;  %v493_v57 = vld [vmem:[%s13549_s22 + $0x38] sm:$0xff]  ;;  %v499_v63 = vld [vmem:[%s13549_s22 + $0x68] sm:$0xff]  ;;  %v500_v48 = vld [vmem:[%s13549_s22 + $0x70] sm:$0xff] }
 0x128   :  { %9826 = vmatpush3.msra.mxu1 %v484_v55  ;;  %v462_v13 = vmul.f32 0.2, %v430_v3  ;;  %v428_v14 = vadd.f32 %v11154_v30, %v408_v4  ;;  %v406_v15 = vmul.f32 %v11157_v31, %v383_v52  ;;  %vm446_vm8 = vcmp.ge.f32.partialorder %v430_v3, 0.0  ;;  %v491_v55 = vld [vmem:[%s13549_s22 + $0x28] sm:$0xff]  ;;  %v502_v2 = vld [vmem:[%s13549_s22 + $0x80] sm:$0xff]  ;;  %v504_v4 = vld [vmem:[%s13549_s22 + $0x90] sm:$0xff] }
 0x129   :  { %9827 = vmatprep.subr.mxu1 %v483_v59  ;;  %v479_v16 = vsel %vm447_vm7, %v431_v62, %v463_v6  ;;  %v461_v18 = vmul.f32 0.2, %v429_v7  ;;  %v427_v24 = vadd.f32 %v11154_v30, %v407_v10  ;;  %v405_v26 = vmul.f32 %v11157_v31, %v382_v36  ;;  %v498_v62 = vld [vmem:[%s13549_s22 + $0x60] sm:$0xff]  ;;  %v505_v52 = vld [vmem:[%s13549_s22 + $0x98] sm:$0xff]  ;;  %v507_v6 = vld [vmem:[%s13549_s22 + $0xa8] sm:$0xff] }
 0x12a   :  { %9828 = vmatpush3.msra.mxu1 %v483_v59  ;;  %vm445_vm9 = vcmp.ge.f32.partialorder %v429_v7, 0.0  ;;  %v478_v28 = vsel %vm446_vm8, %v430_v3, %v462_v13  ;;  %v460_v32 = vmul.f32 0.2, %v428_v14  ;;  %v426_v33 = vadd.f32 %v11154_v30, %v406_v15  ;;  %v496_v59 = vld [vmem:[%s13549_s22 + $0x50] sm:$0xff]  ;;  %v503_v3 = vld [vmem:[%s13549_s22 + $0x88] sm:$0xff]  ;;  %v509_v10 = vld [vmem:[%s13549_s22 + $0xb8] sm:$0xff] }
 0x12b   :  { %9829 = vmatprep.subr.mxu1 %v482_v1  ;;  %v404_v34 = vmul.f32 %v11157_v31, %v381_v40  ;;  %vm444_vm10 = vcmp.ge.f32.partialorder %v428_v14, 0.0  ;;  %v477_v35 = vsel %vm445_vm9, %v429_v7, %v461_v18  ;;  %v459_v38 = vmul.f32 0.2, %v427_v24  ;;  %v508_v7 = vld [vmem:[%s13549_s22 + $0xb0] sm:$0xff]  ;;  %v510_v36 = vld [vmem:[%s13549_s22 + $0xc0] sm:$0xff]  ;;  %v515_v40 = vld [vmem:[%s13549_s22 + $0xe8] sm:$0xff] }
 0x12c   :  { %9830 = vmatpush3.msra.mxu1 %v482_v1  ;;  %v425_v39 = vadd.f32 %v11154_v30, %v405_v26  ;;  %v403_v41 = vmul.f32 %v11157_v31, %v380_v25  ;;  %vm443_vm11 = vcmp.ge.f32.partialorder %v427_v24, 0.0  ;;  %v476_v20 = vsel %vm444_vm10, %v428_v14, %v460_v32  ;;  %v501_v1 = vld [vmem:[%s13549_s22 + $0x78] sm:$0xff]  ;;  %v512_v13 = vld [vmem:[%s13549_s22 + $0xd0] sm:$0xff]  ;;  %v514_v15 = vld [vmem:[%s13549_s22 + $0xe0] sm:$0xff] }
 0x12d   :  { %9831 = vmatprep.subr.mxu1 %v481_v5  ;;  %v458_v42 = vmul.f32 0.2, %v426_v33  ;;  %v424_v37 = vadd.f32 %v11154_v30, %v404_v34  ;;  %v402_v43 = vmul.f32 %v11157_v31, %v379_v29  ;;  %vm442_vm12 = vcmp.ge.f32.partialorder %v426_v33, 0.0  ;;  %v513_v14 = vld [vmem:[%s13549_s22 + $0xd8] sm:$0xff]  ;;  %v519_v26 = vld [vmem:[%s13549_s22 + $0x108] sm:$0xff]  ;;  %v520_v25 = vld [vmem:[%s13549_s22 + $0x110] sm:$0xff] }
 0x12e   :  { %9832 = vmatpush3.msra.mxu1 %v481_v5  ;;  %v475_v21 = vsel %vm443_vm11, %v427_v24, %v459_v38  ;;  %v457_v9 = vmul.f32 0.2, %v425_v39  ;;  %v423_v22 = vadd.f32 %v11154_v30, %v403_v41  ;;  %vm441_vm13 = vcmp.ge.f32.partialorder %v425_v39, 0.0  ;;  %v506_v5 = vld [vmem:[%s13549_s22 + $0xa0] sm:$0xff]  ;;  %v517_v18 = vld [vmem:[%s13549_s22 + $0xf8] sm:$0xff]  ;;  %v524_v34 = vld [vmem:[%s13549_s22 + $0x130] sm:$0xff] }
 0x12f   :  { %9833 = vmatprep.subr.mxu1 %v480_v11  ;;  %v474_v27 = vsel %vm442_vm12, %v426_v33, %v458_v42  ;;  %v456_v44 = vmul.f32 0.2, %v424_v37  ;;  %v422_v8 = vadd.f32 %v11154_v30, %v402_v43  ;;  %vm440_vm14 = vcmp.ge.f32.partialorder %v424_v37, 0.0  ;;  %v8737_v30 = vld [vmem:[%s13551_s25 + $0x10] sm:$0xff]  ;;  %v518_v24 = vld [vmem:[%s13549_s22 + $0x100] sm:$0xff]  ;;  %v523_v33 = vld [vmem:[%s13549_s22 + $0x128] sm:$0xff] }
 0x130   :  { %9834 = vmatpush3.msra.mxu1 %v480_v11  ;;  %v473_v45 = vsel %vm441_vm13, %v425_v39, %v457_v9  ;;  %v455_v46 = vmul.f32 0.2, %v423_v22  ;;  %vm439_vm15 = vcmp.ge.f32.partialorder %v423_v22, 0.0  ;;  %9953 = vmatprep.subr.mxu0 %v8737_v30  ;;  %v511_v11 = vld [vmem:[%s13549_s22 + $0xc8] sm:$0xff]  ;;  %v522_v32 = vld [vmem:[%s13549_s22 + $0x120] sm:$0xff]  ;;  %v525_v29 = vld [vmem:[%s13549_s22 + $0x138] sm:$0xff] }
 0x131   :  { %9835 = vmatprep.subr.mxu1 %v479_v16  ;;  %v472_v31 = vsel %vm440_vm14, %v424_v37, %v456_v44  ;;  %v454_v47 = vmul.f32 0.2, %v422_v8  ;;  %vm438_vm1 = vcmp.ge.f32.partialorder %v422_v8, 0.0  ;;  %9954 = vmatpush3.msra.mxu0 %v8737_v30  ;;  %v11349_v38 = vld [vmem:[%s13551_s25 + $0x8] sm:$0xff]  ;;  %v528_v41 = vld [vmem:[%s13549_s22 + $0x150] sm:$0xff]  ;;  %v530_v42 = vld [vmem:[%s13549_s22 + $0x160] sm:$0xff] }
 0x132   :  { %9836 = vmatpush3.msra.mxu1 %v479_v16  ;;  %v471_v49 = vsel %vm439_vm15, %v423_v22, %v455_v46  ;;  %v516_v16 = vld [vmem:[%s13549_s22 + $0xf0] sm:$0xff]  ;;  %9961 = vmatprep.subr.mxu0 %v11349_v38  ;;  %v527_v39 = vld [vmem:[%s13549_s22 + $0x148] sm:$0xff]  ;;  %v534_v9 = vld [vmem:[%s13549_s22 + $0x180] sm:$0xff]  ;;  %vm2591_vm2 = vcmask 261120   ;;  %vm2709_vm7 = vcmp.lt.s32.totalorder %v11141_v17, 4  ;;  %vm2668_vm8 = vcmp.lt.s32.totalorder %v11141_v17, 5 }
 0x133   :  { %9837 = vmatprep.subr.mxu1 %v478_v28  ;;  %v470_v50 = vsel %vm438_vm1, %v422_v8, %v454_v47  ;;  %v531_v37 = vld [vmem:[%s13549_s22 + $0x168] sm:$0xff]  ;;  %v532_v43 = vld [vmem:[%s13549_s22 + $0x170] sm:$0xff]  ;;  %v537_v44 = vld [vmem:[%s13549_s22 + $0x198] sm:$0xff]  ;;  %vm2946_vm9 = vcmp.lt.s32.totalorder %v11141_v17, 3  ;;  %vm3090_vm10 = vcmp.lt.s32.totalorder %v11141_v17, 1  ;;  %vm3340_vm11 = vcmp.lt.s32.totalorder %v11141_v17, 7 }
 0x134   :  { %9838 = vmatpush3.msra.mxu1 %v478_v28  ;;  %v521_v28 = vld [vmem:[%s13549_s22 + $0x118] sm:$0xff]  ;;  %v535_v22 = vld [vmem:[%s13549_s22 + $0x188] sm:$0xff]  ;;  %v538_v8 = vld [vmem:[%s13549_s22 + $0x1a0] sm:$0xff] }
 0x135   :  { %9839 = vmatprep.subr.mxu1 %v477_v35  ;;  %v540_v46 = vld [vmem:[%s13549_s22 + $0x1b0] sm:$0xff]  ;;  %v542_v47 = vld [vmem:[%s13549_s22 + $0x1c0] sm:$0xff]  ;;  %v545_v30 = vld [vmem:[%s13549_s22 + $0x1d8] sm:$0xff] }
 0x136   :  { %9840 = vmatpush3.msra.mxu1 %v477_v35  ;;  %v526_v35 = vld [vmem:[%s13549_s22 + $0x140] sm:$0xff] }
 0x137   :  { %9841 = vmatprep.subr.mxu1 %v476_v20 }
 0x138   :  { %9842 = vmatpush3.msra.mxu1 %v476_v20  ;;  %v529_v20 = vld [vmem:[%s13549_s22 + $0x158] sm:$0xff] }
 0x139   :  { %9843 = vmatprep.subr.mxu1 %v475_v21 }
 0x13a   :  { %9844 = vmatpush3.msra.mxu1 %v475_v21  ;;  %v533_v21 = vld [vmem:[%s13549_s22 + $0x178] sm:$0xff] }
 0x13b   :  { %9845 = vmatprep.subr.mxu1 %v474_v27 }
 0x13c   :  { %9846 = vmatpush3.msra.mxu1 %v474_v27  ;;  %v536_v27 = vld [vmem:[%s13549_s22 + $0x190] sm:$0xff] }
 0x13d   :  { %9847 = vmatprep.subr.mxu1 %v473_v45 }
 0x13e   :  { %9848 = vmatpush3.msra.mxu1 %v473_v45  ;;  %v539_v45 = vld [vmem:[%s13549_s22 + $0x1a8] sm:$0xff] }
 0x13f   :  { %9849 = vmatprep.subr.mxu1 %v472_v31 }
 0x140   :  { %9850 = vmatpush3.msra.mxu1 %v472_v31  ;;  %v541_v31 = vld [vmem:[%s13549_s22 + $0x1b8] sm:$0xff] }
 0x141   :  { %9851 = vmatprep.subr.mxu1 %v471_v49 }
 0x142   :  { %9852 = vmatpush3.msra.mxu1 %v471_v49  ;;  %v543_v49 = vld [vmem:[%s13549_s22 + $0x1c8] sm:$0xff] }
 0x143   :  { %9853 = vmatprep.subr.mxu1 %v470_v50 }
 0x144   :  { %9854 = vmatpush3.msra.mxu1 %v470_v50  ;;  %v546_v50 = vld [vmem:[%s13549_s22 + $0x1e0] sm:$0xff] }
 0x145   :  { %9856 = vmatmul.mubr.f32.vlgmr.msra.gmra.mxu1 %v487_v51  ;;  %v547_v51 = vld [vmem:[%s13549_s22 + $0x1e8] sm:$0xff] }
 0x146   :  { %9858 = vmatprep.mubr.f32.mxu1 %v488_v53  ;;  %v548_v53 = vld [vmem:[%s13549_s22 + $0x1f0] sm:$0xff] }
 0x149   :  { %9859 = vmatmul.mubr.f32.gmra.mxu1 %v489_v54  ;;  %v549_v54 = vld [vmem:[%s13549_s22 + $0x1f8] sm:$0xff] }
 0x14a   :  { %9861 = vmatprep.mubr.f32.mxu1 %v490_v60 }
 0x14d   :  { %9862 = vmatmul.mubr.f32.gmra.mxu1 %v491_v55 }
 0x14e   :  { %9864 = vmatprep.mubr.f32.mxu1 %v492_v56 }
 0x151   :  { %9865 = vmatmul.mubr.f32.gmra.mxu1 %v493_v57 }
 0x152   :  { %9867 = vmatprep.mubr.f32.mxu1 %v494_v58 }
 0x155   :  { %9868 = vmatmul.mubr.f32.gmra.mxu1 %v495_v0  ;;  %v8831_v0 = vld [vmem:[%s13489_s6 + $0x20] sm:$0xff] }
 0x156   :  { %9870 = vmatprep.mubr.f32.mxu1 %v496_v59  ;;  %v8833_v59 = vld [vmem:[%s13489_s6 + $0x30] sm:$0xff] }
 0x159   :  { %9871 = vmatmul.mubr.f32.gmra.mxu1 %v497_v61  ;;  %v10843_v61 = vmov 0  }
 0x15a   :  { %9873 = vmatprep.mubr.f32.mxu1 %v498_v62  ;;  %10789 = vset.pattern.permute.xlu0 %v10843_v61 }
 0x15b   :  { %10790 = vset.pattern.permute.xlu1 %v10843_v61  ;;  %2721 = vperm.xlu0 %10789, %v8831_v0   ;;  %v8789_v61 = vld [vmem:[%s13551_s25 + $0x90] sm:$0xff] }
 0x15c   :  { %2731 = vperm.xlu1 %10790, %v8833_v59  }
 0x15d   :  { %9874 = vmatmul.mubr.f32.gmra.mxu1 %v499_v63  ;;  %v935_v63 = vld [vmem:[%s13551_s25] sm:$0xff] }
 0x15e   :  { %9876 = vmatprep.mubr.f32.mxu1 %v500_v48  ;;  %v8832_v48 = vld [vmem:[%s13489_s6 + $0x28] sm:$0xff] }
 0x15f   :  { %2726 = vperm.xlu0 %10789, %v8832_v48   ;;  %v8796_v48 = vld [vmem:[%s13551_s25 + $0xa8] sm:$0xff] }
 0x161   :  { %9877 = vmatmul.mubr.f32.gmra.mxu1 %v501_v1 }
 0x162   :  { %9879 = vmatprep.mubr.f32.mxu1 %v502_v2  ;;  %v8748_v2 = vld [vmem:[%s13551_s25 + $0x28] sm:$0xff] }
 0x165   :  { %9880 = vmatmul.mubr.f32.gmra.mxu1 %v503_v3 }
 0x166   :  { %9882 = vmatprep.mubr.f32.mxu1 %v504_v4  ;;  %v8834_v4 = vld [vmem:[%s13489_s6 + $0x38] sm:$0xff] }
 0x167   :  { %2736 = vperm.xlu1 %10790, %v8834_v4   ;;  %v8862_v4 = vld [vmem:[%s13489_s6 + $0x78] sm:$0xff] }
 0x169   :  { %9883 = vmatmul.mubr.f32.gmra.mxu1 %v505_v52  ;;  %v2673_v52 = vld [vmem:[%s13489_s6] sm:$0xff] }
 0x16a   :  { %9885 = vmatprep.mubr.f32.mxu1 %v506_v5  ;;  %2679 = vperm.xlu0 %10789, %v2673_v52  }
 0x16d   :  { %9886 = vmatmul.mubr.f32.gmra.mxu1 %v507_v6 }
 0x16e   :  { %9888 = vmatprep.mubr.f32.mxu1 %v508_v7  ;;  %v8747_v7 = vld [vmem:[%s13551_s25 + $0x20] sm:$0xff] }
 0x171   :  { %9889 = vmatmul.mubr.f32.gmra.mxu1 %v509_v10  ;;  %v2674_v10 = vld [vmem:[%s13489_s6 + $0x8] sm:$0xff] }
 0x172   :  { %9891 = vmatprep.mubr.f32.mxu1 %v510_v36  ;;  %2684 = vperm.xlu1 %10790, %v2674_v10   ;;  %v8802_v10 = vld [vmem:[%s13551_s25 + $0xb8] sm:$0xff] }
 0x175   :  { %9892 = vmatmul.mubr.f32.gmra.mxu1 %v511_v11  ;;  %v8847_v11 = vld [vmem:[%s13489_s6 + $0x40] sm:$0xff] }
 0x176   :  { %9894 = vmatprep.mubr.f32.mxu1 %v512_v13  ;;  %v8754_v13 = vld [vmem:[%s13551_s25 + $0x38] sm:$0xff]  ;;  %2958 = vperm.xlu0 %10789, %v8847_v11  }
 0x179   :  { %9895 = vmatmul.mubr.f32.gmra.mxu1 %v513_v14 }
 0x17a   :  { %9897 = vmatprep.mubr.f32.mxu1 %v514_v15  ;;  %v8848_v15 = vld [vmem:[%s13489_s6 + $0x48] sm:$0xff] }
 0x17b   :  { %2963 = vperm.xlu1 %10790, %v8848_v15   ;;  %v8892_v15 = vld [vmem:[%s13489_s6 + $0xc8] sm:$0xff] }
 0x17d   :  { %9898 = vmatmul.mubr.f32.gmra.mxu1 %v515_v40 }
 0x17e   :  { %9900 = vmatprep.mubr.f32.mxu1 %v516_v16  ;;  %v2675_v16 = vld [vmem:[%s13489_s6 + $0x10] sm:$0xff] }
 0x17f   :  { %2689 = vperm.xlu0 %10789, %v2675_v16   ;;  %v8801_v16 = vld [vmem:[%s13551_s25 + $0xb0] sm:$0xff] }
 0x181   :  { %9901 = vmatmul.mubr.f32.gmra.mxu1 %v517_v18 }
 0x182   :  { %9903 = vmatprep.mubr.f32.mxu1 %v518_v24  ;;  %v8753_v24 = vld [vmem:[%s13551_s25 + $0x30] sm:$0xff] }
 0x185   :  { %9904 = vmatmul.mubr.f32.gmra.mxu1 %v519_v26  ;;  %v2676_v26 = vld [vmem:[%s13489_s6 + $0x18] sm:$0xff] }
 0x186   :  { %9906 = vmatprep.mubr.f32.mxu1 %v520_v25  ;;  %2694 = vperm.xlu1 %10790, %v2676_v26   ;;  %v8808_v26 = vld [vmem:[%s13551_s25 + $0xc8] sm:$0xff] }
 0x189   :  { %9907 = vmatmul.mubr.f32.gmra.mxu1 %v521_v28  ;;  %v8849_v28 = vld [vmem:[%s13489_s6 + $0x50] sm:$0xff] }
 0x18a   :  { %9909 = vmatprep.mubr.f32.mxu1 %v522_v32  ;;  %v8760_v32 = vld [vmem:[%s13551_s25 + $0x48] sm:$0xff]  ;;  %2968 = vperm.xlu0 %10789, %v8849_v28  }
 0x18d   :  { %9910 = vmatmul.mubr.f32.gmra.mxu1 %v523_v33 }
 0x18e   :  { %9912 = vmatprep.mubr.f32.mxu1 %v524_v34  ;;  %v8850_v34 = vld [vmem:[%s13489_s6 + $0x58] sm:$0xff] }
 0x18f   :  { %2973 = vperm.xlu1 %10790, %v8850_v34   ;;  %v8894_v34 = vld [vmem:[%s13489_s6 + $0xd8] sm:$0xff] }
 0x191   :  { %9913 = vmatmul.mubr.f32.gmra.mxu1 %v525_v29 }
 0x192   :  { %9915 = vmatprep.mubr.f32.mxu1 %v526_v35  ;;  %v8859_v35 = vld [vmem:[%s13489_s6 + $0x60] sm:$0xff] }
 0x193   :  { %3102 = vperm.xlu0 %10789, %v8859_v35   ;;  %v8807_v35 = vld [vmem:[%s13551_s25 + $0xc0] sm:$0xff] }
 0x195   :  { %9916 = vmatmul.mubr.f32.gmra.mxu1 %v527_v39  ;;  %v8759_v39 = vld [vmem:[%s13551_s25 + $0x40] sm:$0xff] }
 0x196   :  { %9918 = vmatprep.mubr.f32.mxu1 %v528_v41 }
 0x199   :  { %9919 = vmatmul.mubr.f32.gmra.mxu1 %v529_v20  ;;  %v8766_v20 = vld [vmem:[%s13551_s25 + $0x58] sm:$0xff] }
 0x19a   :  { %9921 = vmatprep.mubr.f32.mxu1 %v530_v42 }
 0x19d   :  { %9922 = vmatmul.mubr.f32.gmra.mxu1 %v531_v37 }
 0x19e   :  { %9924 = vmatprep.mubr.f32.mxu1 %v532_v43 }
 0x1a1   :  { %9925 = vmatmul.mubr.f32.gmra.mxu1 %v533_v21  ;;  %v8765_v21 = vld [vmem:[%s13551_s25 + $0x50] sm:$0xff] }
 0x1a2   :  { %9927 = vmatprep.mubr.f32.mxu1 %v534_v9 }
 0x1a5   :  { %9928 = vmatmul.mubr.f32.gmra.mxu1 %v535_v22  ;;  %v8772_v22 = vld [vmem:[%s13551_s25 + $0x68] sm:$0xff] }
 0x1a6   :  { %9930 = vmatprep.mubr.f32.mxu1 %v536_v27 }
 0x1a9   :  { %9931 = vmatmul.mubr.f32.gmra.mxu1 %v537_v44 }
 0x1aa   :  { %9933 = vmatprep.mubr.f32.mxu1 %v538_v8 }
 0x1ad   :  { %9934 = vmatmul.mubr.f32.gmra.mxu1 %v539_v45  ;;  %v8771_v45 = vld [vmem:[%s13551_s25 + $0x60] sm:$0xff] }
 0x1ae   :  { %9936 = vmatprep.mubr.f32.mxu1 %v540_v46 }
 0x1b1   :  { %9937 = vmatmul.mubr.f32.gmra.mxu1 %v541_v31  ;;  %v8778_v31 = vld [vmem:[%s13551_s25 + $0x78] sm:$0xff] }
 0x1b2   :  { %9939 = vmatprep.mubr.f32.mxu1 %v542_v47 }
 0x1b5   :  { %9940 = vmatmul.mubr.f32.gmra.mxu1 %v543_v49 }
 0x1b6   :  { %9942 = vmatprep.mubr.f32.mxu1 %v544_v12 }
 0x1b9   :  { %9943 = vmatmul.mubr.f32.gmra.mxu1 %v545_v30  ;;  %v8777_v30 = vld [vmem:[%s13551_s25 + $0x70] sm:$0xff] }
 0x1ba   :  { %9945 = vmatprep.mubr.f32.mxu1 %v546_v50 }
 0x1bd   :  { %9946 = vmatmul.mubr.f32.gmra.mxu1 %v547_v51  ;;  %v8784_v51 = vld [vmem:[%s13551_s25 + $0x88] sm:$0xff] }
 0x1be   :  { %9948 = vmatprep.mubr.f32.mxu1 %v548_v53 }
 0x1c1   :  { %9949 = vmatmul.mubr.f32.gmra.mxu1 %v549_v54 }
 0x205   :  { %v9857_v60 = vpop.f32.mrf.mxu1 }
 0x207   :  { %v616_v55 = vpop.f32.mrf.mxu1 }
 0x209   :  { %v9860_v56 = vpop.f32.mrf.mxu1 }
 0x20b   :  { %v626_v57 = vpop.f32.mrf.mxu1 }
 0x20d   :  { %v9863_v58 = vpop.f32.mrf.mxu1 }
 0x20f   :  { %v636_v62 = vpop.f32.mrf.mxu1 }
 0x210   :  { %9955 = vmatprep.mubr.msk.f32.mxu0 %vm89_vm0, %v636_v62 }
 0x211   :  { %v9866_v1 = vpop.f32.mrf.mxu1  ;;  %9956 = vmatmul.mubr.msk.f32.vlgmr.msra.gmra.mxu0 %vm89_vm0, %v9863_v58 }
 0x212   :  { %9962 = vmatpush3.msra.mxu0 %v11349_v38 }
 0x213   :  { %v646_v3 = vpop.f32.mrf.mxu1  ;;  %9963 = vmatprep.subr.mxu0 %v935_v63 }
 0x214   :  { %9958 = vmatprep.mubr.msk.f32.mxu0 %vm89_vm0, %v646_v3  ;;  %9964 = vmatpush3.msra.mxu0 %v935_v63  ;;  %v8860_v63 = vld [vmem:[%s13489_s6 + $0x68] sm:$0xff] }
 0x215   :  { %9959 = vmatmul.mubr.msk.f32.gmra.mxu0 %vm89_vm0, %v9866_v1  ;;  %9971 = vmatprep.subr.mxu0 %v8748_v2  ;;  %v9869_v5 = vpop.f32.mrf.mxu1 }
 0x216   :  { %9965 = vmatprep.mubr.msk.f32.mxu0 %vm89_vm0, %v616_v55  ;;  %v8783_v55 = vld [vmem:[%s13551_s25 + $0x80] sm:$0xff]  ;;  %3107 = vperm.xlu1 %10790, %v8860_v63  }
 0x217   :  { %v656_v6 = vpop.f32.mrf.mxu1 }
 0x219   :  { %9966 = vmatmul.mubr.msk.f32.vlgmr.msra.gmra.mxu0 %vm89_vm0, %v9857_v60  ;;  %v9872_v36 = vpop.f32.mrf.mxu1 }
 0x21a   :  { %9972 = vmatpush3.msra.mxu0 %v8748_v2  ;;  %9968 = vmatprep.mubr.msk.f32.mxu0 %vm89_vm0, %v626_v57  ;;  %v8790_v57 = vld [vmem:[%s13551_s25 + $0x98] sm:$0xff]  ;;  %v8861_v2 = vld [vmem:[%s13489_s6 + $0x70] sm:$0xff] }
 0x21b   :  { %9973 = vmatprep.subr.mxu0 %v8747_v7  ;;  %v666_v14 = vpop.f32.mrf.mxu1  ;;  %3112 = vperm.xlu0 %10789, %v8861_v2  }
 0x21c   :  { %9974 = vmatpush3.msra.mxu0 %v8747_v7  ;;  %3117 = vperm.xlu1 %10790, %v8862_v4  }
 0x21d   :  { %9969 = vmatmul.mubr.msk.f32.gmra.mxu0 %vm89_vm0, %v9860_v56  ;;  %9981 = vmatprep.subr.mxu0 %v8754_v13  ;;  %v9875_v40 = vpop.f32.mrf.mxu1 }
 0x21e   :  { %9975 = vmatprep.mubr.msk.f32.mxu0 %vm89_vm0, %v656_v6  ;;  %v8795_v6 = vld [vmem:[%s13551_s25 + $0xa0] sm:$0xff] }
 0x21f   :  { %v676_v18 = vpop.f32.mrf.mxu1 }
 0x221   :  { %9976 = vmatmul.mubr.msk.f32.vlgmr.msra.gmra.mxu0 %vm89_vm0, %v9869_v5  ;;  %v9878_v25 = vpop.f32.mrf.mxu1  ;;  %v8879_v5 = vld [vmem:[%s13489_s6 + $0xa0] sm:$0xff] }
 0x222   :  { %9982 = vmatpush3.msra.mxu0 %v8754_v13  ;;  %9978 = vmatprep.mubr.msk.f32.mxu0 %vm89_vm0, %v666_v14  ;;  %v8891_v13 = vld [vmem:[%s13489_s6 + $0xc0] sm:$0xff] }
 0x223   :  { %9983 = vmatprep.subr.mxu0 %v8753_v24  ;;  %v686_v33 = vpop.f32.mrf.mxu1  ;;  %3352 = vperm.xlu0 %10789, %v8879_v5  }
 0x224   :  { %9984 = vmatpush3.msra.mxu0 %v8753_v24 }
 0x225   :  { %9979 = vmatmul.mubr.msk.f32.gmra.mxu0 %vm89_vm0, %v9872_v36  ;;  %9991 = vmatprep.subr.mxu0 %v8760_v32  ;;  %v9881_v29 = vpop.f32.mrf.mxu1  ;;  %v8880_v36 = vld [vmem:[%s13489_s6 + $0xa8] sm:$0xff] }
 0x226   :  { %9985 = vmatprep.mubr.msk.f32.mxu0 %vm89_vm0, %v676_v18  ;;  %3357 = vperm.xlu1 %10790, %v8880_v36   ;;  %v8881_v18 = vld [vmem:[%s13489_s6 + $0xb0] sm:$0xff] }
 0x227   :  { %v696_v38 = vpop.f32.mrf.mxu1  ;;  %3487 = vperm.xlu0 %10789, %v8891_v13  }
 0x229   :  { %9986 = vmatmul.mubr.msk.f32.vlgmr.msra.gmra.mxu0 %vm89_vm0, %v9875_v40  ;;  %v9884_v41 = vpop.f32.mrf.mxu1 }
 0x22a   :  { %9992 = vmatpush3.msra.mxu0 %v8760_v32  ;;  %9988 = vmatprep.mubr.msk.f32.mxu0 %vm89_vm0, %v686_v33  ;;  %v8893_v32 = vld [vmem:[%s13489_s6 + $0xd0] sm:$0xff] }
 0x22b   :  { %9993 = vmatprep.subr.mxu0 %v8759_v39  ;;  %v706_v42 = vpop.f32.mrf.mxu1  ;;  %3492 = vperm.xlu1 %10790, %v8892_v15  }
 0x22c   :  { %9994 = vmatpush3.msra.mxu0 %v8759_v39  ;;  %3362 = vperm.xlu0 %10789, %v8881_v18  }
 0x22d   :  { %9989 = vmatmul.mubr.msk.f32.gmra.mxu0 %vm89_vm0, %v9878_v25  ;;  %10001 = vmatprep.subr.mxu0 %v8766_v20  ;;  %v9887_v37 = vpop.f32.mrf.mxu1  ;;  %v8882_v25 = vld [vmem:[%s13489_s6 + $0xb8] sm:$0xff] }
 0x22e   :  { %9995 = vmatprep.mubr.msk.f32.mxu0 %vm89_vm0, %v696_v38  ;;  %v8903_v38 = vld [vmem:[%s13489_s6 + $0xe0] sm:$0xff] }
 0x22f   :  { %v716_v43 = vpop.f32.mrf.mxu1  ;;  %3367 = vperm.xlu1 %10790, %v8882_v25  }
 0x230   :  { %3497 = vperm.xlu0 %10789, %v8893_v32  }
 0x231   :  { %9996 = vmatmul.mubr.msk.f32.vlgmr.msra.gmra.mxu0 %vm89_vm0, %v9881_v29  ;;  %v9890_v9 = vpop.f32.mrf.mxu1 }
 0x232   :  { %10002 = vmatpush3.msra.mxu0 %v8766_v20  ;;  %9998 = vmatprep.mubr.msk.f32.mxu0 %vm89_vm0, %v706_v42  ;;  %v8904_v20 = vld [vmem:[%s13489_s6 + $0xe8] sm:$0xff] }
 0x233   :  { %10003 = vmatprep.subr.mxu0 %v8765_v21  ;;  %v726_v27 = vpop.f32.mrf.mxu1  ;;  %3502 = vperm.xlu1 %10790, %v8894_v34  }
 0x234   :  { %10004 = vmatpush3.msra.mxu0 %v8765_v21  ;;  %3622 = vperm.xlu0 %10789, %v8903_v38   ;;  %v8916_v21 = vld [vmem:[%s13489_s6 + $0x108] sm:$0xff] }
 0x235   :  { %9999 = vmatmul.mubr.msk.f32.gmra.mxu0 %vm89_vm0, %v9884_v41  ;;  %10011 = vmatprep.subr.mxu0 %v8772_v22  ;;  %v9893_v44 = vpop.f32.mrf.mxu1  ;;  %v8814_v41 = vld [vmem:[%s13551_s25 + $0xd8] sm:$0xff] }
 0x236   :  { %10005 = vmatprep.mubr.msk.f32.mxu0 %vm89_vm0, %v716_v43 }
 0x237   :  { %v736_v8 = vpop.f32.mrf.mxu1  ;;  %3627 = vperm.xlu1 %10790, %v8904_v20  }
 0x239   :  { %10006 = vmatmul.mubr.msk.f32.vlgmr.msra.gmra.mxu0 %vm89_vm0, %v9887_v37  ;;  %v9896_v46 = vpop.f32.mrf.mxu1  ;;  %v8915_v37 = vld [vmem:[%s13489_s6 + $0x100] sm:$0xff] }
 0x23a   :  { %10012 = vmatpush3.msra.mxu0 %v8772_v22  ;;  %10008 = vmatprep.mubr.msk.f32.mxu0 %vm89_vm0, %v726_v27  ;;  %v8813_v22 = vld [vmem:[%s13551_s25 + $0xd0] sm:$0xff] }
 0x23b   :  { %10013 = vmatprep.subr.mxu0 %v8771_v45  ;;  %v746_v47 = vpop.f32.mrf.mxu1  ;;  %3757 = vperm.xlu0 %10789, %v8915_v37   ;;  %v8905_v27 = vld [vmem:[%s13489_s6 + $0xf0] sm:$0xff] }
 0x23c   :  { %10014 = vmatpush3.msra.mxu0 %v8771_v45  ;;  %3762 = vperm.xlu1 %10790, %v8916_v21   ;;  %v8906_v45 = vld [vmem:[%s13489_s6 + $0xf8] sm:$0xff] }
 0x23d   :  { %10009 = vmatmul.mubr.msk.f32.gmra.mxu0 %vm89_vm0, %v9890_v9  ;;  %10021 = vmatprep.subr.mxu0 %v8778_v31  ;;  %v9899_v49 = vpop.f32.mrf.mxu1 }
 0x23e   :  { %10015 = vmatprep.mubr.msk.f32.mxu0 %vm89_vm0, %v736_v8  ;;  %v8820_v8 = vld [vmem:[%s13551_s25 + $0xe8] sm:$0xff] }
 0x23f   :  { %v756_v12 = vpop.f32.mrf.mxu1  ;;  %3632 = vperm.xlu0 %10789, %v8905_v27   ;;  %v8835_v27 = vld [vmem:[%s13490_s7 + $0x20] sm:$0xff] }
 0x240   :  { %3637 = vperm.xlu1 %10790, %v8906_v45  }
 0x241   :  { %10016 = vmatmul.mubr.msk.f32.vlgmr.msra.gmra.mxu0 %vm89_vm0, %v9893_v44  ;;  %v9902_v50 = vpop.f32.mrf.mxu1 }
 0x242   :  { %10022 = vmatpush3.msra.mxu0 %v8778_v31  ;;  %10018 = vmatprep.mubr.msk.f32.mxu0 %vm89_vm0, %v746_v47  ;;  %v8917_v31 = vld [vmem:[%s13489_s6 + $0x110] sm:$0xff] }
 0x243   :  { %10023 = vmatprep.subr.mxu0 %v8777_v30  ;;  %v766_v53 = vpop.f32.mrf.mxu1  ;;  %3767 = vperm.xlu0 %10789, %v8917_v31  }
 0x244   :  { %10024 = vmatpush3.msra.mxu0 %v8777_v30  ;;  %v8819_v30 = vld [vmem:[%s13551_s25 + $0xe0] sm:$0xff] }
 0x245   :  { %10019 = vmatmul.mubr.msk.f32.gmra.mxu0 %vm89_vm0, %v9896_v46  ;;  %10031 = vmatprep.subr.mxu0 %v8784_v51  ;;  %v9905_v54 = vpop.f32.mrf.mxu1 }
 0x246   :  { %10025 = vmatprep.mubr.msk.f32.mxu0 %vm89_vm0, %v756_v12 }
 0x247   :  { %v776_v60 = vpop.f32.mrf.mxu1 }
 0x249   :  { %10026 = vmatmul.mubr.msk.f32.vlgmr.msra.gmra.mxu0 %vm89_vm0, %v9899_v49  ;;  %v9908_v56 = vpop.f32.mrf.mxu1  ;;  %v8918_v49 = vld [vmem:[%s13489_s6 + $0x118] sm:$0xff] }
 0x24a   :  { %10032 = vmatpush3.msra.mxu0 %v8784_v51  ;;  %10028 = vmatprep.mubr.msk.f32.mxu0 %vm89_vm0, %v766_v53  ;;  %v8826_v51 = vld [vmem:[%s13551_s25 + $0xf8] sm:$0xff] }
 0x24b   :  { %10033 = vmatprep.subr.mxu0 %v8783_v55  ;;  %v786_v58 = vpop.f32.mrf.mxu1  ;;  %3772 = vperm.xlu1 %10790, %v8918_v49   ;;  %v11716_v49 = vld [vmem:[%s13490_s7 + $0x58] sm:$0xff] }
 0x24c   :  { %10034 = vmatpush3.msra.mxu0 %v8783_v55  ;;  %v8825_v55 = vld [vmem:[%s13551_s25 + $0xf0] sm:$0xff] }
 0x24d   :  { %10029 = vmatmul.mubr.msk.f32.gmra.mxu0 %vm89_vm0, %v9902_v50  ;;  %10041 = vmatprep.subr.mxu0 %v8790_v57  ;;  %v9911_v0 = vpop.f32.mrf.mxu1 }
 0x24e   :  { %10035 = vmatprep.mubr.msk.f32.mxu0 %vm89_vm0, %v776_v60 }
 0x24f   :  { %v796_v59 = vpop.f32.mrf.mxu1 }
 0x251   :  { %10036 = vmatmul.mubr.msk.f32.vlgmr.msra.gmra.mxu0 %vm89_vm0, %v9905_v54  ;;  %v9914_v62 = vpop.f32.mrf.mxu1 }
 0x252   :  { %10042 = vmatpush3.msra.mxu0 %v8790_v57  ;;  %10038 = vmatprep.mubr.msk.f32.mxu0 %vm89_vm0, %v786_v58  ;;  %v8838_v58 = vld [vmem:[%s13490_s7 + $0x38] sm:$0xff] }
 0x253   :  { %10043 = vmatprep.subr.mxu0 %v8789_v61  ;;  %v806_v1 = vpop.f32.mrf.mxu1  ;;  %10111 = vmatprep.subr.mxu1 %v8838_v58 }
 0x254   :  { %10044 = vmatpush3.msra.mxu0 %v8789_v61  ;;  %10112 = vmatpush3.msra.mxu1 %v8838_v58  ;;  %v8836_v61 = vld [vmem:[%s13490_s7 + $0x28] sm:$0xff] }
 0x255   :  { %10039 = vmatmul.mubr.msk.f32.gmra.mxu0 %vm89_vm0, %v9908_v56  ;;  %10051 = vmatprep.subr.mxu0 %v8796_v48  ;;  %v9917_v3 = vpop.f32.mrf.mxu1 }
 0x256   :  { %10045 = vmatprep.mubr.msk.f32.mxu0 %vm89_vm0, %v796_v59 }
 0x257   :  { %v816_v52 = vpop.f32.mrf.mxu1 }
 0x259   :  { %10046 = vmatmul.mubr.msk.f32.vlgmr.msra.gmra.mxu0 %vm89_vm0, %v9911_v0  ;;  %v9920_v7 = vpop.f32.mrf.mxu1  ;;  %v8837_v0 = vld [vmem:[%s13490_s7 + $0x30] sm:$0xff] }
 0x25a   :  { %10052 = vmatpush3.msra.mxu0 %v8796_v48  ;;  %10048 = vmatprep.mubr.msk.f32.mxu0 %vm89_vm0, %v806_v1 }
 0x25b   :  { %10053 = vmatprep.subr.mxu0 %v8795_v6  ;;  %v826_v11 = vpop.f32.mrf.mxu1  ;;  %10113 = vmatprep.subr.mxu1 %v8837_v0 }
 0x25c   :  { %10054 = vmatpush3.msra.mxu0 %v8795_v6  ;;  %10114 = vmatpush3.msra.mxu1 %v8837_v0 }
 0x25d   :  { %10049 = vmatmul.mubr.msk.f32.gmra.mxu0 %vm89_vm0, %v9914_v62  ;;  %10061 = vmatprep.subr.mxu0 %v8802_v10  ;;  %v9923_v14 = vpop.f32.mrf.mxu1 }
 0x25e   :  { %10055 = vmatprep.mubr.msk.f32.mxu0 %vm89_vm0, %v816_v52  ;;  %10115 = vmatprep.subr.mxu1 %v8836_v61 }
 0x25f   :  { %v836_v40 = vpop.f32.mrf.mxu1  ;;  %10116 = vmatpush3.msra.mxu1 %v8836_v61 }
 0x260   :  { %10117 = vmatprep.subr.mxu1 %v8835_v27 }
 0x261   :  { %10056 = vmatmul.mubr.msk.f32.vlgmr.msra.gmra.mxu0 %vm89_vm0, %v9917_v3  ;;  %v9926_v24 = vpop.f32.mrf.mxu1  ;;  %10118 = vmatpush3.msra.mxu1 %v8835_v27 }
 0x262   :  { %10062 = vmatpush3.msra.mxu0 %v8802_v10  ;;  %10058 = vmatprep.mubr.msk.f32.mxu0 %vm89_vm0, %v826_v11 }
 0x263   :  { %10063 = vmatprep.subr.mxu0 %v8801_v16  ;;  %v846_v28 = vpop.f32.mrf.mxu1  ;;  %10139 = vmatprep.subr.mxu1 %v11716_v49 }
 0x264   :  { %10064 = vmatpush3.msra.mxu0 %v8801_v16 }
 0x265   :  { %10059 = vmatmul.mubr.msk.f32.gmra.mxu0 %vm89_vm0, %v9920_v7  ;;  %10071 = vmatprep.subr.mxu0 %v8808_v26  ;;  %v9929_v33 = vpop.f32.mrf.mxu1 }
 0x266   :  { %10065 = vmatprep.mubr.msk.f32.mxu0 %vm89_vm0, %v836_v40 }
 0x267   :  { %v856_v29 = vpop.f32.mrf.mxu1 }
 0x269   :  { %10066 = vmatmul.mubr.msk.f32.vlgmr.msra.gmra.mxu0 %vm89_vm0, %v9923_v14  ;;  %v9932_v39 = vpop.f32.mrf.mxu1 }
 0x26a   :  { %10072 = vmatpush3.msra.mxu0 %v8808_v26  ;;  %10068 = vmatprep.mubr.msk.f32.mxu0 %vm89_vm0, %v846_v28 }
 0x26b   :  { %10073 = vmatprep.subr.mxu0 %v8807_v35  ;;  %v866_v42 = vpop.f32.mrf.mxu1 }
 0x26c   :  { %10074 = vmatpush3.msra.mxu0 %v8807_v35 }
 0x26d   :  { %10069 = vmatmul.mubr.msk.f32.gmra.mxu0 %vm89_vm0, %v9926_v24  ;;  %10081 = vmatprep.subr.mxu0 %v8814_v41  ;;  %v9935_v43 = vpop.f32.mrf.mxu1 }
 0x26e   :  { %10075 = vmatprep.mubr.msk.f32.mxu0 %vm89_vm0, %v856_v29 }
 0x26f   :  { %v876_v9 = vpop.f32.mrf.mxu1 }
 0x271   :  { %10076 = vmatmul.mubr.msk.f32.vlgmr.msra.gmra.mxu0 %vm89_vm0, %v9929_v33  ;;  %v9938_v44 = vpop.f32.mrf.mxu1 }
 0x272   :  { %10082 = vmatpush3.msra.mxu0 %v8814_v41  ;;  %10078 = vmatprep.mubr.msk.f32.mxu0 %vm89_vm0, %v866_v42 }
 0x273   :  { %10083 = vmatprep.subr.mxu0 %v8813_v22  ;;  %v886_v46 = vpop.f32.mrf.mxu1 }
 0x274   :  { %10084 = vmatpush3.msra.mxu0 %v8813_v22 }
 0x275   :  { %10079 = vmatmul.mubr.msk.f32.gmra.mxu0 %vm89_vm0, %v9932_v39  ;;  %10091 = vmatprep.subr.mxu0 %v8820_v8  ;;  %v9941_v47 = vpop.f32.mrf.mxu1 }
 0x276   :  { %10085 = vmatprep.mubr.msk.f32.mxu0 %vm89_vm0, %v876_v9 }
 0x277   :  { %v896_v12 = vpop.f32.mrf.mxu1 }
 0x279   :  { %10086 = vmatmul.mubr.msk.f32.vlgmr.msra.gmra.mxu0 %vm89_vm0, %v9935_v43  ;;  %v9944_v50 = vpop.f32.mrf.mxu1 }
 0x27a   :  { %10092 = vmatpush3.msra.mxu0 %v8820_v8  ;;  %10088 = vmatprep.mubr.msk.f32.mxu0 %vm89_vm0, %v886_v46  ;;  %v2703_v8 = vld [vmem:[%s13490_s7 + $0x10] sm:$0xff]  ;;  %v2702_v46 = vld [vmem:[%s13490_s7 + $0x8] sm:$0xff] }
 0x27b   :  { %10093 = vmatprep.subr.mxu0 %v8819_v30  ;;  %v906_v53 = vpop.f32.mrf.mxu1 }
 0x27c   :  { %10094 = vmatpush3.msra.mxu0 %v8819_v30  ;;  %v11722_v30 = vld [vmem:[%s13490_s7 + $0x78] sm:$0xff] }
 0x27d   :  { %10089 = vmatmul.mubr.msk.f32.gmra.mxu0 %vm89_vm0, %v9938_v44  ;;  %10101 = vmatprep.subr.mxu0 %v8826_v51  ;;  %v9947_v54 = vpop.f32.mrf.mxu1  ;;  %v2704_v44 = vld [vmem:[%s13490_s7 + $0x18] sm:$0xff] }
 0x27e   :  { %10095 = vmatprep.mubr.msk.f32.mxu0 %vm89_vm0, %v896_v12 }
 0x27f   :  { %v916_v60 = vpop.f32.mrf.mxu1 }
 0x281   :  { %10096 = vmatmul.mubr.msk.f32.vlgmr.msra.gmra.mxu0 %vm89_vm0, %v9941_v47  ;;  %v9950_v56 = vpop.f32.mrf.mxu1  ;;  %v2701_v47 = vld [vmem:[%s13490_s7] sm:$0xff] }
 0x282   :  { %10102 = vmatpush3.msra.mxu0 %v8826_v51  ;;  %10098 = vmatprep.mubr.msk.f32.mxu0 %vm89_vm0, %v906_v53 }
 0x283   :  { %10103 = vmatprep.subr.mxu0 %v8825_v55  ;;  %v926_v57 = vpop.f32.mrf.mxu1 }
 0x284   :  { %10104 = vmatpush3.msra.mxu0 %v8825_v55 }
 0x285   :  { %10099 = vmatmul.mubr.msk.f32.gmra.mxu0 %vm89_vm0, %v9944_v50  ;;  %10125 = vmatprep.subr.mxu0 %v2704_v44 }
 0x286   :  { %10105 = vmatprep.mubr.msk.f32.mxu0 %vm89_vm0, %v916_v60 }
 0x289   :  { %10106 = vmatmul.mubr.msk.f32.vlgmr.msra.gmra.mxu0 %vm89_vm0, %v9947_v54 }
 0x28a   :  { %10108 = vmatprep.mubr.msk.f32.mxu0 %vm89_vm0, %v926_v57  ;;  %10126 = vmatpush3.msra.mxu0 %v2704_v44 }
 0x28b   :  { %10127 = vmatprep.subr.mxu0 %v2703_v8 }
 0x28c   :  { %10128 = vmatpush3.msra.mxu0 %v2703_v8 }
 0x28d   :  { %10109 = vmatmul.mubr.msk.f32.gmra.mxu0 %vm89_vm0, %v9950_v56  ;;  %10129 = vmatprep.subr.mxu0 %v2702_v46 }
 0x28e   :  { %10130 = vmatpush3.msra.mxu0 %v2702_v46 }
 0x28f   :  { %10131 = vmatprep.subr.mxu0 %v2701_v47 }
 0x290   :  { %10132 = vmatpush3.msra.mxu0 %v2701_v47 }
 0x291   :  { %10153 = vmatprep.subr.mxu0 %v11722_v30 }
 0x2d1   :  { %v9957_v59 = vpop.f32.mrf.mxu0 }
 0x2d3   :  { %v11678_v62 = vpop.f32.mrf.mxu0 }
 0x2d5   :  { %v9960_v63 = vpop.f32.mrf.mxu0 }
 0x2d7   :  { %v11680_v48 = vpop.f32.mrf.mxu0 }
 0x2d9   :  { %v9967_v1 = vpop.f32.mrf.mxu0 }
 0x2da   :  { %v1121_v2 = vadd.f32 %v9967_v1, %v9957_v59 }
 0x2db   :  { %v11682_v3 = vpop.f32.mrf.mxu0 }
 0x2dd   :  { %v9970_v4 = vpop.f32.mrf.mxu0 }
 0x2de   :  { %v1131_v52 = vadd.f32 %v9970_v4, %v9960_v63  ;;  %v1116_v4 = vadd.f32 %v11682_v3, %v11678_v62 }
 0x2df   :  { %v11684_v5 = vpop.f32.mrf.mxu0 }
 0x2e1   :  { %v9977_v6 = vpop.f32.mrf.mxu0 }
 0x2e2   :  { %v1235_v7 = vadd.f32 %v9977_v6, %v1121_v2 }
 0x2e3   :  { %v11686_v10 = vpop.f32.mrf.mxu0 }
 0x2e4   :  { %v1234_v6 = vadd.f32 %v11686_v10, %v1116_v4 }
 0x2e5   :  { %v9980_v36 = vpop.f32.mrf.mxu0 }
 0x2e6   :  { %v1237_v11 = vadd.f32 %v9980_v36, %v1131_v52 }
 0x2e7   :  { %v11688_v13 = vpop.f32.mrf.mxu0 }
 0x2e9   :  { %v9987_v14 = vpop.f32.mrf.mxu0 }
 0x2ea   :  { %v1339_v15 = vadd.f32 %v9987_v14, %v1235_v7  ;;  %v1126_v7 = vadd.f32 %v11684_v5, %v11680_v48 }
 0x2eb   :  { %v11690_v40 = vpop.f32.mrf.mxu0 }
 0x2ec   :  { %v1236_v14 = vadd.f32 %v11688_v13, %v1126_v7 }
 0x2ed   :  { %v9990_v16 = vpop.f32.mrf.mxu0 }
 0x2ee   :  { %v1341_v18 = vadd.f32 %v9990_v16, %v1237_v11  ;;  %v1338_v11 = vadd.f32 %v11690_v40, %v1234_v6 }
 0x2ef   :  { %v11692_v24 = vpop.f32.mrf.mxu0 }
 0x2f1   :  { %v9997_v26 = vpop.f32.mrf.mxu0 }
 0x2f2   :  { %v1443_v25 = vadd.f32 %v9997_v26, %v1339_v15 }
 0x2f3   :  { %v1423_v28 = vpop.f32.mrf.mxu0 }
 0x2f4   :  { %v1442_v16 = vadd.f32 %v1423_v28, %v1338_v11 }
 0x2f5   :  { %v10000_v32 = vpop.f32.mrf.mxu0 }
 0x2f6   :  { %v1445_v33 = vadd.f32 %v10000_v32, %v1341_v18  ;;  %v1340_v18 = vadd.f32 %v11692_v24, %v1236_v14 }
 0x2f7   :  { %v11694_v34 = vpop.f32.mrf.mxu0 }
 0x2f8   :  { %v1444_v62 = vadd.f32 %v11694_v34, %v1340_v18 }
 0x2f9   :  { %v10007_v29 = vpop.f32.mrf.mxu0 }
 0x2fa   :  { %v1547_v35 = vadd.f32 %v10007_v29, %v1443_v25 }
 0x2fb   :  { %v1527_v38 = vpop.f32.mrf.mxu0 }
 0x2fc   :  { %v1546_v25 = vadd.f32 %v1527_v38, %v1442_v16 }
 0x2fd   :  { %v10010_v39 = vpop.f32.mrf.mxu0 }
 0x2fe   :  { %v11696_v41 = vadd.f32 %v10010_v39, %v1445_v33 }
 0x2ff   :  { %v1537_v20 = vpop.f32.mrf.mxu0 }
 0x300   :  { %v1548_v29 = vadd.f32 %v1537_v20, %v1444_v62 }
 0x301   :  { %v10017_v42 = vpop.f32.mrf.mxu0 }
 0x302   :  { %v1651_v32 = vadd.f32 %v10017_v42, %v1547_v35 }
 0x303   :  { %v1631_v37 = vpop.f32.mrf.mxu0 }
 0x304   :  { %v1650_v33 = vadd.f32 %v1631_v37, %v1546_v25 }
 0x305   :  { %v10020_v43 = vpop.f32.mrf.mxu0 }
 0x306   :  { %v1653_v48 = vadd.f32 %v10020_v43, %v11696_v41 }
 0x307   :  { %v1641_v21 = vpop.f32.mrf.mxu0 }
 0x308   :  { %v1652_v27 = vadd.f32 %v1641_v21, %v1548_v29 }
 0x309   :  { %v10027_v9 = vpop.f32.mrf.mxu0 }
 0x30a   :  { %v1755_v10 = vadd.f32 %v10027_v9, %v1651_v32 }
 0x30b   :  { %v1735_v22 = vpop.f32.mrf.mxu0 }
 0x30c   :  { %v1754_v5 = vadd.f32 %v1735_v22, %v1650_v33 }
 0x30d   :  { %v10030_v45 = vpop.f32.mrf.mxu0 }
 0x30e   :  { %v1757_v44 = vadd.f32 %v10030_v45, %v1653_v48 }
 0x30f   :  { %v1745_v31 = vpop.f32.mrf.mxu0 }
 0x310   :  { %v1756_v24 = vadd.f32 %v1745_v31, %v1652_v27 }
 0x311   :  { %v10037_v12 = vpop.f32.mrf.mxu0 }
 0x312   :  { %v1859_v40 = vadd.f32 %v10037_v12, %v1755_v10 }
 0x313   :  { %v1839_v50 = vpop.f32.mrf.mxu0 }
 0x314   :  { %v1858_v28 = vadd.f32 %v1839_v50, %v1754_v5 }
 0x315   :  { %v10040_v51 = vpop.f32.mrf.mxu0 }
 0x316   :  { %v1861_v38 = vadd.f32 %v10040_v51, %v1757_v44 }
 0x317   :  { %v1849_v53 = vpop.f32.mrf.mxu0 }
 0x318   :  { %v1860_v34 = vadd.f32 %v1849_v53, %v1756_v24 }
 0x319   :  { %v10047_v54 = vpop.f32.mrf.mxu0 }
 0x31a   :  { %v1963_v8 = vadd.f32 %v10047_v54, %v1859_v40 }
 0x31b   :  { %v1943_v60 = vpop.f32.mrf.mxu0 }
 0x31c   :  { %v1962_v35 = vadd.f32 %v1943_v60, %v1858_v28 }
 0x31d   :  { %v10050_v55 = vpop.f32.mrf.mxu0 }
 0x31e   :  { %v1965_v37 = vadd.f32 %v10050_v55, %v1861_v38 }
 0x31f   :  { %v1953_v56 = vpop.f32.mrf.mxu0 }
 0x320   :  { %v1964_v4 = vadd.f32 %v1953_v56, %v1860_v34  ;;  %v11753_v34 = vpop.permute.xlu0 %2721 }
 0x321   :  { %v10057_v57 = vpop.f32.mrf.mxu0 }
 0x322   :  { %v2067_v42 = vadd.f32 %v10057_v57, %v1963_v8 }
 0x323   :  { %v2047_v58 = vpop.f32.mrf.mxu0 }
 0x324   :  { %v2066_v9 = vadd.f32 %v2047_v58, %v1962_v35 }
 0x325   :  { %v10060_v0 = vpop.f32.mrf.mxu0 }
 0x326   :  { %v2069_v41 = vadd.f32 %v10060_v0, %v1965_v37 }
 0x327   :  { %v2057_v59 = vpop.f32.mrf.mxu0 }
 0x328   :  { %v2068_v21 = vadd.f32 %v2057_v59, %v1964_v4  ;;  %v11755_v4 = vpop.permute.xlu1 %2731 }
 0x329   :  { %v10067_v61 = vpop.f32.mrf.mxu0 }
 0x32a   :  { %v2171_v20 = vadd.f32 %v10067_v61, %v2067_v42 }
 0x32b   :  { %v2151_v63 = vpop.f32.mrf.mxu0 }
 0x32c   :  { %v2170_v43 = vadd.f32 %v2151_v63, %v2066_v9 }
 0x32d   :  { %v10070_v1 = vpop.f32.mrf.mxu0 }
 0x32e   :  { %v2173_v45 = vadd.f32 %v10070_v1, %v2069_v41 }
 0x32f   :  { %v2161_v2 = vpop.f32.mrf.mxu0 }
 0x330   :  { %v2172_v31 = vadd.f32 %v2161_v2, %v2068_v21 }
 0x331   :  { %v10077_v52 = vpop.f32.mrf.mxu0 }
 0x332   :  { %v2275_v22 = vadd.f32 %v10077_v52, %v2171_v20 }
 0x333   :  { %v2255_v36 = vpop.f32.mrf.mxu0 }
 0x334   :  { %v2274_v50 = vadd.f32 %v2255_v36, %v2170_v43  ;;  %v11757_v43 = vpop.permute.xlu0 %2726 }
 0x335   :  { %v10080_v15 = vpop.f32.mrf.mxu0 }
 0x336   :  { %v2277_v51 = vadd.f32 %v10080_v15, %v2173_v45 }
 0x337   :  { %v2265_v26 = vpop.f32.mrf.mxu0 }
 0x338   :  { %v2276_v53 = vadd.f32 %v2265_v26, %v2172_v31 }
 0x339   :  { %v10087_v3 = vpop.f32.mrf.mxu0 }
 0x33a   :  { %v2379_v54 = vadd.f32 %v10087_v3, %v2275_v22 }
 0x33b   :  { %v2359_v39 = vpop.f32.mrf.mxu0 }
 0x33c   :  { %v2378_v60 = vadd.f32 %v2359_v39, %v2274_v50 }
 0x33d   :  { %v10090_v13 = vpop.f32.mrf.mxu0 }
 0x33e   :  { %v2381_v55 = vadd.f32 %v10090_v13, %v2277_v51 }
 0x33f   :  { %v2369_v46 = vpop.f32.mrf.mxu0 }
 0x340   :  { %v2380_v56 = vadd.f32 %v2369_v46, %v2276_v53 }
 0x341   :  { %v10097_v47 = vpop.f32.mrf.mxu0 }
 0x342   :  { %v2483_v57 = vadd.f32 %v10097_v47, %v2379_v54  ;;  %v11760_v54 = vpop.permute.xlu1 %2736 }
 0x343   :  { %v2463_v6 = vpop.f32.mrf.mxu0 }
 0x344   :  { %v2482_v58 = vadd.f32 %v2463_v6, %v2378_v60 }
 0x345   :  { %v10100_v12 = vpop.f32.mrf.mxu0 }
 0x346   :  { %v2485_v63 = vadd.f32 %v10100_v12, %v2381_v55  ;;  %v11764_v60 = vpop.permute.xlu1 %2684  ;;  %v2590_v55 = vld [vmem:[%s13552_s17] sm:$0x3] }
 0x347   :  { %v2473_v7 = vpop.f32.mrf.mxu0 }
 0x348   :  { %v2484_v59 = vadd.f32 %v2473_v7, %v2380_v56  ;;  %v11762_v7 = vpop.permute.xlu0 %2679 }
 0x349   :  { %v10107_v11 = vpop.f32.mrf.mxu0 }
 0x34a   :  { %v11735_v61 = vadd.f32 %v10107_v11, %v2483_v57  ;;  %v11768_v53 = vpop.permute.xlu1 %2963 }
 0x34b   :  { %v2567_v0 = vpop.f32.mrf.mxu0 }
 0x34c   :  { %v11737_v52 = vadd.f32 %v2567_v0, %v2482_v58  ;;  %v2606_v2 = vmul.f32 %v11735_v61, %v11735_v61  ;;  %v2593_v18 = vsel %vm2591_vm2, %v11735_v61, 0.0  ;;  %v11766_v57 = vpop.permute.xlu0 %2958 }
 0x34d   :  { %v10110_v1 = vpop.f32.mrf.mxu0 }
 0x34e   :  { %v2592_v36 = vsel %vm2591_vm2, %v11737_v52, 0.0  ;;  %v2605_v14 = vmul.f32 %v11737_v52, %v11737_v52  ;;  %v2589_v15 = vadd.f32 %v10110_v1, %v2485_v63  ;;  %v2610_v62 = vsel %vm2591_vm2, %v2606_v2, 0.0 }
 0x34f   :  { %v2577_v16 = vpop.f32.mrf.mxu0  ;;  %v2594_v32 = vadd.f32 %v2593_v18, %v2592_v36  ;;  %v2645_v2 = vrot.slane %v2590_v55, %v11147_v19 }
 0x350   :  { %v2609_v26 = vsel %vm2591_vm2, %v2605_v14, 0.0  ;;  %v2588_v25 = vadd.f32 %v2577_v16, %v2484_v59  ;;  %v2608_v3 = vmul.f32 %v2589_v15, %v2589_v15  ;;  %v2597_v48 = vsel %vm2591_vm2, %v2589_v15, 0.0  ;;  %v11770_v11 = vpop.permute.xlu0 %2689 }
 0x351   :  { %v2611_v29 = vadd.f32 %v2610_v62, %v2609_v26 }
 0x352   :  { %v2595_v33 = vsel %vm2591_vm2, %v2588_v25, 0.0  ;;  %v2607_v10 = vmul.f32 %v2588_v25, %v2588_v25  ;;  %v2614_v13 = vsel %vm2591_vm2, %v2608_v3, 0.0 }
 0x353   :  { %v2596_v39 = vadd.f32 %v2595_v33, %v2594_v32 }
 0x354   :  { %v2612_v5 = vsel %vm2591_vm2, %v2607_v10, 0.0  ;;  %v11777_v0 = vpop.permute.xlu0 %2968 }
 0x355   :  { %v2598_v40 = vadd.f32 %v2597_v48, %v2596_v39  ;;  %v2613_v27 = vadd.f32 %v2612_v5, %v2611_v29 }
 0x357   :  { %v2599_v44 = vrot.slane %v2598_v40, 4  ;;  %v2615_v28 = vadd.f32 %v2614_v13, %v2613_v27 }
 0x358   :  { %v11784_v33 = vpop.permute.xlu0 %3102 }
 0x359   :  { %v2600_v8 = vadd.f32 %v2599_v44, %v2598_v40  ;;  %v2616_v24 = vrot.slane %v2615_v28, 4 }
 0x35b   :  { %v2601_v46 = vrot.slane %v2600_v8, 2  ;;  %v2617_v38 = vadd.f32 %v2616_v24, %v2615_v28 }
 0x35c   :  { %v11797_v44 = vpop.permute.xlu0 %3112 }
 0x35d   :  { %v2602_v35 = vadd.f32 %v2601_v46, %v2600_v8  ;;  %v2618_v42 = vrot.slane %v2617_v38, 2 }
 0x35f   :  { %v2603_v47 = vrot.slane %v2602_v35, 1  ;;  %v2619_v37 = vadd.f32 %v2618_v42, %v2617_v38 }
 0x361   :  { %v2604_v9 = vadd.f32 %v2603_v47, %v2602_v35  ;;  %v2620_v20 = vrot.slane %v2619_v37, 1 }
 0x363   :  { %v2621_v6 = vadd.f32 %v2620_v20, %v2619_v37  ;;  %v2622_v41 = vmul.f32 0.03125, %v2604_v9 }
 0x365   :  { %v2623_v22 = vmul.f32 0.03125, %v2621_v6  ;;  %v2624_v21 = vmul.f32 %v2622_v41, %v2622_v41  ;;  %v2628_v12 = vsub.f32 %v11735_v61, %v2622_v41  ;;  %v2630_v45 = vsub.f32 %v2589_v15, %v2622_v41  ;;  %v11775_v61 = vpop.permute.xlu1 %2694 }
 0x366   :  { %v2627_v63 = vsub.f32 %v11737_v52, %v2622_v41  ;;  %v2629_v59 = vsub.f32 %v2588_v25, %v2622_v41 }
 0x367   :  { %v2625_v50 = vsub.f32 %v2623_v22, %v2624_v21 }
 0x369   :  { %v2626_v31 = vmax.f32 %v2625_v50, 0.0  ;;  %v11782_v18 = vpop.permute.xlu1 %2973  ;;  %v11840_v50 = vpop.permute.xlu0 %3352 }
 0x36b   :  { %v2631_v51 = vadd.f32 1e-05, %v2626_v31 }
 0x36d   :  { %10793 = vrsqrt.f32 %v2631_v51  ;;  %v11790_v5 = vpop.permute.xlu1 %3107 }
 0x371   :  { %v11816_v9 = vpop.permute.xlu1 %3117 }
 0x37a   :  { %v10794_v58 = vpop.eup %10793 }
 0x37b   :  { %v2633_v56 = vmul.f32 %v10794_v58, %v2590_v55  ;;  %v8853_v55 = vld [vmem:[%s13490_s7 + $0x50] sm:$0xff] }
 0x37d   :  { %v2637_v1 = vrot.slane %v2633_v56, %v11150_v23 }
 0x37f   :  { %v2638_v36 = vmul.f32 %v2637_v1, %v2627_v63  ;;  %v2639_v14 = vmul.f32 %v2637_v1, %v2628_v12  ;;  %v2640_v15 = vmul.f32 %v2637_v1, %v2629_v59  ;;  %v2641_v16 = vmul.f32 %v2637_v1, %v2630_v45 }
 0x381   :  { %v2646_v26 = vadd.f32 %v2645_v2, %v2638_v36  ;;  %v2647_v32 = vadd.f32 %v2645_v2, %v2639_v14  ;;  %v2648_v62 = vadd.f32 %v2645_v2, %v2640_v15  ;;  %v2649_v3 = vadd.f32 %v2645_v2, %v2641_v16  ;;  %v8865_v36 = vld [vmem:[%s13490_s7 + $0x70] sm:$0xff]  ;;  %v11877_v15 = vpop.permute.xlu1 %3357 }
 0x383   :  { %vm2652_vm3 = vcmp.ge.f32.partialorder %v2648_v62, 0.0  ;;  %v2654_v10 = vmul.f32 0.2, %v2646_v26  ;;  %v2655_v52 = vmul.f32 0.2, %v2647_v32  ;;  %vm2651_vm4 = vcmp.ge.f32.partialorder %v2647_v32, 0.0 }
 0x384   :  { %v2656_v25 = vmul.f32 0.2, %v2648_v62  ;;  %v2657_v29 = vmul.f32 0.2, %v2649_v3  ;;  %vm2650_vm5 = vcmp.ge.f32.partialorder %v2646_v26, 0.0  ;;  %vm2653_vm6 = vcmp.ge.f32.partialorder %v2649_v3, 0.0 }
 0x385   :  { %v11786_v39 = vsel %vm2651_vm4, %v2647_v32, %v2655_v52  ;;  %v11788_v48 = vsel %vm2650_vm5, %v2646_v26, %v2654_v10  ;;  %v8864_v52 = vld [vmem:[%s13490_s7 + $0x68] sm:$0xff] }
 0x386   :  { %13553 = vst [vmem:[#allocation6_spill] sm:$0xff] %v11786_v39  ;;  %13554 = vst [vmem:[#allocation7_spill] sm:$0xff] %v11788_v48  ;;  %v11792_v40 = vsel %vm2652_vm3, %v2648_v62, %v2656_v25  ;;  %v2663_v27 = vrot.slane %v11786_v39, 3  ;;  %v2706_v13 = vrot.slane %v11786_v39, 4  ;;  %v11800_v8 = vsel %vm2653_vm6, %v2649_v3, %v2657_v29  ;;  %v11891_v3 = vpop.permute.xlu0 %3487  ;;  %v8851_v25 = vld [vmem:[%s13490_s7 + $0x40] sm:$0xff] }
 0x387   :  { %13555 = vst [vmem:[#allocation8_spill] sm:$0xff] %v11792_v40  ;;  %v2707_v28 = vrot.slane %v11792_v40, 4  ;;  %13556 = vst [vmem:[#allocation9_spill] sm:$0xff] %v11800_v8  ;;  %v2705_v24 = vrot.slane %v11788_v48, 4  ;;  %v2662_v46 = vrot.slane %v11788_v48, 3  ;;  %v2664_v38 = vrot.slane %v11792_v40, 3 }
 0x388   :  { %v2708_v35 = vrot.slane %v11800_v8, 4  ;;  %v2665_v37 = vrot.slane %v11800_v8, 3  ;;  %v2942_v58 = vrot.slane %v11788_v48, 5  ;;  %v2945_v56 = vrot.slane %v11800_v8, 5  ;;  %13557 = vst [vmem:[#allocation10_spill] sm:$0xff] %v11891_v3 }
 0x389   :  { %v11809_v42 = vsel %vm2709_vm7, %v2705_v24, %v2706_v13  ;;  %v11820_v20 = vsel %vm2709_vm7, %v2706_v13, %v2707_v28  ;;  %v11826_v41 = vsel %vm2668_vm8, %v2662_v46, %v2663_v27  ;;  %v11832_v21 = vsel %vm2668_vm8, %v2663_v27, %v2664_v38 }
 0x38a   :  { %v11813_v47 = vsel %vm2709_vm7, %v2708_v35, %v2705_v24  ;;  %v2740_v22 = vmul.f32 %v11757_v43, %v11809_v42  ;;  %v11836_v12 = vsel %vm2668_vm8, %v2665_v37, %v2662_v46  ;;  %v2698_v45 = vmul.f32 %v11764_v60, %v11826_v41 }
 0x38b   :  { %v2739_v6 = vmul.f32 %v11753_v34, %v11813_v47  ;;  %v2697_v31 = vmul.f32 %v11762_v7, %v11836_v12  ;;  %v2741_v51 = vmul.f32 %v11755_v4, %v11820_v20  ;;  %v2699_v63 = vmul.f32 %v11770_v11, %v11832_v21 }
 0x38c   :  { %v11860_v59 = vsel %vm2709_vm7, %v2707_v28, %v2708_v35  ;;  %v3086_v1 = vrot.slane %v11788_v48, 7  ;;  %v3089_v2 = vrot.slane %v11800_v8, 7  ;;  %v11874_v14 = vsel %vm2668_vm8, %v2664_v38, %v2665_v37  ;;  %v8863_v38 = vld [vmem:[%s13490_s7 + $0x60] sm:$0xff]  ;;  %v8874_v35 = vld [vmem:[%s13490_s7 + $0x98] sm:$0xff]  ;;  %v11924_v37 = vpop.permute.xlu1 %3492 }
 0x38d   :  { %10119 = vmatprep.mubr.msk.f32.mxu1 %vm2591_vm2, %v2739_v6  ;;  %10133 = vmatprep.mubr.msk.f32.mxu0 %vm2591_vm2, %v2697_v31  ;;  %v2943_v16 = vrot.slane %v11786_v39, 5  ;;  %v2742_v26 = vmul.f32 %v11760_v54, %v11860_v59  ;;  %v11888_v32 = vsel %vm2946_vm9, %v2945_v56, %v2942_v58  ;;  %v3087_v62 = vrot.slane %v11786_v39, 7  ;;  %13558 = vst [vmem:[#allocation11_spill] sm:$0xff] %v11924_v37  ;;  %v11936_v31 = vpop.permute.xlu0 %3362 }
 0x38e   :  { %10120 = vmatmul.mubr.msk.f32.vlgmr.msra.gmra.mxu1 %vm2591_vm2, %v2740_v22  ;;  %10134 = vmatmul.mubr.msk.f32.vlgmr.msra.gmra.mxu0 %vm2591_vm2, %v2698_v45  ;;  %v2944_v10 = vrot.slane %v11792_v40, 5  ;;  %v3094_v29 = vsel %vm3090_vm10, %v3089_v2, %v3086_v1  ;;  %v3088_v27 = vrot.slane %v11792_v40, 7  ;;  %v2976_v28 = vmul.f32 %v11766_v57, %v11888_v32 }
 0x38f   :  { %10140 = vmatpush3.msra.mxu1 %v11716_v49  ;;  %10122 = vmatprep.mubr.msk.f32.mxu1 %vm2591_vm2, %v2741_v51  ;;  %v8852_v49 = vld [vmem:[%s13490_s7 + $0x48] sm:$0xff]  ;;  %v11911_v13 = vsel %vm2946_vm9, %v2942_v58, %v2943_v16  ;;  %v3093_v24 = vsel %vm3090_vm10, %v3086_v1, %v3087_v62  ;;  %v3120_v46 = vmul.f32 %v11784_v33, %v3094_v29  ;;  %v3337_v1 = vrot.slane %v11786_v39, 1 }
 0x390   :  { %10136 = vmatprep.mubr.msk.f32.mxu0 %vm2591_vm2, %v2699_v63  ;;  %10141 = vmatprep.subr.mxu1 %v8853_v55  ;;  %v11928_v6 = vsel %vm2946_vm9, %v2943_v16, %v2944_v10  ;;  %v2977_v22 = vmul.f32 %v11768_v53, %v11911_v13  ;;  %v3092_v45 = vsel %vm3090_vm10, %v3087_v62, %v3088_v27  ;;  %v8873_v63 = vld [vmem:[%s13490_s7 + $0x90] sm:$0xff]  ;;  %v3336_v16 = vrot.slane %v11788_v48, 1  ;;  %v8872_v62 = vld [vmem:[%s13490_s7 + $0x88] sm:$0xff] }
 0x391   :  { %10154 = vmatpush3.msra.mxu0 %v11722_v30  ;;  %10142 = vmatpush3.msra.mxu1 %v8853_v55  ;;  %v2700_v30 = vmul.f32 %v11775_v61, %v11874_v14  ;;  %v3121_v51 = vmul.f32 %v11790_v5, %v3093_v24  ;;  %v8886_v55 = vld [vmem:[%s13490_s7 + $0xb8] sm:$0xff]  ;;  %v2978_v58 = vmul.f32 %v11777_v0, %v11928_v6  ;;  %v3339_v24 = vrot.slane %v11800_v8, 1 }
 0x392   :  { %10155 = vmatprep.subr.mxu0 %v8865_v36  ;;  %10143 = vmatprep.subr.mxu1 %v8852_v49 }
 0x393   :  { %10156 = vmatpush3.msra.mxu0 %v8865_v36  ;;  %10123 = vmatmul.mubr.msk.f32.gmra.mxu1 %vm2591_vm2, %v2742_v26  ;;  %v3122_v36 = vmul.f32 %v11797_v44, %v3092_v45  ;;  %v8885_v26 = vld [vmem:[%s13490_s7 + $0xb0] sm:$0xff] }
 0x394   :  { %10137 = vmatmul.mubr.msk.f32.gmra.mxu0 %vm2591_vm2, %v2700_v30  ;;  %10144 = vmatpush3.msra.mxu1 %v8852_v49  ;;  %v11955_v49 = vsel %vm2946_vm9, %v2944_v10, %v2945_v56  ;;  %v3091_v56 = vsel %vm3090_vm10, %v3088_v27, %v3089_v2  ;;  %v11970_v10 = vpop.permute.xlu1 %3367  ;;  %v3338_v30 = vrot.slane %v11792_v40, 1  ;;  %v8884_v2 = vld [vmem:[%s13490_s7 + $0xa8] sm:$0xff]  ;;  %v8871_v27 = vld [vmem:[%s13490_s7 + $0x80] sm:$0xff] }
 0x395   :  { %10157 = vmatprep.subr.mxu0 %v8864_v52  ;;  %10145 = vmatprep.subr.mxu1 %v8851_v25  ;;  %v3123_v29 = vmul.f32 %v11816_v9, %v3091_v56  ;;  %v3344_v56 = vsel %vm3340_vm11, %v3339_v24, %v3336_v16 }
 0x396   :  { %10147 = vmatprep.mubr.msk.f32.mxu1 %vm2591_vm2, %v2976_v28  ;;  %10158 = vmatpush3.msra.mxu0 %v8864_v52  ;;  %v2979_v52 = vmul.f32 %v11782_v18, %v11955_v49  ;;  %v3343_v28 = vsel %vm3340_vm11, %v3336_v16, %v3337_v1  ;;  %v8895_v16 = vld [vmem:[%s13490_s7 + $0xc0] sm:$0xff] }
 0x397   :  { %10161 = vmatprep.mubr.msk.f32.mxu0 %vm2591_vm2, %v3120_v46  ;;  %10146 = vmatpush3.msra.mxu1 %v8851_v25  ;;  %v11976_v25 = vpop.permute.xlu0 %3497  ;;  %v3342_v46 = vsel %vm3340_vm11, %v3337_v1, %v3338_v30  ;;  %v8897_v1 = vld [vmem:[%s13490_s7 + $0xd0] sm:$0xff] }
 0x398   :  { %10159 = vmatprep.subr.mxu0 %v8863_v38  ;;  %10167 = vmatprep.subr.mxu1 %v8874_v35  ;;  %13559 = vst [vmem:[#allocation12_spill] sm:$0xff] %v11976_v25  ;;  %v11999_v45 = vpop.permute.xlu1 %3502 }
 0x399   :  { %10160 = vmatpush3.msra.mxu0 %v8863_v38  ;;  %10148 = vmatmul.mubr.msk.f32.vlgmr.msra.gmra.mxu1 %vm2591_vm2, %v2977_v22  ;;  %v3370_v38 = vmul.f32 %v11840_v50, %v3343_v28  ;;  %v8898_v22 = vld [vmem:[%s13490_s7 + $0xd8] sm:$0xff]  ;;  %13560 = vst [vmem:[#allocation13_spill] sm:$0xff] %v11999_v45 }
 0x39a   :  { %10162 = vmatmul.mubr.msk.f32.vlgmr.msra.gmra.mxu0 %vm2591_vm2, %v3121_v51  ;;  %10168 = vmatpush3.msra.mxu1 %v8874_v35  ;;  %v8883_v35 = vld [vmem:[%s13490_s7 + $0xa0] sm:$0xff]  ;;  %v3341_v51 = vsel %vm3340_vm11, %v3338_v30, %v3339_v24 }
 0x39b   :  { %10181 = vmatprep.subr.mxu0 %v8886_v55  ;;  %10150 = vmatprep.mubr.msk.f32.mxu1 %vm2591_vm2, %v2978_v58  ;;  %v12007_v58 = vpop.permute.xlu0 %3622  ;;  %v8907_v24 = vld [vmem:[%s13490_s7 + $0xe0] sm:$0xff] }
 0x39c   :  { %10164 = vmatprep.mubr.msk.f32.mxu0 %vm2591_vm2, %v3122_v36  ;;  %10169 = vmatprep.subr.mxu1 %v8873_v63  ;;  %13561 = vst [vmem:[#allocation14_spill] sm:$0xff] %v12007_v58  ;;  %v3372_v36 = vmul.f32 %v11936_v31, %v3341_v51  ;;  %v12029_v30 = vpop.permute.xlu1 %3627  ;;  %v3640_v28 = vmul.f32 %v12007_v58, %v11809_v42 }
 0x39d   :  { %10182 = vmatpush3.msra.mxu0 %v8886_v55  ;;  %10170 = vmatpush3.msra.mxu1 %v8873_v63  ;;  %v3371_v55 = vmul.f32 %v11877_v15, %v3342_v46  ;;  %v8910_v63 = vld [vmem:[%s13490_s7 + $0xf8] sm:$0xff]  ;;  %13562 = vst [vmem:[#allocation15_spill] sm:$0xff] %v12029_v30  ;;  %v3641_v42 = vmul.f32 %v12029_v30, %v11820_v20  ;;  %v8920_v20 = vld [vmem:[%s13490_s7 + $0x108] sm:$0xff] }
 0x39e   :  { %10183 = vmatprep.subr.mxu0 %v8885_v26  ;;  %10171 = vmatprep.subr.mxu1 %v8872_v62  ;;  %v8922_v46 = vld [vmem:[%s13490_s7 + $0x118] sm:$0xff] }
 0x39f   :  { %10184 = vmatpush3.msra.mxu0 %v8885_v26  ;;  %10151 = vmatmul.mubr.msk.f32.gmra.mxu1 %vm2591_vm2, %v2979_v52  ;;  %v8909_v26 = vld [vmem:[%s13490_s7 + $0xf0] sm:$0xff]  ;;  %v12032_v52 = vpop.permute.xlu0 %3757 }
 0x3a0   :  { %10165 = vmatmul.mubr.msk.f32.gmra.mxu0 %vm2591_vm2, %v3123_v29  ;;  %10172 = vmatpush3.msra.mxu1 %v8872_v62  ;;  %v8896_v62 = vld [vmem:[%s13490_s7 + $0xc8] sm:$0xff]  ;;  %13563 = vst [vmem:[#allocation16_spill] sm:$0xff] %v12032_v52  ;;  %v3373_v29 = vmul.f32 %v11970_v10, %v3344_v56 }
 0x3a1   :  { %10185 = vmatprep.subr.mxu0 %v8884_v2  ;;  %10173 = vmatprep.subr.mxu1 %v8871_v27  ;;  %v8928_v56 = vld [vmem:[%s13492_s9 + $0x28] sm:$0xff] }
 0x3a2   :  { %10175 = vmatprep.mubr.msk.f32.mxu1 %vm2591_vm2, %v11788_v48  ;;  %10186 = vmatpush3.msra.mxu0 %v8884_v2  ;;  %v8908_v2 = vld [vmem:[%s13490_s7 + $0xe8] sm:$0xff] }
 0x3a3   :  { %10189 = vmatprep.mubr.msk.f32.mxu0 %vm2591_vm2, %v3370_v38  ;;  %10174 = vmatpush3.msra.mxu1 %v8871_v27  ;;  %v3505_v27 = vmul.f32 %v11891_v3, %v11826_v41  ;;  %v12054_v38 = vpop.permute.xlu1 %3762  ;;  %v3506_v41 = vmul.f32 %v11924_v37, %v11832_v21  ;;  %v8921_v21 = vld [vmem:[%s13490_s7 + $0x110] sm:$0xff] }
 0x3a4   :  { %10187 = vmatprep.subr.mxu0 %v8883_v35  ;;  %10195 = vmatprep.subr.mxu1 %v8898_v22  ;;  %13564 = vst [vmem:[#allocation17_spill] sm:$0xff] %v12054_v38 }
 0x3a5   :  { %10188 = vmatpush3.msra.mxu0 %v8883_v35  ;;  %10176 = vmatmul.mubr.msk.f32.vlgmr.msra.gmra.mxu1 %vm2591_vm2, %v11786_v39  ;;  %v12062_v35 = vpop.permute.xlu0 %3632 }
 0x3a6   :  { %10190 = vmatmul.mubr.msk.f32.vlgmr.msra.gmra.mxu0 %vm2591_vm2, %v3371_v55  ;;  %10196 = vmatpush3.msra.mxu1 %v8898_v22  ;;  %13565 = vst [vmem:[#allocation18_spill] sm:$0xff] %v12062_v35  ;;  %v3507_v22 = vmul.f32 %v11976_v25, %v11874_v14  ;;  %v3642_v51 = vmul.f32 %v12062_v35, %v11860_v59 }
 0x3a7   :  { %10209 = vmatprep.subr.mxu0 %v8910_v63  ;;  %10178 = vmatprep.mubr.msk.f32.mxu1 %vm2591_vm2, %v11792_v40  ;;  %v12078_v55 = vpop.permute.xlu1 %3637  ;;  %v3508_v59 = vmul.f32 %v11999_v45, %v11836_v12  ;;  %v3776_v12 = vmul.f32 %v12054_v38, %v11928_v6  ;;  %v8930_v6 = vld [vmem:[%s13492_s9 + $0x38] sm:$0xff] }
 0x3a8   :  { %10192 = vmatprep.mubr.msk.f32.mxu0 %vm2591_vm2, %v3372_v36  ;;  %10197 = vmatprep.subr.mxu1 %v8897_v1  ;;  %13566 = vst [vmem:[#allocation19_spill] sm:$0xff] %v12078_v55  ;;  %v3643_v14 = vmul.f32 %v12078_v55, %v11813_v47 }
 0x3a9   :  { %10210 = vmatpush3.msra.mxu0 %v8910_v63  ;;  %10198 = vmatpush3.msra.mxu1 %v8897_v1  ;;  %v8919_v63 = vld [vmem:[%s13490_s7 + $0x100] sm:$0xff]  ;;  %v3775_v1 = vmul.f32 %v12032_v52, %v11911_v13  ;;  %v12093_v36 = vpop.permute.xlu0 %3767  ;;  %s10846_s7 = smov [#allocation3]  }
 0x3aa   :  { %10211 = vmatprep.subr.mxu0 %v8909_v26  ;;  %10199 = vmatprep.subr.mxu1 %v8896_v62  ;;  %13567 = vst [vmem:[#allocation20_spill] sm:$0xff] %v12093_v36  ;;  %v3777_v47 = vmul.f32 %v12093_v36, %v11955_v49  ;;  %v8929_v49 = vld [vmem:[%s13492_s9 + $0x30] sm:$0xff] }
 0x3ab   :  { %10212 = vmatpush3.msra.mxu0 %v8909_v26  ;;  %10179 = vmatmul.mubr.msk.f32.gmra.mxu1 %vm2591_vm2, %v11800_v8  ;;  %v12099_v26 = vpop.permute.xlu1 %3772 }
 0x3ac   :  { %10193 = vmatmul.mubr.msk.f32.gmra.mxu0 %vm2591_vm2, %v3373_v29  ;;  %10200 = vmatpush3.msra.mxu1 %v8896_v62  ;;  %13568 = vst [vmem:[#allocation21_spill] sm:$0xff] %v12099_v26  ;;  %v3778_v13 = vmul.f32 %v12099_v26, %v11888_v32  ;;  %v3971_v62 = vld [vmem:[%s13492_s9 + $0x18] sm:$0xff]  ;;  %v3970_v32 = vld [vmem:[%s13492_s9 + $0x10] sm:$0xff]  ;;  %v3969_v29 = vld [vmem:[%s13492_s9 + $0x8] sm:$0xff] }
 0x3ad   :  { %10213 = vmatprep.subr.mxu0 %v8908_v2  ;;  %10201 = vmatprep.subr.mxu1 %v8895_v16 }
 0x3ae   :  { %10203 = vmatprep.mubr.msk.f32.mxu1 %vm2591_vm2, %v3505_v27  ;;  %10214 = vmatpush3.msra.mxu0 %v8908_v2  ;;  %v8927_v2 = vld [vmem:[%s13492_s9 + $0x20] sm:$0xff]  ;;  %v12132_v27 = vld [vmem:[%s13492_s9 + $0x58] sm:$0xff] }
 0x3af   :  { %10217 = vmatprep.mubr.msk.f32.mxu0 %vm2591_vm2, %v3640_v28  ;;  %10202 = vmatpush3.msra.mxu1 %v8895_v16  ;;  %v3968_v16 = vld [vmem:[%s13492_s9] sm:$0xff]  ;;  %v12137_v28 = vld [vmem:[%s13492_s9 + $0x78] sm:$0xff] }
 0x3b0   :  { %10215 = vmatprep.subr.mxu0 %v8907_v24  ;;  %10223 = vmatprep.subr.mxu1 %v8922_v46 }
 0x3b1   :  { %10216 = vmatpush3.msra.mxu0 %v8907_v24  ;;  %10204 = vmatmul.mubr.msk.f32.vlgmr.msra.gmra.mxu1 %vm2591_vm2, %v3506_v41 }
 0x3b2   :  { %10218 = vmatmul.mubr.msk.f32.vlgmr.msra.gmra.mxu0 %vm2591_vm2, %v3641_v42  ;;  %10224 = vmatpush3.msra.mxu1 %v8922_v46 }
 0x3b3   :  { %10206 = vmatprep.mubr.msk.f32.mxu1 %vm2591_vm2, %v3507_v22  ;;  %10220 = vmatprep.mubr.msk.f32.mxu0 %vm2591_vm2, %v3642_v51 }
 0x3b4   :  { %10225 = vmatprep.subr.mxu1 %v8921_v21  ;;  %10237 = vmatprep.subr.mxu0 %v8930_v6 }
 0x3b5   :  { %10226 = vmatpush3.msra.mxu1 %v8921_v21  ;;  %10238 = vmatpush3.msra.mxu0 %v8930_v6 }
 0x3b6   :  { %10227 = vmatprep.subr.mxu1 %v8920_v20  ;;  %10207 = vmatmul.mubr.msk.f32.gmra.mxu1 %vm2591_vm2, %v3508_v59 }
 0x3b7   :  { %10221 = vmatmul.mubr.msk.f32.gmra.mxu0 %vm2591_vm2, %v3643_v14  ;;  %10228 = vmatpush3.msra.mxu1 %v8920_v20 }
 0x3b8   :  { %10229 = vmatprep.subr.mxu1 %v8919_v63  ;;  %10231 = vmatprep.mubr.msk.f32.mxu1 %vm2591_vm2, %v3775_v1 }
 0x3b9   :  { %10230 = vmatpush3.msra.mxu1 %v8919_v63  ;;  %10239 = vmatprep.subr.mxu0 %v8929_v49 }
 0x3ba   :  { %10232 = vmatmul.mubr.msk.f32.vlgmr.msra.gmra.mxu1 %vm2591_vm2, %v3776_v12  ;;  %10251 = vmatprep.subr.mxu1 %v3971_v62 }
 0x3bb   :  { %10234 = vmatprep.mubr.msk.f32.mxu1 %vm2591_vm2, %v3777_v47  ;;  %10252 = vmatpush3.msra.mxu1 %v3971_v62 }
 0x3bc   :  { %10253 = vmatprep.subr.mxu1 %v3970_v32  ;;  %10240 = vmatpush3.msra.mxu0 %v8929_v49 }
 0x3bd   :  { %10254 = vmatpush3.msra.mxu1 %v3970_v32  ;;  %10241 = vmatprep.subr.mxu0 %v8928_v56 }
 0x3be   :  { %10235 = vmatmul.mubr.msk.f32.gmra.mxu1 %vm2591_vm2, %v3778_v13  ;;  %10255 = vmatprep.subr.mxu1 %v3969_v29 }
 0x3bf   :  { %10242 = vmatpush3.msra.mxu0 %v8928_v56  ;;  %10256 = vmatpush3.msra.mxu1 %v3969_v29 }
 0x3c0   :  { %10243 = vmatprep.subr.mxu0 %v8927_v2  ;;  %10257 = vmatprep.subr.mxu1 %v3968_v16 }
 0x3c1   :  { %10244 = vmatpush3.msra.mxu0 %v8927_v2  ;;  %10258 = vmatpush3.msra.mxu1 %v3968_v16 }
 0x3c2   :  { %10265 = vmatprep.subr.mxu0 %v12132_v27  ;;  %10279 = vmatprep.subr.mxu1 %v12137_v28 }
 0x44e   :  { %v10121_v24 = vpop.f32.mrf.mxu1  ;;  %v10135_v46 = vpop.f32.mrf.mxu0 }
 0x44f   :  { %v2929_v32 = vadd.f32 %v10135_v46, %v10121_v24 }
 0x450   :  { %v2826_v41 = vpop.f32.mrf.mxu1  ;;  %v2923_v42 = vpop.f32.mrf.mxu0 }
 0x451   :  { %v2924_v2 = vadd.f32 %v2923_v42, %v2826_v41 }
 0x453   :  { %v10124_v22 = vpop.f32.mrf.mxu1 }
 0x454   :  { %v10138_v51 = vpop.f32.mrf.mxu0 }
 0x455   :  { %v2836_v21 = vpop.f32.mrf.mxu1  ;;  %v2939_v8 = vadd.f32 %v10138_v51, %v10124_v22 }
 0x456   :  { %v2933_v20 = vpop.f32.mrf.mxu0 }
 0x457   :  { %v2934_v48 = vadd.f32 %v2933_v20, %v2836_v21 }
 0x459   :  { %v10149_v59 = vpop.f32.mrf.mxu1 }
 0x45a   :  { %v10163_v14 = vpop.f32.mrf.mxu0  ;;  %v3083_v16 = vadd.f32 %v10149_v59, %v2929_v32 }
 0x45b   :  { %v3063_v63 = vpop.f32.mrf.mxu1 }
 0x45c   :  { %v3207_v1 = vpop.f32.mrf.mxu0  ;;  %v3082_v40 = vadd.f32 %v3063_v63, %v2924_v2  ;;  %v3227_v36 = vadd.f32 %v10163_v14, %v3083_v16 }
 0x45e   :  { %v3226_v35 = vadd.f32 %v3207_v1, %v3082_v40 }
 0x45f   :  { %v10152_v12 = vpop.f32.mrf.mxu1 }
 0x460   :  { %v10166_v47 = vpop.f32.mrf.mxu0  ;;  %v3085_v38 = vadd.f32 %v10152_v12, %v2939_v8 }
 0x461   :  { %v3073_v13 = vpop.f32.mrf.mxu1 }
 0x462   :  { %v3217_v6 = vpop.f32.mrf.mxu0  ;;  %v3084_v55 = vadd.f32 %v3073_v13, %v2934_v48  ;;  %v3229_v30 = vadd.f32 %v10166_v47, %v3085_v38 }
 0x464   :  { %v3228_v24 = vadd.f32 %v3217_v6, %v3084_v55 }
 0x465   :  { %v10177_v62 = vpop.f32.mrf.mxu1 }
 0x466   :  { %v10191_v49 = vpop.f32.mrf.mxu0  ;;  %v3333_v25 = vadd.f32 %v10177_v62, %v3227_v36 }
 0x467   :  { %v3313_v56 = vpop.f32.mrf.mxu1 }
 0x468   :  { %v3457_v29 = vpop.f32.mrf.mxu0  ;;  %v3332_v37 = vadd.f32 %v3313_v56, %v3226_v35  ;;  %v3477_v3 = vadd.f32 %v10191_v49, %v3333_v25 }
 0x46a   :  { %v3476_v51 = vadd.f32 %v3457_v29, %v3332_v37 }
 0x46b   :  { %v10180_v39 = vpop.f32.mrf.mxu1 }
 0x46c   :  { %v10194_v26 = vpop.f32.mrf.mxu0  ;;  %v3335_v41 = vadd.f32 %v10180_v39, %v3229_v30 }
 0x46d   :  { %v3323_v52 = vpop.f32.mrf.mxu1 }
 0x46e   :  { %v3467_v45 = vpop.f32.mrf.mxu0  ;;  %v3334_v22 = vadd.f32 %v3323_v52, %v3228_v24  ;;  %v3479_v14 = vadd.f32 %v10194_v26, %v3335_v41 }
 0x470   :  { %v3478_v63 = vadd.f32 %v3467_v45, %v3334_v22 }
 0x471   :  { %v10205_v58 = vpop.f32.mrf.mxu1 }
 0x472   :  { %v10219_v46 = vpop.f32.mrf.mxu0  ;;  %v3612_v59 = vadd.f32 %v10205_v58, %v3477_v3 }
 0x473   :  { %v3592_v42 = vpop.f32.mrf.mxu1 }
 0x474   :  { %v3727_v21 = vpop.f32.mrf.mxu0  ;;  %v3611_v8 = vadd.f32 %v3592_v42, %v3476_v51  ;;  %v3747_v12 = vadd.f32 %v10219_v46, %v3612_v59 }
 0x476   :  { %v10208_v20 = vpop.f32.mrf.mxu1  ;;  %v3746_v1 = vadd.f32 %v3727_v21, %v3611_v8 }
 0x477   :  { %v3614_v40 = vadd.f32 %v10208_v20, %v3479_v14  ;;  %v10222_v36 = vpop.f32.mrf.mxu0 }
 0x478   :  { %v3602_v48 = vpop.f32.mrf.mxu1 }
 0x479   :  { %v3613_v38 = vadd.f32 %v3602_v48, %v3478_v63  ;;  %v3749_v25 = vadd.f32 %v10222_v36, %v3614_v40  ;;  %v3737_v39 = vpop.f32.mrf.mxu0 }
 0x47a   :  { %v10233_v35 = vpop.f32.mrf.mxu1 }
 0x47b   :  { %v3882_v55 = vadd.f32 %v10233_v35, %v3747_v12  ;;  %v3748_v52 = vadd.f32 %v3737_v39, %v3613_v38 }
 0x47c   :  { %v3862_v47 = vpop.f32.mrf.mxu1 }
 0x47d   :  { %v3881_v30 = vadd.f32 %v3862_v47, %v3746_v1  ;;  %v3900_v3 = vmul.f32 %v3882_v55, %v3882_v55  ;;  %v3887_v6 = vsel %vm2591_vm2, %v3882_v55, 0.0 }
 0x47e   :  { %v10236_v37 = vpop.f32.mrf.mxu1 }
 0x47f   :  { %v3886_v58 = vsel %vm2591_vm2, %v3881_v30, 0.0  ;;  %v3899_v26 = vmul.f32 %v3881_v30, %v3881_v30  ;;  %v3884_v13 = vadd.f32 %v10236_v37, %v3749_v25  ;;  %v3904_v56 = vsel %vm2591_vm2, %v3900_v3, 0.0 }
 0x480   :  { %v3872_v45 = vpop.f32.mrf.mxu1  ;;  %v3888_v32 = vadd.f32 %v3887_v6, %v3886_v58 }
 0x481   :  { %v3903_v62 = vsel %vm2591_vm2, %v3899_v26, 0.0  ;;  %v3883_v49 = vadd.f32 %v3872_v45, %v3748_v52  ;;  %v3902_v29 = vmul.f32 %v3884_v13, %v3884_v13  ;;  %v3891_v41 = vsel %vm2591_vm2, %v3884_v13, 0.0  ;;  %v3885_v26 = vld [vmem:[%s13491_s8] sm:$0x3] }
 0x482   :  { %v3905_v24 = vadd.f32 %v3904_v56, %v3903_v62 }
 0x483   :  { %v3889_v2 = vsel %vm2591_vm2, %v3883_v49, 0.0  ;;  %v3901_v16 = vmul.f32 %v3883_v49, %v3883_v49  ;;  %v3908_v59 = vsel %vm2591_vm2, %v3902_v29, 0.0 }
 0x484   :  { %v3890_v46 = vadd.f32 %v3889_v2, %v3888_v32  ;;  %v3939_v32 = vrot.slane %v3885_v26, %v11147_v19 }
 0x485   :  { %v3906_v42 = vsel %vm2591_vm2, %v3901_v16, 0.0 }
 0x486   :  { %v3892_v22 = vadd.f32 %v3891_v41, %v3890_v46  ;;  %v3907_v51 = vadd.f32 %v3906_v42, %v3905_v24 }
 0x488   :  { %v3893_v21 = vrot.slane %v3892_v22, 4  ;;  %v3909_v20 = vadd.f32 %v3908_v59, %v3907_v51 }
 0x48a   :  { %v3894_v14 = vadd.f32 %v3893_v21, %v3892_v22  ;;  %v3910_v8 = vrot.slane %v3909_v20, 4 }
 0x48c   :  { %v3895_v63 = vrot.slane %v3894_v14, 2  ;;  %v3911_v48 = vadd.f32 %v3910_v8, %v3909_v20 }
 0x48e   :  { %v3896_v12 = vadd.f32 %v3895_v63, %v3894_v14  ;;  %v3912_v40 = vrot.slane %v3911_v48, 2 }
 0x490   :  { %v3897_v36 = vrot.slane %v3896_v12, 1  ;;  %v3913_v38 = vadd.f32 %v3912_v40, %v3911_v48 }
 0x492   :  { %v3898_v35 = vadd.f32 %v3897_v36, %v3896_v12  ;;  %v3914_v1 = vrot.slane %v3913_v38, 1 }
 0x494   :  { %v3915_v47 = vadd.f32 %v3914_v1, %v3913_v38  ;;  %v3916_v25 = vmul.f32 0.03125, %v3898_v35 }
 0x496   :  { %v3917_v39 = vmul.f32 0.03125, %v3915_v47  ;;  %v3918_v52 = vmul.f32 %v3916_v25, %v3916_v25  ;;  %v3921_v62 = vsub.f32 %v3881_v30, %v3916_v25  ;;  %v3922_v56 = vsub.f32 %v3882_v55, %v3916_v25 }
 0x497   :  { %v3923_v29 = vsub.f32 %v3883_v49, %v3916_v25  ;;  %v3924_v2 = vsub.f32 %v3884_v13, %v3916_v25 }
 0x498   :  { %v3919_v37 = vsub.f32 %v3917_v39, %v3918_v52 }
 0x49a   :  { %v3920_v3 = vmax.f32 %v3919_v37, 0.0 }
 0x49c   :  { %v3925_v58 = vadd.f32 1e-05, %v3920_v3 }
 0x49e   :  { %10795 = vrsqrt.f32 %v3925_v58 }
 0x4ab   :  { %v10796_v45 = vpop.eup %10795 }
 0x4ac   :  { %v3927_v6 = vmul.f32 %v10796_v45, %v3885_v26 }
 0x4ae   :  { %v3931_v16 = vrot.slane %v3927_v6, %v11150_v23 }
 0x4b0   :  { %v3932_v24 = vmul.f32 %v3931_v16, %v3921_v62  ;;  %v3933_v46 = vmul.f32 %v3931_v16, %v3922_v56  ;;  %v3934_v41 = vmul.f32 %v3931_v16, %v3923_v29  ;;  %v3935_v42 = vmul.f32 %v3931_v16, %v3924_v2  ;;  %v8941_v56 = vld [vmem:[%s13492_s9 + $0x50] sm:$0xff] }
 0x4b2   :  { %v3940_v22 = vadd.f32 %v3939_v32, %v3932_v24  ;;  %v3941_v51 = vadd.f32 %v3939_v32, %v3933_v46  ;;  %v3942_v59 = vadd.f32 %v3939_v32, %v3934_v41  ;;  %v3943_v21 = vadd.f32 %v3939_v32, %v3935_v42  ;;  %v8949_v41 = vld [vmem:[%s13492_s9 + $0x70] sm:$0xff]  ;;  %v8940_v42 = vld [vmem:[%s13492_s9 + $0x48] sm:$0xff] }
 0x4b4   :  { %vm3945_vm12 = vcmp.ge.f32.partialorder %v3941_v51, 0.0  ;;  %vm3946_vm13 = vcmp.ge.f32.partialorder %v3942_v59, 0.0  ;;  %v3949_v20 = vmul.f32 0.2, %v3941_v51  ;;  %v3950_v14 = vmul.f32 0.2, %v3942_v59 }
 0x4b5   :  { %vm3944_vm14 = vcmp.ge.f32.partialorder %v3940_v22, 0.0  ;;  %vm3947_vm15 = vcmp.ge.f32.partialorder %v3943_v21, 0.0  ;;  %v3948_v30 = vmul.f32 0.2, %v3940_v22  ;;  %v3951_v55 = vmul.f32 0.2, %v3943_v21 }
 0x4b6   :  { %v12154_v49 = vsel %vm3945_vm12, %v3941_v51, %v3949_v20  ;;  %v12156_v13 = vsel %vm3946_vm13, %v3942_v59, %v3950_v14 }
 0x4b7   :  { %v12158_v8 = vsel %vm3944_vm14, %v3940_v22, %v3948_v30  ;;  %v12160_v63 = vsel %vm3947_vm15, %v3943_v21, %v3951_v55  ;;  %v3973_v48 = vrot.slane %v12154_v49, 4  ;;  %v3957_v12 = vrot.slane %v12154_v49, 3  ;;  %v8948_v30 = vld [vmem:[%s13492_s9 + $0x68] sm:$0xff] }
 0x4b8   :  { %v3972_v40 = vrot.slane %v12158_v8, 4  ;;  %v3975_v36 = vrot.slane %v12160_v63, 4  ;;  %v3956_v38 = vrot.slane %v12158_v8, 3  ;;  %v3959_v35 = vrot.slane %v12160_v63, 3 }
 0x4b9   :  { %v3974_v1 = vrot.slane %v12156_v13, 4  ;;  %v3958_v47 = vrot.slane %v12156_v13, 3  ;;  %v4183_v29 = vrot.slane %v12158_v8, 5  ;;  %v4186_v2 = vrot.slane %v12160_v63, 5 }
 0x4ba   :  { %v12172_v25 = vsel %vm2709_vm7, %v3972_v40, %v3973_v48  ;;  %v12176_v39 = vsel %vm2709_vm7, %v3975_v36, %v3972_v40  ;;  %v12180_v52 = vsel %vm2668_vm8, %v3956_v38, %v3957_v12  ;;  %v12184_v37 = vsel %vm2668_vm8, %v3959_v35, %v3956_v38 }
 0x4bb   :  { %v3980_v3 = vmul.f32 %v12176_v39, %v11753_v34  ;;  %v3964_v58 = vmul.f32 %v12184_v37, %v11762_v7  ;;  %v3981_v26 = vmul.f32 %v12172_v25, %v11757_v43  ;;  %v3965_v45 = vmul.f32 %v12180_v52, %v11764_v60 }
 0x4bc   :  { %v12196_v6 = vsel %vm2709_vm7, %v3973_v48, %v3974_v1  ;;  %v12200_v62 = vsel %vm2668_vm8, %v3957_v12, %v3958_v47  ;;  %v12217_v24 = vsel %vm2709_vm7, %v3974_v1, %v3975_v36  ;;  %v4301_v46 = vrot.slane %v12158_v8, 7  ;;  %v8947_v1 = vld [vmem:[%s13492_s9 + $0x60] sm:$0xff] }
 0x4bd   :  { %10245 = vmatprep.mubr.msk.f32.mxu0 %vm2591_vm2, %v3980_v3  ;;  %10259 = vmatprep.mubr.msk.f32.mxu1 %vm2591_vm2, %v3964_v58  ;;  %v3982_v32 = vmul.f32 %v12196_v6, %v11755_v4  ;;  %v3966_v16 = vmul.f32 %v12200_v62, %v11770_v11  ;;  %v12230_v22 = vsel %vm2668_vm8, %v3958_v47, %v3959_v35  ;;  %v4304_v51 = vrot.slane %v12160_v63, 7  ;;  %v8958_v47 = vld [vmem:[%s13492_s9 + $0x98] sm:$0xff] }
 0x4be   :  { %10246 = vmatmul.mubr.msk.f32.vlgmr.msra.gmra.mxu0 %vm2591_vm2, %v3981_v26  ;;  %10260 = vmatmul.mubr.msk.f32.vlgmr.msra.gmra.mxu1 %vm2591_vm2, %v3965_v45  ;;  %v3983_v59 = vmul.f32 %v12217_v24, %v11760_v54  ;;  %v12240_v21 = vsel %vm2946_vm9, %v4186_v2, %v4183_v29  ;;  %v4302_v20 = vrot.slane %v12154_v49, 7  ;;  %v3967_v14 = vmul.f32 %v12230_v22, %v11775_v61 }
 0x4bf   :  { %10266 = vmatpush3.msra.mxu0 %v12132_v27  ;;  %10248 = vmatprep.mubr.msk.f32.mxu0 %vm2591_vm2, %v3982_v32  ;;  %v4184_v27 = vrot.slane %v12154_v49, 5  ;;  %v4308_v55 = vsel %vm3090_vm10, %v4304_v51, %v4301_v46  ;;  %v4185_v48 = vrot.slane %v12156_v13, 5  ;;  %v4303_v12 = vrot.slane %v12156_v13, 7  ;;  %v8966_v32 = vld [vmem:[%s13492_s9 + $0xb8] sm:$0xff] }
 0x4c0   :  { %10262 = vmatprep.mubr.msk.f32.mxu1 %vm2591_vm2, %v3966_v16  ;;  %10267 = vmatprep.subr.mxu0 %v8941_v56  ;;  %v4191_v36 = vmul.f32 %v12240_v21, %v11766_v57  ;;  %v4307_v38 = vsel %vm3090_vm10, %v4301_v46, %v4302_v20  ;;  %v4309_v35 = vmul.f32 %v4308_v55, %v11784_v33 }
 0x4c1   :  { %10280 = vmatpush3.msra.mxu1 %v12137_v28  ;;  %10268 = vmatpush3.msra.mxu0 %v8941_v56  ;;  %v8939_v28 = vld [vmem:[%s13492_s9 + $0x40] sm:$0xff]  ;;  %v12259_v40 = vsel %vm2946_vm9, %v4183_v29, %v4184_v27  ;;  %v12275_v3 = vsel %vm2946_vm9, %v4184_v27, %v4185_v48  ;;  %v4306_v26 = vsel %vm3090_vm10, %v4302_v20, %v4303_v12  ;;  %v8957_v29 = vld [vmem:[%s13492_s9 + $0x90] sm:$0xff] }
 0x4c2   :  { %10281 = vmatprep.subr.mxu1 %v8949_v41  ;;  %10269 = vmatprep.subr.mxu0 %v8940_v42  ;;  %v4192_v58 = vmul.f32 %v12259_v40, %v11768_v53  ;;  %v4310_v45 = vmul.f32 %v4307_v38, %v11790_v5  ;;  %v4193_v56 = vmul.f32 %v12275_v3, %v11777_v0  ;;  %v8965_v27 = vld [vmem:[%s13492_s9 + $0xb0] sm:$0xff]  ;;  %v8963_v38 = vld [vmem:[%s13492_s9 + $0xa0] sm:$0xff] }
 0x4c3   :  { %10282 = vmatpush3.msra.mxu1 %v8949_v41  ;;  %10249 = vmatmul.mubr.msk.f32.gmra.mxu0 %vm2591_vm2, %v3983_v59  ;;  %v4311_v16 = vmul.f32 %v4306_v26, %v11797_v44  ;;  %v12296_v46 = vsel %vm2946_vm9, %v4185_v48, %v4186_v2  ;;  %v4525_v41 = vrot.slane %v12158_v8, 1  ;;  %v8956_v59 = vld [vmem:[%s13492_s9 + $0x88] sm:$0xff]  ;;  %v4305_v20 = vsel %vm3090_vm10, %v4303_v12, %v4304_v51  ;;  %v8955_v51 = vld [vmem:[%s13492_s9 + $0x80] sm:$0xff] }
 0x4c4   :  { %10263 = vmatmul.mubr.msk.f32.gmra.mxu1 %vm2591_vm2, %v3967_v14  ;;  %10270 = vmatpush3.msra.mxu0 %v8940_v42  ;;  %v4526_v42 = vrot.slane %v12154_v49, 1  ;;  %v4194_v2 = vmul.f32 %v12296_v46, %v11782_v18  ;;  %v4527_v14 = vrot.slane %v12156_v13, 1  ;;  %v4528_v48 = vrot.slane %v12160_v63, 1 }
 0x4c5   :  { %10283 = vmatprep.subr.mxu1 %v8948_v30  ;;  %10271 = vmatprep.subr.mxu0 %v8939_v28 }
 0x4c6   :  { %10273 = vmatprep.mubr.msk.f32.mxu0 %vm2591_vm2, %v4191_v36  ;;  %10284 = vmatpush3.msra.mxu1 %v8948_v30  ;;  %v4312_v30 = vmul.f32 %v4305_v20, %v11816_v9  ;;  %v4531_v55 = vsel %vm3340_vm11, %v4525_v41, %v4526_v42  ;;  %v4530_v12 = vsel %vm3340_vm11, %v4526_v42, %v4527_v14  ;;  %v13570_v42 = vld [vmem:[#allocation14_spill] sm:$0xff]  ;;  %v8990_v20 = vld [vmem:[%s13492_s9 + $0x118] sm:$0xff] }
 0x4c7   :  { %10287 = vmatprep.mubr.msk.f32.mxu1 %vm2591_vm2, %v4309_v35  ;;  %10272 = vmatpush3.msra.mxu0 %v8939_v28  ;;  %v8964_v28 = vld [vmem:[%s13492_s9 + $0xa8] sm:$0xff]  ;;  %v4533_v36 = vmul.f32 %v4531_v55, %v11840_v50  ;;  %v8974_v35 = vld [vmem:[%s13492_s9 + $0xd8] sm:$0xff] }
 0x4c8   :  { %10285 = vmatprep.subr.mxu1 %v8947_v1  ;;  %10293 = vmatprep.subr.mxu0 %v8958_v47 }
 0x4c9   :  { %10286 = vmatpush3.msra.mxu1 %v8947_v1  ;;  %10274 = vmatmul.mubr.msk.f32.vlgmr.msra.gmra.mxu0 %vm2591_vm2, %v4192_v58  ;;  %v4529_v1 = vsel %vm3340_vm11, %v4527_v14, %v4528_v48  ;;  %v8982_v58 = vld [vmem:[%s13492_s9 + $0xf8] sm:$0xff] }
 0x4ca   :  { %10288 = vmatmul.mubr.msk.f32.vlgmr.msra.gmra.mxu1 %vm2591_vm2, %v4310_v45  ;;  %10294 = vmatpush3.msra.mxu0 %v8958_v47  ;;  %v4534_v47 = vmul.f32 %v4530_v12, %v11877_v15  ;;  %v4535_v26 = vmul.f32 %v4529_v1, %v11936_v31  ;;  %v8981_v45 = vld [vmem:[%s13492_s9 + $0xf0] sm:$0xff]  ;;  %v8987_v12 = vld [vmem:[%s13492_s9 + $0x100] sm:$0xff] }
 0x4cb   :  { %10307 = vmatprep.subr.mxu1 %v8966_v32  ;;  %10276 = vmatprep.mubr.msk.f32.mxu0 %vm2591_vm2, %v4193_v56  ;;  %v8980_v56 = vld [vmem:[%s13492_s9 + $0xe8] sm:$0xff]  ;;  %v13573_v14 = vld [vmem:[#allocation12_spill] sm:$0xff] }
 0x4cc   :  { %10290 = vmatprep.mubr.msk.f32.mxu1 %vm2591_vm2, %v4311_v16  ;;  %10295 = vmatprep.subr.mxu0 %v8957_v29  ;;  %v13569_v16 = vld [vmem:[#allocation10_spill] sm:$0xff] }
 0x4cd   :  { %10308 = vmatpush3.msra.mxu1 %v8966_v32  ;;  %10296 = vmatpush3.msra.mxu0 %v8957_v29  ;;  %v4532_v32 = vsel %vm3340_vm11, %v4528_v48, %v4525_v41  ;;  %v8971_v29 = vld [vmem:[%s13492_s9 + $0xc0] sm:$0xff]  ;;  %v4643_v41 = vmul.f32 %v12180_v52, %v13569_v16  ;;  %v13572_v52 = vld [vmem:[#allocation15_spill] sm:$0xff] }
 0x4ce   :  { %10309 = vmatprep.subr.mxu1 %v8965_v27  ;;  %10297 = vmatprep.subr.mxu0 %v8956_v59 }
 0x4cf   :  { %10310 = vmatpush3.msra.mxu1 %v8965_v27  ;;  %10277 = vmatmul.mubr.msk.f32.gmra.mxu0 %vm2591_vm2, %v4194_v2  ;;  %v4753_v27 = vmul.f32 %v12172_v25, %v13570_v42  ;;  %v4754_v25 = vmul.f32 %v12196_v6, %v13572_v52  ;;  %v8988_v6 = vld [vmem:[%s13492_s9 + $0x108] sm:$0xff] }
 0x4d0   :  { %10291 = vmatmul.mubr.msk.f32.gmra.mxu1 %vm2591_vm2, %v4312_v30  ;;  %10298 = vmatpush3.msra.mxu0 %v8956_v59  ;;  %v8979_v59 = vld [vmem:[%s13492_s9 + $0xe0] sm:$0xff]  ;;  %v4645_v30 = vmul.f32 %v12230_v22, %v13573_v14 }
 0x4d1   :  { %10311 = vmatprep.subr.mxu1 %v8964_v28  ;;  %10299 = vmatprep.subr.mxu0 %v8955_v51  ;;  %v13575_v22 = vld [vmem:[#allocation13_spill] sm:$0xff] }
 0x4d2   :  { %10301 = vmatprep.mubr.msk.f32.mxu0 %vm2591_vm2, %v12158_v8  ;;  %10312 = vmatpush3.msra.mxu1 %v8964_v28  ;;  %v8973_v8 = vld [vmem:[%s13492_s9 + $0xd0] sm:$0xff]  ;;  %v13574_v28 = vld [vmem:[#allocation18_spill] sm:$0xff]  ;;  %v4646_v55 = vmul.f32 %v12184_v37, %v13575_v22 }
 0x4d3   :  { %10315 = vmatprep.mubr.msk.f32.mxu1 %vm2591_vm2, %v4533_v36  ;;  %10300 = vmatpush3.msra.mxu0 %v8955_v51  ;;  %v4755_v51 = vmul.f32 %v12217_v24, %v13574_v28  ;;  %v13576_v24 = vld [vmem:[#allocation19_spill] sm:$0xff]  ;;  %v13577_v36 = vld [vmem:[#allocation16_spill] sm:$0xff] }
 0x4d4   :  { %10313 = vmatprep.subr.mxu1 %v8963_v38  ;;  %10321 = vmatprep.subr.mxu0 %v8974_v35  ;;  %v4756_v48 = vmul.f32 %v12176_v39, %v13576_v24  ;;  %v13579_v39 = vld [vmem:[#allocation20_spill] sm:$0xff] }
 0x4d5   :  { %10314 = vmatpush3.msra.mxu1 %v8963_v38  ;;  %10302 = vmatmul.mubr.msk.f32.vlgmr.msra.gmra.mxu0 %vm2591_vm2, %v12154_v49  ;;  %v8972_v49 = vld [vmem:[%s13492_s9 + $0xc8] sm:$0xff]  ;;  %v4863_v38 = vmul.f32 %v12259_v40, %v13577_v36  ;;  %v4865_v1 = vmul.f32 %v12296_v46, %v13579_v39  ;;  %v8997_v46 = vld [vmem:[%s13494_s11 + $0x30] sm:$0xff] }
 0x4d6   :  { %10316 = vmatmul.mubr.msk.f32.vlgmr.msra.gmra.mxu1 %vm2591_vm2, %v4534_v47  ;;  %10322 = vmatpush3.msra.mxu0 %v8974_v35  ;;  %v13578_v35 = vld [vmem:[#allocation17_spill] sm:$0xff] }
 0x4d7   :  { %10335 = vmatprep.subr.mxu1 %v8982_v58  ;;  %10304 = vmatprep.mubr.msk.f32.mxu0 %vm2591_vm2, %v12156_v13  ;;  %v4536_v13 = vmul.f32 %v4532_v32, %v11970_v10  ;;  %v4864_v37 = vmul.f32 %v12275_v3, %v13578_v35  ;;  %v13580_v47 = vld [vmem:[#allocation21_spill] sm:$0xff] }
 0x4d8   :  { %10318 = vmatprep.mubr.msk.f32.mxu1 %vm2591_vm2, %v4535_v26  ;;  %10323 = vmatprep.subr.mxu0 %v8973_v8  ;;  %v4866_v40 = vmul.f32 %v12240_v21, %v13580_v47  ;;  %v8998_v3 = vld [vmem:[%s13494_s11 + $0x38] sm:$0xff]  ;;  %v5062_v21 = vld [vmem:[%s13494_s11 + $0x10] sm:$0xff]  ;;  %v5061_v26 = vld [vmem:[%s13494_s11 + $0x8] sm:$0xff] }
 0x4d9   :  { %10336 = vmatpush3.msra.mxu1 %v8982_v58  ;;  %10324 = vmatpush3.msra.mxu0 %v8973_v8  ;;  %v5063_v58 = vld [vmem:[%s13494_s11 + $0x18] sm:$0xff]  ;;  %v8996_v8 = vld [vmem:[%s13494_s11 + $0x28] sm:$0xff] }
 0x4da   :  { %10337 = vmatprep.subr.mxu1 %v8981_v45  ;;  %10325 = vmatprep.subr.mxu0 %v8972_v49  ;;  %v12449_v32 = vld [vmem:[%s13494_s11 + $0x58] sm:$0xff] }
 0x4db   :  { %10338 = vmatpush3.msra.mxu1 %v8981_v45  ;;  %10305 = vmatmul.mubr.msk.f32.gmra.mxu0 %vm2591_vm2, %v12160_v63  ;;  %v13571_v63 = vld [vmem:[#allocation11_spill] sm:$0xff]  ;;  %v8995_v45 = vld [vmem:[%s13494_s11 + $0x20] sm:$0xff] }
 0x4dc   :  { %10319 = vmatmul.mubr.msk.f32.gmra.mxu1 %vm2591_vm2, %v4536_v13  ;;  %10326 = vmatpush3.msra.mxu0 %v8972_v49  ;;  %v4644_v2 = vmul.f32 %v12200_v62, %v13571_v63  ;;  %v8989_v62 = vld [vmem:[%s13492_s9 + $0x110] sm:$0xff]  ;;  %v5060_v49 = vld [vmem:[%s13494_s11] sm:$0xff]  ;;  %v12455_v13 = vld [vmem:[%s13494_s11 + $0x78] sm:$0xff] }
 0x4dd   :  { %10339 = vmatprep.subr.mxu1 %v8980_v56  ;;  %10327 = vmatprep.subr.mxu0 %v8971_v29 }
 0x4de   :  { %10329 = vmatprep.mubr.msk.f32.mxu0 %vm2591_vm2, %v4643_v41  ;;  %10340 = vmatpush3.msra.mxu1 %v8980_v56 }
 0x4df   :  { %10343 = vmatprep.mubr.msk.f32.mxu1 %vm2591_vm2, %v4753_v27  ;;  %10328 = vmatpush3.msra.mxu0 %v8971_v29 }
 0x4e0   :  { %10341 = vmatprep.subr.mxu1 %v8979_v59  ;;  %10349 = vmatprep.subr.mxu0 %v8990_v20 }
 0x4e1   :  { %10342 = vmatpush3.msra.mxu1 %v8979_v59  ;;  %10330 = vmatmul.mubr.msk.f32.vlgmr.msra.gmra.mxu0 %vm2591_vm2, %v4644_v2 }
 0x4e2   :  { %10344 = vmatmul.mubr.msk.f32.vlgmr.msra.gmra.mxu1 %vm2591_vm2, %v4754_v25  ;;  %10350 = vmatpush3.msra.mxu0 %v8990_v20 }
 0x4e3   :  { %10332 = vmatprep.mubr.msk.f32.mxu0 %vm2591_vm2, %v4645_v30  ;;  %10346 = vmatprep.mubr.msk.f32.mxu1 %vm2591_vm2, %v4755_v51 }
 0x4e4   :  { %10351 = vmatprep.subr.mxu0 %v8989_v62  ;;  %10363 = vmatprep.subr.mxu1 %v8998_v3 }
 0x4e5   :  { %10352 = vmatpush3.msra.mxu0 %v8989_v62  ;;  %10364 = vmatpush3.msra.mxu1 %v8998_v3 }
 0x4e6   :  { %10353 = vmatprep.subr.mxu0 %v8988_v6  ;;  %10333 = vmatmul.mubr.msk.f32.gmra.mxu0 %vm2591_vm2, %v4646_v55 }
 0x4e7   :  { %10347 = vmatmul.mubr.msk.f32.gmra.mxu1 %vm2591_vm2, %v4756_v48  ;;  %10354 = vmatpush3.msra.mxu0 %v8988_v6 }
 0x4e8   :  { %10355 = vmatprep.subr.mxu0 %v8987_v12  ;;  %10357 = vmatprep.mubr.msk.f32.mxu0 %vm2591_vm2, %v4863_v38 }
 0x4e9   :  { %10356 = vmatpush3.msra.mxu0 %v8987_v12  ;;  %10365 = vmatprep.subr.mxu1 %v8997_v46 }
 0x4ea   :  { %10358 = vmatmul.mubr.msk.f32.vlgmr.msra.gmra.mxu0 %vm2591_vm2, %v4864_v37  ;;  %10377 = vmatprep.subr.mxu0 %v5063_v58 }
 0x4eb   :  { %10360 = vmatprep.mubr.msk.f32.mxu0 %vm2591_vm2, %v4865_v1  ;;  %10378 = vmatpush3.msra.mxu0 %v5063_v58 }
 0x4ec   :  { %10379 = vmatprep.subr.mxu0 %v5062_v21  ;;  %10366 = vmatpush3.msra.mxu1 %v8997_v46 }
 0x4ed   :  { %10380 = vmatpush3.msra.mxu0 %v5062_v21  ;;  %10367 = vmatprep.subr.mxu1 %v8996_v8 }
 0x4ee   :  { %10361 = vmatmul.mubr.msk.f32.gmra.mxu0 %vm2591_vm2, %v4866_v40  ;;  %10381 = vmatprep.subr.mxu0 %v5061_v26 }
 0x4ef   :  { %10368 = vmatpush3.msra.mxu1 %v8996_v8  ;;  %10382 = vmatpush3.msra.mxu0 %v5061_v26 }
 0x4f0   :  { %10369 = vmatprep.subr.mxu1 %v8995_v45  ;;  %10383 = vmatprep.subr.mxu0 %v5060_v49 }
 0x4f1   :  { %10370 = vmatpush3.msra.mxu1 %v8995_v45  ;;  %10384 = vmatpush3.msra.mxu0 %v5060_v49 }
 0x4f2   :  { %10391 = vmatprep.subr.mxu1 %v12449_v32  ;;  %10405 = vmatprep.subr.mxu0 %v12455_v13 }
 0x57e   :  { %v10247_v56 = vpop.f32.mrf.mxu0  ;;  %v10261_v29 = vpop.f32.mrf.mxu1 }
 0x57f   :  { %v4170_v40 = vadd.f32 %v10261_v29, %v10247_v56 }
 0x580   :  { %v4067_v41 = vpop.f32.mrf.mxu0  ;;  %v4164_v27 = vpop.f32.mrf.mxu1 }
 0x581   :  { %v4165_v46 = vadd.f32 %v4164_v27, %v4067_v41 }
 0x583   :  { %v10250_v59 = vpop.f32.mrf.mxu0 }
 0x584   :  { %v10264_v20 = vpop.f32.mrf.mxu1 }
 0x585   :  { %v4077_v2 = vpop.f32.mrf.mxu0  ;;  %v4180_v8 = vadd.f32 %v10264_v20, %v10250_v59 }
 0x586   :  { %v4174_v25 = vpop.f32.mrf.mxu1 }
 0x587   :  { %v4175_v49 = vadd.f32 %v4174_v25, %v4077_v2 }
 0x589   :  { %v10275_v30 = vpop.f32.mrf.mxu0 }
 0x58a   :  { %v10289_v51 = vpop.f32.mrf.mxu1  ;;  %v4298_v21 = vadd.f32 %v10275_v30, %v4170_v40 }
 0x58b   :  { %v4278_v62 = vpop.f32.mrf.mxu0 }
 0x58c   :  { %v4396_v6 = vpop.f32.mrf.mxu1  ;;  %v4297_v26 = vadd.f32 %v4278_v62, %v4165_v46  ;;  %v4416_v39 = vadd.f32 %v10289_v51, %v4298_v21 }
 0x58e   :  { %v4415_v28 = vadd.f32 %v4396_v6, %v4297_v26 }
 0x58f   :  { %v10278_v55 = vpop.f32.mrf.mxu0 }
 0x590   :  { %v10292_v48 = vpop.f32.mrf.mxu1  ;;  %v4300_v35 = vadd.f32 %v10278_v55, %v4180_v8 }
 0x591   :  { %v4288_v12 = vpop.f32.mrf.mxu0 }
 0x592   :  { %v4406_v38 = vpop.f32.mrf.mxu1  ;;  %v4299_v24 = vadd.f32 %v4288_v12, %v4175_v49  ;;  %v4418_v52 = vadd.f32 %v10292_v48, %v4300_v35 }
 0x594   :  { %v4417_v56 = vadd.f32 %v4406_v38, %v4299_v24 }
 0x595   :  { %v10303_v37 = vpop.f32.mrf.mxu0 }
 0x596   :  { %v10317_v1 = vpop.f32.mrf.mxu1  ;;  %v4522_v14 = vadd.f32 %v10303_v37, %v4416_v39 }
 0x597   :  { %v4502_v3 = vpop.f32.mrf.mxu0 }
 0x598   :  { %v4620_v58 = vpop.f32.mrf.mxu1  ;;  %v4521_v63 = vadd.f32 %v4502_v3, %v4415_v28  ;;  %v4640_v16 = vadd.f32 %v10317_v1, %v4522_v14 }
 0x59a   :  { %v4639_v20 = vadd.f32 %v4620_v58, %v4521_v63 }
 0x59b   :  { %v10306_v45 = vpop.f32.mrf.mxu0 }
 0x59c   :  { %v10320_v47 = vpop.f32.mrf.mxu1  ;;  %v4524_v41 = vadd.f32 %v10306_v45, %v4418_v52 }
 0x59d   :  { %v4512_v36 = vpop.f32.mrf.mxu0 }
 0x59e   :  { %v4630_v22 = vpop.f32.mrf.mxu1  ;;  %v4523_v59 = vadd.f32 %v4512_v36, %v4417_v56  ;;  %v4642_v51 = vadd.f32 %v10320_v47, %v4524_v41 }
 0x5a0   :  { %v4641_v55 = vadd.f32 %v4630_v22, %v4523_v59 }
 0x5a1   :  { %v10331_v42 = vpop.f32.mrf.mxu0 }
 0x5a2   :  { %v10345_v29 = vpop.f32.mrf.mxu1  ;;  %v4750_v30 = vadd.f32 %v10331_v42, %v4640_v16 }
 0x5a3   :  { %v4730_v27 = vpop.f32.mrf.mxu0 }
 0x5a4   :  { %v4840_v2 = vpop.f32.mrf.mxu1  ;;  %v4749_v62 = vadd.f32 %v4730_v27, %v4639_v20  ;;  %v4860_v40 = vadd.f32 %v10345_v29, %v4750_v30 }
 0x5a6   :  { %v10334_v25 = vpop.f32.mrf.mxu0  ;;  %v4859_v48 = vadd.f32 %v4840_v2, %v4749_v62 }
 0x5a7   :  { %v4752_v6 = vadd.f32 %v10334_v25, %v4642_v51  ;;  %v10348_v39 = vpop.f32.mrf.mxu1 }
 0x5a8   :  { %v4740_v12 = vpop.f32.mrf.mxu0 }
 0x5a9   :  { %v4751_v35 = vadd.f32 %v4740_v12, %v4641_v55  ;;  %v4862_v14 = vadd.f32 %v10348_v39, %v4752_v6  ;;  %v4850_v52 = vpop.f32.mrf.mxu1 }
 0x5aa   :  { %v10359_v28 = vpop.f32.mrf.mxu0 }
 0x5ab   :  { %v4970_v24 = vadd.f32 %v10359_v28, %v4860_v40  ;;  %v4861_v36 = vadd.f32 %v4850_v52, %v4751_v35 }
 0x5ac   :  { %v4950_v38 = vpop.f32.mrf.mxu0 }
 0x5ad   :  { %v4969_v37 = vadd.f32 %v4950_v38, %v4859_v48  ;;  %v4988_v16 = vmul.f32 %v4970_v24, %v4970_v24  ;;  %v4975_v3 = vsel %vm2591_vm2, %v4970_v24, 0.0 }
 0x5ae   :  { %v10362_v63 = vpop.f32.mrf.mxu0 }
 0x5af   :  { %v4974_v42 = vsel %vm2591_vm2, %v4969_v37, 0.0  ;;  %v4987_v47 = vmul.f32 %v4969_v37, %v4969_v37  ;;  %v4972_v1 = vadd.f32 %v10362_v63, %v4862_v14  ;;  %v4992_v8 = vsel %vm2591_vm2, %v4988_v16, 0.0 }
 0x5b0   :  { %v4960_v22 = vpop.f32.mrf.mxu0  ;;  %v4976_v21 = vadd.f32 %v4975_v3, %v4974_v42 }
 0x5b1   :  { %v4991_v58 = vsel %vm2591_vm2, %v4987_v47, 0.0  ;;  %v4971_v46 = vadd.f32 %v4960_v22, %v4861_v36  ;;  %v4990_v26 = vmul.f32 %v4972_v1, %v4972_v1  ;;  %v4979_v41 = vsel %vm2591_vm2, %v4972_v1, 0.0  ;;  %v4973_v47 = vld [vmem:[%s13493_s10] sm:$0x3] }
 0x5b2   :  { %v4993_v56 = vadd.f32 %v4992_v8, %v4991_v58 }
 0x5b3   :  { %v4977_v45 = vsel %vm2591_vm2, %v4971_v46, 0.0  ;;  %v4989_v49 = vmul.f32 %v4971_v46, %v4971_v46  ;;  %v4996_v30 = vsel %vm2591_vm2, %v4990_v26, 0.0 }
 0x5b4   :  { %v4978_v29 = vadd.f32 %v4977_v45, %v4976_v21  ;;  %v5027_v21 = vrot.slane %v4973_v47, %v11147_v19 }
 0x5b5   :  { %v4994_v27 = vsel %vm2591_vm2, %v4989_v49, 0.0 }
 0x5b6   :  { %v4980_v59 = vadd.f32 %v4979_v41, %v4978_v29  ;;  %v4995_v20 = vadd.f32 %v4994_v27, %v4993_v56 }
 0x5b8   :  { %v4981_v2 = vrot.slane %v4980_v59, 4  ;;  %v4997_v25 = vadd.f32 %v4996_v30, %v4995_v20 }
 0x5ba   :  { %v4982_v51 = vadd.f32 %v4981_v2, %v4980_v59  ;;  %v4998_v62 = vrot.slane %v4997_v25, 4 }
 0x5bc   :  { %v4983_v55 = vrot.slane %v4982_v51, 2  ;;  %v4999_v12 = vadd.f32 %v4998_v62, %v4997_v25  ;;  %v13581_v25 = vld [vmem:[#allocation7_spill] sm:$0xff]  ;;  %v13582_v62 = vld [vmem:[#allocation6_spill] sm:$0xff] }
 0x5be   :  { %v4984_v40 = vadd.f32 %v4983_v55, %v4982_v51  ;;  %v5000_v6 = vrot.slane %v4999_v12, 2 }
 0x5c0   :  { %v4985_v39 = vrot.slane %v4984_v40, 1  ;;  %v5001_v35 = vadd.f32 %v5000_v6, %v4999_v12 }
 0x5c2   :  { %v4986_v28 = vadd.f32 %v4985_v39, %v4984_v40  ;;  %v5002_v48 = vrot.slane %v5001_v35, 1  ;;  %v13584_v40 = vld [vmem:[#allocation9_spill] sm:$0xff] }
 0x5c4   :  { %v5003_v38 = vadd.f32 %v5002_v48, %v5001_v35  ;;  %v5004_v14 = vmul.f32 0.03125, %v4986_v28 }
 0x5c6   :  { %v5005_v52 = vmul.f32 0.03125, %v5003_v38  ;;  %v5006_v36 = vmul.f32 %v5004_v14, %v5004_v14  ;;  %v5009_v58 = vsub.f32 %v4969_v37, %v5004_v14  ;;  %v5010_v8 = vsub.f32 %v4970_v24, %v5004_v14  ;;  %v13583_v37 = vld [vmem:[#allocation8_spill] sm:$0xff] }
 0x5c7   :  { %v5011_v26 = vsub.f32 %v4971_v46, %v5004_v14  ;;  %v5012_v45 = vsub.f32 %v4972_v1, %v5004_v14 }
 0x5c8   :  { %v5007_v63 = vsub.f32 %v5005_v52, %v5006_v36 }
 0x5ca   :  { %v5008_v16 = vmax.f32 %v5007_v63, 0.0 }
 0x5cc   :  { %v5013_v42 = vadd.f32 1e-05, %v5008_v16 }
 0x5ce   :  { %10797 = vrsqrt.f32 %v5013_v42 }
 0x5db   :  { %v10798_v22 = vpop.eup %10797 }
 0x5dc   :  { %v5015_v3 = vmul.f32 %v10798_v22, %v4973_v47 }
 0x5de   :  { %v5019_v49 = vrot.slane %v5015_v3, %v11150_v23 }
 0x5e0   :  { %v5020_v56 = vmul.f32 %v5019_v49, %v5009_v58  ;;  %v5021_v29 = vmul.f32 %v5019_v49, %v5010_v8  ;;  %v5022_v41 = vmul.f32 %v5019_v49, %v5011_v26  ;;  %v5023_v27 = vmul.f32 %v5019_v49, %v5012_v45 }
 0x5e2   :  { %v5028_v59 = vadd.f32 %v5027_v21, %v5020_v56  ;;  %v5029_v20 = vadd.f32 %v5027_v21, %v5021_v29  ;;  %v5030_v30 = vadd.f32 %v5027_v21, %v5022_v41  ;;  %v5031_v2 = vadd.f32 %v5027_v21, %v5023_v27 }
 0x5e4   :  { %v5032_v51 = vadd.f32 %v5028_v59, %v13581_v25  ;;  %v5033_v55 = vadd.f32 %v5029_v20, %v13582_v62  ;;  %v5034_v12 = vadd.f32 %v5030_v30, %v13583_v37  ;;  %v5035_v24 = vadd.f32 %v5031_v2, %v13584_v40  ;;  %v9009_v59 = vld [vmem:[%s13494_s11 + $0x50] sm:$0xff] }
 0x5e5   :  { %v9017_v62 = vld [vmem:[%s13494_s11 + $0x70] sm:$0xff] }
 0x5e6   :  { %vm5037_vm1 = vcmp.ge.f32.partialorder %v5033_v55, 0.0  ;;  %vm5038_vm3 = vcmp.ge.f32.partialorder %v5034_v12, 0.0  ;;  %v5041_v1 = vmul.f32 0.2, %v5033_v55  ;;  %v5042_v46 = vmul.f32 0.2, %v5034_v12 }
 0x5e7   :  { %vm5036_vm4 = vcmp.ge.f32.partialorder %v5032_v51, 0.0  ;;  %vm5039_vm5 = vcmp.ge.f32.partialorder %v5035_v24, 0.0  ;;  %v5040_v6 = vmul.f32 0.2, %v5032_v51  ;;  %v5043_v39 = vmul.f32 0.2, %v5035_v24 }
 0x5e8   :  { %v12475_v35 = vsel %vm5037_vm1, %v5033_v55, %v5041_v1  ;;  %v12477_v28 = vsel %vm5038_vm3, %v5034_v12, %v5042_v46  ;;  %v9008_v55 = vld [vmem:[%s13494_s11 + $0x48] sm:$0xff] }
 0x5e9   :  { %13585 = vst [vmem:[#allocation7_spill] sm:$0xff] %v12475_v35  ;;  %13586 = vst [vmem:[#allocation6_spill] sm:$0xff] %v12477_v28  ;;  %v12479_v48 = vsel %vm5036_vm4, %v5032_v51, %v5040_v6  ;;  %v12481_v38 = vsel %vm5039_vm5, %v5035_v24, %v5043_v39  ;;  %v5065_v14 = vrot.slane %v12475_v35, 4  ;;  %v5049_v52 = vrot.slane %v12475_v35, 3  ;;  %v9016_v6 = vld [vmem:[%s13494_s11 + $0x68] sm:$0xff] }
 0x5ea   :  { %13587 = vst [vmem:[#allocation8_spill] sm:$0xff] %v12479_v48  ;;  %13588 = vst [vmem:[#allocation9_spill] sm:$0xff] %v12481_v38  ;;  %v5064_v36 = vrot.slane %v12479_v48, 4  ;;  %v5067_v63 = vrot.slane %v12481_v38, 4  ;;  %v5048_v16 = vrot.slane %v12479_v48, 3  ;;  %v5051_v42 = vrot.slane %v12481_v38, 3 }
 0x5eb   :  { %v5066_v47 = vrot.slane %v12477_v28, 4  ;;  %v5050_v22 = vrot.slane %v12477_v28, 3  ;;  %v5275_v20 = vrot.slane %v12479_v48, 5  ;;  %v5278_v30 = vrot.slane %v12481_v38, 5 }
 0x5ec   :  { %v12493_v3 = vsel %vm2709_vm7, %v5064_v36, %v5065_v14  ;;  %v12497_v58 = vsel %vm2709_vm7, %v5067_v63, %v5064_v36  ;;  %v12501_v21 = vsel %vm2668_vm8, %v5048_v16, %v5049_v52  ;;  %v12505_v8 = vsel %vm2668_vm8, %v5051_v42, %v5048_v16 }
 0x5ed   :  { %v5072_v26 = vmul.f32 %v12497_v58, %v11753_v34  ;;  %v5056_v45 = vmul.f32 %v12505_v8, %v11762_v7  ;;  %v5057_v49 = vmul.f32 %v12501_v21, %v11764_v60  ;;  %v5073_v56 = vmul.f32 %v12493_v3, %v11757_v43 }
 0x5ee   :  { %v12517_v29 = vsel %vm2709_vm7, %v5065_v14, %v5066_v47  ;;  %v12521_v41 = vsel %vm2668_vm8, %v5049_v52, %v5050_v22  ;;  %v12538_v25 = vsel %vm2709_vm7, %v5066_v47, %v5067_v63  ;;  %v5393_v51 = vrot.slane %v12479_v48, 7  ;;  %v9015_v47 = vld [vmem:[%s13494_s11 + $0x60] sm:$0xff] }
 0x5ef   :  { %10371 = vmatprep.mubr.msk.f32.mxu1 %vm2591_vm2, %v5072_v26  ;;  %10385 = vmatprep.mubr.msk.f32.mxu0 %vm2591_vm2, %v5056_v45  ;;  %v5074_v27 = vmul.f32 %v12517_v29, %v11755_v4  ;;  %v5058_v2 = vmul.f32 %v12521_v41, %v11770_v11  ;;  %v12551_v37 = vsel %vm2668_vm8, %v5050_v22, %v5051_v42  ;;  %v5276_v12 = vrot.slane %v12475_v35, 5  ;;  %v9026_v22 = vld [vmem:[%s13494_s11 + $0x98] sm:$0xff] }
 0x5f0   :  { %10372 = vmatmul.mubr.msk.f32.vlgmr.msra.gmra.mxu1 %vm2591_vm2, %v5073_v56  ;;  %10386 = vmatmul.mubr.msk.f32.vlgmr.msra.gmra.mxu0 %vm2591_vm2, %v5057_v49  ;;  %v5075_v40 = vmul.f32 %v12538_v25, %v11760_v54  ;;  %v12561_v24 = vsel %vm2946_vm9, %v5278_v30, %v5275_v20  ;;  %v5394_v1 = vrot.slane %v12475_v35, 7  ;;  %v5059_v46 = vmul.f32 %v12551_v37, %v11775_v61 }
 0x5f1   :  { %10392 = vmatpush3.msra.mxu1 %v12449_v32  ;;  %10374 = vmatprep.mubr.msk.f32.mxu1 %vm2591_vm2, %v5074_v27  ;;  %v5396_v32 = vrot.slane %v12481_v38, 7  ;;  %v5277_v14 = vrot.slane %v12477_v28, 5  ;;  %v5395_v52 = vrot.slane %v12477_v28, 7  ;;  %v12580_v36 = vsel %vm2946_vm9, %v5275_v20, %v5276_v12  ;;  %v9034_v27 = vld [vmem:[%s13494_s11 + $0xb8] sm:$0xff]  ;;  %v9025_v20 = vld [vmem:[%s13494_s11 + $0x90] sm:$0xff] }
 0x5f2   :  { %10388 = vmatprep.mubr.msk.f32.mxu0 %vm2591_vm2, %v5058_v2  ;;  %10393 = vmatprep.subr.mxu1 %v9009_v59  ;;  %v5283_v63 = vmul.f32 %v12561_v24, %v11766_v57  ;;  %v5399_v16 = vsel %vm3090_vm10, %v5393_v51, %v5394_v1  ;;  %v5284_v45 = vmul.f32 %v12580_v36, %v11768_v53  ;;  %vm7352_vm5 = vcmask 31744  }
 0x5f3   :  { %10406 = vmatpush3.msra.mxu0 %v12455_v13  ;;  %10394 = vmatpush3.msra.mxu1 %v9009_v59  ;;  %v9007_v13 = vld [vmem:[%s13494_s11 + $0x40] sm:$0xff]  ;;  %v5400_v39 = vsel %vm3090_vm10, %v5396_v32, %v5393_v51  ;;  %v12596_v26 = vsel %vm2946_vm9, %v5276_v12, %v5277_v14  ;;  %v5398_v49 = vsel %vm3090_vm10, %v5394_v1, %v5395_v52  ;;  %v9033_v12 = vld [vmem:[%s13494_s11 + $0xb0] sm:$0xff] }
 0x5f4   :  { %10407 = vmatprep.subr.mxu0 %v9017_v62  ;;  %10395 = vmatprep.subr.mxu1 %v9008_v55  ;;  %v5401_v42 = vmul.f32 %v5400_v39, %v11784_v33  ;;  %v5402_v56 = vmul.f32 %v5399_v16, %v11790_v5  ;;  %v5285_v59 = vmul.f32 %v12596_v26, %v11777_v0  ;;  %v9031_v16 = vld [vmem:[%s13494_s11 + $0xa0] sm:$0xff] }
 0x5f5   :  { %10408 = vmatpush3.msra.mxu0 %v9017_v62  ;;  %10375 = vmatmul.mubr.msk.f32.gmra.mxu1 %vm2591_vm2, %v5075_v40  ;;  %v5403_v2 = vmul.f32 %v5398_v49, %v11797_v44  ;;  %v12617_v51 = vsel %vm2946_vm9, %v5277_v14, %v5278_v30  ;;  %v5617_v62 = vrot.slane %v12479_v48, 1  ;;  %v9024_v40 = vld [vmem:[%s13494_s11 + $0x88] sm:$0xff]  ;;  %v5397_v1 = vsel %vm3090_vm10, %v5395_v52, %v5396_v32  ;;  %v9023_v32 = vld [vmem:[%s13494_s11 + $0x80] sm:$0xff]  ;;  %v9041_v49 = vld [vmem:[%s13494_s11 + $0xd0] sm:$0xff] }
 0x5f6   :  { %10389 = vmatmul.mubr.msk.f32.gmra.mxu0 %vm2591_vm2, %v5059_v46  ;;  %10396 = vmatpush3.msra.mxu1 %v9008_v55  ;;  %v5618_v55 = vrot.slane %v12475_v35, 1  ;;  %v5286_v30 = vmul.f32 %v12617_v51, %v11782_v18  ;;  %v5619_v46 = vrot.slane %v12477_v28, 1  ;;  %v5620_v14 = vrot.slane %v12481_v38, 1 }
 0x5f7   :  { %10409 = vmatprep.subr.mxu0 %v9016_v6  ;;  %10397 = vmatprep.subr.mxu1 %v9007_v13 }
 0x5f8   :  { %10399 = vmatprep.mubr.msk.f32.mxu1 %vm2591_vm2, %v5283_v63  ;;  %10410 = vmatpush3.msra.mxu0 %v9016_v6  ;;  %v5404_v6 = vmul.f32 %v5397_v1, %v11816_v9  ;;  %v5623_v39 = vsel %vm3340_vm11, %v5617_v62, %v5618_v55  ;;  %v5622_v52 = vsel %vm3340_vm11, %v5618_v55, %v5619_v46  ;;  %v9048_v55 = vld [vmem:[%s13494_s11 + $0xe8] sm:$0xff] }
 0x5f9   :  { %10413 = vmatprep.mubr.msk.f32.mxu0 %vm2591_vm2, %v5401_v42  ;;  %10398 = vmatpush3.msra.mxu1 %v9007_v13  ;;  %v9032_v13 = vld [vmem:[%s13494_s11 + $0xa8] sm:$0xff]  ;;  %v5625_v63 = vmul.f32 %v5623_v39, %v11840_v50  ;;  %v9042_v42 = vld [vmem:[%s13494_s11 + $0xd8] sm:$0xff] }
 0x5fa   :  { %10411 = vmatprep.subr.mxu0 %v9015_v47  ;;  %10419 = vmatprep.subr.mxu1 %v9026_v22  ;;  %v13590_v1 = vld [vmem:[#allocation14_spill] sm:$0xff]  ;;  %v13593_v39 = vld [vmem:[#allocation12_spill] sm:$0xff] }
 0x5fb   :  { %10412 = vmatpush3.msra.mxu0 %v9015_v47  ;;  %10400 = vmatmul.mubr.msk.f32.vlgmr.msra.gmra.mxu1 %vm2591_vm2, %v5284_v45  ;;  %v5621_v47 = vsel %vm3340_vm11, %v5619_v46, %v5620_v14  ;;  %v9050_v45 = vld [vmem:[%s13494_s11 + $0xf8] sm:$0xff]  ;;  %v9047_v46 = vld [vmem:[%s13494_s11 + $0xe0] sm:$0xff] }
 0x5fc   :  { %10414 = vmatmul.mubr.msk.f32.vlgmr.msra.gmra.mxu0 %vm2591_vm2, %v5402_v56  ;;  %10420 = vmatpush3.msra.mxu1 %v9026_v22  ;;  %v5626_v22 = vmul.f32 %v5622_v52, %v11877_v15  ;;  %v5627_v56 = vmul.f32 %v5621_v47, %v11936_v31  ;;  %v13594_v52 = vld [vmem:[#allocation18_spill] sm:$0xff] }
 0x5fd   :  { %10433 = vmatprep.subr.mxu0 %v9034_v27  ;;  %10402 = vmatprep.mubr.msk.f32.mxu1 %vm2591_vm2, %v5285_v59  ;;  %v9040_v59 = vld [vmem:[%s13494_s11 + $0xc8] sm:$0xff]  ;;  %v9055_v47 = vld [vmem:[%s13494_s11 + $0x100] sm:$0xff] }
 0x5fe   :  { %10416 = vmatprep.mubr.msk.f32.mxu0 %vm2591_vm2, %v5403_v2  ;;  %10421 = vmatprep.subr.mxu1 %v9025_v20 }
 0x5ff   :  { %10434 = vmatpush3.msra.mxu0 %v9034_v27  ;;  %10422 = vmatpush3.msra.mxu1 %v9025_v20  ;;  %v9049_v27 = vld [vmem:[%s13494_s11 + $0xf0] sm:$0xff]  ;;  %v5624_v20 = vsel %vm3340_vm11, %v5620_v14, %v5617_v62  ;;  %v13589_v62 = vld [vmem:[#allocation10_spill] sm:$0xff]  ;;  %v5737_v14 = vmul.f32 %v12551_v37, %v13593_v39 }
 0x600   :  { %10435 = vmatprep.subr.mxu0 %v9033_v12  ;;  %10423 = vmatprep.subr.mxu1 %v9024_v40  ;;  %v5628_v2 = vmul.f32 %v5624_v20, %v11970_v10  ;;  %v9064_v20 = vld [vmem:[%s13496_s13 + $0x28] sm:$0xff] }
 0x601   :  { %10436 = vmatpush3.msra.mxu0 %v9033_v12  ;;  %10403 = vmatmul.mubr.msk.f32.gmra.mxu1 %vm2591_vm2, %v5286_v30  ;;  %v9039_v12 = vld [vmem:[%s13494_s11 + $0xc0] sm:$0xff]  ;;  %v5845_v30 = vmul.f32 %v12493_v3, %v13590_v1 }
 0x602   :  { %10417 = vmatmul.mubr.msk.f32.gmra.mxu0 %vm2591_vm2, %v5404_v6  ;;  %10424 = vmatpush3.msra.mxu1 %v9024_v40  ;;  %v5735_v40 = vmul.f32 %v12501_v21, %v13589_v62  ;;  %v9058_v6 = vld [vmem:[%s13494_s11 + $0x118] sm:$0xff]  ;;  %v13592_v21 = vld [vmem:[#allocation15_spill] sm:$0xff] }
 0x603   :  { %10437 = vmatprep.subr.mxu0 %v9032_v13  ;;  %10425 = vmatprep.subr.mxu1 %v9023_v32  ;;  %v5846_v3 = vmul.f32 %v12517_v29, %v13592_v21  ;;  %v9056_v29 = vld [vmem:[%s13494_s11 + $0x108] sm:$0xff] }
 0x604   :  { %10427 = vmatprep.mubr.msk.f32.mxu1 %vm2591_vm2, %v12479_v48  ;;  %10438 = vmatpush3.msra.mxu0 %v9032_v13  ;;  %v13591_v13 = vld [vmem:[#allocation11_spill] sm:$0xff] }
 0x605   :  { %10441 = vmatprep.mubr.msk.f32.mxu0 %vm2591_vm2, %v5625_v63  ;;  %10426 = vmatpush3.msra.mxu1 %v9023_v32  ;;  %v5736_v32 = vmul.f32 %v12521_v41, %v13591_v13  ;;  %v5847_v63 = vmul.f32 %v12538_v25, %v13594_v52  ;;  %v9057_v41 = vld [vmem:[%s13494_s11 + $0x110] sm:$0xff] }
 0x606   :  { %10439 = vmatprep.subr.mxu0 %v9031_v16  ;;  %10447 = vmatprep.subr.mxu1 %v9042_v42  ;;  %v13596_v25 = vld [vmem:[#allocation19_spill] sm:$0xff] }
 0x607   :  { %10440 = vmatpush3.msra.mxu0 %v9031_v16  ;;  %10428 = vmatmul.mubr.msk.f32.vlgmr.msra.gmra.mxu1 %vm2591_vm2, %v12475_v35  ;;  %v13595_v16 = vld [vmem:[#allocation13_spill] sm:$0xff] }
 0x608   :  { %10442 = vmatmul.mubr.msk.f32.vlgmr.msra.gmra.mxu0 %vm2591_vm2, %v5626_v22  ;;  %10448 = vmatpush3.msra.mxu1 %v9042_v42  ;;  %v5738_v37 = vmul.f32 %v12505_v8, %v13595_v16  ;;  %v5848_v42 = vmul.f32 %v12497_v58, %v13596_v25  ;;  %v13597_v22 = vld [vmem:[#allocation16_spill] sm:$0xff] }
 0x609   :  { %10461 = vmatprep.subr.mxu0 %v9050_v45  ;;  %10430 = vmatprep.mubr.msk.f32.mxu1 %vm2591_vm2, %v12477_v28  ;;  %v13599_v58 = vld [vmem:[#allocation20_spill] sm:$0xff] }
 0x60a   :  { %10444 = vmatprep.mubr.msk.f32.mxu0 %vm2591_vm2, %v5627_v56  ;;  %10449 = vmatprep.subr.mxu1 %v9041_v49  ;;  %v5957_v56 = vmul.f32 %v12617_v51, %v13599_v58  ;;  %v9065_v51 = vld [vmem:[%s13496_s13 + $0x30] sm:$0xff] }
 0x60b   :  { %10462 = vmatpush3.msra.mxu0 %v9050_v45  ;;  %10450 = vmatpush3.msra.mxu1 %v9041_v49  ;;  %v5955_v45 = vmul.f32 %v12580_v36, %v13597_v22  ;;  %v13598_v49 = vld [vmem:[#allocation17_spill] sm:$0xff] }
 0x60c   :  { %10463 = vmatprep.subr.mxu0 %v9049_v27  ;;  %10451 = vmatprep.subr.mxu1 %v9040_v59  ;;  %v5956_v8 = vmul.f32 %v12596_v26, %v13598_v49  ;;  %v9066_v26 = vld [vmem:[%s13496_s13 + $0x38] sm:$0xff] }
 0x60d   :  { %10464 = vmatpush3.msra.mxu0 %v9049_v27  ;;  %10431 = vmatmul.mubr.msk.f32.gmra.mxu1 %vm2591_vm2, %v12481_v38  ;;  %v13600_v27 = vld [vmem:[#allocation21_spill] sm:$0xff] }
 0x60e   :  { %10445 = vmatmul.mubr.msk.f32.gmra.mxu0 %vm2591_vm2, %v5628_v2  ;;  %10452 = vmatpush3.msra.mxu1 %v9040_v59  ;;  %v5958_v36 = vmul.f32 %v12561_v24, %v13600_v27  ;;  %v6151_v59 = vld [vmem:[%s13496_s13 + $0x18] sm:$0xff]  ;;  %v6150_v24 = vld [vmem:[%s13496_s13 + $0x10] sm:$0xff]  ;;  %v6149_v2 = vld [vmem:[%s13496_s13 + $0x8] sm:$0xff] }
 0x60f   :  { %10465 = vmatprep.subr.mxu0 %v9048_v55  ;;  %10453 = vmatprep.subr.mxu1 %v9039_v12 }
 0x610   :  { %10455 = vmatprep.mubr.msk.f32.mxu1 %vm2591_vm2, %v5735_v40  ;;  %10466 = vmatpush3.msra.mxu0 %v9048_v55  ;;  %v9063_v55 = vld [vmem:[%s13496_s13 + $0x20] sm:$0xff]  ;;  %v12770_v40 = vld [vmem:[%s13496_s13 + $0x58] sm:$0xff] }
 0x611   :  { %10469 = vmatprep.mubr.msk.f32.mxu0 %vm2591_vm2, %v5845_v30  ;;  %10454 = vmatpush3.msra.mxu1 %v9039_v12  ;;  %v6148_v12 = vld [vmem:[%s13496_s13] sm:$0xff]  ;;  %v12776_v30 = vld [vmem:[%s13496_s13 + $0x78] sm:$0xff] }
 0x612   :  { %10467 = vmatprep.subr.mxu0 %v9047_v46  ;;  %10475 = vmatprep.subr.mxu1 %v9058_v6 }
 0x613   :  { %10468 = vmatpush3.msra.mxu0 %v9047_v46  ;;  %10456 = vmatmul.mubr.msk.f32.vlgmr.msra.gmra.mxu1 %vm2591_vm2, %v5736_v32 }
 0x614   :  { %10470 = vmatmul.mubr.msk.f32.vlgmr.msra.gmra.mxu0 %vm2591_vm2, %v5846_v3  ;;  %10476 = vmatpush3.msra.mxu1 %v9058_v6 }
 0x615   :  { %10458 = vmatprep.mubr.msk.f32.mxu1 %vm2591_vm2, %v5737_v14  ;;  %10472 = vmatprep.mubr.msk.f32.mxu0 %vm2591_vm2, %v5847_v63 }
 0x616   :  { %10477 = vmatprep.subr.mxu1 %v9057_v41  ;;  %10489 = vmatprep.subr.mxu0 %v9066_v26 }
 0x617   :  { %10478 = vmatpush3.msra.mxu1 %v9057_v41  ;;  %10490 = vmatpush3.msra.mxu0 %v9066_v26 }
 0x618   :  { %10479 = vmatprep.subr.mxu1 %v9056_v29  ;;  %10459 = vmatmul.mubr.msk.f32.gmra.mxu1 %vm2591_vm2, %v5738_v37 }
 0x619   :  { %10473 = vmatmul.mubr.msk.f32.gmra.mxu0 %vm2591_vm2, %v5848_v42  ;;  %10480 = vmatpush3.msra.mxu1 %v9056_v29 }
 0x61a   :  { %10481 = vmatprep.subr.mxu1 %v9055_v47  ;;  %10483 = vmatprep.mubr.msk.f32.mxu1 %vm2591_vm2, %v5955_v45 }
 0x61b   :  { %10482 = vmatpush3.msra.mxu1 %v9055_v47  ;;  %10491 = vmatprep.subr.mxu0 %v9065_v51 }
 0x61c   :  { %10484 = vmatmul.mubr.msk.f32.vlgmr.msra.gmra.mxu1 %vm2591_vm2, %v5956_v8  ;;  %10503 = vmatprep.subr.mxu1 %v6151_v59 }
 0x61d   :  { %10486 = vmatprep.mubr.msk.f32.mxu1 %vm2591_vm2, %v5957_v56  ;;  %10504 = vmatpush3.msra.mxu1 %v6151_v59 }
 0x61e   :  { %10505 = vmatprep.subr.mxu1 %v6150_v24  ;;  %10492 = vmatpush3.msra.mxu0 %v9065_v51 }
 0x61f   :  { %10506 = vmatpush3.msra.mxu1 %v6150_v24  ;;  %10493 = vmatprep.subr.mxu0 %v9064_v20 }
 0x620   :  { %10487 = vmatmul.mubr.msk.f32.gmra.mxu1 %vm2591_vm2, %v5958_v36  ;;  %10507 = vmatprep.subr.mxu1 %v6149_v2 }
 0x621   :  { %10494 = vmatpush3.msra.mxu0 %v9064_v20  ;;  %10508 = vmatpush3.msra.mxu1 %v6149_v2 }
 0x622   :  { %10495 = vmatprep.subr.mxu0 %v9063_v55  ;;  %10509 = vmatprep.subr.mxu1 %v6148_v12 }
 0x623   :  { %10496 = vmatpush3.msra.mxu0 %v9063_v55  ;;  %10510 = vmatpush3.msra.mxu1 %v6148_v12 }
 0x624   :  { %10517 = vmatprep.subr.mxu0 %v12770_v40  ;;  %10531 = vmatprep.subr.mxu1 %v12776_v30 }
 0x6b0   :  { %v10373_v46 = vpop.f32.mrf.mxu1  ;;  %v10387_v6 = vpop.f32.mrf.mxu0 }
 0x6b1   :  { %v5262_v24 = vadd.f32 %v10387_v6, %v10373_v46 }
 0x6b2   :  { %v5159_v32 = vpop.f32.mrf.mxu1  ;;  %v5256_v3 = vpop.f32.mrf.mxu0 }
 0x6b3   :  { %v5257_v55 = vadd.f32 %v5256_v3, %v5159_v32 }
 0x6b5   :  { %v10376_v14 = vpop.f32.mrf.mxu1 }
 0x6b6   :  { %v10390_v63 = vpop.f32.mrf.mxu0 }
 0x6b7   :  { %v5169_v41 = vpop.f32.mrf.mxu1  ;;  %v5272_v38 = vadd.f32 %v10390_v63, %v10376_v14 }
 0x6b8   :  { %v5266_v29 = vpop.f32.mrf.mxu0 }
 0x6b9   :  { %v5267_v48 = vadd.f32 %v5266_v29, %v5169_v41 }
 0x6bb   :  { %v10401_v37 = vpop.f32.mrf.mxu1 }
 0x6bc   :  { %v10415_v42 = vpop.f32.mrf.mxu0  ;;  %v5390_v12 = vadd.f32 %v10401_v37, %v5262_v24 }
 0x6bd   :  { %v5370_v47 = vpop.f32.mrf.mxu1 }
 0x6be   :  { %v5488_v45 = vpop.f32.mrf.mxu0  ;;  %v5389_v28 = vadd.f32 %v5370_v47, %v5257_v55  ;;  %v5508_v58 = vadd.f32 %v10415_v42, %v5390_v12 }
 0x6c0   :  { %v5507_v52 = vadd.f32 %v5488_v45, %v5389_v28 }
 0x6c1   :  { %v10404_v8 = vpop.f32.mrf.mxu1 }
 0x6c2   :  { %v10418_v56 = vpop.f32.mrf.mxu0  ;;  %v5392_v49 = vadd.f32 %v10404_v8, %v5272_v38 }
 0x6c3   :  { %v5380_v36 = vpop.f32.mrf.mxu1 }
 0x6c4   :  { %v5498_v26 = vpop.f32.mrf.mxu0  ;;  %v5391_v25 = vadd.f32 %v5380_v36, %v5267_v48  ;;  %v5510_v21 = vadd.f32 %v10418_v56, %v5392_v49 }
 0x6c6   :  { %v5509_v46 = vadd.f32 %v5498_v26, %v5391_v25 }
 0x6c7   :  { %v10429_v59 = vpop.f32.mrf.mxu1 }
 0x6c8   :  { %v10443_v51 = vpop.f32.mrf.mxu0  ;;  %v5614_v39 = vadd.f32 %v10429_v59, %v5508_v58 }
 0x6c9   :  { %v5594_v20 = vpop.f32.mrf.mxu1 }
 0x6ca   :  { %v5712_v2 = vpop.f32.mrf.mxu0  ;;  %v5613_v13 = vadd.f32 %v5594_v20, %v5507_v52  ;;  %v5732_v62 = vadd.f32 %v10443_v51, %v5614_v39 }
 0x6cc   :  { %v5731_v63 = vadd.f32 %v5712_v2, %v5613_v13 }
 0x6cd   :  { %v10432_v35 = vpop.f32.mrf.mxu1 }
 0x6ce   :  { %v10446_v27 = vpop.f32.mrf.mxu0  ;;  %v5616_v32 = vadd.f32 %v10432_v35, %v5510_v21 }
 0x6cf   :  { %v5604_v22 = vpop.f32.mrf.mxu1 }
 0x6d0   :  { %v5722_v16 = vpop.f32.mrf.mxu0  ;;  %v5615_v14 = vadd.f32 %v5604_v22, %v5509_v46  ;;  %v5734_v42 = vadd.f32 %v10446_v27, %v5616_v32 }
 0x6d2   :  { %v5733_v47 = vadd.f32 %v5722_v16, %v5615_v14 }
 0x6d3   :  { %v10457_v1 = vpop.f32.mrf.mxu1 }
 0x6d4   :  { %v10471_v6 = vpop.f32.mrf.mxu0  ;;  %v5842_v37 = vadd.f32 %v10457_v1, %v5732_v62 }
 0x6d5   :  { %v5822_v3 = vpop.f32.mrf.mxu1 }
 0x6d6   :  { %v5932_v41 = vpop.f32.mrf.mxu0  ;;  %v5841_v38 = vadd.f32 %v5822_v3, %v5731_v63  ;;  %v5952_v8 = vadd.f32 %v10471_v6, %v5842_v37 }
 0x6d8   :  { %v10460_v29 = vpop.f32.mrf.mxu1  ;;  %v5951_v45 = vadd.f32 %v5932_v41, %v5841_v38 }
 0x6d9   :  { %v5844_v28 = vadd.f32 %v10460_v29, %v5734_v42  ;;  %v10474_v58 = vpop.f32.mrf.mxu0 }
 0x6da   :  { %v5832_v48 = vpop.f32.mrf.mxu1 }
 0x6db   :  { %v5843_v49 = vadd.f32 %v5832_v48, %v5733_v47  ;;  %v5954_v39 = vadd.f32 %v10474_v58, %v5844_v28  ;;  %v5942_v35 = vpop.f32.mrf.mxu0 }
 0x6dc   :  { %v10485_v52 = vpop.f32.mrf.mxu1 }
 0x6dd   :  { %v6062_v25 = vadd.f32 %v10485_v52, %v5952_v8  ;;  %v5953_v22 = vadd.f32 %v5942_v35, %v5843_v49 }
 0x6de   :  { %v6042_v56 = vpop.f32.mrf.mxu1 }
 0x6df   :  { %v6061_v21 = vadd.f32 %v6042_v56, %v5951_v45  ;;  %v6080_v62 = vmul.f32 %v6062_v25, %v6062_v25  ;;  %v6067_v26 = vsel %vm2591_vm2, %v6062_v25, 0.0 }
 0x6e0   :  { %v10488_v13 = vpop.f32.mrf.mxu1 }
 0x6e1   :  { %v6066_v1 = vsel %vm2591_vm2, %v6061_v21, 0.0  ;;  %v6079_v27 = vmul.f32 %v6061_v21, %v6061_v21  ;;  %v6064_v36 = vadd.f32 %v10488_v13, %v5954_v39  ;;  %v6084_v20 = vsel %vm2591_vm2, %v6080_v62, 0.0 }
 0x6e2   :  { %v6052_v16 = vpop.f32.mrf.mxu1  ;;  %v6068_v24 = vadd.f32 %v6067_v26, %v6066_v1 }
 0x6e3   :  { %v6083_v59 = vsel %vm2591_vm2, %v6079_v27, 0.0  ;;  %v6063_v51 = vadd.f32 %v6052_v16, %v5953_v22  ;;  %v6082_v2 = vmul.f32 %v6064_v36, %v6064_v36  ;;  %v6071_v32 = vsel %vm2591_vm2, %v6064_v36, 0.0  ;;  %v6065_v27 = vld [vmem:[%s13495_s12] sm:$0x3]  ;;  %s10845_s12 = smov 120  }
 0x6e4   :  { %v6085_v46 = vadd.f32 %v6084_v20, %v6083_v59 }
 0x6e5   :  { %v6069_v55 = vsel %vm2591_vm2, %v6063_v51, 0.0  ;;  %v6081_v12 = vmul.f32 %v6063_v51, %v6063_v51  ;;  %v6088_v37 = vsel %vm2591_vm2, %v6082_v2, 0.0 }
 0x6e6   :  { %v6070_v6 = vadd.f32 %v6069_v55, %v6068_v24  ;;  %v6119_v24 = vrot.slane %v6065_v27, %v11147_v19 }
 0x6e7   :  { %v6086_v3 = vsel %vm2591_vm2, %v6081_v12, 0.0 }
 0x6e8   :  { %v6072_v14 = vadd.f32 %v6071_v32, %v6070_v6  ;;  %v6087_v63 = vadd.f32 %v6086_v3, %v6085_v46 }
 0x6ea   :  { %v6073_v41 = vrot.slane %v6072_v14, 4  ;;  %v6089_v29 = vadd.f32 %v6088_v37, %v6087_v63 }
 0x6ec   :  { %v6074_v42 = vadd.f32 %v6073_v41, %v6072_v14  ;;  %v6090_v38 = vrot.slane %v6089_v29, 4 }
 0x6ee   :  { %v6075_v47 = vrot.slane %v6074_v42, 2  ;;  %v6091_v48 = vadd.f32 %v6090_v38, %v6089_v29 }
 0x6f0   :  { %v6076_v8 = vadd.f32 %v6075_v47, %v6074_v42  ;;  %v6092_v28 = vrot.slane %v6091_v48, 2 }
 0x6f2   :  { %v6077_v58 = vrot.slane %v6076_v8, 1  ;;  %v6093_v49 = vadd.f32 %v6092_v28, %v6091_v48 }
 0x6f4   :  { %v6078_v52 = vadd.f32 %v6077_v58, %v6076_v8  ;;  %v6094_v45 = vrot.slane %v6093_v49, 1 }
 0x6f6   :  { %v6095_v56 = vadd.f32 %v6094_v45, %v6093_v49  ;;  %v6096_v39 = vmul.f32 0.03125, %v6078_v52 }
 0x6f8   :  { %v6097_v35 = vmul.f32 0.03125, %v6095_v56  ;;  %v6098_v22 = vmul.f32 %v6096_v39, %v6096_v39  ;;  %v6101_v59 = vsub.f32 %v6061_v21, %v6096_v39  ;;  %v6102_v20 = vsub.f32 %v6062_v25, %v6096_v39 }
 0x6f9   :  { %v6103_v2 = vsub.f32 %v6063_v51, %v6096_v39  ;;  %v6104_v55 = vsub.f32 %v6064_v36, %v6096_v39 }
 0x6fa   :  { %v6099_v13 = vsub.f32 %v6097_v35, %v6098_v22 }
 0x6fc   :  { %v6100_v62 = vmax.f32 %v6099_v13, 0.0 }
 0x6fe   :  { %v6105_v1 = vadd.f32 1e-05, %v6100_v62 }
 0x700   :  { %10799 = vrsqrt.f32 %v6105_v1 }
 0x70d   :  { %v10800_v16 = vpop.eup %10799 }
 0x70e   :  { %v6107_v26 = vmul.f32 %v10800_v16, %v6065_v27 }
 0x710   :  { %v6111_v12 = vrot.slane %v6107_v26, %v11150_v23 }
 0x712   :  { %v6112_v46 = vmul.f32 %v6111_v12, %v6101_v59  ;;  %v6113_v6 = vmul.f32 %v6111_v12, %v6102_v20  ;;  %v6114_v32 = vmul.f32 %v6111_v12, %v6103_v2  ;;  %v6115_v3 = vmul.f32 %v6111_v12, %v6104_v55  ;;  %v9077_v20 = vld [vmem:[%s13496_s13 + $0x50] sm:$0xff] }
 0x714   :  { %v6120_v14 = vadd.f32 %v6119_v24, %v6112_v46  ;;  %v6121_v63 = vadd.f32 %v6119_v24, %v6113_v6  ;;  %v6122_v37 = vadd.f32 %v6119_v24, %v6114_v32  ;;  %v6123_v41 = vadd.f32 %v6119_v24, %v6115_v3  ;;  %v9085_v32 = vld [vmem:[%s13496_s13 + $0x70] sm:$0xff]  ;;  %v9076_v3 = vld [vmem:[%s13496_s13 + $0x48] sm:$0xff] }
 0x716   :  { %vm6125_vm6 = vcmp.ge.f32.partialorder %v6121_v63, 0.0  ;;  %vm6126_vm12 = vcmp.ge.f32.partialorder %v6122_v37, 0.0  ;;  %v6129_v29 = vmul.f32 0.2, %v6121_v63  ;;  %v6130_v42 = vmul.f32 0.2, %v6122_v37 }
 0x717   :  { %vm6124_vm13 = vcmp.ge.f32.partialorder %v6120_v14, 0.0  ;;  %vm6127_vm14 = vcmp.ge.f32.partialorder %v6123_v41, 0.0  ;;  %v6128_v21 = vmul.f32 0.2, %v6120_v14  ;;  %v6131_v25 = vmul.f32 0.2, %v6123_v41 }
 0x718   :  { %v12792_v51 = vsel %vm6125_vm6, %v6121_v63, %v6129_v29  ;;  %v12794_v36 = vsel %vm6126_vm12, %v6122_v37, %v6130_v42 }
 0x719   :  { %v12796_v38 = vsel %vm6124_vm13, %v6120_v14, %v6128_v21  ;;  %v12798_v47 = vsel %vm6127_vm14, %v6123_v41, %v6131_v25  ;;  %v6153_v48 = vrot.slane %v12792_v51, 4  ;;  %v6137_v8 = vrot.slane %v12792_v51, 3  ;;  %v9084_v21 = vld [vmem:[%s13496_s13 + $0x68] sm:$0xff] }
 0x71a   :  { %v6152_v28 = vrot.slane %v12796_v38, 4  ;;  %v6155_v58 = vrot.slane %v12798_v47, 4  ;;  %v6136_v49 = vrot.slane %v12796_v38, 3  ;;  %v6139_v52 = vrot.slane %v12798_v47, 3 }
 0x71b   :  { %v6154_v45 = vrot.slane %v12794_v36, 4  ;;  %v6138_v56 = vrot.slane %v12794_v36, 3  ;;  %v6363_v2 = vrot.slane %v12796_v38, 5  ;;  %v6366_v55 = vrot.slane %v12798_v47, 5 }
 0x71c   :  { %v12810_v39 = vsel %vm2709_vm7, %v6152_v28, %v6153_v48  ;;  %v12814_v35 = vsel %vm2709_vm7, %v6155_v58, %v6152_v28  ;;  %v12818_v22 = vsel %vm2668_vm8, %v6136_v49, %v6137_v8  ;;  %v12822_v13 = vsel %vm2668_vm8, %v6139_v52, %v6136_v49 }
 0x71d   :  { %v6160_v62 = vmul.f32 %v12814_v35, %v11753_v34  ;;  %v6161_v1 = vmul.f32 %v12810_v39, %v11757_v43  ;;  %v6144_v27 = vmul.f32 %v12822_v13, %v11762_v7  ;;  %v6145_v16 = vmul.f32 %v12818_v22, %v11764_v60 }
 0x71e   :  { %v12834_v26 = vsel %vm2709_vm7, %v6153_v48, %v6154_v45  ;;  %v12838_v59 = vsel %vm2668_vm8, %v6137_v8, %v6138_v56  ;;  %v12855_v46 = vsel %vm2709_vm7, %v6154_v45, %v6155_v58  ;;  %v6481_v6 = vrot.slane %v12796_v38, 7  ;;  %v9083_v45 = vld [vmem:[%s13496_s13 + $0x60] sm:$0xff] }
 0x71f   :  { %10497 = vmatprep.mubr.msk.f32.mxu0 %vm2591_vm2, %v6160_v62  ;;  %10511 = vmatprep.mubr.msk.f32.mxu1 %vm2591_vm2, %v6144_v27  ;;  %v6162_v24 = vmul.f32 %v12834_v26, %v11755_v4  ;;  %v6146_v12 = vmul.f32 %v12838_v59, %v11770_v11  ;;  %v12868_v14 = vsel %vm2668_vm8, %v6138_v56, %v6139_v52  ;;  %v6364_v63 = vrot.slane %v12792_v51, 5  ;;  %v9094_v56 = vld [vmem:[%s13496_s13 + $0x98] sm:$0xff] }
 0x720   :  { %10498 = vmatmul.mubr.msk.f32.vlgmr.msra.gmra.mxu0 %vm2591_vm2, %v6161_v1  ;;  %10512 = vmatmul.mubr.msk.f32.vlgmr.msra.gmra.mxu1 %vm2591_vm2, %v6145_v16  ;;  %v6163_v37 = vmul.f32 %v12855_v46, %v11760_v54  ;;  %v12878_v41 = vsel %vm2946_vm9, %v6366_v55, %v6363_v2  ;;  %v6482_v29 = vrot.slane %v12792_v51, 7  ;;  %v6147_v42 = vmul.f32 %v12868_v14, %v11775_v61 }
 0x721   :  { %10518 = vmatpush3.msra.mxu0 %v12770_v40  ;;  %10500 = vmatprep.mubr.msk.f32.mxu0 %vm2591_vm2, %v6162_v24  ;;  %v6484_v40 = vrot.slane %v12798_v47, 7  ;;  %v6365_v48 = vrot.slane %v12794_v36, 5  ;;  %v6483_v8 = vrot.slane %v12794_v36, 7  ;;  %v12897_v28 = vsel %vm2946_vm9, %v6363_v2, %v6364_v63  ;;  %v9102_v24 = vld [vmem:[%s13496_s13 + $0xb8] sm:$0xff]  ;;  %v9093_v2 = vld [vmem:[%s13496_s13 + $0x90] sm:$0xff] }
 0x722   :  { %10514 = vmatprep.mubr.msk.f32.mxu1 %vm2591_vm2, %v6146_v12  ;;  %10519 = vmatprep.subr.mxu0 %v9077_v20  ;;  %v6371_v58 = vmul.f32 %v12878_v41, %v11766_v57  ;;  %v6487_v49 = vsel %vm3090_vm10, %v6481_v6, %v6482_v29  ;;  %v6372_v1 = vmul.f32 %v12897_v28, %v11768_v53 }
 0x723   :  { %10532 = vmatpush3.msra.mxu1 %v12776_v30  ;;  %10520 = vmatpush3.msra.mxu0 %v9077_v20  ;;  %v9075_v30 = vld [vmem:[%s13496_s13 + $0x40] sm:$0xff]  ;;  %v6488_v25 = vsel %vm3090_vm10, %v6484_v40, %v6481_v6  ;;  %v12913_v62 = vsel %vm2946_vm9, %v6364_v63, %v6365_v48  ;;  %v6486_v27 = vsel %vm3090_vm10, %v6482_v29, %v6483_v8  ;;  %v9101_v63 = vld [vmem:[%s13496_s13 + $0xb0] sm:$0xff] }
 0x724   :  { %10533 = vmatprep.subr.mxu1 %v9085_v32  ;;  %10521 = vmatprep.subr.mxu0 %v9076_v3  ;;  %v6489_v52 = vmul.f32 %v6488_v25, %v11784_v33  ;;  %v6490_v16 = vmul.f32 %v6487_v49, %v11790_v5  ;;  %v6373_v20 = vmul.f32 %v12913_v62, %v11777_v0  ;;  %v9099_v49 = vld [vmem:[%s13496_s13 + $0xa0] sm:$0xff] }
 0x725   :  { %10534 = vmatpush3.msra.mxu1 %v9085_v32  ;;  %10501 = vmatmul.mubr.msk.f32.gmra.mxu0 %vm2591_vm2, %v6163_v37  ;;  %v6491_v12 = vmul.f32 %v6486_v27, %v11797_v44  ;;  %v12934_v6 = vsel %vm2946_vm9, %v6365_v48, %v6366_v55  ;;  %v6705_v32 = vrot.slane %v12796_v38, 1  ;;  %v9092_v37 = vld [vmem:[%s13496_s13 + $0x88] sm:$0xff]  ;;  %v6485_v29 = vsel %vm3090_vm10, %v6483_v8, %v6484_v40  ;;  %v9091_v40 = vld [vmem:[%s13496_s13 + $0x80] sm:$0xff] }
 0x726   :  { %10515 = vmatmul.mubr.msk.f32.gmra.mxu1 %vm2591_vm2, %v6147_v42  ;;  %10522 = vmatpush3.msra.mxu0 %v9076_v3  ;;  %v6706_v3 = vrot.slane %v12792_v51, 1  ;;  %v6374_v55 = vmul.f32 %v12934_v6, %v11782_v18  ;;  %v6707_v42 = vrot.slane %v12794_v36, 1  ;;  %v6708_v48 = vrot.slane %v12798_v47, 1 }
 0x727   :  { %10535 = vmatprep.subr.mxu1 %v9084_v21  ;;  %10523 = vmatprep.subr.mxu0 %v9075_v30 }
 0x728   :  { %10525 = vmatprep.mubr.msk.f32.mxu0 %vm2591_vm2, %v6371_v58  ;;  %10536 = vmatpush3.msra.mxu1 %v9084_v21  ;;  %v6492_v21 = vmul.f32 %v6485_v29, %v11816_v9  ;;  %v6711_v25 = vsel %vm3340_vm11, %v6705_v32, %v6706_v3  ;;  %v6710_v8 = vsel %vm3340_vm11, %v6706_v3, %v6707_v42  ;;  %v13602_v3 = vld [vmem:[#allocation14_spill] sm:$0xff]  ;;  %v9126_v29 = vld [vmem:[%s13496_s13 + $0x118] sm:$0xff] }
 0x729   :  { %10539 = vmatprep.mubr.msk.f32.mxu1 %vm2591_vm2, %v6489_v52  ;;  %10524 = vmatpush3.msra.mxu0 %v9075_v30  ;;  %v9100_v30 = vld [vmem:[%s13496_s13 + $0xa8] sm:$0xff]  ;;  %v6713_v58 = vmul.f32 %v6711_v25, %v11840_v50  ;;  %v9110_v52 = vld [vmem:[%s13496_s13 + $0xd8] sm:$0xff] }
 0x72a   :  { %10537 = vmatprep.subr.mxu1 %v9083_v45  ;;  %10545 = vmatprep.subr.mxu0 %v9094_v56  ;;  %v13607_v25 = vld [vmem:[#allocation13_spill] sm:$0xff] }
 0x72b   :  { %10538 = vmatpush3.msra.mxu1 %v9083_v45  ;;  %10526 = vmatmul.mubr.msk.f32.vlgmr.msra.gmra.mxu0 %vm2591_vm2, %v6372_v1  ;;  %v6709_v45 = vsel %vm3340_vm11, %v6707_v42, %v6708_v48  ;;  %v9118_v1 = vld [vmem:[%s13496_s13 + $0xf8] sm:$0xff] }
 0x72c   :  { %10540 = vmatmul.mubr.msk.f32.vlgmr.msra.gmra.mxu1 %vm2591_vm2, %v6490_v16  ;;  %10546 = vmatpush3.msra.mxu0 %v9094_v56  ;;  %v6714_v56 = vmul.f32 %v6710_v8, %v11877_v15  ;;  %v6715_v27 = vmul.f32 %v6709_v45, %v11936_v31  ;;  %v9117_v16 = vld [vmem:[%s13496_s13 + $0xf0] sm:$0xff]  ;;  %v9123_v8 = vld [vmem:[%s13496_s13 + $0x100] sm:$0xff] }
 0x72d   :  { %10559 = vmatprep.subr.mxu1 %v9102_v24  ;;  %10528 = vmatprep.mubr.msk.f32.mxu0 %vm2591_vm2, %v6373_v20  ;;  %v9116_v20 = vld [vmem:[%s13496_s13 + $0xe8] sm:$0xff]  ;;  %v13605_v42 = vld [vmem:[#allocation12_spill] sm:$0xff] }
 0x72e   :  { %10542 = vmatprep.mubr.msk.f32.mxu1 %vm2591_vm2, %v6491_v12  ;;  %10547 = vmatprep.subr.mxu0 %v9093_v2  ;;  %v13601_v12 = vld [vmem:[#allocation10_spill] sm:$0xff] }
 0x72f   :  { %10560 = vmatpush3.msra.mxu1 %v9102_v24  ;;  %10548 = vmatpush3.msra.mxu0 %v9093_v2  ;;  %v6712_v24 = vsel %vm3340_vm11, %v6708_v48, %v6705_v32  ;;  %v9107_v2 = vld [vmem:[%s13496_s13 + $0xc0] sm:$0xff]  ;;  %v6823_v32 = vmul.f32 %v12818_v22, %v13601_v12  ;;  %v13604_v22 = vld [vmem:[#allocation15_spill] sm:$0xff] }
 0x730   :  { %10561 = vmatprep.subr.mxu1 %v9101_v63  ;;  %10549 = vmatprep.subr.mxu0 %v9092_v37 }
 0x731   :  { %10562 = vmatpush3.msra.mxu1 %v9101_v63  ;;  %10529 = vmatmul.mubr.msk.f32.gmra.mxu0 %vm2591_vm2, %v6374_v55  ;;  %v6933_v63 = vmul.f32 %v12810_v39, %v13602_v3  ;;  %v6934_v39 = vmul.f32 %v12834_v26, %v13604_v22  ;;  %v9124_v26 = vld [vmem:[%s13496_s13 + $0x108] sm:$0xff] }
 0x732   :  { %10543 = vmatmul.mubr.msk.f32.gmra.mxu1 %vm2591_vm2, %v6492_v21  ;;  %10550 = vmatpush3.msra.mxu0 %v9092_v37  ;;  %v9115_v37 = vld [vmem:[%s13496_s13 + $0xe0] sm:$0xff]  ;;  %v6825_v21 = vmul.f32 %v12868_v14, %v13605_v42  ;;  %v6826_v14 = vmul.f32 %v12822_v13, %v13607_v25 }
 0x733   :  { %10563 = vmatprep.subr.mxu1 %v9100_v30  ;;  %10551 = vmatprep.subr.mxu0 %v9091_v40 }
 0x734   :  { %10553 = vmatprep.mubr.msk.f32.mxu0 %vm2591_vm2, %v12796_v38  ;;  %10564 = vmatpush3.msra.mxu1 %v9100_v30  ;;  %v9109_v38 = vld [vmem:[%s13496_s13 + $0xd0] sm:$0xff]  ;;  %v13606_v30 = vld [vmem:[#allocation18_spill] sm:$0xff] }
 0x735   :  { %10567 = vmatprep.mubr.msk.f32.mxu1 %vm2591_vm2, %v6713_v58  ;;  %10552 = vmatpush3.msra.mxu0 %v9091_v40  ;;  %v6935_v40 = vmul.f32 %v12855_v46, %v13606_v30  ;;  %v13608_v46 = vld [vmem:[#allocation19_spill] sm:$0xff]  ;;  %v13609_v58 = vld [vmem:[#allocation16_spill] sm:$0xff] }
 0x736   :  { %10565 = vmatprep.subr.mxu1 %v9099_v49  ;;  %10573 = vmatprep.subr.mxu0 %v9110_v52  ;;  %v6936_v48 = vmul.f32 %v12814_v35, %v13608_v46  ;;  %v13611_v35 = vld [vmem:[#allocation20_spill] sm:$0xff] }
 0x737   :  { %10566 = vmatpush3.msra.mxu1 %v9099_v49  ;;  %10554 = vmatmul.mubr.msk.f32.vlgmr.msra.gmra.mxu0 %vm2591_vm2, %v12792_v51  ;;  %v9108_v51 = vld [vmem:[%s13496_s13 + $0xc8] sm:$0xff]  ;;  %v7043_v49 = vmul.f32 %v12897_v28, %v13609_v58  ;;  %v7045_v45 = vmul.f32 %v12934_v6, %v13611_v35 }
 0x738   :  { %10568 = vmatmul.mubr.msk.f32.vlgmr.msra.gmra.mxu1 %vm2591_vm2, %v6714_v56  ;;  %10574 = vmatpush3.msra.mxu0 %v9110_v52  ;;  %v13610_v52 = vld [vmem:[#allocation17_spill] sm:$0xff]  ;;  %v7229_v6 = vld [vmem:[%s13498_s15 + $0x8] sm:$0xff] }
 0x739   :  { %10587 = vmatprep.subr.mxu1 %v9118_v1  ;;  %10556 = vmatprep.mubr.msk.f32.mxu0 %vm2591_vm2, %v12794_v36  ;;  %v6716_v36 = vmul.f32 %v6712_v24, %v11970_v10  ;;  %v7044_v13 = vmul.f32 %v12913_v62, %v13610_v52  ;;  %v13612_v56 = vld [vmem:[#allocation21_spill] sm:$0xff] }
 0x73a   :  { %10570 = vmatprep.mubr.msk.f32.mxu1 %vm2591_vm2, %v6715_v27  ;;  %10575 = vmatprep.subr.mxu0 %v9109_v38  ;;  %v7046_v28 = vmul.f32 %v12878_v41, %v13612_v56  ;;  %v7231_v62 = vld [vmem:[%s13498_s15 + $0x18] sm:$0xff]  ;;  %v7228_v41 = vld [vmem:[%s13498_s15] sm:$0xff] }
 0x73b   :  { %10588 = vmatpush3.msra.mxu1 %v9118_v1  ;;  %10576 = vmatpush3.msra.mxu0 %v9109_v38  ;;  %v7230_v1 = vld [vmem:[%s13498_s15 + $0x10] sm:$0xff] }
 0x73c   :  { %10589 = vmatprep.subr.mxu1 %v9117_v16  ;;  %10577 = vmatprep.subr.mxu0 %v9108_v51 }
 0x73d   :  { %10590 = vmatpush3.msra.mxu1 %v9117_v16  ;;  %10557 = vmatmul.mubr.msk.f32.gmra.mxu0 %vm2591_vm2, %v12798_v47  ;;  %v13603_v47 = vld [vmem:[#allocation11_spill] sm:$0xff] }
 0x73e   :  { %10571 = vmatmul.mubr.msk.f32.gmra.mxu1 %vm2591_vm2, %v6716_v36  ;;  %10578 = vmatpush3.msra.mxu0 %v9108_v51  ;;  %v6824_v55 = vmul.f32 %v12838_v59, %v13603_v47  ;;  %v9125_v59 = vld [vmem:[%s13496_s13 + $0x110] sm:$0xff] }
 0x73f   :  { %10591 = vmatprep.subr.mxu1 %v9116_v20  ;;  %10579 = vmatprep.subr.mxu0 %v9107_v2 }
 0x740   :  { %10581 = vmatprep.mubr.msk.f32.mxu0 %vm2591_vm2, %v6823_v32  ;;  %10592 = vmatpush3.msra.mxu1 %v9116_v20 }
 0x741   :  { %10595 = vmatprep.mubr.msk.f32.mxu1 %vm2591_vm2, %v6933_v63  ;;  %10580 = vmatpush3.msra.mxu0 %v9107_v2 }
 0x742   :  { %10593 = vmatprep.subr.mxu1 %v9115_v37  ;;  %10601 = vmatprep.subr.mxu0 %v9126_v29 }
 0x743   :  { %10594 = vmatpush3.msra.mxu1 %v9115_v37  ;;  %10582 = vmatmul.mubr.msk.f32.vlgmr.msra.gmra.mxu0 %vm2591_vm2, %v6824_v55 }
 0x744   :  { %10596 = vmatmul.mubr.msk.f32.vlgmr.msra.gmra.mxu1 %vm2591_vm2, %v6934_v39  ;;  %10602 = vmatpush3.msra.mxu0 %v9126_v29 }
 0x745   :  { %10584 = vmatprep.mubr.msk.f32.mxu0 %vm2591_vm2, %v6825_v21  ;;  %10598 = vmatprep.mubr.msk.f32.mxu1 %vm2591_vm2, %v6935_v40 }
 0x746   :  { %10603 = vmatprep.subr.mxu0 %v9125_v59  ;;  %10615 = vmatprep.subr.mxu1 %v7231_v62 }
 0x747   :  { %10604 = vmatpush3.msra.mxu0 %v9125_v59  ;;  %10616 = vmatpush3.msra.mxu1 %v7231_v62 }
 0x748   :  { %10605 = vmatprep.subr.mxu0 %v9124_v26  ;;  %10585 = vmatmul.mubr.msk.f32.gmra.mxu0 %vm2591_vm2, %v6826_v14 }
 0x749   :  { %10599 = vmatmul.mubr.msk.f32.gmra.mxu1 %vm2591_vm2, %v6936_v48  ;;  %10606 = vmatpush3.msra.mxu0 %v9124_v26 }
 0x74a   :  { %10607 = vmatprep.subr.mxu0 %v9123_v8  ;;  %10609 = vmatprep.mubr.msk.f32.mxu0 %vm2591_vm2, %v7043_v49 }
 0x74b   :  { %10608 = vmatpush3.msra.mxu0 %v9123_v8  ;;  %10617 = vmatprep.subr.mxu1 %v7230_v1 }
 0x74c   :  { %10610 = vmatmul.mubr.msk.f32.vlgmr.msra.gmra.mxu0 %vm2591_vm2, %v7044_v13  ;;  %10618 = vmatpush3.msra.mxu1 %v7230_v1 }
 0x74d   :  { %10612 = vmatprep.mubr.msk.f32.mxu0 %vm2591_vm2, %v7045_v45  ;;  %10619 = vmatprep.subr.mxu1 %v7229_v6 }
 0x74e   :  { %10620 = vmatpush3.msra.mxu1 %v7229_v6 }
 0x74f   :  { %10621 = vmatprep.subr.mxu1 %v7228_v41 }
 0x750   :  { %10613 = vmatmul.mubr.msk.f32.gmra.mxu0 %vm2591_vm2, %v7046_v28  ;;  %10622 = vmatpush3.msra.mxu1 %v7228_v41 }
 0x7e0   :  { %v10499_v38 = vpop.f32.mrf.mxu0  ;;  %v10513_v27 = vpop.f32.mrf.mxu1 }
 0x7e1   :  { %v6350_v14 = vadd.f32 %v10513_v27, %v10499_v38 }
 0x7e2   :  { %v6247_v16 = vpop.f32.mrf.mxu0  ;;  %v6344_v51 = vpop.f32.mrf.mxu1 }
 0x7e3   :  { %v6345_v49 = vadd.f32 %v6344_v51, %v6247_v16 }
 0x7e5   :  { %v10502_v24 = vpop.f32.mrf.mxu0 }
 0x7e6   :  { %v10516_v36 = vpop.f32.mrf.mxu1 }
 0x7e7   :  { %v6257_v20 = vpop.f32.mrf.mxu0  ;;  %v6360_v45 = vadd.f32 %v10516_v36, %v10502_v24 }
 0x7e8   :  { %v6354_v2 = vpop.f32.mrf.mxu1 }
 0x7e9   :  { %v6355_v1 = vadd.f32 %v6354_v2, %v6257_v20 }
 0x7eb   :  { %v10527_v32 = vpop.f32.mrf.mxu0 }
 0x7ec   :  { %v10541_v63 = vpop.f32.mrf.mxu1  ;;  %v6478_v13 = vadd.f32 %v10527_v32, %v6350_v14 }
 0x7ed   :  { %v6458_v37 = vpop.f32.mrf.mxu0 }
 0x7ee   :  { %v6576_v29 = vpop.f32.mrf.mxu1  ;;  %v6477_v28 = vadd.f32 %v6458_v37, %v6345_v49  ;;  %v6596_v41 = vadd.f32 %v10541_v63, %v6478_v13 }
 0x7f0   :  { %v6595_v46 = vadd.f32 %v6576_v29, %v6477_v28 }
 0x7f1   :  { %v10530_v55 = vpop.f32.mrf.mxu0 }
 0x7f2   :  { %v10544_v39 = vpop.f32.mrf.mxu1  ;;  %v6480_v56 = vadd.f32 %v10530_v55, %v6360_v45 }
 0x7f3   :  { %v6468_v21 = vpop.f32.mrf.mxu0 }
 0x7f4   :  { %v6586_v40 = vpop.f32.mrf.mxu1  ;;  %v6479_v52 = vadd.f32 %v6468_v21, %v6355_v1  ;;  %v6598_v30 = vadd.f32 %v10544_v39, %v6480_v56 }
 0x7f6   :  { %v6597_v38 = vadd.f32 %v6586_v40, %v6479_v52 }
 0x7f7   :  { %v10555_v59 = vpop.f32.mrf.mxu0 }
 0x7f8   :  { %v10569_v26 = vpop.f32.mrf.mxu1  ;;  %v6702_v25 = vadd.f32 %v10555_v59, %v6596_v41 }
 0x7f9   :  { %v6682_v48 = vpop.f32.mrf.mxu0 }
 0x7fa   :  { %v6800_v8 = vpop.f32.mrf.mxu1  ;;  %v6701_v42 = vadd.f32 %v6682_v48, %v6595_v46  ;;  %v6820_v47 = vadd.f32 %v10569_v26, %v6702_v25 }
 0x7fc   :  { %v6819_v36 = vadd.f32 %v6800_v8, %v6701_v42 }
 0x7fd   :  { %v10558_v62 = vpop.f32.mrf.mxu0 }
 0x7fe   :  { %v10572_v6 = vpop.f32.mrf.mxu1  ;;  %v6704_v16 = vadd.f32 %v10558_v62, %v6598_v30 }
 0x7ff   :  { %v6692_v35 = vpop.f32.mrf.mxu0 }
 0x800   :  { %v6810_v58 = vpop.f32.mrf.mxu1  ;;  %v6703_v24 = vadd.f32 %v6692_v35, %v6597_v38  ;;  %v6822_v63 = vadd.f32 %v10572_v6, %v6704_v16 }
 0x802   :  { %v6821_v55 = vadd.f32 %v6810_v58, %v6703_v24 }
 0x803   :  { %v10583_v22 = vpop.f32.mrf.mxu0 }
 0x804   :  { %v10597_v27 = vpop.f32.mrf.mxu1  ;;  %v6930_v32 = vadd.f32 %v10583_v22, %v6820_v47 }
 0x805   :  { %v6910_v51 = vpop.f32.mrf.mxu0 }
 0x806   :  { %v7020_v20 = vpop.f32.mrf.mxu1  ;;  %v6929_v37 = vadd.f32 %v6910_v51, %v6819_v36  ;;  %v7040_v14 = vadd.f32 %v10597_v27, %v6930_v32 }
 0x808   :  { %v10586_v2 = vpop.f32.mrf.mxu0  ;;  %v7039_v39 = vadd.f32 %v7020_v20, %v6929_v37 }
 0x809   :  { %v6932_v29 = vadd.f32 %v10586_v2, %v6822_v63  ;;  %v10600_v59 = vpop.f32.mrf.mxu1 }
 0x80a   :  { %v6920_v21 = vpop.f32.mrf.mxu0 }
 0x80b   :  { %v6931_v56 = vadd.f32 %v6920_v21, %v6821_v55  ;;  %v7042_v25 = vadd.f32 %v10600_v59, %v6932_v29  ;;  %v7030_v30 = vpop.f32.mrf.mxu1 }
 0x80c   :  { %v10611_v46 = vpop.f32.mrf.mxu0 }
 0x80d   :  { %v7150_v52 = vadd.f32 %v10611_v46, %v7040_v14  ;;  %v7041_v35 = vadd.f32 %v7030_v30, %v6931_v56 }
 0x80e   :  { %v7130_v40 = vpop.f32.mrf.mxu0 }
 0x80f   :  { %v7149_v26 = vadd.f32 %v7130_v40, %v7039_v39  ;;  %v7168_v47 = vmul.f32 %v7150_v52, %v7150_v52  ;;  %v7155_v49 = vsel %vm2591_vm2, %v7150_v52, 0.0 }
 0x810   :  { %v10614_v42 = vpop.f32.mrf.mxu0 }
 0x811   :  { %v7154_v22 = vsel %vm2591_vm2, %v7149_v26, 0.0  ;;  %v7167_v48 = vmul.f32 %v7149_v26, %v7149_v26  ;;  %v7152_v8 = vadd.f32 %v10614_v42, %v7042_v25  ;;  %v7172_v62 = vsel %vm2591_vm2, %v7168_v47, 0.0 }
 0x812   :  { %v7140_v58 = vpop.f32.mrf.mxu0  ;;  %v7156_v28 = vadd.f32 %v7155_v49, %v7154_v22 }
 0x813   :  { %v7171_v13 = vsel %vm2591_vm2, %v7167_v48, 0.0  ;;  %v7151_v45 = vadd.f32 %v7140_v58, %v7041_v35  ;;  %v7170_v1 = vmul.f32 %v7152_v8, %v7152_v8  ;;  %v7159_v16 = vsel %vm2591_vm2, %v7152_v8, 0.0  ;;  %v7153_v48 = vld [vmem:[%s13497_s14] sm:$0x3] }
 0x814   :  { %v7173_v38 = vadd.f32 %v7172_v62, %v7171_v13 }
 0x815   :  { %v7157_v6 = vsel %vm2591_vm2, %v7151_v45, 0.0  ;;  %v7169_v41 = vmul.f32 %v7151_v45, %v7151_v45  ;;  %v7176_v32 = vsel %vm2591_vm2, %v7170_v1, 0.0 }
 0x816   :  { %v7158_v27 = vadd.f32 %v7157_v6, %v7156_v28  ;;  %v7207_v28 = vrot.slane %v7153_v48, %v11147_v19 }
 0x817   :  { %v7174_v51 = vsel %vm2591_vm2, %v7169_v41, 0.0 }
 0x818   :  { %v7160_v24 = vadd.f32 %v7159_v16, %v7158_v27  ;;  %v7175_v36 = vadd.f32 %v7174_v51, %v7173_v38 }
 0x81a   :  { %v7161_v20 = vrot.slane %v7160_v24, 4  ;;  %v7177_v2 = vadd.f32 %v7176_v32, %v7175_v36 }
 0x81c   :  { %v7162_v63 = vadd.f32 %v7161_v20, %v7160_v24  ;;  %v7178_v37 = vrot.slane %v7177_v2, 4 }
 0x81e   :  { %v7163_v55 = vrot.slane %v7162_v63, 2  ;;  %v7179_v21 = vadd.f32 %v7178_v37, %v7177_v2  ;;  %v13613_v2 = vld [vmem:[#allocation8_spill] sm:$0xff]  ;;  %v13614_v37 = vld [vmem:[#allocation7_spill] sm:$0xff] }
 0x820   :  { %v7164_v14 = vadd.f32 %v7163_v55, %v7162_v63  ;;  %v7180_v29 = vrot.slane %v7179_v21, 2 }
 0x822   :  { %v7165_v59 = vrot.slane %v7164_v14, 1  ;;  %v7181_v56 = vadd.f32 %v7180_v29, %v7179_v21 }
 0x824   :  { %v7166_v46 = vadd.f32 %v7165_v59, %v7164_v14  ;;  %v7182_v39 = vrot.slane %v7181_v56, 1  ;;  %v13616_v14 = vld [vmem:[#allocation9_spill] sm:$0xff] }
 0x826   :  { %v7183_v40 = vadd.f32 %v7182_v39, %v7181_v56  ;;  %v7184_v25 = vmul.f32 0.03125, %v7166_v46 }
 0x828   :  { %v7185_v30 = vmul.f32 0.03125, %v7183_v40  ;;  %v7186_v35 = vmul.f32 %v7184_v25, %v7184_v25  ;;  %v7191_v13 = vsub.f32 %v7151_v45, %v7184_v25  ;;  %v7189_v1 = vsub.f32 %v7149_v26, %v7184_v25  ;;  %v13615_v45 = vld [vmem:[#allocation6_spill] sm:$0xff] }
 0x829   :  { %v7190_v6 = vsub.f32 %v7150_v52, %v7184_v25  ;;  %v7192_v41 = vsub.f32 %v7152_v8, %v7184_v25 }
 0x82a   :  { %v7187_v42 = vsub.f32 %v7185_v30, %v7186_v35  ;;  %v9131_v30 = vld [vmem:[%s13499_s16] ss:$0 sm:$0xff] }
 0x82c   :  { %v7188_v47 = vmax.f32 %v7187_v42, 0.0 }
 0x82e   :  { %v7193_v22 = vadd.f32 1e-05, %v7188_v47 }
 0x830   :  { %10801 = vrsqrt.f32 %v7193_v22 }
 0x83d   :  { %v10802_v58 = vpop.eup %10801 }
 0x83e   :  { %v7195_v49 = vmul.f32 %v10802_v58, %v7153_v48 }
 0x840   :  { %v7199_v62 = vrot.slane %v7195_v49, %v11150_v23 }
 0x842   :  { %v7202_v38 = vmul.f32 %v7199_v62, %v7191_v13  ;;  %v7200_v27 = vmul.f32 %v7199_v62, %v7189_v1  ;;  %v7201_v16 = vmul.f32 %v7199_v62, %v7190_v6  ;;  %v7203_v51 = vmul.f32 %v7199_v62, %v7192_v41  ;;  %v7337_v6 = vld [vmem:[%s13501_s18 + $0x8] sm:$0xff] }
 0x844   :  { %v7210_v24 = vadd.f32 %v7207_v28, %v7202_v38  ;;  %v7208_v36 = vadd.f32 %v7207_v28, %v7200_v27  ;;  %v7209_v32 = vadd.f32 %v7207_v28, %v7201_v16  ;;  %v7211_v20 = vadd.f32 %v7207_v28, %v7203_v51  ;;  %v7336_v38 = vld [vmem:[%s13501_s18] sm:$0xff] }
 0x846   :  { %v7212_v63 = vadd.f32 %v7208_v36, %v13613_v2  ;;  %v7213_v55 = vadd.f32 %v7209_v32, %v13614_v37  ;;  %v7214_v21 = vadd.f32 %v7210_v24, %v13615_v45  ;;  %v7215_v29 = vadd.f32 %v7211_v20, %v13616_v14  ;;  %v7338_v32 = vld [vmem:[%s13501_s18 + $0x10] sm:$0xff]  ;;  %v7339_v2 = vld [vmem:[%s13501_s18 + $0x18] sm:$0xff] }
 0x848   :  { %vm7216_vm15 = vcmp.ge.f32.partialorder %v7212_v63, 0.0  ;;  %v7220_v26 = vmul.f32 0.2, %v7212_v63  ;;  %vm7217_vm1 = vcmp.ge.f32.partialorder %v7213_v55, 0.0  ;;  %v7221_v52 = vmul.f32 0.2, %v7213_v55 }
 0x849   :  { %vm7218_vm3 = vcmp.ge.f32.partialorder %v7214_v21, 0.0  ;;  %v7222_v8 = vmul.f32 0.2, %v7214_v21  ;;  %v7223_v46 = vmul.f32 0.2, %v7215_v29  ;;  %vm7219_vm4 = vcmp.ge.f32.partialorder %v7215_v29, 0.0 }
 0x84a   :  { %v13089_v59 = vsel %vm7216_vm15, %v7212_v63, %v7220_v26  ;;  %v13091_v56 = vsel %vm7217_vm1, %v7213_v55, %v7221_v52 }
 0x84b   :  { %10623 = vmatprep.mubr.msk.f32.mxu1 %vm2591_vm2, %v13089_v59  ;;  %v13097_v39 = vsel %vm7218_vm3, %v7214_v21, %v7222_v8  ;;  %v13101_v40 = vsel %vm7219_vm4, %v7215_v29, %v7223_v46 }
 0x84c   :  { %10624 = vmatmul.mubr.msk.f32.vlgmr.msra.gmra.mxu1 %vm2591_vm2, %v13091_v56 }
 0x84d   :  { %10626 = vmatprep.mubr.msk.f32.mxu1 %vm2591_vm2, %v13097_v39 }
 0x850   :  { %10627 = vmatmul.mubr.msk.f32.gmra.mxu1 %vm2591_vm2, %v13101_v40 }
 0x90c   :  { %v10625_v25 = vpop.f32.mrf.mxu1 }
 0x90d   :  { %v13114_v49 = vadd.f32 %v10625_v25, %v9131_v30 }
 0x90e   :  { %v7317_v35 = vpop.f32.mrf.mxu1 }
 0x90f   :  { %v13108_v42 = vadd.f32 %v9131_v30, %v7317_v35 }
 0x910   :  { %v10628_v47 = vpop.f32.mrf.mxu1 }
 0x911   :  { %v7333_v22 = vadd.f32 %v10628_v47, %v9131_v30  ;;  %10637 = vmatprep.mubr.msk.f32.mxu0 %vm7352_vm5, %v13108_v42 }
 0x912   :  { %v7327_v48 = vpop.f32.mrf.mxu1 }
 0x913   :  { %v13112_v58 = vadd.f32 %v9131_v30, %v7327_v48  ;;  %7350 = vrot.lane.b32.xlu0 %v7333_v22, %s10844_s23 }
 0x915   :  { %7348 = vrot.lane.b32.xlu1 %v13112_v58, %s10844_s23 }
 0x917   :  { %7346 = vrot.lane.b32.xlu0 %v13114_v49, %s10844_s23 }
 0x919   :  { %7344 = vrot.lane.b32.xlu1 %v13108_v42, %s10844_s23  ;;  %s8710_s23 = sshll.u32 %s10846_s7, 4  ;;  %s8711_s23 = int_to_ptr.vmem [resolvable:$true] %s8710_s23 }
 0x91a   :  { %p10826_p1 = scmp.lt.s32.totalorder %s8711_s23, %s8711_s23 }
 0x985   :  { %v7351_v13 = vpop.permute.xlu0 %7350 }
 0x986   :  { %10629 = vmatprep.subr.msk.mxu0 %vm7352_vm5, %v7351_v13 }
 0x987   :  { %10630 = vmatpush3.xpose.msk.msra.mxu0 %vm7352_vm5, %v7351_v13  ;;  %v7349_v28 = vpop.permute.xlu1 %7348 }
 0x988   :  { %10631 = vmatprep.subr.msk.mxu0 %vm7352_vm5, %v7349_v28 }
 0x989   :  { %v7347_v62 = vpop.permute.xlu0 %7346 }
 0x98b   :  { %10632 = vmatpush3.xpose.msk.msra.mxu0 %vm7352_vm5, %v7349_v28  ;;  %v7345_v1 = vpop.permute.xlu1 %7344 }
 0x98c   :  { %10633 = vmatprep.subr.msk.mxu0 %vm7352_vm5, %v7347_v62 }
 0x98f   :  { %10634 = vmatpush3.xpose.msk.msra.mxu0 %vm7352_vm5, %v7347_v62 }
 0x990   :  { %10635 = vmatprep.subr.msk.mxu0 %vm7352_vm5, %v7345_v1 }
 0x993   :  { %10636 = vmatpush3.xpose.msk.msra.mxu0 %vm7352_vm5, %v7345_v1 }
 0x996   :  { %10638 = vmatmul.mubr.msk.f32.vlgmr.msra.gmra.mxu0 %vm7352_vm5, %v13114_v49 }
 0x997   :  { %10640 = vmatprep.mubr.msk.f32.mxu0 %vm7352_vm5, %v13112_v58 }
 0x99a   :  { %10641 = vmatmul.mubr.msk.f32.gmra.mxu0 %vm7352_vm5, %v7333_v22 }
 0xa56   :  { %v10639_v41 = vpop.f32.mrf.mxu0 }
 0xa57   :  { %v7441_v27 = vadd.f32 %v10639_v41, %v7337_v6 }
 0xa58   :  { %v7435_v16 = vpop.f32.mrf.mxu0 }
 0xa59   :  { %v7436_v51 = vadd.f32 %v7435_v16, %v7336_v38  ;;  %v7457_v24 = vsel %vm2591_vm2, %v7441_v27, -inf  ;;  %v9148_v38 = vld [vmem:[#allocation2] ss:$0 sm:$0xff] }
 0xa5a   :  { %7458 = vmax.xlane.f32.xlu1 %v7457_v24  ;;  %v10642_v36 = vpop.f32.mrf.mxu0 }
 0xa5b   :  { %v7454_v20 = vsel %vm2591_vm2, %v7436_v51, -inf  ;;  %v7451_v55 = vadd.f32 %v10642_v36, %v7339_v2 }
 0xa5c   :  { %v7445_v63 = vpop.f32.mrf.mxu0  ;;  %7455 = vmax.xlane.f32.xlu0 %v7454_v20 }
 0xa5d   :  { %v7446_v37 = vadd.f32 %v7445_v63, %v7338_v32  ;;  %v7463_v21 = vsel %vm2591_vm2, %v7451_v55, -inf }
 0xa5f   :  { %v7460_v45 = vsel %vm2591_vm2, %v7446_v37, -inf }
 0xa60   :  { %7461 = vmax.xlane.f32.xlu0 %v7460_v45 }
 0xa64   :  { %7464 = vmax.xlane.f32.xlu0 %v7463_v21 }
 0xa6b   :  { %7505 = vrot.lane.b32.xlu1 %v7333_v22, %s10845_s12 }
 0xae3   :  { %v7459_v14 = vpop.xlane.xlu1 %7458 }
 0xae4   :  { %v7467_v29 = vsub.f32 %v7441_v27, %v7459_v14 }
 0xae5   :  { %v7456_v26 = vpop.xlane.xlu0 %7455 }
 0xae6   :  { %v7472_v52 = vmul.f32 1.442695, %v7467_v29  ;;  %v7466_v8 = vsub.f32 %v7436_v51, %v7456_v26  ;;  %v9152_v26 = vld [vmem:[%s13502_s19 + $0x38] sm:$0xff] }
 0xae7   :  { %v7506_v46 = vpop.permute.xlu1 %7505 }
 0xae8   :  { %10803 = vpow2.f32 %v7472_v52  ;;  %v7470_v25 = vmul.f32 1.442695, %v7466_v8  ;;  %10643 = vmatprep.subr.mxu1 %v7506_v46  ;;  %v7640_v52 = vld [vmem:[%s13502_s19 + $0x18] sm:$0xff]  ;;  %v9151_v8 = vld [vmem:[%s13502_s19 + $0x30] sm:$0xff] }
 0xae9   :  { %10644 = vmatpush3.msra.mxu1 %v7506_v46  ;;  %v7462_v30 = vpop.xlane.xlu0 %7461  ;;  %10671 = vmatprep.subr.mxu0 %v7640_v52  ;;  %v7639_v46 = vld [vmem:[%s13502_s19 + $0x10] sm:$0xff] }
 0xaea   :  { %10805 = vpow2.f32 %v7470_v25  ;;  %v7468_v41 = vsub.f32 %v7446_v37, %v7462_v30  ;;  %10672 = vmatpush3.msra.mxu0 %v7640_v52  ;;  %v9150_v25 = vld [vmem:[%s13502_s19 + $0x28] sm:$0xff] }
 0xaeb   :  { %10673 = vmatprep.subr.mxu0 %v7639_v46  ;;  %v7638_v30 = vld [vmem:[%s13502_s19 + $0x8] sm:$0xff] }
 0xaec   :  { %v7474_v27 = vmul.f32 1.442695, %v7468_v41  ;;  %10674 = vmatpush3.msra.mxu0 %v7639_v46  ;;  %v9171_v46 = vld [vmem:[%s13502_s19 + $0x70] sm:$0xff] }
 0xaed   :  { %v7465_v35 = vpop.xlane.xlu0 %7464  ;;  %10675 = vmatprep.subr.mxu0 %v7638_v30 }
 0xaee   :  { %v7469_v47 = vsub.f32 %v7451_v55, %v7465_v35  ;;  %v9149_v35 = vld [vmem:[%s13502_s19 + $0x20] sm:$0xff]  ;;  %10676 = vmatpush3.msra.mxu0 %v7638_v30 }
 0xaf0   :  { %v7476_v48 = vmul.f32 1.442695, %v7469_v47  ;;  %v7637_v47 = vld [vmem:[%s13502_s19] sm:$0xff] }
 0xaf1   :  { %10677 = vmatprep.subr.mxu0 %v7637_v47 }
 0xaf2   :  { %10807 = vpow2.f32 %v7476_v48  ;;  %v9164_v48 = vld [vmem:[%s13502_s19 + $0x58] sm:$0xff]  ;;  %10678 = vmatpush3.msra.mxu0 %v7637_v47 }
 0xaf3   :  { %10809 = vpow2.f32 %v7474_v27 }
 0xaf5   :  { %v10804_v13 = vpop.eup %10803 }
 0xaf6   :  { %v7481_v28 = vsel %vm2591_vm2, %v10804_v13, 0.0 }
 0xaf7   :  { %v10806_v22 = vpop.eup %10805  ;;  %7482 = vadd.xlane.f32.xlu0 %v7481_v28 }
 0xaf8   :  { %v7478_v62 = vsel %vm2591_vm2, %v10806_v22, 0.0 }
 0xaf9   :  { %7479 = vadd.xlane.f32.xlu1 %v7478_v62 }
 0xaff   :  { %v10808_v1 = vpop.eup %10807 }
 0xb00   :  { %v7487_v6 = vsel %vm2591_vm2, %v10808_v1, 0.0  ;;  %v10810_v16 = vpop.eup %10809 }
 0xb01   :  { %7488 = vadd.xlane.f32.xlu0 %v7487_v6  ;;  %v7484_v51 = vsel %vm2591_vm2, %v10810_v16, 0.0 }
 0xb0a   :  { %7501 = vrot.lane.b32.xlu1 %v13114_v49, %s10845_s12 }
 0xb17   :  { %7503 = vrot.lane.b32.xlu0 %v13112_v58, %s10845_s12 }
 0xb1b   :  { %7614 = vperm.xlu0 %10789, %v9148_v38  }
 0xb2e   :  { %7485 = vadd.xlane.f32.xlu1 %v7484_v51 }
 0xb3f   :  { %7499 = vrot.lane.b32.xlu1 %v13108_v42, %s10845_s12 }
 0xb80   :  { %v7483_v36 = vpop.xlane.xlu0 %7482 }
 0xb82   :  { %v7480_v24 = vpop.xlane.xlu1 %7479 }
 0xb83   :  { %10811 = vrcp.f32 %v7480_v24 }
 0xb84   :  { %10813 = vrcp.f32 %v7483_v36 }
 0xb86   :  { %v7502_v2 = vpop.permute.xlu1 %7501 }
 0xb8a   :  { %v7489_v32 = vpop.xlane.xlu0 %7488 }
 0xb8b   :  { %10815 = vrcp.f32 %v7489_v32 }
 0xb8e   :  { %v7504_v49 = vpop.permute.xlu0 %7503 }
 0xb8f   :  { %10645 = vmatprep.subr.mxu1 %v7504_v49 }
 0xb90   :  { %v10812_v20 = vpop.eup %10811  ;;  %10646 = vmatpush3.msra.mxu1 %v7504_v49 }
 0xb91   :  { %10647 = vmatprep.subr.mxu1 %v7502_v2  ;;  %v7494_v58 = vmul.f32 %v10812_v20, %v10806_v22  ;;  %v10814_v37 = vpop.eup %10813 }
 0xb92   :  { %10648 = vmatpush3.msra.mxu1 %v7502_v2  ;;  %v7495_v55 = vmul.f32 %v10814_v37, %v10804_v13  ;;  %v9172_v13 = vld [vmem:[%s13502_s19 + $0x78] sm:$0xff] }
 0xb93   :  { %10651 = vmatprep.mubr.msk.f32.mxu1 %vm2591_vm2, %v7494_v58  ;;  %10699 = vmatprep.subr.mxu0 %v9172_v13 }
 0xb96   :  { %v7615_v62 = vpop.permute.xlu0 %7614 }
 0xb98   :  { %v10816_v45 = vpop.eup %10815 }
 0xb99   :  { %v7497_v29 = vmul.f32 %v10816_v45, %v10808_v1 }
 0xbb7   :  { %v7486_v63 = vpop.xlane.xlu1 %7485 }
 0xbb8   :  { %10817 = vrcp.f32 %v7486_v63 }
 0xbbb   :  { %v7500_v42 = vpop.permute.xlu1 %7499 }
 0xbbc   :  { %10649 = vmatprep.subr.mxu1 %v7500_v42 }
 0xbbd   :  { %10650 = vmatpush3.msra.mxu1 %v7500_v42 }
 0xbbe   :  { %10652 = vmatmul.mubr.msk.f32.vlgmr.msra.gmra.mxu1 %vm2591_vm2, %v7495_v55  ;;  %10657 = vmatprep.subr.mxu1 %v9152_v26 }
 0xbbf   :  { %10658 = vmatpush3.msra.mxu1 %v9152_v26 }
 0xbc0   :  { %10659 = vmatprep.subr.mxu1 %v9151_v8 }
 0xbc1   :  { %10660 = vmatpush3.msra.mxu1 %v9151_v8 }
 0xbc2   :  { %10661 = vmatprep.subr.mxu1 %v9150_v25 }
 0xbc3   :  { %10662 = vmatpush3.msra.mxu1 %v9150_v25  ;;  %v9162_v25 = vld [vmem:[%s13502_s19 + $0x48] sm:$0xff] }
 0xbc4   :  { %10663 = vmatprep.subr.mxu1 %v9149_v35 }
 0xbc5   :  { %v10818_v21 = vpop.eup %10817  ;;  %10664 = vmatpush3.msra.mxu1 %v9149_v35 }
 0xbc6   :  { %v7496_v14 = vmul.f32 %v10818_v21, %v10810_v16  ;;  %10685 = vmatprep.subr.mxu1 %v9164_v48 }
 0xbc8   :  { %10654 = vmatprep.mubr.msk.f32.mxu1 %vm2591_vm2, %v7496_v14 }
 0xbc9   :  { %10655 = vmatmul.mubr.msk.f32.gmra.mxu1 %vm2591_vm2, %v7497_v29 }
 0xc7e   :  { %v10653_v28 = vpop.f32.mrf.mxu1 }
 0xc7f   :  { %v7618_v6 = vmul.f32 %v10653_v28, %v7615_v62 }
 0xc80   :  { %v7589_v22 = vpop.f32.mrf.mxu1 }
 0xc81   :  { %v7617_v1 = vmul.f32 %v7615_v62, %v7589_v22  ;;  %v13197_v38 = vadd.f32 %v7618_v6, %v13091_v56 }
 0xc83   :  { %v13194_v41 = vadd.f32 %v7617_v1, %v13089_v59  ;;  %v7626_v20 = vrot.slane %v13197_v38, 3  ;;  %v7642_v2 = vrot.slane %v13197_v38, 4  ;;  %v7853_v28 = vrot.slane %v13197_v38, 5 }
 0xc84   :  { %v7971_v6 = vrot.slane %v13197_v38, 7 }
 0xc85   :  { %v7641_v24 = vrot.slane %v13194_v41, 4  ;;  %v7625_v36 = vrot.slane %v13194_v41, 3  ;;  %v7852_v35 = vrot.slane %v13194_v41, 5  ;;  %v7970_v47 = vrot.slane %v13194_v41, 7 }
 0xc87   :  { %v13213_v63 = vsel %vm2709_vm7, %v7641_v24, %v7642_v2 }
 0xc88   :  { %v7650_v21 = vmul.f32 %v13213_v63, %v11757_v43  ;;  %v9163_v43 = vld [vmem:[%s13502_s19 + $0x50] sm:$0xff] }
 0xc89   :  { %v10656_v27 = vpop.f32.mrf.mxu1 }
 0xc8a   :  { %v7620_v16 = vmul.f32 %v10656_v27, %v7615_v62  ;;  %v13300_v27 = vsel %vm2946_vm9, %v7852_v35, %v7853_v28 }
 0xc8b   :  { %v7599_v51 = vpop.f32.mrf.mxu1 }
 0xc8c   :  { %v13202_v32 = vadd.f32 %v7620_v16, %v13101_v40  ;;  %v7619_v49 = vmul.f32 %v7615_v62, %v7599_v51  ;;  %v13217_v40 = vsel %vm2668_vm8, %v7625_v36, %v7626_v20  ;;  %v9161_v62 = vld [vmem:[%s13502_s19 + $0x40] sm:$0xff]  ;;  %v7976_v51 = vsel %vm3090_vm10, %v7970_v47, %v7971_v6 }
 0xc8d   :  { %v7634_v14 = vmul.f32 %v13217_v40, %v11764_v60  ;;  %v8312_v17 = vmul.f32 %v13217_v40, %v13601_v12  ;;  %v13618_v12 = vld [vmem:[#allocation15_spill] sm:$0xff] }
 0xc8e   :  { %v13207_v59 = vadd.f32 %v7619_v49, %v13097_v39  ;;  %v7644_v56 = vrot.slane %v13202_v32, 4  ;;  %v7628_v58 = vrot.slane %v13202_v32, 3  ;;  %v9180_v49 = vld [vmem:[%s13502_s19 + $0x98] sm:$0xff] }
 0xc90   :  { %v13221_v37 = vsel %vm2709_vm7, %v7644_v56, %v7641_v24  ;;  %v13225_v39 = vsel %vm2668_vm8, %v7628_v58, %v7625_v36  ;;  %v7643_v42 = vrot.slane %v13207_v59, 4  ;;  %v7627_v26 = vrot.slane %v13207_v59, 3  ;;  %v9169_v36 = vld [vmem:[%s13502_s19 + $0x60] sm:$0xff] }
 0xc91   :  { %v7649_v55 = vmul.f32 %v13221_v37, %v11753_v34  ;;  %v7633_v45 = vmul.f32 %v13225_v39, %v11762_v7  ;;  %v7855_v7 = vrot.slane %v13202_v32, 5  ;;  %v7854_v1 = vrot.slane %v13207_v59, 5 }
 0xc92   :  { %v13238_v29 = vsel %vm2709_vm7, %v7642_v2, %v7643_v42  ;;  %v13253_v60 = vsel %vm2668_vm8, %v7626_v20, %v7627_v26  ;;  %v13257_v52 = vsel %vm2709_vm7, %v7643_v42, %v7644_v56  ;;  %v13271_v30 = vsel %vm2668_vm8, %v7627_v26, %v7628_v58  ;;  %v9188_v56 = vld [vmem:[%s13502_s19 + $0xb8] sm:$0xff]  ;;  %v9179_v58 = vld [vmem:[%s13502_s19 + $0x90] sm:$0xff] }
 0xc93   :  { %10665 = vmatprep.mubr.msk.f32.mxu1 %vm2591_vm2, %v7649_v55  ;;  %10679 = vmatprep.mubr.msk.f32.mxu0 %vm2591_vm2, %v7633_v45  ;;  %v7651_v34 = vmul.f32 %v13238_v29, %v11755_v4  ;;  %v7973_v4 = vrot.slane %v13202_v32, 7  ;;  %v7635_v8 = vmul.f32 %v13253_v60, %v11770_v11  ;;  %v7652_v11 = vmul.f32 %v13257_v52, %v11760_v54  ;;  %v9178_v45 = vld [vmem:[%s13502_s19 + $0x88] sm:$0xff] }
 0xc94   :  { %10666 = vmatmul.mubr.msk.f32.vlgmr.msra.gmra.mxu1 %vm2591_vm2, %v7650_v21  ;;  %10680 = vmatmul.mubr.msk.f32.vlgmr.msra.gmra.mxu0 %vm2591_vm2, %v7634_v14  ;;  %v7636_v22 = vmul.f32 %v13271_v30, %v11775_v61  ;;  %v7972_v61 = vrot.slane %v13207_v59, 7  ;;  %v7861_v20 = vmul.f32 %v13300_v27, %v11768_v53  ;;  %v7979_v2 = vmul.f32 %v7976_v51, %v11790_v5  ;;  %v9209_v51 = vld [vmem:[%s13502_s19 + $0x100] sm:$0xff] }
 0xc95   :  { %10686 = vmatpush3.msra.mxu1 %v9164_v48  ;;  %10668 = vmatprep.mubr.msk.f32.mxu1 %vm2591_vm2, %v7651_v34  ;;  %v13280_v48 = vsel %vm2946_vm9, %v7855_v7, %v7852_v35  ;;  %v7977_v54 = vsel %vm3090_vm10, %v7973_v4, %v7970_v47  ;;  %v13337_v42 = vsel %vm2946_vm9, %v7854_v1, %v7855_v7  ;;  %v8194_v55 = vrot.slane %v13194_v41, 1  ;;  %v9177_v7 = vld [vmem:[%s13502_s19 + $0x80] sm:$0xff]  ;;  %v9204_v47 = vld [vmem:[%s13502_s19 + $0xf8] sm:$0xff] }
 0xc96   :  { %10687 = vmatprep.subr.mxu1 %v9163_v43  ;;  %10700 = vmatpush3.msra.mxu0 %v9172_v13  ;;  %v9170_v13 = vld [vmem:[%s13502_s19 + $0x68] sm:$0xff]  ;;  %v7860_v16 = vmul.f32 %v13280_v48, %v11766_v57  ;;  %v7978_v24 = vmul.f32 %v7977_v54, %v11784_v33  ;;  %v13316_v57 = vsel %vm2946_vm9, %v7853_v28, %v7854_v1  ;;  %v8195_v21 = vrot.slane %v13197_v38, 1 }
 0xc97   :  { %10682 = vmatprep.mubr.msk.f32.mxu0 %vm2591_vm2, %v7635_v8  ;;  %10688 = vmatpush3.msra.mxu1 %v9163_v43  ;;  %v7975_v33 = vsel %vm3090_vm10, %v7971_v6, %v7972_v61  ;;  %v7862_v53 = vmul.f32 %v13316_v57, %v11777_v0  ;;  %v9187_v0 = vld [vmem:[%s13502_s19 + $0xb0] sm:$0xff]  ;;  %v8196_v14 = vrot.slane %v13207_v59, 1  ;;  %v7863_v26 = vmul.f32 %v13337_v42, %v11782_v18  ;;  %v9186_v43 = vld [vmem:[%s13502_s19 + $0xa8] sm:$0xff]  ;;  %v9185_v8 = vld [vmem:[%s13502_s19 + $0xa0] sm:$0xff] }
 0xc98   :  { %10701 = vmatprep.subr.mxu0 %v9171_v46  ;;  %10689 = vmatprep.subr.mxu1 %v9162_v25  ;;  %v7980_v5 = vmul.f32 %v7975_v33, %v11797_v44  ;;  %v7974_v44 = vsel %vm3090_vm10, %v7972_v61, %v7973_v4  ;;  %v8200_v4 = vsel %vm3340_vm11, %v8194_v55, %v8195_v21  ;;  %v13620_v1 = vld [vmem:[#allocation18_spill] sm:$0xff]  ;;  %v13621_v61 = vld [vmem:[#allocation13_spill] sm:$0xff] }
 0xc99   :  { %10702 = vmatpush3.msra.mxu0 %v9171_v46  ;;  %10669 = vmatmul.mubr.msk.f32.gmra.mxu1 %vm2591_vm2, %v7652_v11  ;;  %v7981_v34 = vmul.f32 %v7974_v44, %v11816_v9  ;;  %v8199_v18 = vsel %vm3340_vm11, %v8195_v21, %v8196_v14  ;;  %v8202_v9 = vmul.f32 %v8200_v4, %v11840_v50  ;;  %v9196_v46 = vld [vmem:[%s13502_s19 + $0xd8] sm:$0xff] }
 0xc9a   :  { %10683 = vmatmul.mubr.msk.f32.gmra.mxu0 %vm2591_vm2, %v7636_v22  ;;  %10690 = vmatpush3.msra.mxu1 %v9162_v25  ;;  %v8197_v25 = vrot.slane %v13202_v32, 1  ;;  %v8203_v35 = vmul.f32 %v8199_v18, %v11877_v15  ;;  %v9203_v15 = vld [vmem:[%s13502_s19 + $0xf0] sm:$0xff]  ;;  %v9193_v22 = vld [vmem:[%s13502_s19 + $0xc0] sm:$0xff]  ;;  %v8424_v6 = vmul.f32 %v13257_v52, %v13620_v1 }
 0xc9b   :  { %10703 = vmatprep.subr.mxu0 %v9170_v13  ;;  %10691 = vmatprep.subr.mxu1 %v9161_v62  ;;  %v13622_v52 = vld [vmem:[#allocation19_spill] sm:$0xff]  ;;  %v13626_v33 = vld [vmem:[#allocation21_spill] sm:$0xff] }
 0xc9c   :  { %10693 = vmatprep.mubr.msk.f32.mxu1 %vm2591_vm2, %v7860_v16  ;;  %10704 = vmatpush3.msra.mxu0 %v9170_v13  ;;  %v8198_v50 = vsel %vm3340_vm11, %v8196_v14, %v8197_v25  ;;  %v8201_v28 = vsel %vm3340_vm11, %v8197_v25, %v8194_v55  ;;  %v9201_v13 = vld [vmem:[%s13502_s19 + $0xe0] sm:$0xff]  ;;  %v8425_v16 = vmul.f32 %v13221_v37, %v13622_v52  ;;  %v13625_v37 = vld [vmem:[#allocation20_spill] sm:$0xff] }
 0xc9d   :  { %10707 = vmatprep.mubr.msk.f32.mxu0 %vm2591_vm2, %v7978_v24  ;;  %10692 = vmatpush3.msra.mxu1 %v9161_v62  ;;  %v8204_v11 = vmul.f32 %v8198_v50, %v11936_v31  ;;  %v8205_v31 = vmul.f32 %v8201_v28, %v11970_v10  ;;  %v8422_v10 = vmul.f32 %v13213_v63, %v13602_v3  ;;  %v9212_v62 = vld [vmem:[%s13502_s19 + $0x118] sm:$0xff] }
 0xc9e   :  { %10705 = vmatprep.subr.mxu0 %v9169_v36  ;;  %10713 = vmatprep.subr.mxu1 %v9180_v49  ;;  %v8423_v3 = vmul.f32 %v13238_v29, %v13618_v12  ;;  %v13619_v63 = vld [vmem:[#allocation12_spill] sm:$0xff]  ;;  %v9210_v29 = vld [vmem:[%s13502_s19 + $0x108] sm:$0xff] }
 0xc9f   :  { %10706 = vmatpush3.msra.mxu0 %v9169_v36  ;;  %10694 = vmatmul.mubr.msk.f32.vlgmr.msra.gmra.mxu1 %vm2591_vm2, %v7861_v20  ;;  %v8314_v40 = vmul.f32 %v13271_v30, %v13619_v63  ;;  %v8315_v30 = vmul.f32 %v13225_v39, %v13621_v61  ;;  %v13623_v24 = vld [vmem:[#allocation16_spill] sm:$0xff]  ;;  %v8534_v20 = vmul.f32 %v13337_v42, %v13625_v37 }
 0xca0   :  { %10708 = vmatmul.mubr.msk.f32.vlgmr.msra.gmra.mxu0 %vm2591_vm2, %v7979_v2  ;;  %10714 = vmatpush3.msra.mxu1 %v9180_v49  ;;  %v8532_v36 = vmul.f32 %v13300_v27, %v13623_v24  ;;  %v13624_v49 = vld [vmem:[#allocation17_spill] sm:$0xff]  ;;  %v8535_v27 = vmul.f32 %v13280_v48, %v13626_v33 }
 0xca1   :  { %10727 = vmatprep.subr.mxu0 %v9188_v56  ;;  %10696 = vmatprep.mubr.msk.f32.mxu1 %vm2591_vm2, %v7862_v53  ;;  %v8533_v39 = vmul.f32 %v13316_v57, %v13624_v49 }
 0xca2   :  { %10710 = vmatprep.mubr.msk.f32.mxu0 %vm2591_vm2, %v7980_v5  ;;  %10715 = vmatprep.subr.mxu1 %v9179_v58 }
 0xca3   :  { %10728 = vmatpush3.msra.mxu0 %v9188_v56  ;;  %10716 = vmatpush3.msra.mxu1 %v9179_v58 }
 0xca4   :  { %10729 = vmatprep.subr.mxu0 %v9187_v0  ;;  %10717 = vmatprep.subr.mxu1 %v9178_v45 }
 0xca5   :  { %10730 = vmatpush3.msra.mxu0 %v9187_v0  ;;  %10697 = vmatmul.mubr.msk.f32.gmra.mxu1 %vm2591_vm2, %v7863_v26 }
 0xca6   :  { %10711 = vmatmul.mubr.msk.f32.gmra.mxu0 %vm2591_vm2, %v7981_v34  ;;  %10718 = vmatpush3.msra.mxu1 %v9178_v45 }
 0xca7   :  { %10731 = vmatprep.subr.mxu0 %v9186_v43  ;;  %10719 = vmatprep.subr.mxu1 %v9177_v7 }
 0xca8   :  { %10721 = vmatprep.mubr.msk.f32.mxu1 %vm2591_vm2, %v13194_v41  ;;  %10732 = vmatpush3.msra.mxu0 %v9186_v43  ;;  %v9195_v41 = vld [vmem:[%s13502_s19 + $0xd0] sm:$0xff] }
 0xca9   :  { %10735 = vmatprep.mubr.msk.f32.mxu0 %vm2591_vm2, %v8202_v9  ;;  %10720 = vmatpush3.msra.mxu1 %v9177_v7 }
 0xcaa   :  { %10733 = vmatprep.subr.mxu0 %v9185_v8  ;;  %10741 = vmatprep.subr.mxu1 %v9196_v46 }
 0xcab   :  { %10734 = vmatpush3.msra.mxu0 %v9185_v8  ;;  %10722 = vmatmul.mubr.msk.f32.vlgmr.msra.gmra.mxu1 %vm2591_vm2, %v13197_v38  ;;  %v9194_v38 = vld [vmem:[%s13502_s19 + $0xc8] sm:$0xff] }
 0xcac   :  { %10736 = vmatmul.mubr.msk.f32.vlgmr.msra.gmra.mxu0 %vm2591_vm2, %v8203_v35  ;;  %10742 = vmatpush3.msra.mxu1 %v9196_v46 }
 0xcad   :  { %10755 = vmatprep.subr.mxu0 %v9204_v47  ;;  %10724 = vmatprep.mubr.msk.f32.mxu1 %vm2591_vm2, %v13207_v59  ;;  %v9202_v59 = vld [vmem:[%s13502_s19 + $0xe8] sm:$0xff] }
 0xcae   :  { %10738 = vmatprep.mubr.msk.f32.mxu0 %vm2591_vm2, %v8204_v11  ;;  %10743 = vmatprep.subr.mxu1 %v9195_v41 }
 0xcaf   :  { %10756 = vmatpush3.msra.mxu0 %v9204_v47  ;;  %10744 = vmatpush3.msra.mxu1 %v9195_v41 }
 0xcb0   :  { %10757 = vmatprep.subr.mxu0 %v9203_v15  ;;  %10745 = vmatprep.subr.mxu1 %v9194_v38 }
 0xcb1   :  { %10758 = vmatpush3.msra.mxu0 %v9203_v15  ;;  %10725 = vmatmul.mubr.msk.f32.gmra.mxu1 %vm2591_vm2, %v13202_v32  ;;  %v13617_v32 = vld [vmem:[#allocation11_spill] sm:$0xff] }
 0xcb2   :  { %10739 = vmatmul.mubr.msk.f32.gmra.mxu0 %vm2591_vm2, %v8205_v31  ;;  %10746 = vmatpush3.msra.mxu1 %v9194_v38  ;;  %v8313_v54 = vmul.f32 %v13253_v60, %v13617_v32  ;;  %v9211_v60 = vld [vmem:[%s13502_s19 + $0x110] sm:$0xff] }
 0xcb3   :  { %10759 = vmatprep.subr.mxu0 %v9202_v59  ;;  %10747 = vmatprep.subr.mxu1 %v9193_v22 }
 0xcb4   :  { %10749 = vmatprep.mubr.msk.f32.mxu1 %vm2591_vm2, %v8312_v17  ;;  %10760 = vmatpush3.msra.mxu0 %v9202_v59 }
 0xcb5   :  { %10763 = vmatprep.mubr.msk.f32.mxu0 %vm2591_vm2, %v8422_v10  ;;  %10748 = vmatpush3.msra.mxu1 %v9193_v22 }
 0xcb6   :  { %10761 = vmatprep.subr.mxu0 %v9201_v13  ;;  %10769 = vmatprep.subr.mxu1 %v9212_v62 }
 0xcb7   :  { %10762 = vmatpush3.msra.mxu0 %v9201_v13  ;;  %10750 = vmatmul.mubr.msk.f32.vlgmr.msra.gmra.mxu1 %vm2591_vm2, %v8313_v54 }
 0xcb8   :  { %10764 = vmatmul.mubr.msk.f32.vlgmr.msra.gmra.mxu0 %vm2591_vm2, %v8423_v3  ;;  %10770 = vmatpush3.msra.mxu1 %v9212_v62 }
 0xcb9   :  { %10752 = vmatprep.mubr.msk.f32.mxu1 %vm2591_vm2, %v8314_v40  ;;  %10766 = vmatprep.mubr.msk.f32.mxu0 %vm2591_vm2, %v8424_v6 }
 0xcba   :  { %10771 = vmatprep.subr.mxu1 %v9211_v60 }
 0xcbb   :  { %10772 = vmatpush3.msra.mxu1 %v9211_v60 }
 0xcbc   :  { %10773 = vmatprep.subr.mxu1 %v9210_v29  ;;  %10753 = vmatmul.mubr.msk.f32.gmra.mxu1 %vm2591_vm2, %v8315_v30 }
 0xcbd   :  { %10767 = vmatmul.mubr.msk.f32.gmra.mxu0 %vm2591_vm2, %v8425_v16  ;;  %10774 = vmatpush3.msra.mxu1 %v9210_v29 }
 0xcbe   :  { %10775 = vmatprep.subr.mxu1 %v9209_v51  ;;  %10777 = vmatprep.mubr.msk.f32.mxu1 %vm2591_vm2, %v8532_v36 }
 0xcbf   :  { %10776 = vmatpush3.msra.mxu1 %v9209_v51 }
 0xcc0   :  { %10778 = vmatmul.mubr.msk.f32.vlgmr.msra.gmra.mxu1 %vm2591_vm2, %v8533_v39 }
 0xcc1   :  { %10780 = vmatprep.mubr.msk.f32.mxu1 %vm2591_vm2, %v8534_v20 }
 0xcc4   :  { %10781 = vmatmul.mubr.msk.f32.gmra.mxu1 %vm2591_vm2, %v8535_v27 }
 0xd54   :  { %v10667_v2 = vpop.f32.mrf.mxu1  ;;  %v10681_v56 = vpop.f32.mrf.mxu0 }
 0xd55   :  { %v7839_v4 = vadd.f32 %v10681_v56, %v10667_v2 }
 0xd56   :  { %v7736_v53 = vpop.f32.mrf.mxu1  ;;  %v7833_v57 = vpop.f32.mrf.mxu0 }
 0xd57   :  { %v7834_v8 = vadd.f32 %v7833_v57, %v7736_v53 }
 0xd59   :  { %v10670_v58 = vpop.f32.mrf.mxu1 }
 0xd5a   :  { %v10684_v5 = vpop.f32.mrf.mxu0 }
 0xd5b   :  { %v7746_v55 = vpop.f32.mrf.mxu1  ;;  %v7849_v25 = vadd.f32 %v10684_v5, %v10670_v58 }
 0xd5c   :  { %v7843_v0 = vpop.f32.mrf.mxu0 }
 0xd5d   :  { %v7844_v47 = vadd.f32 %v7843_v0, %v7746_v55 }
 0xd5f   :  { %v10695_v45 = vpop.f32.mrf.mxu1 }
 0xd60   :  { %v10709_v44 = vpop.f32.mrf.mxu0  ;;  %v7967_v46 = vadd.f32 %v10695_v45, %v7839_v4 }
 0xd61   :  { %v7947_v42 = vpop.f32.mrf.mxu1 }
 0xd62   :  { %v8065_v21 = vpop.f32.mrf.mxu0  ;;  %v7966_v50 = vadd.f32 %v7947_v42, %v7834_v8  ;;  %v8085_v11 = vadd.f32 %v10709_v44, %v7967_v46 }
 0xd64   :  { %v8084_v59 = vadd.f32 %v8065_v21, %v7966_v50 }
 0xd65   :  { %v10698_v14 = vpop.f32.mrf.mxu1 }
 0xd66   :  { %v10712_v26 = vpop.f32.mrf.mxu0  ;;  %v7969_v15 = vadd.f32 %v10698_v14, %v7849_v25 }
 0xd67   :  { %v7957_v34 = vpop.f32.mrf.mxu1 }
 0xd68   :  { %v8075_v43 = vpop.f32.mrf.mxu0  ;;  %v7968_v28 = vadd.f32 %v7957_v34, %v7844_v47  ;;  %v8087_v17 = vadd.f32 %v10712_v26, %v7969_v15 }
 0xd6a   :  { %v8086_v62 = vadd.f32 %v8075_v43, %v7968_v28 }
 0xd6b   :  { %v10723_v7 = vpop.f32.mrf.mxu1 }
 0xd6c   :  { %v10737_v48 = vpop.f32.mrf.mxu0  ;;  %v8191_v22 = vadd.f32 %v10723_v7, %v8085_v11 }
 0xd6d   :  { %v8171_v18 = vpop.f32.mrf.mxu1 }
 0xd6e   :  { %v8289_v9 = vpop.f32.mrf.mxu0  ;;  %v8190_v10 = vadd.f32 %v8171_v18, %v8084_v59  ;;  %v8309_v54 = vadd.f32 %v10737_v48, %v8191_v22 }
 0xd70   :  { %v8308_v40 = vadd.f32 %v8289_v9, %v8190_v10 }
 0xd71   :  { %v10726_v35 = vpop.f32.mrf.mxu1 }
 0xd72   :  { %v10740_v41 = vpop.f32.mrf.mxu0  ;;  %v8193_v12 = vadd.f32 %v10726_v35, %v8087_v17 }
 0xd73   :  { %v8181_v38 = vpop.f32.mrf.mxu1 }
 0xd74   :  { %v8299_v31 = vpop.f32.mrf.mxu0  ;;  %v8192_v63 = vadd.f32 %v8181_v38, %v8086_v62  ;;  %v8311_v29 = vadd.f32 %v10740_v41, %v8193_v12 }
 0xd76   :  { %v8310_v30 = vadd.f32 %v8299_v31, %v8192_v63 }
 0xd77   :  { %v10751_v13 = vpop.f32.mrf.mxu1 }
 0xd78   :  { %v10765_v32 = vpop.f32.mrf.mxu0  ;;  %v8419_v1 = vadd.f32 %v10751_v13, %v8309_v54 }
 0xd79   :  { %v8399_v3 = vpop.f32.mrf.mxu1 }
 0xd7a   :  { %v8509_v6 = vpop.f32.mrf.mxu0  ;;  %v8418_v61 = vadd.f32 %v8399_v3, %v8308_v40  ;;  %v8529_v16 = vadd.f32 %v10765_v32, %v8419_v1  ;;  %v8642_v3 = vld [vmem:[%s13503_s20] sm:$0x3]  ;;  %s10821_s20 = scalar_lea.vmem %s8711_s23, 512 }
 0xd7b   :  { %p10822_p0 = scmp.ne.s32.totalorder %s8711_s23, %s10821_s20  ;;  %p10827_p2 = scmp.lt.s32.totalorder %s10821_s20, %s10821_s20 }
 0xd7c   :  { %v10754_v60 = vpop.f32.mrf.mxu1  ;;  %v8528_v39 = vadd.f32 %v8509_v6, %v8418_v61  ;;  %v8696_v6 = vrot.slane %v8642_v3, %v11147_v19 }
 0xd7d   :  { %v8421_v51 = vadd.f32 %v10754_v60, %v8311_v29  ;;  %v10768_v24 = vpop.f32.mrf.mxu0  ;;  %p10828_p3 = por %p10827_p2, %p10826_p1 }
 0xd7e   :  { %v8409_v52 = vpop.f32.mrf.mxu1 }
 0xd7f   :  { %v8420_v36 = vadd.f32 %v8409_v52, %v8310_v30  ;;  %v8531_v33 = vadd.f32 %v10768_v24, %v8421_v51  ;;  %v8519_v27 = vpop.f32.mrf.mxu0  ;;  %p10829_p4 = pnand %p10828_p3, %p10822_p0 }
 0xd80   :  { %v10779_v49 = vpop.f32.mrf.mxu1 }
 0xd81   :  { %v8639_v37 = vadd.f32 %v10779_v49, %v8529_v16  ;;  %v8530_v56 = vadd.f32 %v8519_v27, %v8420_v36 }
 0xd82   :  { %v8619_v20 = vpop.f32.mrf.mxu1 }
 0xd83   :  { %v8638_v2 = vadd.f32 %v8619_v20, %v8528_v39  ;;  %v8657_v57 = vmul.f32 %v8639_v37, %v8639_v37  ;;  %v8644_v45 = vsel %vm89_vm0, %v8639_v37, 0.0 }
 0xd84   :  { %v10782_v53 = vpop.f32.mrf.mxu1 }
 0xd85   :  { %v8643_v58 = vsel %vm89_vm0, %v8638_v2, 0.0  ;;  %v8656_v5 = vmul.f32 %v8638_v2, %v8638_v2  ;;  %v8641_v55 = vadd.f32 %v10782_v53, %v8531_v33  ;;  %v8661_v14 = vsel %vm89_vm0, %v8657_v57, 0.0 }
 0xd86   :  { %v8629_v0 = vpop.f32.mrf.mxu1  ;;  %v8645_v21 = vadd.f32 %v8644_v45, %v8643_v58 }
 0xd87   :  { %v8660_v44 = vsel %vm89_vm0, %v8656_v5, 0.0  ;;  %v8640_v42 = vadd.f32 %v8629_v0, %v8530_v56  ;;  %v8659_v26 = vmul.f32 %v8641_v55, %v8641_v55  ;;  %v8648_v4 = vsel %vm89_vm0, %v8641_v55, 0.0 }
 0xd88   :  { %v8662_v7 = vadd.f32 %v8661_v14, %v8660_v44 }
 0xd89   :  { %v8646_v34 = vsel %vm89_vm0, %v8640_v42, 0.0  ;;  %v8658_v43 = vmul.f32 %v8640_v42, %v8640_v42  ;;  %v8665_v46 = vsel %vm89_vm0, %v8659_v26, 0.0 }
 0xd8a   :  { %v8647_v48 = vadd.f32 %v8646_v34, %v8645_v21 }
 0xd8b   :  { %v8663_v18 = vsel %vm89_vm0, %v8658_v43, 0.0 }
 0xd8c   :  { %v8649_v9 = vadd.f32 %v8648_v4, %v8647_v48  ;;  %v8664_v8 = vadd.f32 %v8663_v18, %v8662_v7 }
 0xd8e   :  { %v8650_v25 = vrot.slane %v8649_v9, 4  ;;  %v8666_v50 = vadd.f32 %v8665_v46, %v8664_v8 }
 0xd90   :  { %v8651_v35 = vadd.f32 %v8650_v25, %v8649_v9  ;;  %v8667_v47 = vrot.slane %v8666_v50, 4 }
 0xd92   :  { %v8652_v41 = vrot.slane %v8651_v35, 2  ;;  %v8668_v11 = vadd.f32 %v8667_v47, %v8666_v50 }
 0xd94   :  { %v8653_v15 = vadd.f32 %v8652_v41, %v8651_v35  ;;  %v8669_v38 = vrot.slane %v8668_v11, 2 }
 0xd96   :  { %v8654_v28 = vrot.slane %v8653_v15, 1  ;;  %v8670_v31 = vadd.f32 %v8669_v38, %v8668_v11 }
 0xd98   :  { %v8655_v59 = vadd.f32 %v8654_v28, %v8653_v15  ;;  %v8671_v22 = vrot.slane %v8670_v31, 1 }
 0xd9a   :  { %v8672_v17 = vadd.f32 %v8671_v22, %v8670_v31  ;;  %v8673_v10 = vmul.f32 0.03125, %v8655_v59 }
 0xd9c   :  { %v8674_v13 = vmul.f32 0.03125, %v8672_v17  ;;  %v8675_v62 = vmul.f32 %v8673_v10, %v8673_v10  ;;  %v8680_v1 = vsub.f32 %v8640_v42, %v8673_v10  ;;  %v8678_v29 = vsub.f32 %v8638_v2, %v8673_v10 }
 0xd9d   :  { %v8679_v61 = vsub.f32 %v8639_v37, %v8673_v10  ;;  %v8681_v30 = vsub.f32 %v8641_v55, %v8673_v10 }
 0xd9e   :  { %v8676_v32 = vsub.f32 %v8674_v13, %v8675_v62 }
 0xda0   :  { %v8677_v54 = vmax.f32 %v8676_v32, 0.0 }
 0xda2   :  { %v8682_v12 = vadd.f32 1e-05, %v8677_v54 }
 0xda4   :  { %10819 = vrsqrt.f32 %v8682_v12 }
 0xdb1   :  { %v10820_v63 = vpop.eup %10819 }
 0xdb2   :  { %v8684_v40 = vmul.f32 %v10820_v63, %v8642_v3 }
 0xdb4   :  { %v8688_v60 = vrot.slane %v8684_v40, %v11150_v23 }
 0xdb6   :  { %v8691_v52 = vmul.f32 %v8688_v60, %v8680_v1  ;;  %v8689_v16 = vmul.f32 %v8688_v60, %v8678_v29  ;;  %v8690_v51 = vmul.f32 %v8688_v60, %v8679_v61  ;;  %v8692_v24 = vmul.f32 %v8688_v60, %v8681_v30 }
 0xdb8   :  { %v8699_v36 = vadd.f32 %v8696_v6, %v8691_v52  ;;  %v8697_v49 = vadd.f32 %v8696_v6, %v8689_v16  ;;  %v8698_v39 = vadd.f32 %v8696_v6, %v8690_v51  ;;  %v8700_v20 = vadd.f32 %v8696_v6, %v8692_v24 }
 0xdba   :  { %8703 = vst.msk [vmem:[#allocation3 + $0x10] sm:$0xff] %vm89_vm0, %v8699_v36  ;;  %8701 = vst.msk [vmem:[#allocation3] sm:$0xff] %vm89_vm0, %v8697_v49 }
 0xdbb   :  { %8702 = vst.msk [vmem:[#allocation3 + $0x8] sm:$0xff] %vm89_vm0, %v8698_v39  ;;  %8704 = vst.msk [vmem:[#allocation3 + $0x18] sm:$0xff] %vm89_vm0, %v8700_v20 }
 0xdbc   :  { %10832 = shalt.err (!%p10829_p4)
}
 0xdbd   :  { %s10847_s16 = smov 128   ;;  %s10848_s1 = smov 8  }
 0xdbe   :  { %8716 = dma.vmem_to_hbm [thread:$0]  %s8711_s23, 512, %s13504_s21, [#allocation4], %s10847_s16, %s10847_s16, %s10848_s1  }
 0xdbf   :  { %10841 = dma.done.wait [#allocation4], 512  }
 0xdc0   :  { %10842 = vsyncadd [#allocation4], 4294966784 }
 0xdc1   :  { %8720 = vsyncpa [#allocation4], 1 }

</bundles_post_ra>
